<compile_context>
chip_gen: v6e
topology: v6e:2x2x1
jax: 0.10.0
libtpu: 0.0.40
codegen_flags: <defaults>
</compile_context>

<pallas_src>
import functools

import jax
import jax.numpy as jnp
from jax.experimental import pallas as pl
from jax.experimental.pallas import tpu as pltpu


# -----------------------------------------------------------------------------
# Fused kernel: conv-as-one-matmul + BatchNorm2d (batch stats) + PReLU.
# -----------------------------------------------------------------------------
def _psp_fused_kernel(x_ref, w_ref, g_ref, b_ref, a_ref, o_ref,
                      *, m, chunk, n_pad, eps):
    n_chunks = m // chunk
    w = w_ref[...]                                      # (Kp, Np) bf16, VMEM-resident

    # ---- Pass 1: chunked conv matmul -> o_ref, plus per-channel sum / sumsq.
    def conv_body(i, carry):
        s, ss = carry
        row = pl.multiple_of(i * chunk, chunk)
        lhs = x_ref[pl.ds(row, chunk), :]               # (chunk, Kp) bf16
        acc = jnp.dot(lhs, w, preferred_element_type=jnp.float32)  # (chunk, Np) f32
        o_ref[pl.ds(row, chunk), :] = acc
        s = s + jnp.sum(acc, axis=0, keepdims=True)
        ss = ss + jnp.sum(acc * acc, axis=0, keepdims=True)
        return s, ss

    zeros = jnp.zeros((1, n_pad), jnp.float32)
    s, ss = jax.lax.fori_loop(0, n_chunks, conv_body, (zeros, zeros), unroll=True)

    # ---- BatchNorm2d (training-mode batch stats) folded into one scale/shift.
    #      Conv bias is omitted: it cancels exactly under batch statistics.
    inv_m = 1.0 / m
    mean = s * inv_m
    var = ss * inv_m - mean * mean                      # biased batch variance
    scale = g_ref[...] * jax.lax.rsqrt(var + eps)       # (1, Np)
    shift = b_ref[...] - mean * scale                   # (1, Np)
    alpha = a_ref[...]                                  # (1, 1) shared PReLU slope

    # ---- Pass 2: in-place scale/shift + PReLU on the VMEM-resident output.
    def apply_body(i, _):
        row = pl.multiple_of(i * chunk, chunk)
        y = o_ref[pl.ds(row, chunk), :] * scale + shift
        o_ref[pl.ds(row, chunk), :] = jnp.where(y > 0.0, y, alpha * y)
        return 0

    jax.lax.fori_loop(0, n_chunks, apply_body, 0, unroll=True)


# -----------------------------------------------------------------------------
# XLA prologue helpers (tiny, on the ~40 KB input).
# -----------------------------------------------------------------------------
def _bilinear_upsample_2x(x):
    """2x bilinear upsample, align_corners=False (modern F.upsample default), NHWC."""
    b, h, w, c = x.shape
    # rows: out[2j] = 0.75*x[j] + 0.25*x[j-1];  out[2j+1] = 0.75*x[j] + 0.25*x[j+1]
    xp = jnp.concatenate([x[:, :1], x[:, :-1]], axis=1)          # clamped j-1
    xn = jnp.concatenate([x[:, 1:], x[:, -1:]], axis=1)          # clamped j+1
    rows_even = 0.75 * x + 0.25 * xp
    rows_odd = 0.75 * x + 0.25 * xn
    xr = jnp.stack([rows_even, rows_odd], axis=2).reshape(b, 2 * h, w, c)
    # cols: same stencil along W
    cp = jnp.concatenate([xr[:, :, :1], xr[:, :, :-1]], axis=2)
    cn = jnp.concatenate([xr[:, :, 1:], xr[:, :, -1:]], axis=2)
    cols_even = 0.75 * xr + 0.25 * cp
    cols_odd = 0.75 * xr + 0.25 * cn
    return jnp.stack([cols_even, cols_odd], axis=3).reshape(b, 2 * h, 2 * w, c)


def _round_up(x, mult):
    return ((x + mult - 1) // mult) * mult


def _pick_chunk(m):
    for c in (512, 256, 128, 64, 32, 16, 8):
        if m % c == 0:
            return c
    return m


# -----------------------------------------------------------------------------
# Wrapper
# -----------------------------------------------------------------------------
def psp_upsample_forward(params, x_nchw, eps=1e-5):
    conv_w = params["conv_w"]                                    # (Cout, Cin, 3, 3)
    gamma, beta, alpha = params["bn_gamma"], params["bn_beta"], params["prelu_a"]

    c_out, c_in, kh, kw = conv_w.shape
    n_b, cx, h_in, w_in = x_nchw.shape
    assert cx == c_in and (kh, kw) == (3, 3)
    h_o, w_o = 2 * h_in, 2 * w_in
    m = n_b * h_o * w_o
    k = 9 * c_in
    k_pad = _round_up(k, 128)                                    # lane-dense LHS / K
    n_pad = _round_up(c_out, 128)                                # lane-dense output
    chunk = _pick_chunk(m)
    assert m % chunk == 0

    # NCHW -> NHWC, bilinear 2x upsample, zero pad, im2col (one small XLA fusion).
    x = jnp.transpose(x_nchw, (0, 2, 3, 1)).astype(jnp.float32)
    up_pad = jnp.pad(_bilinear_upsample_2x(x), ((0, 0), (1, 1), (1, 1), (0, 0)))
    taps = [up_pad[:, di:di + h_o, dj:dj + w_o, :]
            for di in range(3) for dj in range(3)]               # (di, dj, Cin) order
    patches = jnp.concatenate(taps, axis=-1).reshape(m, k)
    patches = jnp.pad(patches, ((0, 0), (0, k_pad - k))).astype(jnp.bfloat16)

    # Torch conv weight (Cout,Cin,3,3) -> (K, Cout) in matching (di, dj, Cin) order,
    # zero-padded to (Kp, Np).  Conv bias is intentionally NOT used (cancels in BN).
    w_mat = jnp.transpose(conv_w, (2, 3, 1, 0)).reshape(k, c_out)
    w_mat = jnp.pad(w_mat, ((0, k_pad - k), (0, n_pad - c_out))).astype(jnp.bfloat16)

    g_pad = jnp.pad(gamma.reshape(1, c_out).astype(jnp.float32),
                    ((0, 0), (0, n_pad - c_out)))
    b_pad = jnp.pad(beta.reshape(1, c_out).astype(jnp.float32),
                    ((0, 0), (0, n_pad - c_out)))
    a_arr = alpha.reshape(1, 1).astype(jnp.float32)

    out2d = pl.pallas_call(
        functools.partial(_psp_fused_kernel, m=m, chunk=chunk, n_pad=n_pad, eps=eps),
        out_shape=jax.ShapeDtypeStruct((m, n_pad), jnp.float32),
        grid=(1,),                                   # single block: whole slab in VMEM
        in_specs=[
            pl.BlockSpec((m, k_pad), lambda i: (0, 0)),
            pl.BlockSpec((k_pad, n_pad), lambda i: (0, 0)),
            pl.BlockSpec((1, n_pad), lambda i: (0, 0)),
            pl.BlockSpec((1, n_pad), lambda i: (0, 0)),
            pl.BlockSpec((1, 1), lambda i: (0, 0)),
        ],
        out_specs=pl.BlockSpec((m, n_pad), lambda i: (0, 0)),
        compiler_params=pltpu.CompilerParams(
            dimension_semantics=("arbitrary",)),
    )(patches, w_mat, g_pad, b_pad, a_arr)

    out = out2d[:, :c_out].reshape(n_b, h_o, w_o, c_out)
    return jnp.transpose(out, (0, 3, 1, 2))                      # NHWC -> NCHW


# -----------------------------------------------------------------------------
# Parameters (deterministic synthetic init; PyTorch-default BN/PReLU init)
# -----------------------------------------------------------------------------
def init_params(key, in_channels, out_channels):
    k1, k2 = jax.random.split(key)
    fan_in = in_channels * 9
    return {
        "conv_w": jax.random.normal(k1, (out_channels, in_channels, 3, 3),
                                    jnp.float32) / jnp.sqrt(fan_in),
        # Kept for module parity; mathematically a no-op under batch-stat BN.
        "conv_b": jax.random.normal(k2, (out_channels,), jnp.float32) * 0.01,
        "bn_gamma": jnp.ones((out_channels,), jnp.float32),   # BatchNorm2d default
        "bn_beta": jnp.zeros((out_channels,), jnp.float32),
        "prelu_a": jnp.full((1,), 0.25, jnp.float32),         # nn.PReLU() default
    }


if __name__ == "__main__":
    key = jax.random.PRNGKey(0)
    pkey, xkey = jax.random.split(key)
    in_channels, out_channels = 4, 32
    params = init_params(pkey, in_channels, out_channels)
    x = jax.random.normal(xkey, (2, in_channels, 16, 16), jnp.float32)   # NCHW
    out = jax.jit(psp_upsample_forward)(params, x)
    out = jax.block_until_ready(out)
    assert out.shape == (2, out_channels, 32, 32), out.shape
    assert bool(jnp.all(jnp.isfinite(out)))
    print("KERNEL_OK")
</pallas_src>

<mosaic_0001>
module attributes {stable_mosaic.version = 11 : i64} {
  func.func @_psp_fused_kernel(%arg0: i32, %arg1: memref<2048x128xbf16, #tpu.memory_space<vmem>>, %arg2: memref<128x128xbf16, #tpu.memory_space<vmem>>, %arg3: memref<1x128xf32, #tpu.memory_space<vmem>>, %arg4: memref<1x128xf32, #tpu.memory_space<vmem>>, %arg5: memref<1x1xf32, #tpu.memory_space<vmem>>, %arg6: memref<2048x128xf32, #tpu.memory_space<vmem>>) attributes {dimension_semantics = [#tpu.dimension_semantics<arbitrary>], iteration_bounds = array<i64: 1>, scalar_prefetch = 0 : i64, scratch_operands = 0 : i64, tpu.core_type = #tpu.core_type<tc>, window_params = [{pipeline_mode = #tpu.pipeline_mode<synchronous>, transform_indices = @transform_0, window_bounds = array<i64: 2048, 128>}, {pipeline_mode = #tpu.pipeline_mode<synchronous>, transform_indices = @transform_1, window_bounds = array<i64: 128, 128>}, {pipeline_mode = #tpu.pipeline_mode<synchronous>, transform_indices = @transform_2, window_bounds = array<i64: 1, 128>}, {pipeline_mode = #tpu.pipeline_mode<synchronous>, transform_indices = @transform_3, window_bounds = array<i64: 1, 128>}, {pipeline_mode = #tpu.pipeline_mode<synchronous>, transform_indices = @transform_4, window_bounds = array<i64: 1, 1>}, {pipeline_mode = #tpu.pipeline_mode<synchronous>, transform_indices = @transform_5, window_bounds = array<i64: 2048, 128>}]} {
    %c0 = arith.constant 0 : index
    %c0_0 = arith.constant 0 : index
    %0 = vector.load %arg2[%c0, %c0_0] : memref<128x128xbf16, #tpu.memory_space<vmem>>, vector<128x128xbf16>
    %cst = arith.constant 0.000000e+00 : f32
    %1 = vector.broadcast %cst : f32 to vector<1x128xf32>
    %c0_i32 = arith.constant 0 : i32
    %c512_i32 = arith.constant 512 : i32
    %2 = arith.muli %c0_i32, %c512_i32 : i32
    %3 = tpu.assume_multiple %2, 512 : i32
    %4 = arith.index_cast %3 : i32 to index
    %c0_1 = arith.constant 0 : index
    %5 = vector.load %arg1[%4, %c0_1] : memref<2048x128xbf16, #tpu.memory_space<vmem>>, vector<512x128xbf16>
    %cst_2 = arith.constant dense<0.000000e+00> : vector<512x128xf32>
    %6 = tpu.matmul %5, %0, %cst_2 {dimension_numbers = #tpu.dot_dimension_numbers<[1], [0], [0], [1], [0, 0, 1, 1], [], []>} : vector<512x128xbf16>, vector<128x128xbf16>, vector<512x128xf32> -> vector<512x128xf32>
    %7 = arith.index_cast %3 : i32 to index
    %c0_3 = arith.constant 0 : index
    %8 = vector.load %arg6[%7, %c0_3] : memref<2048x128xf32, #tpu.memory_space<vmem>>, vector<512x128xf32>
    tpu.vector_store %arg6[%7, %c0_3], %6 {strides = array<i32>} : memref<2048x128xf32, #tpu.memory_space<vmem>>, vector<512x128xf32>,
    %cst_4 = arith.constant dense<0.000000e+00> : vector<128xf32>
    %9 = vector.multi_reduction <add>, %6, %cst_4 [0] : vector<512x128xf32> to vector<128xf32>
    %10 = vector.shape_cast %9 : vector<128xf32> to vector<1x128xf32>
    %11 = arith.addf %1, %10 : vector<1x128xf32>
    %12 = arith.mulf %6, %6 : vector<512x128xf32>
    %cst_5 = arith.constant dense<0.000000e+00> : vector<128xf32>
    %13 = vector.multi_reduction <add>, %12, %cst_5 [0] : vector<512x128xf32> to vector<128xf32>
    %14 = vector.shape_cast %13 : vector<128xf32> to vector<1x128xf32>
    %15 = arith.addf %1, %14 : vector<1x128xf32>
    %c1_i32 = arith.constant 1 : i32
    %c512_i32_6 = arith.constant 512 : i32
    %16 = arith.muli %c1_i32, %c512_i32_6 : i32
    %17 = tpu.assume_multiple %16, 512 : i32
    %18 = arith.index_cast %17 : i32 to index
    %c0_7 = arith.constant 0 : index
    %19 = vector.load %arg1[%18, %c0_7] : memref<2048x128xbf16, #tpu.memory_space<vmem>>, vector<512x128xbf16>
    %cst_8 = arith.constant dense<0.000000e+00> : vector<512x128xf32>
    %20 = tpu.matmul %19, %0, %cst_8 {dimension_numbers = #tpu.dot_dimension_numbers<[1], [0], [0], [1], [0, 0, 1, 1], [], []>} : vector<512x128xbf16>, vector<128x128xbf16>, vector<512x128xf32> -> vector<512x128xf32>
    %21 = arith.index_cast %17 : i32 to index
    %c0_9 = arith.constant 0 : index
    %22 = vector.load %arg6[%21, %c0_9] : memref<2048x128xf32, #tpu.memory_space<vmem>>, vector<512x128xf32>
    tpu.vector_store %arg6[%21, %c0_9], %20 {strides = array<i32>} : memref<2048x128xf32, #tpu.memory_space<vmem>>, vector<512x128xf32>,
    %cst_10 = arith.constant dense<0.000000e+00> : vector<128xf32>
    %23 = vector.multi_reduction <add>, %20, %cst_10 [0] : vector<512x128xf32> to vector<128xf32>
    %24 = vector.shape_cast %23 : vector<128xf32> to vector<1x128xf32>
    %25 = arith.addf %11, %24 : vector<1x128xf32>
    %26 = arith.mulf %20, %20 : vector<512x128xf32>
    %cst_11 = arith.constant dense<0.000000e+00> : vector<128xf32>
    %27 = vector.multi_reduction <add>, %26, %cst_11 [0] : vector<512x128xf32> to vector<128xf32>
    %28 = vector.shape_cast %27 : vector<128xf32> to vector<1x128xf32>
    %29 = arith.addf %15, %28 : vector<1x128xf32>
    %c2_i32 = arith.constant 2 : i32
    %c512_i32_12 = arith.constant 512 : i32
    %30 = arith.muli %c2_i32, %c512_i32_12 : i32
    %31 = tpu.assume_multiple %30, 512 : i32
    %32 = arith.index_cast %31 : i32 to index
    %c0_13 = arith.constant 0 : index
    %33 = vector.load %arg1[%32, %c0_13] : memref<2048x128xbf16, #tpu.memory_space<vmem>>, vector<512x128xbf16>
    %cst_14 = arith.constant dense<0.000000e+00> : vector<512x128xf32>
    %34 = tpu.matmul %33, %0, %cst_14 {dimension_numbers = #tpu.dot_dimension_numbers<[1], [0], [0], [1], [0, 0, 1, 1], [], []>} : vector<512x128xbf16>, vector<128x128xbf16>, vector<512x128xf32> -> vector<512x128xf32>
    %35 = arith.index_cast %31 : i32 to index
    %c0_15 = arith.constant 0 : index
    %36 = vector.load %arg6[%35, %c0_15] : memref<2048x128xf32, #tpu.memory_space<vmem>>, vector<512x128xf32>
    tpu.vector_store %arg6[%35, %c0_15], %34 {strides = array<i32>} : memref<2048x128xf32, #tpu.memory_space<vmem>>, vector<512x128xf32>,
    %cst_16 = arith.constant dense<0.000000e+00> : vector<128xf32>
    %37 = vector.multi_reduction <add>, %34, %cst_16 [0] : vector<512x128xf32> to vector<128xf32>
    %38 = vector.shape_cast %37 : vector<128xf32> to vector<1x128xf32>
    %39 = arith.addf %25, %38 : vector<1x128xf32>
    %40 = arith.mulf %34, %34 : vector<512x128xf32>
    %cst_17 = arith.constant dense<0.000000e+00> : vector<128xf32>
    %41 = vector.multi_reduction <add>, %40, %cst_17 [0] : vector<512x128xf32> to vector<128xf32>
    %42 = vector.shape_cast %41 : vector<128xf32> to vector<1x128xf32>
    %43 = arith.addf %29, %42 : vector<1x128xf32>
    %c3_i32 = arith.constant 3 : i32
    %c512_i32_18 = arith.constant 512 : i32
    %44 = arith.muli %c3_i32, %c512_i32_18 : i32
    %45 = tpu.assume_multiple %44, 512 : i32
    %46 = arith.index_cast %45 : i32 to index
    %c0_19 = arith.constant 0 : index
    %47 = vector.load %arg1[%46, %c0_19] : memref<2048x128xbf16, #tpu.memory_space<vmem>>, vector<512x128xbf16>
    %cst_20 = arith.constant dense<0.000000e+00> : vector<512x128xf32>
    %48 = tpu.matmul %47, %0, %cst_20 {dimension_numbers = #tpu.dot_dimension_numbers<[1], [0], [0], [1], [0, 0, 1, 1], [], []>} : vector<512x128xbf16>, vector<128x128xbf16>, vector<512x128xf32> -> vector<512x128xf32>
    %49 = arith.index_cast %45 : i32 to index
    %c0_21 = arith.constant 0 : index
    %50 = vector.load %arg6[%49, %c0_21] : memref<2048x128xf32, #tpu.memory_space<vmem>>, vector<512x128xf32>
    tpu.vector_store %arg6[%49, %c0_21], %48 {strides = array<i32>} : memref<2048x128xf32, #tpu.memory_space<vmem>>, vector<512x128xf32>,
    %cst_22 = arith.constant dense<0.000000e+00> : vector<128xf32>
    %51 = vector.multi_reduction <add>, %48, %cst_22 [0] : vector<512x128xf32> to vector<128xf32>
    %52 = vector.shape_cast %51 : vector<128xf32> to vector<1x128xf32>
    %53 = arith.addf %39, %52 : vector<1x128xf32>
    %54 = arith.mulf %48, %48 : vector<512x128xf32>
    %cst_23 = arith.constant dense<0.000000e+00> : vector<128xf32>
    %55 = vector.multi_reduction <add>, %54, %cst_23 [0] : vector<512x128xf32> to vector<128xf32>
    %56 = vector.shape_cast %55 : vector<128xf32> to vector<1x128xf32>
    %57 = arith.addf %43, %56 : vector<1x128xf32>
    %c4_i32 = arith.constant 4 : i32
    %cst_24 = arith.constant 4.8828125E-4 : f32
    %58 = vector.broadcast %cst_24 : f32 to vector<1x128xf32>
    %59 = arith.mulf %53, %58 : vector<1x128xf32>
    %cst_25 = arith.constant 4.8828125E-4 : f32
    %60 = vector.broadcast %cst_25 : f32 to vector<1x128xf32>
    %61 = arith.mulf %57, %60 : vector<1x128xf32>
    %62 = arith.mulf %59, %59 : vector<1x128xf32>
    %63 = arith.subf %61, %62 : vector<1x128xf32>
    %c0_26 = arith.constant 0 : index
    %c0_27 = arith.constant 0 : index
    %64 = vector.load %arg3[%c0_26, %c0_27] : memref<1x128xf32, #tpu.memory_space<vmem>>, vector<1x128xf32>
    %cst_28 = arith.constant 9.99999974E-6 : f32
    %65 = vector.broadcast %cst_28 : f32 to vector<1x128xf32>
    %66 = arith.addf %63, %65 : vector<1x128xf32>
    %67 = math.rsqrt %66 : vector<1x128xf32>
    %68 = arith.mulf %64, %67 : vector<1x128xf32>
    %c0_29 = arith.constant 0 : index
    %c0_30 = arith.constant 0 : index
    %69 = vector.load %arg4[%c0_29, %c0_30] : memref<1x128xf32, #tpu.memory_space<vmem>>, vector<1x128xf32>
    %70 = arith.mulf %59, %68 : vector<1x128xf32>
    %71 = arith.subf %69, %70 : vector<1x128xf32>
    %c0_31 = arith.constant 0 : index
    %c0_32 = arith.constant 0 : index
    %72 = vector.load %arg5[%c0_31, %c0_32] : memref<1x1xf32, #tpu.memory_space<vmem>>, vector<1x1xf32>
    %c0_i32_33 = arith.constant 0 : i32
    %c512_i32_34 = arith.constant 512 : i32
    %73 = arith.muli %c0_i32_33, %c512_i32_34 : i32
    %74 = tpu.assume_multiple %73, 512 : i32
    %75 = arith.index_cast %74 : i32 to index
    %c0_35 = arith.constant 0 : index
    %76 = vector.load %arg6[%75, %c0_35] : memref<2048x128xf32, #tpu.memory_space<vmem>>, vector<512x128xf32>
    %77 = vector.broadcast %68 : vector<1x128xf32> to vector<512x128xf32>
    %78 = arith.mulf %76, %77 : vector<512x128xf32>
    %79 = vector.broadcast %71 : vector<1x128xf32> to vector<512x128xf32>
    %80 = arith.addf %78, %79 : vector<512x128xf32>
    %cst_36 = arith.constant 0.000000e+00 : f32
    %81 = vector.broadcast %cst_36 : f32 to vector<512x128xf32>
    %82 = arith.cmpf ogt, %80, %81 : vector<512x128xf32>
    %83 = vector.broadcast %72 : vector<1x1xf32> to vector<512x128xf32>
    %84 = arith.mulf %83, %80 : vector<512x128xf32>
    %85 = arith.select %82, %80, %84 : vector<512x128xi1>, vector<512x128xf32>
    %86 = arith.index_cast %74 : i32 to index
    %c0_37 = arith.constant 0 : index
    %87 = vector.load %arg6[%86, %c0_37] : memref<2048x128xf32, #tpu.memory_space<vmem>>, vector<512x128xf32>
    tpu.vector_store %arg6[%86, %c0_37], %85 {strides = array<i32>} : memref<2048x128xf32, #tpu.memory_space<vmem>>, vector<512x128xf32>,
    %c1_i32_38 = arith.constant 1 : i32
    %c512_i32_39 = arith.constant 512 : i32
    %88 = arith.muli %c1_i32_38, %c512_i32_39 : i32
    %89 = tpu.assume_multiple %88, 512 : i32
    %90 = arith.index_cast %89 : i32 to index
    %c0_40 = arith.constant 0 : index
    %91 = vector.load %arg6[%90, %c0_40] : memref<2048x128xf32, #tpu.memory_space<vmem>>, vector<512x128xf32>
    %92 = vector.broadcast %68 : vector<1x128xf32> to vector<512x128xf32>
    %93 = arith.mulf %91, %92 : vector<512x128xf32>
    %94 = vector.broadcast %71 : vector<1x128xf32> to vector<512x128xf32>
    %95 = arith.addf %93, %94 : vector<512x128xf32>
    %cst_41 = arith.constant 0.000000e+00 : f32
    %96 = vector.broadcast %cst_41 : f32 to vector<512x128xf32>
    %97 = arith.cmpf ogt, %95, %96 : vector<512x128xf32>
    %98 = vector.broadcast %72 : vector<1x1xf32> to vector<512x128xf32>
    %99 = arith.mulf %98, %95 : vector<512x128xf32>
    %100 = arith.select %97, %95, %99 : vector<512x128xi1>, vector<512x128xf32>
    %101 = arith.index_cast %89 : i32 to index
    %c0_42 = arith.constant 0 : index
    %102 = vector.load %arg6[%101, %c0_42] : memref<2048x128xf32, #tpu.memory_space<vmem>>, vector<512x128xf32>
    tpu.vector_store %arg6[%101, %c0_42], %100 {strides = array<i32>} : memref<2048x128xf32, #tpu.memory_space<vmem>>, vector<512x128xf32>,
    %c2_i32_43 = arith.constant 2 : i32
    %c512_i32_44 = arith.constant 512 : i32
    %103 = arith.muli %c2_i32_43, %c512_i32_44 : i32
    %104 = tpu.assume_multiple %103, 512 : i32
    %105 = arith.index_cast %104 : i32 to index
    %c0_45 = arith.constant 0 : index
    %106 = vector.load %arg6[%105, %c0_45] : memref<2048x128xf32, #tpu.memory_space<vmem>>, vector<512x128xf32>
    %107 = vector.broadcast %68 : vector<1x128xf32> to vector<512x128xf32>
    %108 = arith.mulf %106, %107 : vector<512x128xf32>
    %109 = vector.broadcast %71 : vector<1x128xf32> to vector<512x128xf32>
    %110 = arith.addf %108, %109 : vector<512x128xf32>
    %cst_46 = arith.constant 0.000000e+00 : f32
    %111 = vector.broadcast %cst_46 : f32 to vector<512x128xf32>
    %112 = arith.cmpf ogt, %110, %111 : vector<512x128xf32>
    %113 = vector.broadcast %72 : vector<1x1xf32> to vector<512x128xf32>
    %114 = arith.mulf %113, %110 : vector<512x128xf32>
    %115 = arith.select %112, %110, %114 : vector<512x128xi1>, vector<512x128xf32>
    %116 = arith.index_cast %104 : i32 to index
    %c0_47 = arith.constant 0 : index
    %117 = vector.load %arg6[%116, %c0_47] : memref<2048x128xf32, #tpu.memory_space<vmem>>, vector<512x128xf32>
    tpu.vector_store %arg6[%116, %c0_47], %115 {strides = array<i32>} : memref<2048x128xf32, #tpu.memory_space<vmem>>, vector<512x128xf32>,
    %c3_i32_48 = arith.constant 3 : i32
    %c512_i32_49 = arith.constant 512 : i32
    %118 = arith.muli %c3_i32_48, %c512_i32_49 : i32
    %119 = tpu.assume_multiple %118, 512 : i32
    %120 = arith.index_cast %119 : i32 to index
    %c0_50 = arith.constant 0 : index
    %121 = vector.load %arg6[%120, %c0_50] : memref<2048x128xf32, #tpu.memory_space<vmem>>, vector<512x128xf32>
    %122 = vector.broadcast %68 : vector<1x128xf32> to vector<512x128xf32>
    %123 = arith.mulf %121, %122 : vector<512x128xf32>
    %124 = vector.broadcast %71 : vector<1x128xf32> to vector<512x128xf32>
    %125 = arith.addf %123, %124 : vector<512x128xf32>
    %cst_51 = arith.constant 0.000000e+00 : f32
    %126 = vector.broadcast %cst_51 : f32 to vector<512x128xf32>
    %127 = arith.cmpf ogt, %125, %126 : vector<512x128xf32>
    %128 = vector.broadcast %72 : vector<1x1xf32> to vector<512x128xf32>
    %129 = arith.mulf %128, %125 : vector<512x128xf32>
    %130 = arith.select %127, %125, %129 : vector<512x128xi1>, vector<512x128xf32>
    %131 = arith.index_cast %119 : i32 to index
    %c0_52 = arith.constant 0 : index
    %132 = vector.load %arg6[%131, %c0_52] : memref<2048x128xf32, #tpu.memory_space<vmem>>, vector<512x128xf32>
    tpu.vector_store %arg6[%131, %c0_52], %130 {strides = array<i32>} : memref<2048x128xf32, #tpu.memory_space<vmem>>, vector<512x128xf32>,
    %c4_i32_53 = arith.constant 4 : i32
    return
  }
  func.func @transform_0(%arg0: i32) -> (i32, i32) {
    %c0_i32 = arith.constant 0 : i32
    %c0_i32_0 = arith.constant 0 : i32
    %c0_i32_1 = arith.constant 0 : i32
    return %c0_i32, %c0_i32_0 : i32, i32
  }
  func.func @transform_1(%arg0: i32) -> (i32, i32) {
    %c0_i32 = arith.constant 0 : i32
    %c0_i32_0 = arith.constant 0 : i32
    %c0_i32_1 = arith.constant 0 : i32
    return %c0_i32, %c0_i32_0 : i32, i32
  }
  func.func @transform_2(%arg0: i32) -> (i32, i32) {
    %c0_i32 = arith.constant 0 : i32
    %c0_i32_0 = arith.constant 0 : i32
    %c0_i32_1 = arith.constant 0 : i32
    return %c0_i32, %c0_i32_0 : i32, i32
  }
  func.func @transform_3(%arg0: i32) -> (i32, i32) {
    %c0_i32 = arith.constant 0 : i32
    %c0_i32_0 = arith.constant 0 : i32
    %c0_i32_1 = arith.constant 0 : i32
    return %c0_i32, %c0_i32_0 : i32, i32
  }
  func.func @transform_4(%arg0: i32) -> (i32, i32) {
    %c0_i32 = arith.constant 0 : i32
    %c0_i32_0 = arith.constant 0 : i32
    %c0_i32_1 = arith.constant 0 : i32
    return %c0_i32, %c0_i32_0 : i32, i32
  }
  func.func @transform_5(%arg0: i32) -> (i32, i32) {
    %c0_i32 = arith.constant 0 : i32
    %c0_i32_0 = arith.constant 0 : i32
    %c0_i32_1 = arith.constant 0 : i32
    return %c0_i32, %c0_i32_0 : i32, i32
  }
}

</mosaic_0001>

<bundles_post_ra>
// kernel: psp_upsample_forward.1
= control target key start
LH: loop header
LB: loop body
LE: loop exit
PB: predicated region body
PF: predicated region fallthrough
CT: control target
= control target key end

     0   :  { %s13646_s1 = inlined_call_operand.vmem [shape: bf16[128,128], index: 1, kind: input, shape index: {}]   ;;  %s13647_s0 = inlined_call_operand.vmem [shape: bf16[2048,128], index: 0, kind: input, shape index: {}]   ;;  %s13648_s4 = inlined_call_operand.<no memory space> [shape: f32[1,1], index: 4, kind: input, shape index: {}]   ;;  %s13649_s2 = inlined_call_operand.vmem [shape: f32[1,128], index: 2, kind: input, shape index: {}]   ;;  %s13650_s3 = inlined_call_operand.vmem [shape: f32[1,128], index: 3, kind: input, shape index: {}]   ;;  %s13651_s5 = inlined_call_operand.vmem [shape: f32[2048,128], index: 5, kind: output, shape index: {}]  }
   0x1   :  { %v6561_v0 = vld [vmem:[%s13646_s1 + $0x38] sm:$0xff]   ;;  %v6562_v1 = vld [vmem:[%s13646_s1 + $0x30] sm:$0xff]   ;;  %v6739_v2 = vld [vmem:[%s13646_s1 + $0x28] sm:$0xff]  }
   0x2   :  { %6239 = vmatprep.subr.bf16.mxu0 %v6561_v0  ;;  %6319 = vmatprep.subr.bf16.mxu1 %v6561_v0  ;;  %v6744_v3 = vld [vmem:[%s13646_s1 + $0x20] sm:$0xff]   ;;  %v6761_v6 = vld [vmem:[%s13646_s1 + $0x18] sm:$0xff]   ;;  %v6770_v7 = vld [vmem:[%s13646_s1 + $0x10] sm:$0xff]  }
   0x3   :  { %6240 = vmatpush3.bf16.msra.mxu0 %v6561_v0  ;;  %6320 = vmatpush3.bf16.msra.mxu1 %v6561_v0  ;;  %v6569_v4 = vld [vmem:[%s13647_s0] sm:$0xff]   ;;  %v6779_v8 = vld [vmem:[%s13646_s1 + $0x8] sm:$0xff]   ;;  %v6573_v12 = vld [vmem:[%s13647_s0 + $0x10] sm:$0xff]  }
   0x4   :  { %6241 = vmatprep.subr.bf16.mxu0 %v6562_v1  ;;  %6321 = vmatprep.subr.bf16.mxu1 %v6562_v1  ;;  %v6570_v5 = vld [vmem:[%s13647_s0 + $0x100] sm:$0xff]   ;;  %v6571_v10 = vld [vmem:[%s13647_s0 + $0x8] sm:$0xff]   ;;  %v6574_v13 = vld [vmem:[%s13647_s0 + $0x110] sm:$0xff]  }
   0x5   :  { %6255 = vmatprep.mubr.bf16.mxu0 %v6569_v4  ;;  %6335 = vmatprep.mubr.bf16.mxu1 %v6570_v5  ;;  %v6788_v9 = vld [vmem:[%s13646_s1] sm:$0xff]   ;;  %v6572_v11 = vld [vmem:[%s13647_s0 + $0x108] sm:$0xff]   ;;  %v6575_v14 = vld [vmem:[%s13647_s0 + $0x18] sm:$0xff]  }
   0x6   :  { %v6576_v15 = vld [vmem:[%s13647_s0 + $0x118] sm:$0xff]   ;;  %v6577_v16 = vld [vmem:[%s13647_s0 + $0x20] sm:$0xff]   ;;  %v6579_v18 = vld [vmem:[%s13647_s0 + $0x28] sm:$0xff]  }
   0x7   :  { %6242 = vmatpush3.bf16.msra.mxu0 %v6562_v1  ;;  %6322 = vmatpush3.bf16.msra.mxu1 %v6562_v1  ;;  %v6578_v17 = vld [vmem:[%s13647_s0 + $0x120] sm:$0xff]   ;;  %v6580_v19 = vld [vmem:[%s13647_s0 + $0x128] sm:$0xff]   ;;  %v6581_v20 = vld [vmem:[%s13647_s0 + $0x30] sm:$0xff]  }
   0x8   :  { %6243 = vmatprep.subr.bf16.mxu0 %v6739_v2  ;;  %6323 = vmatprep.subr.bf16.mxu1 %v6739_v2  ;;  %v6582_v21 = vld [vmem:[%s13647_s0 + $0x130] sm:$0xff]   ;;  %v6583_v22 = vld [vmem:[%s13647_s0 + $0x38] sm:$0xff]   ;;  %v6585_v24 = vld [vmem:[%s13647_s0 + $0x40] sm:$0xff]  }
   0x9   :  { %v6584_v23 = vld [vmem:[%s13647_s0 + $0x138] sm:$0xff]   ;;  %v6586_v25 = vld [vmem:[%s13647_s0 + $0x140] sm:$0xff]   ;;  %v6587_v26 = vld [vmem:[%s13647_s0 + $0x48] sm:$0xff]  }
   0xa   :  { %v6588_v27 = vld [vmem:[%s13647_s0 + $0x148] sm:$0xff]   ;;  %v6589_v28 = vld [vmem:[%s13647_s0 + $0x50] sm:$0xff]   ;;  %v6591_v30 = vld [vmem:[%s13647_s0 + $0x58] sm:$0xff]  }
   0xb   :  { %6244 = vmatpush3.bf16.msra.mxu0 %v6739_v2  ;;  %6324 = vmatpush3.bf16.msra.mxu1 %v6739_v2  ;;  %v6590_v29 = vld [vmem:[%s13647_s0 + $0x150] sm:$0xff]   ;;  %v6592_v31 = vld [vmem:[%s13647_s0 + $0x158] sm:$0xff]   ;;  %v6593_v32 = vld [vmem:[%s13647_s0 + $0x60] sm:$0xff]  }
   0xc   :  { %6245 = vmatprep.subr.bf16.mxu0 %v6744_v3  ;;  %6325 = vmatprep.subr.bf16.mxu1 %v6744_v3  ;;  %v6594_v33 = vld [vmem:[%s13647_s0 + $0x160] sm:$0xff]   ;;  %v6595_v34 = vld [vmem:[%s13647_s0 + $0x68] sm:$0xff]   ;;  %v6597_v36 = vld [vmem:[%s13647_s0 + $0x70] sm:$0xff]  }
   0xd   :  { %v6596_v35 = vld [vmem:[%s13647_s0 + $0x168] sm:$0xff]   ;;  %v6598_v37 = vld [vmem:[%s13647_s0 + $0x170] sm:$0xff]   ;;  %v6599_v38 = vld [vmem:[%s13647_s0 + $0x78] sm:$0xff]  }
   0xe   :  { %v6600_v39 = vld [vmem:[%s13647_s0 + $0x178] sm:$0xff]   ;;  %v6601_v40 = vld [vmem:[%s13647_s0 + $0x80] sm:$0xff]   ;;  %v6603_v42 = vld [vmem:[%s13647_s0 + $0x88] sm:$0xff]  }
   0xf   :  { %6246 = vmatpush3.bf16.msra.mxu0 %v6744_v3  ;;  %6326 = vmatpush3.bf16.msra.mxu1 %v6744_v3  ;;  %v6602_v41 = vld [vmem:[%s13647_s0 + $0x180] sm:$0xff]   ;;  %v6604_v43 = vld [vmem:[%s13647_s0 + $0x188] sm:$0xff]   ;;  %v6605_v44 = vld [vmem:[%s13647_s0 + $0x90] sm:$0xff]  }
  0x10   :  { %6247 = vmatprep.subr.bf16.mxu0 %v6761_v6  ;;  %6327 = vmatprep.subr.bf16.mxu1 %v6761_v6  ;;  %v6606_v45 = vld [vmem:[%s13647_s0 + $0x190] sm:$0xff]   ;;  %v6607_v46 = vld [vmem:[%s13647_s0 + $0x98] sm:$0xff]   ;;  %v6609_v48 = vld [vmem:[%s13647_s0 + $0xa0] sm:$0xff]  }
  0x11   :  { %v6608_v47 = vld [vmem:[%s13647_s0 + $0x198] sm:$0xff]   ;;  %v6610_v49 = vld [vmem:[%s13647_s0 + $0x1a0] sm:$0xff]   ;;  %v6611_v50 = vld [vmem:[%s13647_s0 + $0xa8] sm:$0xff]  }
  0x12   :  { %v6612_v51 = vld [vmem:[%s13647_s0 + $0x1a8] sm:$0xff]   ;;  %v6613_v52 = vld [vmem:[%s13647_s0 + $0xb0] sm:$0xff]   ;;  %v6615_v54 = vld [vmem:[%s13647_s0 + $0xb8] sm:$0xff]  }
  0x13   :  { %6248 = vmatpush3.bf16.msra.mxu0 %v6761_v6  ;;  %6328 = vmatpush3.bf16.msra.mxu1 %v6761_v6  ;;  %v6614_v53 = vld [vmem:[%s13647_s0 + $0x1b0] sm:$0xff]   ;;  %v6616_v55 = vld [vmem:[%s13647_s0 + $0x1b8] sm:$0xff]   ;;  %v6617_v56 = vld [vmem:[%s13647_s0 + $0xc0] sm:$0xff]  }
  0x14   :  { %6249 = vmatprep.subr.bf16.mxu0 %v6770_v7  ;;  %6329 = vmatprep.subr.bf16.mxu1 %v6770_v7  ;;  %v6618_v57 = vld [vmem:[%s13647_s0 + $0x1c0] sm:$0xff]   ;;  %v6619_v58 = vld [vmem:[%s13647_s0 + $0xc8] sm:$0xff]   ;;  %v6621_v60 = vld [vmem:[%s13647_s0 + $0xd0] sm:$0xff]  }
  0x15   :  { %v6620_v59 = vld [vmem:[%s13647_s0 + $0x1c8] sm:$0xff]   ;;  %v6622_v61 = vld [vmem:[%s13647_s0 + $0x1d0] sm:$0xff]   ;;  %v6623_v62 = vld [vmem:[%s13647_s0 + $0xd8] sm:$0xff]  }
  0x16   :  { %v6624_v63 = vld [vmem:[%s13647_s0 + $0x1d8] sm:$0xff]   ;;  %v6629_v4 = vld [vmem:[%s13647_s0 + $0xf0] sm:$0xff]  }
  0x17   :  { %6250 = vmatpush3.bf16.msra.mxu0 %v6770_v7  ;;  %6330 = vmatpush3.bf16.msra.mxu1 %v6770_v7  ;;  %v6630_v5 = vld [vmem:[%s13647_s0 + $0x1f0] sm:$0xff]  }
  0x18   :  { %6251 = vmatprep.subr.bf16.mxu0 %v6779_v8  ;;  %6331 = vmatprep.subr.bf16.mxu1 %v6779_v8 }
  0x1b   :  { %6252 = vmatpush3.bf16.msra.mxu0 %v6779_v8  ;;  %6332 = vmatpush3.bf16.msra.mxu1 %v6779_v8 }
  0x1c   :  { %6253 = vmatprep.subr.bf16.mxu0 %v6788_v9  ;;  %6333 = vmatprep.subr.bf16.mxu1 %v6788_v9 }
  0x1f   :  { %6254 = vmatpush3.bf16.msra.mxu0 %v6788_v9  ;;  %6334 = vmatpush3.bf16.msra.mxu1 %v6788_v9 }
  0x20   :  { %6399 = vmatprep.subr.bf16.mxu0 %v6561_v0  ;;  %6479 = vmatprep.subr.bf16.mxu1 %v6561_v0 }
  0x22   :  { %6256 = vmatmul.mubr.bf16.vlgmr.msra.gmra.mxu0 %v6571_v10  ;;  %6336 = vmatmul.mubr.bf16.vlgmr.msra.gmra.mxu1 %v6572_v11  ;;  %v6635_v10 = vld [vmem:[%s13647_s0 + $0x208] sm:$0xff]  }
  0x23   :  { %6400 = vmatpush3.bf16.msra.mxu0 %v6561_v0  ;;  %6480 = vmatpush3.bf16.msra.mxu1 %v6561_v0  ;;  %v6625_v0 = vld [vmem:[%s13647_s0 + $0xe0] sm:$0xff]   ;;  %v6636_v11 = vld [vmem:[%s13647_s0 + $0x308] sm:$0xff]  }
  0x24   :  { %6259 = vmatprep.mubr.bf16.mxu0 %v6573_v12  ;;  %6339 = vmatprep.mubr.bf16.mxu1 %v6574_v13  ;;  %v6637_v12 = vld [vmem:[%s13647_s0 + $0x210] sm:$0xff]  }
  0x25   :  { %6401 = vmatprep.subr.bf16.mxu0 %v6562_v1  ;;  %6481 = vmatprep.subr.bf16.mxu1 %v6562_v1  ;;  %v6638_v13 = vld [vmem:[%s13647_s0 + $0x310] sm:$0xff]  }
  0x27   :  { %6402 = vmatpush3.bf16.msra.mxu0 %v6562_v1  ;;  %6482 = vmatpush3.bf16.msra.mxu1 %v6562_v1  ;;  %v6626_v1 = vld [vmem:[%s13647_s0 + $0x1e0] sm:$0xff]  }
  0x28   :  { %6403 = vmatprep.subr.bf16.mxu0 %v6739_v2  ;;  %6483 = vmatprep.subr.bf16.mxu1 %v6739_v2 }
  0x2a   :  { %6260 = vmatmul.mubr.bf16.gmra.mxu0 %v6575_v14  ;;  %6340 = vmatmul.mubr.bf16.gmra.mxu1 %v6576_v15  ;;  %v6639_v14 = vld [vmem:[%s13647_s0 + $0x218] sm:$0xff]  }
  0x2b   :  { %6263 = vmatprep.mubr.bf16.mxu0 %v6577_v16  ;;  %6343 = vmatprep.mubr.bf16.mxu1 %v6578_v17  ;;  %v6640_v15 = vld [vmem:[%s13647_s0 + $0x318] sm:$0xff]   ;;  %v6641_v16 = vld [vmem:[%s13647_s0 + $0x220] sm:$0xff]  }
  0x2c   :  { %6404 = vmatpush3.bf16.msra.mxu0 %v6739_v2  ;;  %6484 = vmatpush3.bf16.msra.mxu1 %v6739_v2  ;;  %v6627_v2 = vld [vmem:[%s13647_s0 + $0xe8] sm:$0xff]   ;;  %v6642_v17 = vld [vmem:[%s13647_s0 + $0x320] sm:$0xff]  }
  0x2d   :  { %6405 = vmatprep.subr.bf16.mxu0 %v6744_v3  ;;  %6485 = vmatprep.subr.bf16.mxu1 %v6744_v3 }
  0x30   :  { %6406 = vmatpush3.bf16.msra.mxu0 %v6744_v3  ;;  %6486 = vmatpush3.bf16.msra.mxu1 %v6744_v3  ;;  %v6628_v3 = vld [vmem:[%s13647_s0 + $0x1e8] sm:$0xff]  }
  0x31   :  { %6407 = vmatprep.subr.bf16.mxu0 %v6761_v6  ;;  %6487 = vmatprep.subr.bf16.mxu1 %v6761_v6 }
  0x32   :  { %6264 = vmatmul.mubr.bf16.gmra.mxu0 %v6579_v18  ;;  %6344 = vmatmul.mubr.bf16.gmra.mxu1 %v6580_v19  ;;  %v6643_v18 = vld [vmem:[%s13647_s0 + $0x228] sm:$0xff]  }
  0x33   :  { %6267 = vmatprep.mubr.bf16.mxu0 %v6581_v20  ;;  %6347 = vmatprep.mubr.bf16.mxu1 %v6582_v21  ;;  %v6644_v19 = vld [vmem:[%s13647_s0 + $0x328] sm:$0xff]   ;;  %v6645_v20 = vld [vmem:[%s13647_s0 + $0x230] sm:$0xff]  }
  0x34   :  { %6408 = vmatpush3.bf16.msra.mxu0 %v6761_v6  ;;  %6488 = vmatpush3.bf16.msra.mxu1 %v6761_v6  ;;  %v6631_v6 = vld [vmem:[%s13647_s0 + $0xf8] sm:$0xff]   ;;  %v6646_v21 = vld [vmem:[%s13647_s0 + $0x330] sm:$0xff]  }
  0x35   :  { %6409 = vmatprep.subr.bf16.mxu0 %v6770_v7  ;;  %6489 = vmatprep.subr.bf16.mxu1 %v6770_v7 }
  0x38   :  { %6410 = vmatpush3.bf16.msra.mxu0 %v6770_v7  ;;  %6490 = vmatpush3.bf16.msra.mxu1 %v6770_v7  ;;  %v6632_v7 = vld [vmem:[%s13647_s0 + $0x1f8] sm:$0xff]  }
  0x39   :  { %6411 = vmatprep.subr.bf16.mxu0 %v6779_v8  ;;  %6491 = vmatprep.subr.bf16.mxu1 %v6779_v8 }
  0x3a   :  { %6268 = vmatmul.mubr.bf16.gmra.mxu0 %v6583_v22  ;;  %6348 = vmatmul.mubr.bf16.gmra.mxu1 %v6584_v23  ;;  %v6647_v22 = vld [vmem:[%s13647_s0 + $0x238] sm:$0xff]  }
  0x3b   :  { %6271 = vmatprep.mubr.bf16.mxu0 %v6585_v24  ;;  %6351 = vmatprep.mubr.bf16.mxu1 %v6586_v25  ;;  %v6648_v23 = vld [vmem:[%s13647_s0 + $0x338] sm:$0xff]   ;;  %v6649_v24 = vld [vmem:[%s13647_s0 + $0x240] sm:$0xff]  }
  0x3c   :  { %6412 = vmatpush3.bf16.msra.mxu0 %v6779_v8  ;;  %6492 = vmatpush3.bf16.msra.mxu1 %v6779_v8  ;;  %v6633_v8 = vld [vmem:[%s13647_s0 + $0x200] sm:$0xff]  }
  0x3d   :  { %6413 = vmatprep.subr.bf16.mxu0 %v6788_v9  ;;  %6493 = vmatprep.subr.bf16.mxu1 %v6788_v9  ;;  %v6650_v25 = vld [vmem:[%s13647_s0 + $0x340] sm:$0xff]  }
  0x40   :  { %6414 = vmatpush3.bf16.msra.mxu0 %v6788_v9  ;;  %6494 = vmatpush3.bf16.msra.mxu1 %v6788_v9  ;;  %v6634_v9 = vld [vmem:[%s13647_s0 + $0x300] sm:$0xff]  }
  0x42   :  { %6272 = vmatmul.mubr.bf16.gmra.mxu0 %v6587_v26  ;;  %6352 = vmatmul.mubr.bf16.gmra.mxu1 %v6588_v27  ;;  %v6651_v26 = vld [vmem:[%s13647_s0 + $0x248] sm:$0xff]  }
  0x43   :  { %6275 = vmatprep.mubr.bf16.mxu0 %v6589_v28  ;;  %6355 = vmatprep.mubr.bf16.mxu1 %v6590_v29  ;;  %v6652_v27 = vld [vmem:[%s13647_s0 + $0x348] sm:$0xff]   ;;  %v6653_v28 = vld [vmem:[%s13647_s0 + $0x250] sm:$0xff]  }
  0x44   :  { %v6654_v29 = vld [vmem:[%s13647_s0 + $0x350] sm:$0xff]  }
  0x4a   :  { %6276 = vmatmul.mubr.bf16.gmra.mxu0 %v6591_v30  ;;  %6356 = vmatmul.mubr.bf16.gmra.mxu1 %v6592_v31  ;;  %v6655_v30 = vld [vmem:[%s13647_s0 + $0x258] sm:$0xff]  }
  0x4b   :  { %6279 = vmatprep.mubr.bf16.mxu0 %v6593_v32  ;;  %6359 = vmatprep.mubr.bf16.mxu1 %v6594_v33  ;;  %v6656_v31 = vld [vmem:[%s13647_s0 + $0x358] sm:$0xff]   ;;  %v6657_v32 = vld [vmem:[%s13647_s0 + $0x260] sm:$0xff]  }
  0x4c   :  { %v6658_v33 = vld [vmem:[%s13647_s0 + $0x360] sm:$0xff]  }
  0x52   :  { %6280 = vmatmul.mubr.bf16.gmra.mxu0 %v6595_v34  ;;  %6360 = vmatmul.mubr.bf16.gmra.mxu1 %v6596_v35  ;;  %v6659_v34 = vld [vmem:[%s13647_s0 + $0x268] sm:$0xff]  }
  0x53   :  { %6283 = vmatprep.mubr.bf16.mxu0 %v6597_v36  ;;  %6363 = vmatprep.mubr.bf16.mxu1 %v6598_v37  ;;  %v6660_v35 = vld [vmem:[%s13647_s0 + $0x368] sm:$0xff]   ;;  %v6661_v36 = vld [vmem:[%s13647_s0 + $0x270] sm:$0xff]  }
  0x54   :  { %v6662_v37 = vld [vmem:[%s13647_s0 + $0x370] sm:$0xff]  }
  0x5a   :  { %6284 = vmatmul.mubr.bf16.gmra.mxu0 %v6599_v38  ;;  %6364 = vmatmul.mubr.bf16.gmra.mxu1 %v6600_v39  ;;  %v6663_v38 = vld [vmem:[%s13647_s0 + $0x278] sm:$0xff]  }
  0x5b   :  { %6287 = vmatprep.mubr.bf16.mxu0 %v6601_v40  ;;  %6367 = vmatprep.mubr.bf16.mxu1 %v6602_v41  ;;  %v6664_v39 = vld [vmem:[%s13647_s0 + $0x378] sm:$0xff]   ;;  %v6665_v40 = vld [vmem:[%s13647_s0 + $0x280] sm:$0xff]  }
  0x5c   :  { %v6666_v41 = vld [vmem:[%s13647_s0 + $0x380] sm:$0xff]  }
  0x62   :  { %6288 = vmatmul.mubr.bf16.gmra.mxu0 %v6603_v42  ;;  %6368 = vmatmul.mubr.bf16.gmra.mxu1 %v6604_v43  ;;  %v6667_v42 = vld [vmem:[%s13647_s0 + $0x288] sm:$0xff]  }
  0x63   :  { %6291 = vmatprep.mubr.bf16.mxu0 %v6605_v44  ;;  %6371 = vmatprep.mubr.bf16.mxu1 %v6606_v45  ;;  %v6668_v43 = vld [vmem:[%s13647_s0 + $0x388] sm:$0xff]   ;;  %v6669_v44 = vld [vmem:[%s13647_s0 + $0x290] sm:$0xff]  }
  0x64   :  { %v6670_v45 = vld [vmem:[%s13647_s0 + $0x390] sm:$0xff]  }
  0x6a   :  { %6292 = vmatmul.mubr.bf16.gmra.mxu0 %v6607_v46  ;;  %6372 = vmatmul.mubr.bf16.gmra.mxu1 %v6608_v47 }
  0x6b   :  { %6295 = vmatprep.mubr.bf16.mxu0 %v6609_v48  ;;  %6375 = vmatprep.mubr.bf16.mxu1 %v6610_v49 }
  0x72   :  { %6296 = vmatmul.mubr.bf16.gmra.mxu0 %v6611_v50  ;;  %6376 = vmatmul.mubr.bf16.gmra.mxu1 %v6612_v51 }
  0x73   :  { %6299 = vmatprep.mubr.bf16.mxu0 %v6613_v52  ;;  %6379 = vmatprep.mubr.bf16.mxu1 %v6614_v53  ;;  %v6671_v52 = vld [vmem:[%s13647_s0 + $0x298] sm:$0xff]  }
  0x74   :  { %v6672_v53 = vld [vmem:[%s13647_s0 + $0x398] sm:$0xff]  }
  0x7a   :  { %6300 = vmatmul.mubr.bf16.gmra.mxu0 %v6615_v54  ;;  %6380 = vmatmul.mubr.bf16.gmra.mxu1 %v6616_v55  ;;  %v6673_v54 = vld [vmem:[%s13647_s0 + $0x2a0] sm:$0xff]  }
  0x7b   :  { %6303 = vmatprep.mubr.bf16.mxu0 %v6617_v56  ;;  %6383 = vmatprep.mubr.bf16.mxu1 %v6618_v57 }
  0x82   :  { %6304 = vmatmul.mubr.bf16.gmra.mxu0 %v6619_v58  ;;  %6384 = vmatmul.mubr.bf16.gmra.mxu1 %v6620_v59  ;;  %v6674_v59 = vld [vmem:[%s13647_s0 + $0x3a0] sm:$0xff]  }
  0x83   :  { %6307 = vmatprep.mubr.bf16.mxu0 %v6621_v60  ;;  %6387 = vmatprep.mubr.bf16.mxu1 %v6622_v61 }
  0x8a   :  { %6308 = vmatmul.mubr.bf16.gmra.mxu0 %v6623_v62  ;;  %6388 = vmatmul.mubr.bf16.gmra.mxu1 %v6624_v63 }
  0x8b   :  { %6311 = vmatprep.mubr.bf16.mxu0 %v6625_v0  ;;  %6391 = vmatprep.mubr.bf16.mxu1 %v6626_v1 }
  0x92   :  { %6312 = vmatmul.mubr.bf16.gmra.mxu0 %v6627_v2  ;;  %6392 = vmatmul.mubr.bf16.gmra.mxu1 %v6628_v3 }
  0x93   :  { %6315 = vmatprep.mubr.bf16.mxu0 %v6629_v4  ;;  %6395 = vmatprep.mubr.bf16.mxu1 %v6630_v5 }
  0x9a   :  { %6316 = vmatmul.mubr.bf16.gmra.mxu0 %v6631_v6  ;;  %6396 = vmatmul.mubr.bf16.gmra.mxu1 %v6632_v7 }
  0x9b   :  { %6415 = vmatprep.mubr.bf16.mxu0 %v6633_v8  ;;  %6495 = vmatprep.mubr.bf16.mxu1 %v6634_v9 }
  0xa2   :  { %6416 = vmatmul.mubr.bf16.vlgmr.msra.gmra.mxu0 %v6635_v10  ;;  %6496 = vmatmul.mubr.bf16.vlgmr.msra.gmra.mxu1 %v6636_v11 }
  0xa3   :  { %6419 = vmatprep.mubr.bf16.mxu0 %v6637_v12  ;;  %6499 = vmatprep.mubr.bf16.mxu1 %v6638_v13 }
  0xaa   :  { %6420 = vmatmul.mubr.bf16.gmra.mxu0 %v6639_v14  ;;  %6500 = vmatmul.mubr.bf16.gmra.mxu1 %v6640_v15 }
  0xab   :  { %6423 = vmatprep.mubr.bf16.mxu0 %v6641_v16  ;;  %6503 = vmatprep.mubr.bf16.mxu1 %v6642_v17 }
  0xb2   :  { %6424 = vmatmul.mubr.bf16.gmra.mxu0 %v6643_v18  ;;  %6504 = vmatmul.mubr.bf16.gmra.mxu1 %v6644_v19  ;;  %v6675_v18 = vld [vmem:[%s13647_s0 + $0x2a8] sm:$0xff]  }
  0xb3   :  { %6427 = vmatprep.mubr.bf16.mxu0 %v6645_v20  ;;  %6507 = vmatprep.mubr.bf16.mxu1 %v6646_v21  ;;  %v6676_v19 = vld [vmem:[%s13647_s0 + $0x3a8] sm:$0xff]  }
  0xba   :  { %6428 = vmatmul.mubr.bf16.gmra.mxu0 %v6647_v22  ;;  %6508 = vmatmul.mubr.bf16.gmra.mxu1 %v6648_v23 }
  0xbb   :  { %6431 = vmatprep.mubr.bf16.mxu0 %v6649_v24  ;;  %6511 = vmatprep.mubr.bf16.mxu1 %v6650_v25  ;;  %v6677_v24 = vld [vmem:[%s13647_s0 + $0x2b0] sm:$0xff]  }
  0xc2   :  { %6432 = vmatmul.mubr.bf16.gmra.mxu0 %v6651_v26  ;;  %6512 = vmatmul.mubr.bf16.gmra.mxu1 %v6652_v27 }
  0xc3   :  { %6435 = vmatprep.mubr.bf16.mxu0 %v6653_v28  ;;  %6515 = vmatprep.mubr.bf16.mxu1 %v6654_v29  ;;  %v6678_v29 = vld [vmem:[%s13647_s0 + $0x3b0] sm:$0xff]  }
  0xca   :  { %6436 = vmatmul.mubr.bf16.gmra.mxu0 %v6655_v30  ;;  %6516 = vmatmul.mubr.bf16.gmra.mxu1 %v6656_v31 }
  0xcb   :  { %6439 = vmatprep.mubr.bf16.mxu0 %v6657_v32  ;;  %6519 = vmatprep.mubr.bf16.mxu1 %v6658_v33 }
  0xd2   :  { %6440 = vmatmul.mubr.bf16.gmra.mxu0 %v6659_v34  ;;  %6520 = vmatmul.mubr.bf16.gmra.mxu1 %v6660_v35 }
  0xd3   :  { %6443 = vmatprep.mubr.bf16.mxu0 %v6661_v36  ;;  %6523 = vmatprep.mubr.bf16.mxu1 %v6662_v37 }
  0xda   :  { %6444 = vmatmul.mubr.bf16.gmra.mxu0 %v6663_v38  ;;  %6524 = vmatmul.mubr.bf16.gmra.mxu1 %v6664_v39 }
  0xdb   :  { %6447 = vmatprep.mubr.bf16.mxu0 %v6665_v40  ;;  %6527 = vmatprep.mubr.bf16.mxu1 %v6666_v41 }
  0xe2   :  { %v7120_v46 = vpop.f32.mrf.mxu0  ;;  %v7122_v47 = vpop.f32.mrf.mxu1  ;;  %6448 = vmatmul.mubr.bf16.gmra.mxu0 %v6667_v42  ;;  %6528 = vmatmul.mubr.bf16.gmra.mxu1 %v6668_v43 }
  0xe3   :  { %14012 = vst [vmem:[#allocation3_spill] sm:$0xff] %v7120_v46  ;;  %14013 = vst [vmem:[#allocation4_spill] sm:$0xff] %v7122_v47  ;;  %6451 = vmatprep.mubr.bf16.mxu0 %v6669_v44  ;;  %6531 = vmatprep.mubr.bf16.mxu1 %v6670_v45  ;;  %v768_v2 = vmul.f32 %v7120_v46, %v7120_v46  ;;  %v1583_v3 = vmul.f32 %v7122_v47, %v7122_v47 }
  0xe4   :  { %v7124_v48 = vpop.f32.mrf.mxu0  ;;  %v7126_v49 = vpop.f32.mrf.mxu1 }
  0xe5   :  { %14014 = vst [vmem:[#allocation5_spill] sm:$0xff] %v7124_v48  ;;  %14015 = vst [vmem:[#allocation6_spill] sm:$0xff] %v7126_v49  ;;  %v766_v55 = vmul.f32 %v7124_v48, %v7124_v48  ;;  %v1581_v56 = vmul.f32 %v7126_v49, %v7126_v49 }
  0xe6   :  { %v7128_v50 = vpop.f32.mrf.mxu0  ;;  %v7130_v51 = vpop.f32.mrf.mxu1 }
  0xe7   :  { %14016 = vst [vmem:[#allocation7_spill] sm:$0xff] %v7128_v50  ;;  %14017 = vst [vmem:[#allocation8_spill] sm:$0xff] %v7130_v51  ;;  %v769_v10 = vmul.f32 %v7128_v50, %v7128_v50  ;;  %v1584_v11 = vmul.f32 %v7130_v51, %v7130_v51 }
  0xe8   :  { %v7145_v57 = vpop.f32.mrf.mxu0  ;;  %v7147_v58 = vpop.f32.mrf.mxu1 }
  0xe9   :  { %14018 = vst [vmem:[#allocation9_spill] sm:$0xff] %v7145_v57  ;;  %14019 = vst [vmem:[#allocation10_spill] sm:$0xff] %v7147_v58  ;;  %v696_v60 = vadd.f32 %v7145_v57, %v7124_v48  ;;  %v767_v61 = vmul.f32 %v7145_v57, %v7145_v57  ;;  %v1511_v62 = vadd.f32 %v7147_v58, %v7126_v49 }
  0xea   :  { %v1582_v63 = vmul.f32 %v7147_v58, %v7147_v58  ;;  %v7160_v0 = vpop.f32.mrf.mxu0  ;;  %v7162_v1 = vpop.f32.mrf.mxu1  ;;  %6452 = vmatmul.mubr.bf16.gmra.mxu0 %v6671_v52  ;;  %6532 = vmatmul.mubr.bf16.gmra.mxu1 %v6672_v53 }
  0xeb   :  { %14020 = vst [vmem:[#allocation11_spill] sm:$0xff] %v7160_v0  ;;  %14021 = vst [vmem:[#allocation12_spill] sm:$0xff] %v7162_v1  ;;  %v830_v4 = vadd.f32 %v767_v61, %v766_v55  ;;  %6455 = vmatprep.mubr.bf16.mxu0 %v6673_v54  ;;  %v697_v7 = vadd.f32 %v7120_v46, %v696_v60  ;;  %v1512_v9 = vadd.f32 %v7122_v47, %v1511_v62  ;;  %v6679_v62 = vld [vmem:[%s13647_s0 + $0x2b8] sm:$0xff]  }
  0xec   :  { %v1645_v5 = vadd.f32 %v1582_v63, %v1581_v56  ;;  %v7168_v6 = vpop.f32.mrf.mxu0  ;;  %v7171_v8 = vpop.f32.mrf.mxu1  ;;  %6535 = vmatprep.mubr.bf16.mxu1 %v6674_v59  ;;  %v772_v38 = vmul.f32 %v7160_v0, %v7160_v0  ;;  %v1587_v39 = vmul.f32 %v7162_v1, %v7162_v1  ;;  %v6680_v63 = vld [vmem:[%s13647_s0 + $0x3b8] sm:$0xff]  }
  0xed   :  { %14022 = vst [vmem:[#allocation13_spill] sm:$0xff] %v7168_v6  ;;  %14023 = vst [vmem:[#allocation14_spill] sm:$0xff] %v7171_v8  ;;  %v831_v12 = vadd.f32 %v830_v4, %v768_v2  ;;  %v698_v14 = vadd.f32 %v7128_v50, %v697_v7  ;;  %v1513_v15 = vadd.f32 %v7130_v51, %v1512_v9  ;;  %v6681_v7 = vld [vmem:[%s13647_s0 + $0x2c0] sm:$0xff]  }
  0xee   :  { %v1646_v13 = vadd.f32 %v1645_v5, %v1583_v3  ;;  %v7180_v16 = vpop.f32.mrf.mxu0  ;;  %v7182_v17 = vpop.f32.mrf.mxu1  ;;  %v770_v20 = vmul.f32 %v7168_v6, %v7168_v6  ;;  %v1585_v22 = vmul.f32 %v7171_v8, %v7171_v8 }
  0xef   :  { %14024 = vst [vmem:[#allocation15_spill] sm:$0xff] %v7180_v16  ;;  %14025 = vst [vmem:[#allocation16_spill] sm:$0xff] %v7182_v17  ;;  %v832_v21 = vadd.f32 %v831_v12, %v769_v10  ;;  %v699_v25 = vadd.f32 %v698_v14, %v7168_v6  ;;  %v1514_v26 = vadd.f32 %v1513_v15, %v7171_v8 }
  0xf0   :  { %v1647_v23 = vadd.f32 %v1646_v13, %v1584_v11  ;;  %v7199_v27 = vpop.f32.mrf.mxu0  ;;  %v7201_v28 = vpop.f32.mrf.mxu1  ;;  %v773_v52 = vmul.f32 %v7180_v16, %v7180_v16  ;;  %v1588_v53 = vmul.f32 %v7182_v17, %v7182_v17  ;;  %v6682_v13 = vld [vmem:[%s13647_s0 + $0x3c0] sm:$0xff]  }
  0xf1   :  { %14026 = vst [vmem:[#allocation17_spill] sm:$0xff] %v7199_v27  ;;  %14027 = vst [vmem:[#allocation18_spill] sm:$0xff] %v7201_v28  ;;  %v833_v30 = vadd.f32 %v832_v21, %v770_v20  ;;  %v771_v32 = vmul.f32 %v7199_v27, %v7199_v27  ;;  %v1586_v33 = vmul.f32 %v7201_v28, %v7201_v28 }
  0xf2   :  { %v1648_v31 = vadd.f32 %v1647_v23, %v1585_v22  ;;  %v700_v34 = vadd.f32 %v699_v25, %v7199_v27  ;;  %v1515_v35 = vadd.f32 %v1514_v26, %v7201_v28  ;;  %v7212_v36 = vpop.f32.mrf.mxu0  ;;  %v7214_v37 = vpop.f32.mrf.mxu1  ;;  %6456 = vmatmul.mubr.bf16.gmra.mxu0 %v6675_v18  ;;  %6536 = vmatmul.mubr.bf16.gmra.mxu1 %v6676_v19 }
  0xf3   :  { %14028 = vst [vmem:[#allocation19_spill] sm:$0xff] %v7212_v36  ;;  %14029 = vst [vmem:[#allocation20_spill] sm:$0xff] %v7214_v37  ;;  %v834_v40 = vadd.f32 %v833_v30, %v771_v32  ;;  %6459 = vmatprep.mubr.bf16.mxu0 %v6677_v24  ;;  %6539 = vmatprep.mubr.bf16.mxu1 %v6678_v29  ;;  %v776_v24 = vmul.f32 %v7212_v36, %v7212_v36 }
  0xf4   :  { %v1649_v41 = vadd.f32 %v1648_v31, %v1586_v33  ;;  %v7220_v42 = vpop.f32.mrf.mxu0  ;;  %v701_v43 = vadd.f32 %v7160_v0, %v700_v34  ;;  %v7223_v44 = vpop.f32.mrf.mxu1  ;;  %v1516_v45 = vadd.f32 %v7162_v1, %v1515_v35  ;;  %v1591_v25 = vmul.f32 %v7214_v37, %v7214_v37 }
  0xf5   :  { %14030 = vst [vmem:[#allocation21_spill] sm:$0xff] %v7220_v42  ;;  %14031 = vst [vmem:[#allocation22_spill] sm:$0xff] %v7223_v44  ;;  %v835_v54 = vadd.f32 %v834_v40, %v772_v38  ;;  %v774_v2 = vmul.f32 %v7220_v42, %v7220_v42  ;;  %v1589_v4 = vmul.f32 %v7223_v44, %v7223_v44 }
  0xf6   :  { %v1650_v55 = vadd.f32 %v1649_v41, %v1587_v39  ;;  %v702_v56 = vadd.f32 %v7180_v16, %v701_v43  ;;  %v1517_v59 = vadd.f32 %v7182_v17, %v1516_v45  ;;  %v7232_v60 = vpop.f32.mrf.mxu0  ;;  %v7234_v61 = vpop.f32.mrf.mxu1 }
  0xf7   :  { %14032 = vst [vmem:[#allocation23_spill] sm:$0xff] %v7232_v60  ;;  %14033 = vst [vmem:[#allocation24_spill] sm:$0xff] %v7234_v61  ;;  %v836_v3 = vadd.f32 %v835_v54, %v773_v52  ;;  %v777_v34 = vmul.f32 %v7232_v60, %v7232_v60  ;;  %v1592_v35 = vmul.f32 %v7234_v61, %v7234_v61  ;;  %v6683_v52 = vld [vmem:[%s13647_s0 + $0x2c8] sm:$0xff]  }
  0xf8   :  { %v1651_v5 = vadd.f32 %v1650_v55, %v1588_v53  ;;  %v703_v9 = vadd.f32 %v702_v56, %v7220_v42  ;;  %v1518_v10 = vadd.f32 %v1517_v59, %v7223_v44  ;;  %v7251_v11 = vpop.f32.mrf.mxu0  ;;  %v7253_v12 = vpop.f32.mrf.mxu1  ;;  %v6684_v53 = vld [vmem:[%s13647_s0 + $0x3c8] sm:$0xff]  }
  0xf9   :  { %14034 = vst [vmem:[#allocation25_spill] sm:$0xff] %v7251_v11  ;;  %14035 = vst [vmem:[#allocation26_spill] sm:$0xff] %v7253_v12  ;;  %v837_v14 = vadd.f32 %v836_v3, %v774_v2  ;;  %v775_v18 = vmul.f32 %v7251_v11, %v7251_v11  ;;  %v1590_v19 = vmul.f32 %v7253_v12, %v7253_v12 }
  0xfa   :  { %v1652_v15 = vadd.f32 %v1651_v5, %v1589_v4  ;;  %v704_v20 = vadd.f32 %v703_v9, %v7251_v11  ;;  %v1519_v21 = vadd.f32 %v1518_v10, %v7253_v12  ;;  %v7264_v22 = vpop.f32.mrf.mxu0  ;;  %v7266_v23 = vpop.f32.mrf.mxu1  ;;  %6460 = vmatmul.mubr.bf16.gmra.mxu0 %v6679_v62  ;;  %6540 = vmatmul.mubr.bf16.gmra.mxu1 %v6680_v63  ;;  %v6685_v62 = vld [vmem:[%s13647_s0 + $0x2d0] sm:$0xff]  }
  0xfb   :  { %14036 = vst [vmem:[#allocation27_spill] sm:$0xff] %v7264_v22  ;;  %14037 = vst [vmem:[#allocation28_spill] sm:$0xff] %v7266_v23  ;;  %v838_v26 = vadd.f32 %v837_v14, %v775_v18  ;;  %6463 = vmatprep.mubr.bf16.mxu0 %v6681_v7  ;;  %6543 = vmatprep.mubr.bf16.mxu1 %v6682_v13  ;;  %v6686_v5 = vld [vmem:[%s13647_s0 + $0x3d0] sm:$0xff]  }
  0xfc   :  { %v1653_v29 = vadd.f32 %v1652_v15, %v1590_v19  ;;  %v7272_v30 = vpop.f32.mrf.mxu0  ;;  %v705_v31 = vadd.f32 %v7212_v36, %v704_v20  ;;  %v7275_v32 = vpop.f32.mrf.mxu1  ;;  %v1520_v33 = vadd.f32 %v7214_v37, %v1519_v21  ;;  %v780_v20 = vmul.f32 %v7264_v22, %v7264_v22 }
  0xfd   :  { %14038 = vst [vmem:[#allocation29_spill] sm:$0xff] %v7272_v30  ;;  %14039 = vst [vmem:[#allocation30_spill] sm:$0xff] %v7275_v32  ;;  %v839_v38 = vadd.f32 %v838_v26, %v776_v24  ;;  %v778_v54 = vmul.f32 %v7272_v30, %v7272_v30  ;;  %v1593_v56 = vmul.f32 %v7275_v32, %v7275_v32 }
  0xfe   :  { %v1654_v39 = vadd.f32 %v1653_v29, %v1591_v25  ;;  %v706_v40 = vadd.f32 %v7232_v60, %v705_v31  ;;  %v1521_v41 = vadd.f32 %v7234_v61, %v1520_v33  ;;  %v7284_v43 = vpop.f32.mrf.mxu0  ;;  %v7286_v45 = vpop.f32.mrf.mxu1  ;;  %v1595_v21 = vmul.f32 %v7266_v23, %v7266_v23 }
  0xff   :  { %14040 = vst [vmem:[#allocation31_spill] sm:$0xff] %v7284_v43  ;;  %14041 = vst [vmem:[#allocation32_spill] sm:$0xff] %v7286_v45  ;;  %v840_v55 = vadd.f32 %v839_v38, %v777_v34  ;;  %v781_v34 = vmul.f32 %v7284_v43, %v7284_v43 }
 0x100   :  { %v1655_v59 = vadd.f32 %v1654_v39, %v1592_v35  ;;  %v707_v63 = vadd.f32 %v706_v40, %v7272_v30  ;;  %v1522_v2 = vadd.f32 %v1521_v41, %v7275_v32  ;;  %v7303_v3 = vpop.f32.mrf.mxu0  ;;  %v7305_v4 = vpop.f32.mrf.mxu1  ;;  %v1596_v35 = vmul.f32 %v7286_v45, %v7286_v45 }
 0x101   :  { %14042 = vst [vmem:[#allocation33_spill] sm:$0xff] %v7303_v3  ;;  %14043 = vst [vmem:[#allocation34_spill] sm:$0xff] %v7305_v4  ;;  %v841_v7 = vadd.f32 %v840_v55, %v778_v54  ;;  %v779_v10 = vmul.f32 %v7303_v3, %v7303_v3  ;;  %v1594_v13 = vmul.f32 %v7305_v4, %v7305_v4  ;;  %v6687_v54 = vld [vmem:[%s13647_s0 + $0x2d8] sm:$0xff]  }
 0x102   :  { %v1656_v9 = vadd.f32 %v1655_v59, %v1593_v56  ;;  %v708_v14 = vadd.f32 %v707_v63, %v7303_v3  ;;  %v1523_v15 = vadd.f32 %v1522_v2, %v7305_v4  ;;  %v7316_v18 = vpop.f32.mrf.mxu0  ;;  %v7318_v19 = vpop.f32.mrf.mxu1  ;;  %6464 = vmatmul.mubr.bf16.gmra.mxu0 %v6683_v52  ;;  %6544 = vmatmul.mubr.bf16.gmra.mxu1 %v6684_v53  ;;  %v6688_v55 = vld [vmem:[%s13647_s0 + $0x3d8] sm:$0xff]   ;;  %v6689_v2 = vld [vmem:[%s13647_s0 + $0x2e0] sm:$0xff]   ;;  %v6699_v4 = vmov 0  }
 0x103   :  { %14044 = vst [vmem:[#allocation35_spill] sm:$0xff] %v7316_v18  ;;  %14045 = vst [vmem:[#allocation36_spill] sm:$0xff] %v7318_v19  ;;  %v842_v24 = vadd.f32 %v841_v7, %v779_v10  ;;  %6467 = vmatprep.mubr.bf16.mxu0 %v6685_v62  ;;  %6547 = vmatprep.mubr.bf16.mxu1 %v6686_v5 }
 0x104   :  { %v1657_v25 = vadd.f32 %v1656_v9, %v1594_v13  ;;  %v7324_v26 = vpop.f32.mrf.mxu0  ;;  %v709_v29 = vadd.f32 %v7264_v22, %v708_v14  ;;  %v7327_v31 = vpop.f32.mrf.mxu1  ;;  %v1524_v33 = vadd.f32 %v7266_v23, %v1523_v15  ;;  %v6690_v13 = vld [vmem:[%s13647_s0 + $0x3e0] sm:$0xff]   ;;  %6560 = vset.pattern.permute.xlu0 %v6699_v4 }
 0x105   :  { %14046 = vst [vmem:[#allocation37_spill] sm:$0xff] %v7324_v26  ;;  %14047 = vst [vmem:[#allocation38_spill] sm:$0xff] %v7327_v31  ;;  %v843_v38 = vadd.f32 %v842_v24, %v780_v20  ;;  %v782_v56 = vmul.f32 %v7324_v26, %v7324_v26  ;;  %v1597_v62 = vmul.f32 %v7327_v31, %v7327_v31 }
 0x106   :  { %v1658_v39 = vadd.f32 %v1657_v25, %v1595_v21  ;;  %v710_v40 = vadd.f32 %v7284_v43, %v709_v29  ;;  %v1525_v41 = vadd.f32 %v7286_v45, %v1524_v33  ;;  %v7336_v52 = vpop.f32.mrf.mxu0  ;;  %v7338_v53 = vpop.f32.mrf.mxu1 }
 0x107   :  { %14048 = vst [vmem:[#allocation39_spill] sm:$0xff] %v7336_v52  ;;  %14049 = vst [vmem:[#allocation40_spill] sm:$0xff] %v7338_v53  ;;  %v844_v59 = vadd.f32 %v843_v38, %v781_v34  ;;  %v784_v34 = vmul.f32 %v7316_v18, %v7316_v18 }
 0x108   :  { %v1659_v63 = vadd.f32 %v1658_v39, %v1596_v35  ;;  %v711_v5 = vadd.f32 %v710_v40, %v7324_v26  ;;  %v1526_v7 = vadd.f32 %v1525_v41, %v7327_v31  ;;  %v7355_v9 = vpop.f32.mrf.mxu0  ;;  %v7357_v10 = vpop.f32.mrf.mxu1  ;;  %v1599_v35 = vmul.f32 %v7318_v19, %v7318_v19 }
 0x109   :  { %14050 = vst [vmem:[#allocation41_spill] sm:$0xff] %v7355_v9  ;;  %14051 = vst [vmem:[#allocation42_spill] sm:$0xff] %v7357_v10  ;;  %v845_v14 = vadd.f32 %v844_v59, %v782_v56  ;;  %v783_v20 = vmul.f32 %v7355_v9, %v7355_v9  ;;  %v1598_v21 = vmul.f32 %v7357_v10, %v7357_v10 }
 0x10a   :  { %v1660_v15 = vadd.f32 %v1659_v63, %v1597_v62  ;;  %v712_v24 = vadd.f32 %v711_v5, %v7355_v9  ;;  %v1527_v25 = vadd.f32 %v1526_v7, %v7357_v10  ;;  %v7368_v29 = vpop.f32.mrf.mxu0  ;;  %v7370_v33 = vpop.f32.mrf.mxu1  ;;  %6468 = vmatmul.mubr.bf16.gmra.mxu0 %v6687_v54  ;;  %6548 = vmatmul.mubr.bf16.gmra.mxu1 %v6688_v55 }
 0x10b   :  { %14052 = vst [vmem:[#allocation43_spill] sm:$0xff] %v7368_v29  ;;  %14053 = vst [vmem:[#allocation44_spill] sm:$0xff] %v7370_v33  ;;  %v846_v38 = vadd.f32 %v845_v14, %v783_v20  ;;  %6471 = vmatprep.mubr.bf16.mxu0 %v6689_v2  ;;  %6551 = vmatprep.mubr.bf16.mxu1 %v6690_v13  ;;  %v785_v54 = vmul.f32 %v7336_v52, %v7336_v52  ;;  %v6691_v13 = vld [vmem:[%s13647_s0 + $0x2e8] sm:$0xff]  }
 0x10c   :  { %v1661_v39 = vadd.f32 %v1660_v15, %v1598_v21  ;;  %v713_v40 = vadd.f32 %v7316_v18, %v712_v24  ;;  %v1528_v41 = vadd.f32 %v7318_v19, %v1527_v25  ;;  %v7378_v56 = vpop.f32.mrf.mxu0  ;;  %v7380_v59 = vpop.f32.mrf.mxu1  ;;  %v1600_v55 = vmul.f32 %v7338_v53, %v7338_v53  ;;  %v6692_v15 = vld [vmem:[%s13647_s0 + $0x3e8] sm:$0xff]  }
 0x10d   :  { %14054 = vst [vmem:[#allocation45_spill] sm:$0xff] %v7378_v56  ;;  %14055 = vst [vmem:[#allocation46_spill] sm:$0xff] %v7380_v59  ;;  %v847_v62 = vadd.f32 %v846_v38, %v784_v34  ;;  %v786_v20 = vmul.f32 %v7378_v56, %v7378_v56  ;;  %v1601_v24 = vmul.f32 %v7380_v59, %v7380_v59  ;;  %v6693_v34 = vld [vmem:[%s13647_s0 + $0x2f0] sm:$0xff]  }
 0x10e   :  { %v1662_v63 = vadd.f32 %v1661_v39, %v1599_v35  ;;  %v714_v5 = vadd.f32 %v7336_v52, %v713_v40  ;;  %v1529_v2 = vadd.f32 %v7338_v53, %v1528_v41  ;;  %v7388_v7 = vpop.f32.mrf.mxu0  ;;  %v7390_v14 = vpop.f32.mrf.mxu1  ;;  %v6694_v41 = vld [vmem:[%s13647_s0 + $0x3f0] sm:$0xff]  }
 0x10f   :  { %14056 = vst [vmem:[#allocation47_spill] sm:$0xff] %v7388_v7  ;;  %14057 = vst [vmem:[#allocation48_spill] sm:$0xff] %v7390_v14  ;;  %v848_v21 = vadd.f32 %v847_v62, %v785_v54  ;;  %v1604_v31 = vmul.f32 %v7390_v14, %v7390_v14 }
 0x110   :  { %v1663_v25 = vadd.f32 %v1662_v63, %v1600_v55  ;;  %v715_v35 = vadd.f32 %v714_v5, %v7378_v56  ;;  %v1530_v38 = vadd.f32 %v1529_v2, %v7380_v59  ;;  %v7407_v39 = vpop.f32.mrf.mxu0  ;;  %v7409_v40 = vpop.f32.mrf.mxu1 }
 0x111   :  { %14058 = vst [vmem:[#allocation49_spill] sm:$0xff] %v7407_v39  ;;  %14059 = vst [vmem:[#allocation50_spill] sm:$0xff] %v7409_v40  ;;  %v849_v54 = vadd.f32 %v848_v21, %v786_v20  ;;  %v787_v55 = vmul.f32 %v7407_v39, %v7407_v39  ;;  %v1602_v63 = vmul.f32 %v7409_v40, %v7409_v40 }
 0x112   :  { %v1664_v62 = vadd.f32 %v1663_v25, %v1601_v24  ;;  %v716_v5 = vadd.f32 %v715_v35, %v7407_v39  ;;  %v1531_v2 = vadd.f32 %v1530_v38, %v7409_v40  ;;  %v7420_v59 = vpop.f32.mrf.mxu0  ;;  %v7422_v53 = vpop.f32.mrf.mxu1  ;;  %6472 = vmatmul.mubr.bf16.gmra.mxu0 %v6691_v13  ;;  %6552 = vmatmul.mubr.bf16.gmra.mxu1 %v6692_v15 }
 0x113   :  { %14060 = vst [vmem:[#allocation51_spill] sm:$0xff] %v7420_v59  ;;  %14061 = vst [vmem:[#allocation52_spill] sm:$0xff] %v7422_v53  ;;  %v788_v20 = vmul.f32 %v7368_v29, %v7368_v29  ;;  %v1603_v21 = vmul.f32 %v7370_v33, %v7370_v33  ;;  %v850_v24 = vadd.f32 %v849_v54, %v787_v55  ;;  %6475 = vmatprep.mubr.bf16.mxu0 %v6693_v34 }
 0x114   :  { %v1665_v25 = vadd.f32 %v1664_v62, %v1602_v63  ;;  %v717_v19 = vadd.f32 %v7368_v29, %v716_v5  ;;  %v1532_v35 = vadd.f32 %v7370_v33, %v1531_v2  ;;  %v7430_v38 = vpop.f32.mrf.mxu0  ;;  %v7432_v40 = vpop.f32.mrf.mxu1  ;;  %6555 = vmatprep.mubr.bf16.mxu1 %v6694_v41  ;;  %v789_v13 = vmul.f32 %v7388_v7, %v7388_v7  ;;  %v6695_v41 = vld [vmem:[%s13647_s0 + $0x2f8] sm:$0xff]  }
 0x115   :  { %14062 = vst [vmem:[#allocation53_spill] sm:$0xff] %v7430_v38  ;;  %14063 = vst [vmem:[#allocation54_spill] sm:$0xff] %v7432_v40  ;;  %v851_v15 = vadd.f32 %v850_v24, %v788_v20  ;;  %v6696_v63 = vld [vmem:[%s13647_s0 + $0x3f8] sm:$0xff]  }
 0x116   :  { %v1666_v10 = vadd.f32 %v1665_v25, %v1603_v21  ;;  %v718_v54 = vadd.f32 %v7388_v7, %v717_v19  ;;  %v1533_v34 = vadd.f32 %v7390_v14, %v1532_v35  ;;  %v7440_v62 = vpop.f32.mrf.mxu0  ;;  %v7442_v55 = vpop.f32.mrf.mxu1  ;;  %v790_v19 = vmul.f32 %v7430_v38, %v7430_v38 }
 0x117   :  { %14064 = vst [vmem:[#allocation55_spill] sm:$0xff] %v7440_v62  ;;  %14065 = vst [vmem:[#allocation56_spill] sm:$0xff] %v7442_v55  ;;  %v852_v5 = vadd.f32 %v851_v15, %v789_v13  ;;  %v10_v25 = vstv %s13648_s4  ;;  %v1605_v13 = vmul.f32 %v7432_v40, %v7432_v40 }
 0x118   :  { %v719_v2 = vadd.f32 %v718_v54, %v7430_v38  ;;  %v1667_v20 = vadd.f32 %v1666_v10, %v1604_v31  ;;  %v7453_v21 = vpop.f32.mrf.mxu0  ;;  %v7455_v24 = vpop.f32.mrf.mxu1  ;;  %v1534_v35 = vadd.f32 %v1533_v34, %v7432_v40  ;;  %11 = vst [vmem:[#allocation2] sm:$0x1] %v10_v25 }
 0x119   :  { %14066 = vst [vmem:[#allocation57_spill] sm:$0xff] %v7453_v21  ;;  %14067 = vst [vmem:[#allocation58_spill] sm:$0xff] %v7455_v24  ;;  %v853_v14 = vadd.f32 %v852_v5, %v790_v19  ;;  %v791_v15 = vmul.f32 %v7453_v21, %v7453_v21  ;;  %v1606_v34 = vmul.f32 %v7455_v24, %v7455_v24 }
 0x11a   :  { %v7465_v54 = vpop.f32.mrf.mxu0  ;;  %v7467_v31 = vpop.f32.mrf.mxu1  ;;  %6476 = vmatmul.mubr.bf16.gmra.mxu0 %v6695_v41  ;;  %6556 = vmatmul.mubr.bf16.gmra.mxu1 %v6696_v63  ;;  %v1668_v10 = vadd.f32 %v1667_v20, %v1605_v13  ;;  %v720_v33 = vadd.f32 %v719_v2, %v7453_v21  ;;  %v1535_v19 = vadd.f32 %v1534_v35, %v7455_v24 }
 0x11b   :  { %14068 = vst [vmem:[#allocation59_spill] sm:$0xff] %v7465_v54  ;;  %14069 = vst [vmem:[#allocation60_spill] sm:$0xff] %v7467_v31  ;;  %v854_v40 = vadd.f32 %v853_v14, %v791_v15  ;;  %v792_v41 = vmul.f32 %v7420_v59, %v7420_v59  ;;  %v1607_v14 = vmul.f32 %v7422_v53, %v7422_v53 }
 0x11c   :  { %v7472_v25 = vpop.f32.mrf.mxu0  ;;  %v7474_v5 = vpop.f32.mrf.mxu1  ;;  %v721_v63 = vadd.f32 %v7420_v59, %v720_v33  ;;  %v1669_v2 = vadd.f32 %v1668_v10, %v1606_v34  ;;  %v1536_v35 = vadd.f32 %v7422_v53, %v1535_v19  ;;  %v793_v33 = vmul.f32 %v7440_v62, %v7440_v62 }
 0x11d   :  { %14070 = vst [vmem:[#allocation61_spill] sm:$0xff] %v7472_v25  ;;  %14071 = vst [vmem:[#allocation62_spill] sm:$0xff] %v7474_v5  ;;  %v855_v15 = vadd.f32 %v854_v40, %v792_v41  ;;  %v1608_v19 = vmul.f32 %v7442_v55, %v7442_v55  ;;  %v796_v51 = vmul.f32 %v7465_v54, %v7465_v54 }
 0x11e   :  { %v7477_v45 = vpop.f32.mrf.mxu0  ;;  %v7479_v23 = vpop.f32.mrf.mxu1  ;;  %v1670_v10 = vadd.f32 %v1669_v2, %v1607_v14  ;;  %v722_v34 = vadd.f32 %v7440_v62, %v721_v63  ;;  %v794_v2 = vmul.f32 %v7472_v25, %v7472_v25 }
 0x11f   :  { %14072 = vst [vmem:[#allocation63_spill] sm:$0xff] %v7477_v45  ;;  %14073 = vst [vmem:[#allocation64_spill] sm:$0xff] %v7479_v23  ;;  %v5694_v32 = vld [vmem:[#allocation2] ss:$0 sm:$0xff]  ;;  %v856_v40 = vadd.f32 %v855_v15, %v793_v33  ;;  %v1609_v15 = vmul.f32 %v7474_v5, %v7474_v5  ;;  %v797_v49 = vmul.f32 %v7477_v45, %v7477_v45 }
 0x120   :  { %v7484_v20 = vpop.f32.mrf.mxu0  ;;  %v7486_v13 = vpop.f32.mrf.mxu1  ;;  %3631 = vperm.xlu0 %6560, %v5694_v32   ;;  %v1537_v32 = vadd.f32 %v7442_v55, %v1536_v35  ;;  %v723_v12 = vadd.f32 %v722_v34, %v7472_v25  ;;  %v1671_v63 = vadd.f32 %v1670_v10, %v1608_v19 }
 0x121   :  { %14074 = vst [vmem:[#allocation65_spill] sm:$0xff] %v7484_v20  ;;  %14075 = vst [vmem:[#allocation66_spill] sm:$0xff] %v7486_v13  ;;  %v857_v17 = vadd.f32 %v856_v40, %v794_v2  ;;  %v795_v33 = vmul.f32 %v7484_v20, %v7484_v20  ;;  %v1610_v19 = vmul.f32 %v7486_v13, %v7486_v13 }
 0x122   :  { %v7491_v24 = vpop.f32.mrf.mxu0  ;;  %v7493_v4 = vpop.f32.mrf.mxu1  ;;  %v1538_v35 = vadd.f32 %v1537_v32, %v7474_v5  ;;  %v1672_v1 = vadd.f32 %v1671_v63, %v1609_v15  ;;  %v724_v10 = vadd.f32 %v723_v12, %v7484_v20 }
 0x123   :  { %14076 = vst [vmem:[#allocation67_spill] sm:$0xff] %v7491_v24  ;;  %14077 = vst [vmem:[#allocation68_spill] sm:$0xff] %v7493_v4  ;;  %v858_v2 = vadd.f32 %v857_v17, %v795_v33  ;;  %v800_v38 = vmul.f32 %v7491_v24, %v7491_v24 }
 0x124   :  { %v7498_v61 = vpop.f32.mrf.mxu0  ;;  %v7500_v37 = vpop.f32.mrf.mxu1  ;;  %v1539_v40 = vadd.f32 %v1538_v35, %v7486_v13  ;;  %v725_v63 = vadd.f32 %v7465_v54, %v724_v10  ;;  %v1673_v12 = vadd.f32 %v1672_v1, %v1610_v19  ;;  %v1611_v35 = vmul.f32 %v7467_v31, %v7467_v31 }
 0x125   :  { %14078 = vst [vmem:[#allocation69_spill] sm:$0xff] %v7498_v61  ;;  %14079 = vst [vmem:[#allocation70_spill] sm:$0xff] %v7500_v37  ;;  %v859_v17 = vadd.f32 %v858_v2, %v796_v51 }
 0x126   :  { %v7505_v41 = vpop.f32.mrf.mxu0  ;;  %v7507_v53 = vpop.f32.mrf.mxu1  ;;  %v1540_v58 = vadd.f32 %v7467_v31, %v1539_v40  ;;  %v1674_v20 = vadd.f32 %v1673_v12, %v1611_v35  ;;  %v726_v1 = vadd.f32 %v7477_v45, %v725_v63  ;;  %v1612_v31 = vmul.f32 %v7479_v23, %v7479_v23 }
 0x127   :  { %14080 = vst [vmem:[#allocation71_spill] sm:$0xff] %v7505_v41  ;;  %14081 = vst [vmem:[#allocation72_spill] sm:$0xff] %v7507_v53  ;;  %v860_v51 = vadd.f32 %v859_v17, %v797_v49  ;;  %v798_v12 = vmul.f32 %v7498_v61, %v7498_v61  ;;  %v1613_v49 = vmul.f32 %v7500_v37, %v7500_v37 }
 0x128   :  { %v7512_v14 = vpop.f32.mrf.mxu0  ;;  %v7514_v44 = vpop.f32.mrf.mxu1  ;;  %v1541_v40 = vadd.f32 %v7479_v23, %v1540_v58  ;;  %v727_v25 = vadd.f32 %v726_v1, %v7498_v61  ;;  %v1675_v63 = vadd.f32 %v1674_v20, %v1612_v31  ;;  %v801_v29 = vmul.f32 %v7505_v41, %v7505_v41 }
 0x129   :  { %14082 = vst [vmem:[#allocation73_spill] sm:$0xff] %v7512_v14  ;;  %14083 = vst [vmem:[#allocation74_spill] sm:$0xff] %v7514_v44  ;;  %v861_v62 = vadd.f32 %v860_v51, %v798_v12  ;;  %v799_v17 = vmul.f32 %v7512_v14, %v7512_v14  ;;  %v1614_v20 = vmul.f32 %v7514_v44, %v7514_v44 }
 0x12a   :  { %v7521_v55 = vpop.f32.mrf.mxu0  ;;  %v7523_v34 = vpop.f32.mrf.mxu1  ;;  %v1542_v58 = vadd.f32 %v1541_v40, %v7500_v37  ;;  %v1676_v59 = vadd.f32 %v1675_v63, %v1613_v49  ;;  %v728_v31 = vadd.f32 %v727_v25, %v7512_v14 }
 0x12b   :  { %14084 = vst [vmem:[#allocation75_spill] sm:$0xff] %v7521_v55  ;;  %14085 = vst [vmem:[#allocation76_spill] sm:$0xff] %v7523_v34  ;;  %v862_v12 = vadd.f32 %v861_v62, %v799_v17  ;;  %v804_v26 = vmul.f32 %v7521_v55, %v7521_v55 }
 0x12c   :  { %v7528_v28 = vpop.f32.mrf.mxu0  ;;  %v7530_v32 = vpop.f32.mrf.mxu1  ;;  %v1543_v51 = vadd.f32 %v1542_v58, %v7514_v44  ;;  %v729_v63 = vadd.f32 %v7491_v24, %v728_v31  ;;  %v1677_v25 = vadd.f32 %v1676_v59, %v1614_v20  ;;  %v1615_v58 = vmul.f32 %v7493_v4, %v7493_v4 }
 0x12d   :  { %14086 = vst [vmem:[#allocation77_spill] sm:$0xff] %v7528_v28  ;;  %14087 = vst [vmem:[#allocation78_spill] sm:$0xff] %v7530_v32  ;;  %v863_v62 = vadd.f32 %v862_v12, %v800_v38 }
 0x12e   :  { %v7533_v5 = vpop.f32.mrf.mxu0  ;;  %v7535_v8 = vpop.f32.mrf.mxu1  ;;  %v1544_v7 = vadd.f32 %v7493_v4, %v1543_v51  ;;  %v1678_v39 = vadd.f32 %v1677_v25, %v1615_v58  ;;  %v730_v59 = vadd.f32 %v7505_v41, %v729_v63  ;;  %v1616_v4 = vmul.f32 %v7507_v53, %v7507_v53 }
 0x12f   :  { %14088 = vst [vmem:[#allocation79_spill] sm:$0xff] %v7533_v5  ;;  %14089 = vst [vmem:[#allocation80_spill] sm:$0xff] %v7535_v8  ;;  %v864_v38 = vadd.f32 %v863_v62, %v801_v29  ;;  %v802_v25 = vmul.f32 %v7528_v28, %v7528_v28  ;;  %v1617_v29 = vmul.f32 %v7530_v32, %v7530_v32 }
 0x130   :  { %v7540_v15 = vpop.f32.mrf.mxu0  ;;  %v7542_v47 = vpop.f32.mrf.mxu1  ;;  %v1545_v51 = vadd.f32 %v7507_v53, %v1544_v7  ;;  %v731_v56 = vadd.f32 %v730_v59, %v7528_v28  ;;  %v1679_v63 = vadd.f32 %v1678_v39, %v1616_v4  ;;  %v805_v22 = vmul.f32 %v7533_v5, %v7533_v5 }
 0x131   :  { %14090 = vst [vmem:[#allocation81_spill] sm:$0xff] %v7540_v15  ;;  %14091 = vst [vmem:[#allocation82_spill] sm:$0xff] %v7542_v47  ;;  %v865_v52 = vadd.f32 %v864_v38, %v802_v25  ;;  %v803_v62 = vmul.f32 %v7540_v15, %v7540_v15  ;;  %v1618_v4 = vmul.f32 %v7542_v47, %v7542_v47 }
 0x132   :  { %v7547_v33 = vpop.f32.mrf.mxu0  ;;  %v7549_v13 = vpop.f32.mrf.mxu1  ;;  %v1546_v7 = vadd.f32 %v1545_v51, %v7530_v32  ;;  %v1680_v18 = vadd.f32 %v1679_v63, %v1617_v29  ;;  %v732_v39 = vadd.f32 %v731_v56, %v7540_v15 }
 0x133   :  { %14092 = vst [vmem:[#allocation83_spill] sm:$0xff] %v7547_v33  ;;  %14093 = vst [vmem:[#allocation84_spill] sm:$0xff] %v7549_v13  ;;  %v866_v25 = vadd.f32 %v865_v52, %v803_v62  ;;  %v808_v42 = vmul.f32 %v7547_v33, %v7547_v33 }
 0x134   :  { %v7554_v10 = vpop.f32.mrf.mxu0  ;;  %v7556_v19 = vpop.f32.mrf.mxu1  ;;  %v1547_v38 = vadd.f32 %v1546_v7, %v7542_v47  ;;  %v733_v63 = vadd.f32 %v7521_v55, %v732_v39  ;;  %v1681_v56 = vadd.f32 %v1680_v18, %v1618_v4  ;;  %v1619_v7 = vmul.f32 %v7523_v34, %v7523_v34 }
 0x135   :  { %14094 = vst [vmem:[#allocation85_spill] sm:$0xff] %v7554_v10  ;;  %14095 = vst [vmem:[#allocation86_spill] sm:$0xff] %v7556_v19  ;;  %v867_v52 = vadd.f32 %v866_v25, %v804_v26 }
 0x136   :  { %v7561_v2 = vpop.f32.mrf.mxu0  ;;  %v7563_v54 = vpop.f32.mrf.mxu1  ;;  %v1548_v43 = vadd.f32 %v7523_v34, %v1547_v38  ;;  %v1682_v3 = vadd.f32 %v1681_v56, %v1619_v7  ;;  %v734_v18 = vadd.f32 %v7533_v5, %v733_v63  ;;  %v1620_v34 = vmul.f32 %v7535_v8, %v7535_v8 }
 0x137   :  { %14096 = vst [vmem:[#allocation87_spill] sm:$0xff] %v7561_v2  ;;  %14097 = vst [vmem:[#allocation88_spill] sm:$0xff] %v7563_v54  ;;  %v868_v26 = vadd.f32 %v867_v52, %v805_v22  ;;  %v806_v56 = vmul.f32 %v7554_v10, %v7554_v10  ;;  %v1621_v22 = vmul.f32 %v7556_v19, %v7556_v19 }
 0x138   :  { %v7568_v35 = vpop.f32.mrf.mxu0  ;;  %v7570_v45 = vpop.f32.mrf.mxu1  ;;  %v1549_v38 = vadd.f32 %v7535_v8, %v1548_v43  ;;  %v735_v30 = vadd.f32 %v734_v18, %v7554_v10  ;;  %v1683_v63 = vadd.f32 %v1682_v3, %v1620_v34  ;;  %v809_v0 = vmul.f32 %v7561_v2, %v7561_v2 }
 0x139   :  { %14098 = vst [vmem:[#allocation89_spill] sm:$0xff] %v7568_v35  ;;  %14099 = vst [vmem:[#allocation90_spill] sm:$0xff] %v7570_v45  ;;  %v869_v60 = vadd.f32 %v868_v26, %v806_v56  ;;  %v807_v52 = vmul.f32 %v7568_v35, %v7568_v35  ;;  %v1622_v34 = vmul.f32 %v7570_v45, %v7570_v45 }
 0x13a   :  { %v7577_v23 = vpop.f32.mrf.mxu0  ;;  %v7579_v1 = vpop.f32.mrf.mxu1  ;;  %v1550_v43 = vadd.f32 %v1549_v38, %v7556_v19  ;;  %v1684_v36 = vadd.f32 %v1683_v63, %v1621_v22  ;;  %v736_v3 = vadd.f32 %v735_v30, %v7568_v35 }
 0x13b   :  { %14100 = vst [vmem:[#allocation91_spill] sm:$0xff] %v7579_v1  ;;  %v870_v56 = vadd.f32 %v869_v60, %v807_v52 }
 0x13c   :  { %v7584_v61 = vpop.f32.mrf.mxu0  ;;  %v7586_v40 = vpop.f32.mrf.mxu1  ;;  %v1551_v26 = vadd.f32 %v1550_v43, %v7570_v45  ;;  %v737_v63 = vadd.f32 %v7547_v33, %v736_v3  ;;  %v1685_v30 = vadd.f32 %v1684_v36, %v1622_v34  ;;  %v1623_v43 = vmul.f32 %v7549_v13, %v7549_v13 }
 0x13d   :  { %14101 = vst [vmem:[#allocation92_spill] sm:$0xff] %v7584_v61  ;;  %14102 = vst [vmem:[#allocation93_spill] sm:$0xff] %v7586_v40  ;;  %v871_v60 = vadd.f32 %v870_v56, %v808_v42 }
 0x13e   :  { %v7589_v37 = vpop.f32.mrf.mxu0  ;;  %v7591_v21 = vpop.f32.mrf.mxu1  ;;  %v1552_v16 = vadd.f32 %v7549_v13, %v1551_v26  ;;  %v1686_v27 = vadd.f32 %v1685_v30, %v1623_v43  ;;  %v738_v36 = vadd.f32 %v7561_v2, %v737_v63  ;;  %v1624_v13 = vmul.f32 %v7563_v54, %v7563_v54 }
 0x13f   :  { %14103 = vst [vmem:[#allocation94_spill] sm:$0xff] %v7589_v37  ;;  %14104 = vst [vmem:[#allocation95_spill] sm:$0xff] %v7591_v21  ;;  %v872_v42 = vadd.f32 %v871_v60, %v809_v0  ;;  %v810_v30 = vmul.f32 %v7584_v61, %v7584_v61  ;;  %v1625_v63 = vmul.f32 %v7586_v40, %v7586_v40 }
 0x140   :  { %v7596_v49 = vpop.f32.mrf.mxu0  ;;  %v7598_v14 = vpop.f32.mrf.mxu1  ;;  %v1553_v26 = vadd.f32 %v7563_v54, %v1552_v16  ;;  %v739_v6 = vadd.f32 %v738_v36, %v7584_v61  ;;  %v1687_v43 = vadd.f32 %v1686_v27, %v1624_v13 }
 0x141   :  { %14105 = vst [vmem:[#allocation96_spill] sm:$0xff] %v7596_v49  ;;  %14106 = vst [vmem:[#allocation97_spill] sm:$0xff] %v7598_v14  ;;  %v873_v61 = vadd.f32 %v872_v42, %v810_v30 }
 0x142   :  { %v7603_v17 = vpop.f32.mrf.mxu0  ;;  %v7605_v44 = vpop.f32.mrf.mxu1  ;;  %v1554_v54 = vadd.f32 %v1553_v26, %v7586_v40  ;;  %v1688_v46 = vadd.f32 %v1687_v43, %v1625_v63  ;;  %v1627_v63 = vmul.f32 %v7579_v1, %v7579_v1  ;;  %v813_v43 = vmul.f32 %v7589_v37, %v7589_v37 }
 0x143   :  { %14107 = vst [vmem:[#allocation98_spill] sm:$0xff] %v7605_v44 }
 0x144   :  { %v7610_v31 = vpop.f32.mrf.mxu0  ;;  %v7612_v20 = vpop.f32.mrf.mxu1 }
 0x145   :  { %14108 = vst [vmem:[#allocation99_spill] sm:$0xff] %v7612_v20 }
 0x146   :  { %v7617_v12 = vpop.f32.mrf.mxu0  ;;  %v7619_v24 = vpop.f32.mrf.mxu1 }
 0x147   :  { %14109 = vst [vmem:[#allocation100_spill] sm:$0xff] %v7619_v24 }
 0x148   :  { %v7624_v58 = vpop.f32.mrf.mxu0  ;;  %v7626_v41 = vpop.f32.mrf.mxu1 }
 0x149   :  { %14110 = vst [vmem:[#allocation101_spill] sm:$0xff] %v7626_v41 }
 0x14a   :  { %v7633_v53 = vpop.f32.mrf.mxu0  ;;  %v7635_v59 = vpop.f32.mrf.mxu1 }
 0x14b   :  { %14111 = vst [vmem:[#allocation102_spill] sm:$0xff] %v7635_v59 }
 0x14c   :  { %v7640_v28 = vpop.f32.mrf.mxu0  ;;  %v7642_v51 = vpop.f32.mrf.mxu1 }
 0x14d   :  { %14112 = vst [vmem:[#allocation103_spill] sm:$0xff] %v7642_v51 }
 0x14e   :  { %v7645_v32 = vpop.f32.mrf.mxu0  ;;  %v7647_v9 = vpop.f32.mrf.mxu1 }
 0x14f   :  { %14113 = vst [vmem:[#allocation104_spill] sm:$0xff] %v7647_v9 }
 0x150   :  { %v7652_v29 = vpop.f32.mrf.mxu0  ;;  %v7654_v15 = vpop.f32.mrf.mxu1 }
 0x151   :  { %14114 = vst [vmem:[#allocation105_spill] sm:$0xff] %v7654_v15 }
 0x152   :  { %v7659_v62 = vpop.f32.mrf.mxu0  ;;  %v7661_v47 = vpop.f32.mrf.mxu1 }
 0x153   :  { %14115 = vst [vmem:[#allocation106_spill] sm:$0xff] %v7661_v47 }
 0x154   :  { %v7666_v39 = vpop.f32.mrf.mxu0  ;;  %v7668_v4 = vpop.f32.mrf.mxu1 }
 0x155   :  { %14116 = vst [vmem:[#allocation107_spill] sm:$0xff] %v7668_v4 }
 0x156   :  { %v7673_v25 = vpop.f32.mrf.mxu0  ;;  %v7675_v55 = vpop.f32.mrf.mxu1 }
 0x157   :  { %14117 = vst [vmem:[#allocation108_spill] sm:$0xff] %v7675_v55 }
 0x158   :  { %v7680_v7 = vpop.f32.mrf.mxu0  ;;  %v7682_v5 = vpop.f32.mrf.mxu1 }
 0x159   :  { %14118 = vst [vmem:[#allocation109_spill] sm:$0xff] %v7682_v5 }
 0x15a   :  { %v7689_v8 = vpop.f32.mrf.mxu0  ;;  %v7691_v18 = vpop.f32.mrf.mxu1 }
 0x15b   :  { %14119 = vst [vmem:[#allocation110_spill] sm:$0xff] %v7691_v18 }
 0x15c   :  { %v7696_v10 = vpop.f32.mrf.mxu0  ;;  %v7698_v38 = vpop.f32.mrf.mxu1 }
 0x15d   :  { %14120 = vst [vmem:[#allocation111_spill] sm:$0xff] %v7696_v10  ;;  %14121 = vst [vmem:[#allocation112_spill] sm:$0xff] %v7698_v38  ;;  %v1628_v10 = vmul.f32 %v7591_v21, %v7591_v21 }
 0x15e   :  { %v7701_v19 = vpop.f32.mrf.mxu0  ;;  %v7703_v11 = vpop.f32.mrf.mxu1 }
 0x15f   :  { %14122 = vst [vmem:[#allocation113_spill] sm:$0xff] %v7701_v19  ;;  %14123 = vst [vmem:[#allocation114_spill] sm:$0xff] %v7703_v11  ;;  %v812_v19 = vmul.f32 %v7577_v23, %v7577_v23 }
 0x160   :  { %v7708_v22 = vpop.f32.mrf.mxu0  ;;  %v7710_v35 = vpop.f32.mrf.mxu1 }
 0x161   :  { %14124 = vst [vmem:[#allocation115_spill] sm:$0xff] %v7708_v22  ;;  %14125 = vst [vmem:[#allocation116_spill] sm:$0xff] %v7710_v35 }
 0x162   :  { %v7715_v52 = vpop.f32.mrf.mxu0  ;;  %v7717_v45 = vpop.f32.mrf.mxu1 }
 0x163   :  { %14126 = vst [vmem:[#allocation117_spill] sm:$0xff] %v7715_v52  ;;  %14127 = vst [vmem:[#allocation118_spill] sm:$0xff] %v7717_v45  ;;  %v3213_v18 = vmul.f32 %v7717_v45, %v7717_v45 }
 0x164   :  { %v7722_v3 = vpop.f32.mrf.mxu0  ;;  %v7724_v34 = vpop.f32.mrf.mxu1 }
 0x165   :  { %14128 = vst [vmem:[#allocation119_spill] sm:$0xff] %v7722_v3  ;;  %14129 = vst [vmem:[#allocation120_spill] sm:$0xff] %v7724_v34  ;;  %v2396_v0 = vmul.f32 %v7722_v3, %v7722_v3  ;;  %v3211_v50 = vmul.f32 %v7724_v34, %v7724_v34 }
 0x166   :  { %v7729_v56 = vpop.f32.mrf.mxu0  ;;  %v7731_v33 = vpop.f32.mrf.mxu1 }
 0x167   :  { %14130 = vst [vmem:[#allocation121_spill] sm:$0xff] %v7729_v56  ;;  %14131 = vst [vmem:[#allocation122_spill] sm:$0xff] %v7731_v33 }
 0x168   :  { %v7738_v2 = vpop.f32.mrf.mxu0  ;;  %v7740_v16 = vpop.f32.mrf.mxu1 }
 0x169   :  { %14132 = vst [vmem:[#allocation123_spill] sm:$0xff] %v7738_v2  ;;  %14133 = vst [vmem:[#allocation124_spill] sm:$0xff] %v7740_v16  ;;  %v2326_v60 = vadd.f32 %v7738_v2, %v7722_v3  ;;  %v2397_v36 = vmul.f32 %v7738_v2, %v7738_v2  ;;  %v3141_v27 = vadd.f32 %v7740_v16, %v7724_v34 }
 0x16a   :  { %v3212_v13 = vmul.f32 %v7740_v16, %v7740_v16  ;;  %v7755_v26 = vpop.f32.mrf.mxu0  ;;  %v7757_v40 = vpop.f32.mrf.mxu1  ;;  %v811_v3 = vmul.f32 %v7596_v49, %v7596_v49  ;;  %v2398_v2 = vmul.f32 %v7715_v52, %v7715_v52  ;;  %v1626_v34 = vmul.f32 %v7598_v14, %v7598_v14 }
 0x16b   :  { %14134 = vst [vmem:[#allocation125_spill] sm:$0xff] %v7755_v26  ;;  %14135 = vst [vmem:[#allocation126_spill] sm:$0xff] %v7757_v40  ;;  %v2327_v42 = vadd.f32 %v7715_v52, %v2326_v60  ;;  %v2460_v30 = vadd.f32 %v2397_v36, %v2396_v0  ;;  %v3142_v57 = vadd.f32 %v7717_v45, %v3141_v27 }
 0x16c   :  { %v3275_v16 = vadd.f32 %v3212_v13, %v3211_v50  ;;  %v7767_v48 = vpop.f32.mrf.mxu0  ;;  %v7769_v11 = vpop.f32.mrf.mxu1  ;;  %v740_v0 = vadd.f32 %v739_v6, %v7596_v49  ;;  %v2399_v50 = vmul.f32 %v7729_v56, %v7729_v56  ;;  %v874_v27 = vadd.f32 %v873_v61, %v811_v3 }
 0x16d   :  { %14136 = vst [vmem:[#allocation127_spill] sm:$0xff] %v7767_v48  ;;  %14137 = vst [vmem:[#allocation128_spill] sm:$0xff] %v7769_v11  ;;  %v2461_v35 = vadd.f32 %v2460_v30, %v2398_v2  ;;  %v1555_v13 = vadd.f32 %v1554_v54, %v7598_v14  ;;  %v2328_v2 = vadd.f32 %v7729_v56, %v2327_v42 }
 0x16e   :  { %v7782_v60 = vpop.f32.mrf.mxu0  ;;  %v7784_v36 = vpop.f32.mrf.mxu1  ;;  %v3276_v45 = vadd.f32 %v3275_v16, %v3213_v18  ;;  %v1689_v30 = vadd.f32 %v1688_v46, %v1626_v34  ;;  %v2400_v52 = vmul.f32 %v7767_v48, %v7767_v48  ;;  %v3143_v6 = vadd.f32 %v7731_v33, %v3142_v57 }
 0x16f   :  { %14138 = vst [vmem:[#allocation129_spill] sm:$0xff] %v7782_v60  ;;  %14139 = vst [vmem:[#allocation130_spill] sm:$0xff] %v7784_v36  ;;  %v2462_v22 = vadd.f32 %v2461_v35, %v2399_v50  ;;  %v7799_v61 = vmul.f32 %v7603_v17, %v7603_v17  ;;  %v3214_v46 = vmul.f32 %v7731_v33, %v7731_v33 }
 0x170   :  { %v7791_v49 = vpop.f32.mrf.mxu0  ;;  %v7793_v38 = vpop.f32.mrf.mxu1  ;;  %v2329_v54 = vadd.f32 %v2328_v2, %v7767_v48  ;;  %v741_v35 = vadd.f32 %v7577_v23, %v740_v0  ;;  %v7807_v57 = vmul.f32 %v7605_v44, %v7605_v44  ;;  %v3144_v3 = vadd.f32 %v3143_v6, %v7769_v11 }
 0x171   :  { %14140 = vst [vmem:[#allocation131_spill] sm:$0xff] %v7791_v49  ;;  %14141 = vst [vmem:[#allocation132_spill] sm:$0xff] %v7793_v38  ;;  %v2463_v18 = vadd.f32 %v2462_v22, %v2400_v52  ;;  %v875_v42 = vadd.f32 %v874_v27, %v812_v19  ;;  %v1556_v50 = vadd.f32 %v7579_v1, %v1555_v13 }
 0x172   :  { %v7810_v34 = vpop.f32.mrf.mxu0  ;;  %v7812_v16 = vpop.f32.mrf.mxu1  ;;  %v3215_v33 = vmul.f32 %v7769_v11, %v7769_v11  ;;  %v3277_v2 = vadd.f32 %v3276_v45, %v3214_v46  ;;  %v1690_v48 = vadd.f32 %v1689_v30, %v1627_v63  ;;  %v814_v0 = vmul.f32 %v7610_v31, %v7610_v31 }
 0x173   :  { %14142 = vst [vmem:[#allocation133_spill] sm:$0xff] %v7810_v34  ;;  %14143 = vst [vmem:[#allocation134_spill] sm:$0xff] %v7812_v16  ;;  %v2330_v56 = vadd.f32 %v2329_v54, %v7791_v49  ;;  %v2401_v22 = vmul.f32 %v7791_v49, %v7791_v49  ;;  %v1629_v19 = vmul.f32 %v7612_v20, %v7612_v20 }
 0x174   :  { %v7822_v52 = vpop.f32.mrf.mxu0  ;;  %v7824_v6 = vpop.f32.mrf.mxu1  ;;  %v3278_v27 = vadd.f32 %v3277_v2, %v3215_v33  ;;  %v3145_v13 = vadd.f32 %v3144_v3, %v7793_v38  ;;  %v3216_v45 = vmul.f32 %v7793_v38, %v7793_v38  ;;  %v742_v63 = vadd.f32 %v7589_v37, %v741_v35 }
 0x175   :  { %14144 = vst [vmem:[#allocation135_spill] sm:$0xff] %v7822_v52  ;;  %14145 = vst [vmem:[#allocation136_spill] sm:$0xff] %v7824_v6  ;;  %v2402_v30 = vmul.f32 %v7755_v26, %v7755_v26  ;;  %v2331_v46 = vadd.f32 %v7755_v26, %v2330_v56  ;;  %v2464_v54 = vadd.f32 %v2463_v18, %v2401_v22 }
 0x176   :  { %v7835_v11 = vpop.f32.mrf.mxu0  ;;  %v7837_v49 = vpop.f32.mrf.mxu1  ;;  %v1557_v1 = vadd.f32 %v7591_v21, %v1556_v50  ;;  %v3217_v33 = vmul.f32 %v7757_v40, %v7757_v40  ;;  %v3146_v3 = vadd.f32 %v7757_v40, %v3145_v13  ;;  %v3279_v2 = vadd.f32 %v3278_v27, %v3216_v45 }
 0x177   :  { %14146 = vst [vmem:[#allocation137_spill] sm:$0xff] %v7835_v11  ;;  %14147 = vst [vmem:[#allocation138_spill] sm:$0xff] %v7837_v49  ;;  %v876_v38 = vadd.f32 %v875_v42, %v813_v43  ;;  %v2403_v35 = vmul.f32 %v7782_v60, %v7782_v60  ;;  %v2465_v14 = vadd.f32 %v2464_v54, %v2402_v30 }
 0x178   :  { %v2332_v56 = vadd.f32 %v7782_v60, %v2331_v46  ;;  %v7846_v18 = vpop.f32.mrf.mxu0  ;;  %v7848_v22 = vpop.f32.mrf.mxu1  ;;  %v1691_v26 = vadd.f32 %v1690_v48, %v1628_v10  ;;  %v3218_v50 = vmul.f32 %v7784_v36, %v7784_v36  ;;  %v3280_v21 = vadd.f32 %v3279_v2, %v3217_v33 }
 0x179   :  { %14148 = vst [vmem:[#allocation139_spill] sm:$0xff] %v7846_v18  ;;  %14149 = vst [vmem:[#allocation140_spill] sm:$0xff] %v7848_v22  ;;  %v3147_v37 = vadd.f32 %v7784_v36, %v3146_v3  ;;  %v2404_v43 = vmul.f32 %v7822_v52, %v7822_v52  ;;  %v2466_v42 = vadd.f32 %v2465_v14, %v2403_v35 }
 0x17a   :  { %v2333_v27 = vadd.f32 %v2332_v56, %v7822_v52  ;;  %v2405_v13 = vmul.f32 %v7846_v18, %v7846_v18  ;;  %v7858_v45 = vpop.f32.mrf.mxu0  ;;  %v7860_v30 = vpop.f32.mrf.mxu1  ;;  %v3219_v10 = vmul.f32 %v7824_v6, %v7824_v6  ;;  %v3281_v46 = vadd.f32 %v3280_v21, %v3218_v50 }
 0x17b   :  { %14150 = vst [vmem:[#allocation141_spill] sm:$0xff] %v7858_v45  ;;  %14151 = vst [vmem:[#allocation142_spill] sm:$0xff] %v7860_v30  ;;  %v3148_v48 = vadd.f32 %v3147_v37, %v7824_v6  ;;  %v3220_v54 = vmul.f32 %v7848_v22, %v7848_v22  ;;  %v7869_v33 = vmul.f32 %v7617_v12, %v7617_v12 }
 0x17c   :  { %v7873_v14 = vmul.f32 %v7619_v24, %v7619_v24  ;;  %v2467_v3 = vadd.f32 %v2466_v42, %v2404_v43  ;;  %v2334_v2 = vadd.f32 %v2333_v27, %v7846_v18  ;;  %v7876_v35 = vpop.f32.mrf.mxu0  ;;  %v7878_v37 = vpop.f32.mrf.mxu1  ;;  %v743_v21 = vadd.f32 %v742_v63, %v7610_v31 }
 0x17d   :  { %14152 = vst [vmem:[#allocation143_spill] sm:$0xff] %v7876_v35  ;;  %14153 = vst [vmem:[#allocation144_spill] sm:$0xff] %v7878_v37  ;;  %v1558_v56 = vadd.f32 %v1557_v1, %v7612_v20  ;;  %v3282_v50 = vadd.f32 %v3281_v46, %v3219_v10  ;;  %v3149_v6 = vadd.f32 %v3148_v48, %v7848_v22  ;;  %v14307_v20 = vld [vmem:[#allocation79_spill] sm:$0xff] }
 0x17e   :  { %v877_v36 = vadd.f32 %v876_v38, %v814_v0  ;;  %v2406_v40 = vmul.f32 %v7810_v34, %v7810_v34  ;;  %v2335_v52 = vadd.f32 %v7810_v34, %v2334_v2  ;;  %v2468_v43 = vadd.f32 %v2467_v3, %v2405_v13  ;;  %v7886_v42 = vpop.f32.mrf.mxu0  ;;  %v7888_v27 = vpop.f32.mrf.mxu1 }
 0x17f   :  { %14154 = vst [vmem:[#allocation145_spill] sm:$0xff] %v7886_v42  ;;  %14155 = vst [vmem:[#allocation146_spill] sm:$0xff] %v7888_v27  ;;  %v1692_v18 = vadd.f32 %v1691_v26, %v1629_v19  ;;  %v3221_v63 = vmul.f32 %v7812_v16, %v7812_v16  ;;  %v3150_v1 = vadd.f32 %v7812_v16, %v3149_v6 }
 0x180   :  { %v3283_v10 = vadd.f32 %v3282_v50, %v3220_v54  ;;  %v815_v38 = vmul.f32 %v7624_v58, %v7624_v58  ;;  %v2407_v0 = vmul.f32 %v7835_v11, %v7835_v11  ;;  %v2469_v48 = vadd.f32 %v2468_v43, %v2406_v40  ;;  %v7898_v46 = vpop.f32.mrf.mxu0  ;;  %v7900_v3 = vpop.f32.mrf.mxu1 }
 0x181   :  { %v2336_v13 = vadd.f32 %v7835_v11, %v2335_v52  ;;  %14156 = vst [vmem:[#allocation147_spill] sm:$0xff] %v7898_v46  ;;  %14157 = vst [vmem:[#allocation148_spill] sm:$0xff] %v7900_v3  ;;  %v1630_v26 = vmul.f32 %v7626_v41, %v7626_v41  ;;  %v3222_v6 = vmul.f32 %v7837_v49, %v7837_v49 }
 0x182   :  { %v3284_v19 = vadd.f32 %v3283_v10, %v3221_v63  ;;  %v3151_v54 = vadd.f32 %v7837_v49, %v3150_v1  ;;  %v2408_v40 = vmul.f32 %v7876_v35, %v7876_v35  ;;  %v2470_v50 = vadd.f32 %v2469_v48, %v2407_v0  ;;  %v7912_v43 = vpop.f32.mrf.mxu0  ;;  %v7914_v16 = vpop.f32.mrf.mxu1 }
 0x183   :  { %v2337_v2 = vadd.f32 %v2336_v13, %v7876_v35  ;;  %v2409_v52 = vmul.f32 %v7898_v46, %v7898_v46  ;;  %14158 = vst [vmem:[#allocation149_spill] sm:$0xff] %v7912_v43  ;;  %14159 = vst [vmem:[#allocation150_spill] sm:$0xff] %v7914_v16  ;;  %v3223_v63 = vmul.f32 %v7878_v37, %v7878_v37 }
 0x184   :  { %v3152_v22 = vadd.f32 %v3151_v54, %v7878_v37  ;;  %v3285_v10 = vadd.f32 %v3284_v19, %v3222_v6  ;;  %v3224_v1 = vmul.f32 %v7900_v3, %v7900_v3  ;;  %v744_v13 = vadd.f32 %v743_v21, %v7624_v58  ;;  %v7924_v35 = vpop.f32.mrf.mxu0  ;;  %v7926_v11 = vpop.f32.mrf.mxu1 }
 0x185   :  { %v1559_v0 = vadd.f32 %v1558_v56, %v7626_v41  ;;  %v2471_v48 = vadd.f32 %v2470_v50, %v2408_v40  ;;  %v2338_v49 = vadd.f32 %v2337_v2, %v7898_v46  ;;  %14160 = vst [vmem:[#allocation151_spill] sm:$0xff] %v7924_v35  ;;  %14161 = vst [vmem:[#allocation152_spill] sm:$0xff] %v7926_v11  ;;  %v14305_v41 = vld [vmem:[#allocation75_spill] sm:$0xff] }
 0x186   :  { %v878_v34 = vadd.f32 %v877_v36, %v815_v38  ;;  %v1693_v54 = vadd.f32 %v1692_v18, %v1630_v26  ;;  %v3286_v60 = vadd.f32 %v3285_v10, %v3223_v63  ;;  %v3153_v37 = vadd.f32 %v3152_v22, %v7900_v3  ;;  %v7936_v2 = vpop.f32.mrf.mxu0  ;;  %v7938_v40 = vpop.f32.mrf.mxu1 }
 0x187   :  { %v7931_v6 = vmul.f32 %v7633_v53, %v7633_v53  ;;  %v2410_v21 = vmul.f32 %v7858_v45, %v7858_v45  ;;  %v2339_v56 = vadd.f32 %v7858_v45, %v2338_v49  ;;  %v2472_v19 = vadd.f32 %v2471_v48, %v2409_v52  ;;  %14162 = vst [vmem:[#allocation153_spill] sm:$0xff] %v7936_v2 }
 0x188   :  { %14163 = vst [vmem:[#allocation154_spill] sm:$0xff] %v7938_v40  ;;  %v7942_v36 = vmul.f32 %v7635_v59, %v7635_v59  ;;  %v3225_v18 = vmul.f32 %v7860_v30, %v7860_v30  ;;  %v3154_v22 = vadd.f32 %v7860_v30, %v3153_v37  ;;  %v3287_v38 = vadd.f32 %v3286_v60, %v3224_v1  ;;  %v7951_v63 = vpop.f32.mrf.mxu0  ;;  %v7953_v10 = vpop.f32.mrf.mxu1 }
 0x189   :  { %v745_v26 = vadd.f32 %v7603_v17, %v744_v13  ;;  %v2411_v49 = vmul.f32 %v7886_v42, %v7886_v42  ;;  %v2473_v50 = vadd.f32 %v2472_v19, %v2410_v21  ;;  %v2340_v52 = vadd.f32 %v7886_v42, %v2339_v56  ;;  %14164 = vst [vmem:[#allocation155_spill] sm:$0xff] %v7951_v63 }
 0x18a   :  { %14165 = vst [vmem:[#allocation156_spill] sm:$0xff] %v7953_v10  ;;  %v1560_v48 = vadd.f32 %v7605_v44, %v1559_v0  ;;  %v3226_v3 = vmul.f32 %v7888_v27, %v7888_v27  ;;  %v3288_v45 = vadd.f32 %v3287_v38, %v3225_v18  ;;  %v3155_v60 = vadd.f32 %v7888_v27, %v3154_v22  ;;  %v7964_v56 = vpop.f32.mrf.mxu0  ;;  %v7966_v19 = vpop.f32.mrf.mxu1  ;;  %v14303_v44 = vld [vmem:[#allocation81_spill] sm:$0xff] }
 0x18b   :  { %v2341_v37 = vadd.f32 %v2340_v52, %v7924_v35  ;;  %v2412_v1 = vmul.f32 %v7924_v35, %v7924_v35  ;;  %v2474_v13 = vadd.f32 %v2473_v50, %v2411_v49  ;;  %v2413_v21 = vmul.f32 %v7951_v63, %v7951_v63  ;;  %14166 = vst [vmem:[#allocation157_spill] sm:$0xff] %v7964_v56 }
 0x18c   :  { %14167 = vst [vmem:[#allocation158_spill] sm:$0xff] %v7966_v19  ;;  %v3156_v0 = vadd.f32 %v3155_v60, %v7926_v11  ;;  %v3227_v18 = vmul.f32 %v7926_v11, %v7926_v11  ;;  %v3289_v38 = vadd.f32 %v3288_v45, %v3226_v3  ;;  %v3228_v22 = vmul.f32 %v7953_v10, %v7953_v10  ;;  %v7976_v30 = vpop.f32.mrf.mxu0  ;;  %v7978_v35 = vpop.f32.mrf.mxu1 }
 0x18d   :  { %v879_v52 = vadd.f32 %v878_v34, %v7799_v61  ;;  %v1694_v49 = vadd.f32 %v1693_v54, %v7807_v57  ;;  %v2475_v50 = vadd.f32 %v2474_v13, %v2412_v1  ;;  %v2342_v27 = vadd.f32 %v2341_v37, %v7951_v63  ;;  %14168 = vst [vmem:[#allocation159_spill] sm:$0xff] %v7976_v30 }
 0x18e   :  { %14169 = vst [vmem:[#allocation160_spill] sm:$0xff] %v7978_v35  ;;  %v818_v60 = vmul.f32 %v7640_v28, %v7640_v28  ;;  %v1633_v45 = vmul.f32 %v7642_v51, %v7642_v51  ;;  %v3290_v3 = vadd.f32 %v3289_v38, %v3227_v18  ;;  %v3157_v11 = vadd.f32 %v3156_v0, %v7953_v10  ;;  %v7989_v37 = vpop.f32.mrf.mxu0  ;;  %v7991_v1 = vpop.f32.mrf.mxu1 }
 0x18f   :  { %v746_v61 = vadd.f32 %v7617_v12, %v745_v26  ;;  %v2414_v57 = vmul.f32 %v7912_v43, %v7912_v43  ;;  %v2343_v34 = vadd.f32 %v7912_v43, %v2342_v27  ;;  %v2476_v54 = vadd.f32 %v2475_v50, %v2413_v21  ;;  %14170 = vst [vmem:[#allocation161_spill] sm:$0xff] %v7989_v37 }
 0x190   :  { %14171 = vst [vmem:[#allocation162_spill] sm:$0xff] %v7991_v1  ;;  %v1561_v13 = vadd.f32 %v7619_v24, %v1560_v48  ;;  %v3229_v63 = vmul.f32 %v7914_v16, %v7914_v16  ;;  %v3158_v18 = vadd.f32 %v7914_v16, %v3157_v11  ;;  %v3291_v0 = vadd.f32 %v3290_v3, %v3228_v22  ;;  %v8001_v21 = vpop.f32.mrf.mxu0  ;;  %v8003_v50 = vpop.f32.mrf.mxu1  ;;  %v14301_v24 = vld [vmem:[#allocation77_spill] sm:$0xff] }
 0x191   :  { %v880_v26 = vadd.f32 %v879_v52, %v7869_v33  ;;  %v2415_v38 = vmul.f32 %v7936_v2, %v7936_v2  ;;  %v2477_v10 = vadd.f32 %v2476_v54, %v2414_v57  ;;  %v2344_v27 = vadd.f32 %v7936_v2, %v2343_v34  ;;  %14172 = vst [vmem:[#allocation163_spill] sm:$0xff] %v8001_v21 }
 0x192   :  { %14173 = vst [vmem:[#allocation164_spill] sm:$0xff] %v8003_v50  ;;  %v1695_v48 = vadd.f32 %v1694_v49, %v7873_v14  ;;  %v3230_v43 = vmul.f32 %v7938_v40, %v7938_v40  ;;  %v3292_v42 = vadd.f32 %v3291_v0, %v3229_v63  ;;  %v3159_v11 = vadd.f32 %v7938_v40, %v3158_v18  ;;  %v8014_v57 = vpop.f32.mrf.mxu0  ;;  %v8016_v34 = vpop.f32.mrf.mxu1 }
 0x193   :  { %v2345_v33 = vadd.f32 %v2344_v27, %v7976_v30  ;;  %v2416_v22 = vmul.f32 %v7976_v30, %v7976_v30  ;;  %v2478_v52 = vadd.f32 %v2477_v10, %v2415_v38  ;;  %v2417_v3 = vmul.f32 %v8001_v21, %v8001_v21  ;;  %14174 = vst [vmem:[#allocation165_spill] sm:$0xff] %v8014_v57 }
 0x194   :  { %14175 = vst [vmem:[#allocation166_spill] sm:$0xff] %v8016_v34  ;;  %v3160_v14 = vadd.f32 %v3159_v11, %v7978_v35  ;;  %v3231_v63 = vmul.f32 %v7978_v35, %v7978_v35  ;;  %v3293_v49 = vadd.f32 %v3292_v42, %v3230_v43  ;;  %v3232_v54 = vmul.f32 %v8003_v50, %v8003_v50  ;;  %v8032_v27 = vpop.f32.mrf.mxu0  ;;  %v8034_v11 = vpop.f32.mrf.mxu1 }
 0x195   :  { %v8025_v18 = vmul.f32 %v7645_v32, %v7645_v32  ;;  %v8029_v10 = vmul.f32 %v7647_v9, %v7647_v9  ;;  %v2479_v0 = vadd.f32 %v2478_v52, %v2416_v22  ;;  %v2346_v38 = vadd.f32 %v2345_v33, %v8001_v21  ;;  %14176 = vst [vmem:[#allocation167_spill] sm:$0xff] %v8032_v27 }
 0x196   :  { %14177 = vst [vmem:[#allocation168_spill] sm:$0xff] %v8034_v11  ;;  %v747_v42 = vadd.f32 %v746_v61, %v7640_v28  ;;  %v1562_v43 = vadd.f32 %v1561_v13, %v7642_v51  ;;  %v3294_v35 = vadd.f32 %v3293_v49, %v3231_v63  ;;  %v3161_v40 = vadd.f32 %v3160_v14, %v8003_v50  ;;  %v8042_v52 = vpop.f32.mrf.mxu0  ;;  %v8044_v33 = vpop.f32.mrf.mxu1  ;;  %v14299_v51 = vld [vmem:[#allocation71_spill] sm:$0xff] }
 0x197   :  { %v881_v16 = vadd.f32 %v880_v26, %v818_v60  ;;  %v2418_v30 = vmul.f32 %v7964_v56, %v7964_v56  ;;  %v2347_v2 = vadd.f32 %v7964_v56, %v2346_v38  ;;  %v2480_v22 = vadd.f32 %v2479_v0, %v2417_v3  ;;  %14178 = vst [vmem:[#allocation169_spill] sm:$0xff] %v8042_v52 }
 0x198   :  { %14179 = vst [vmem:[#allocation170_spill] sm:$0xff] %v8044_v33  ;;  %v1696_v21 = vadd.f32 %v1695_v48, %v1633_v45  ;;  %v3233_v61 = vmul.f32 %v7966_v19, %v7966_v19  ;;  %v3162_v13 = vadd.f32 %v7966_v19, %v3161_v40  ;;  %v3295_v63 = vadd.f32 %v3294_v35, %v3232_v54  ;;  %v8054_v49 = vpop.f32.mrf.mxu0  ;;  %v8056_v0 = vpop.f32.mrf.mxu1 }
 0x199   :  { %v819_v60 = vmul.f32 %v7652_v29, %v7652_v29  ;;  %v2419_v26 = vmul.f32 %v7989_v37, %v7989_v37  ;;  %v2481_v14 = vadd.f32 %v2480_v22, %v2418_v30  ;;  %v2348_v3 = vadd.f32 %v7989_v37, %v2347_v2  ;;  %14180 = vst [vmem:[#allocation171_spill] sm:$0xff] %v8054_v49 }
 0x19a   :  { %14181 = vst [vmem:[#allocation172_spill] sm:$0xff] %v8056_v0  ;;  %v1634_v45 = vmul.f32 %v7654_v15, %v7654_v15  ;;  %v3234_v40 = vmul.f32 %v7991_v1, %v7991_v1  ;;  %v3296_v35 = vadd.f32 %v3295_v63, %v3233_v61  ;;  %v3163_v48 = vadd.f32 %v7991_v1, %v3162_v13  ;;  %v8068_v22 = vpop.f32.mrf.mxu0  ;;  %v8070_v19 = vpop.f32.mrf.mxu1 }
 0x19b   :  { %v2349_v54 = vadd.f32 %v2348_v3, %v8032_v27  ;;  %v2420_v30 = vmul.f32 %v8032_v27, %v8032_v27  ;;  %v2482_v38 = vadd.f32 %v2481_v14, %v2419_v26  ;;  %v2421_v2 = vmul.f32 %v8054_v49, %v8054_v49  ;;  %14182 = vst [vmem:[#allocation173_spill] sm:$0xff] %v8068_v22 }
 0x19c   :  { %14183 = vst [vmem:[#allocation174_spill] sm:$0xff] %v8070_v19  ;;  %v3164_v50 = vadd.f32 %v3163_v48, %v8034_v11  ;;  %v3235_v61 = vmul.f32 %v8034_v11, %v8034_v11  ;;  %v3297_v63 = vadd.f32 %v3296_v35, %v3234_v40  ;;  %v3236_v13 = vmul.f32 %v8056_v0, %v8056_v0  ;;  %v8080_v27 = vpop.f32.mrf.mxu0  ;;  %v8082_v37 = vpop.f32.mrf.mxu1 }
 0x19d   :  { %v748_v3 = vadd.f32 %v747_v42, %v7652_v29  ;;  %v1563_v26 = vadd.f32 %v1562_v43, %v7654_v15  ;;  %v2483_v14 = vadd.f32 %v2482_v38, %v2420_v30  ;;  %v2350_v1 = vadd.f32 %v2349_v54, %v8054_v49  ;;  %14184 = vst [vmem:[#allocation175_spill] sm:$0xff] %v8080_v27  ;;  %v14297_v15 = vld [vmem:[#allocation67_spill] sm:$0xff] }
 0x19e   :  { %14185 = vst [vmem:[#allocation176_spill] sm:$0xff] %v8082_v37  ;;  %v882_v56 = vadd.f32 %v881_v16, %v819_v60  ;;  %v1697_v48 = vadd.f32 %v1696_v21, %v1634_v45  ;;  %v3298_v46 = vadd.f32 %v3297_v63, %v3235_v61  ;;  %v3165_v11 = vadd.f32 %v3164_v50, %v8056_v0  ;;  %v8092_v54 = vpop.f32.mrf.mxu0  ;;  %v8094_v30 = vpop.f32.mrf.mxu1 }
 0x19f   :  { %v8087_v40 = vmul.f32 %v7659_v62, %v7659_v62  ;;  %v2422_v42 = vmul.f32 %v8014_v57, %v8014_v57  ;;  %v2351_v43 = vadd.f32 %v8014_v57, %v2350_v1  ;;  %v2484_v35 = vadd.f32 %v2483_v14, %v2421_v2  ;;  %14186 = vst [vmem:[#allocation177_spill] sm:$0xff] %v8092_v54 }
 0x1a0   :  { %14187 = vst [vmem:[#allocation178_spill] sm:$0xff] %v8094_v30  ;;  %v8098_v16 = vmul.f32 %v7661_v47, %v7661_v47  ;;  %v3237_v21 = vmul.f32 %v8016_v34, %v8016_v34  ;;  %v3166_v50 = vadd.f32 %v8016_v34, %v3165_v11  ;;  %v3299_v60 = vadd.f32 %v3298_v46, %v3236_v13  ;;  %v8107_v61 = vpop.f32.mrf.mxu0  ;;  %v8109_v63 = vpop.f32.mrf.mxu1 }
 0x1a1   :  { %v749_v45 = vadd.f32 %v7633_v53, %v748_v3  ;;  %v2423_v1 = vmul.f32 %v8042_v52, %v8042_v52  ;;  %v2485_v38 = vadd.f32 %v2484_v35, %v2422_v42  ;;  %v2352_v2 = vadd.f32 %v8042_v52, %v2351_v43  ;;  %14188 = vst [vmem:[#allocation179_spill] sm:$0xff] %v8107_v61 }
 0x1a2   :  { %14189 = vst [vmem:[#allocation180_spill] sm:$0xff] %v8109_v63  ;;  %v1564_v14 = vadd.f32 %v7635_v59, %v1563_v26  ;;  %v3238_v0 = vmul.f32 %v8044_v33, %v8044_v33  ;;  %v3300_v57 = vadd.f32 %v3299_v60, %v3237_v21  ;;  %v3167_v46 = vadd.f32 %v8044_v33, %v3166_v50  ;;  %v8120_v43 = vpop.f32.mrf.mxu0  ;;  %v8122_v35 = vpop.f32.mrf.mxu1  ;;  %v14296_v59 = vld [vmem:[#allocation73_spill] sm:$0xff] }
 0x1a3   :  { %v2353_v11 = vadd.f32 %v2352_v2, %v8080_v27  ;;  %v2424_v13 = vmul.f32 %v8080_v27, %v8080_v27  ;;  %v2486_v3 = vadd.f32 %v2485_v38, %v2423_v1  ;;  %v2425_v42 = vmul.f32 %v8107_v61, %v8107_v61  ;;  %14190 = vst [vmem:[#allocation181_spill] sm:$0xff] %v8120_v43 }
 0x1a4   :  { %14191 = vst [vmem:[#allocation182_spill] sm:$0xff] %v8122_v35  ;;  %v3168_v26 = vadd.f32 %v3167_v46, %v8082_v37  ;;  %v3239_v21 = vmul.f32 %v8082_v37, %v8082_v37  ;;  %v3301_v60 = vadd.f32 %v3300_v57, %v3238_v0  ;;  %v3240_v50 = vmul.f32 %v8109_v63, %v8109_v63  ;;  %v8132_v34 = vpop.f32.mrf.mxu0  ;;  %v8134_v27 = vpop.f32.mrf.mxu1 }
 0x1a5   :  { %v883_v2 = vadd.f32 %v882_v56, %v7931_v6  ;;  %v1698_v1 = vadd.f32 %v1697_v48, %v7942_v36  ;;  %v2487_v38 = vadd.f32 %v2486_v3, %v2424_v13  ;;  %v2354_v33 = vadd.f32 %v2353_v11, %v8107_v61  ;;  %14192 = vst [vmem:[#allocation183_spill] sm:$0xff] %v8132_v34 }
 0x1a6   :  { %14193 = vst [vmem:[#allocation184_spill] sm:$0xff] %v8134_v27  ;;  %v822_v46 = vmul.f32 %v7666_v39, %v7666_v39  ;;  %v1637_v57 = vmul.f32 %v7668_v4, %v7668_v4  ;;  %v3302_v0 = vadd.f32 %v3301_v60, %v3239_v21  ;;  %v3169_v37 = vadd.f32 %v3168_v26, %v8109_v63  ;;  %v8145_v11 = vpop.f32.mrf.mxu0  ;;  %v8147_v13 = vpop.f32.mrf.mxu1 }
 0x1a7   :  { %v750_v6 = vadd.f32 %v7645_v32, %v749_v45  ;;  %v2426_v36 = vmul.f32 %v8068_v22, %v8068_v22  ;;  %v2355_v56 = vadd.f32 %v8068_v22, %v2354_v33  ;;  %v2488_v48 = vadd.f32 %v2487_v38, %v2425_v42  ;;  %14194 = vst [vmem:[#allocation185_spill] sm:$0xff] %v8145_v11 }
 0x1a8   :  { %14195 = vst [vmem:[#allocation186_spill] sm:$0xff] %v8147_v13  ;;  %v1565_v3 = vadd.f32 %v7647_v9, %v1564_v14  ;;  %v3241_v61 = vmul.f32 %v8070_v19, %v8070_v19  ;;  %v3170_v21 = vadd.f32 %v8070_v19, %v3169_v37  ;;  %v3303_v26 = vadd.f32 %v3302_v0, %v3240_v50  ;;  %v8157_v42 = vpop.f32.mrf.mxu0  ;;  %v8159_v38 = vpop.f32.mrf.mxu1  ;;  %v14295_v9 = vld [vmem:[#allocation69_spill] sm:$0xff] }
 0x1a9   :  { %v884_v45 = vadd.f32 %v883_v2, %v8025_v18  ;;  %v2427_v60 = vmul.f32 %v8092_v54, %v8092_v54  ;;  %v2489_v63 = vadd.f32 %v2488_v48, %v2426_v36  ;;  %v2356_v33 = vadd.f32 %v8092_v54, %v2355_v56  ;;  %14196 = vst [vmem:[#allocation187_spill] sm:$0xff] %v8157_v42 }
 0x1aa   :  { %14197 = vst [vmem:[#allocation188_spill] sm:$0xff] %v8159_v38  ;;  %v1699_v14 = vadd.f32 %v1698_v1, %v8029_v10  ;;  %v3242_v22 = vmul.f32 %v8094_v30, %v8094_v30  ;;  %v3304_v52 = vadd.f32 %v3303_v26, %v3241_v61  ;;  %v3171_v37 = vadd.f32 %v8094_v30, %v3170_v21  ;;  %v8170_v36 = vpop.f32.mrf.mxu0  ;;  %v8172_v56 = vpop.f32.mrf.mxu1 }
 0x1ab   :  { %v2357_v18 = vadd.f32 %v2356_v33, %v8132_v34  ;;  %v2428_v50 = vmul.f32 %v8132_v34, %v8132_v34  ;;  %v2490_v2 = vadd.f32 %v2489_v63, %v2427_v60  ;;  %v2429_v0 = vmul.f32 %v8157_v42, %v8157_v42  ;;  %14198 = vst [vmem:[#allocation189_spill] sm:$0xff] %v8170_v36 }
 0x1ac   :  { %14199 = vst [vmem:[#allocation190_spill] sm:$0xff] %v8172_v56  ;;  %v3172_v10 = vadd.f32 %v3171_v37, %v8134_v27  ;;  %v3243_v61 = vmul.f32 %v8134_v27, %v8134_v27  ;;  %v3305_v1 = vadd.f32 %v3304_v52, %v3242_v22  ;;  %v3244_v48 = vmul.f32 %v8159_v38, %v8159_v38  ;;  %v8185_v33 = vpop.f32.mrf.mxu0  ;;  %v8187_v30 = vpop.f32.mrf.mxu1 }
 0x1ad   :  { %v751_v21 = vadd.f32 %v750_v6, %v7666_v39  ;;  %v8182_v63 = vmul.f32 %v7673_v25, %v7673_v25  ;;  %v2491_v26 = vadd.f32 %v2490_v2, %v2428_v50  ;;  %v2358_v60 = vadd.f32 %v2357_v18, %v8157_v42  ;;  %14200 = vst [vmem:[#allocation191_spill] sm:$0xff] %v8185_v33 }
 0x1ae   :  { %14201 = vst [vmem:[#allocation192_spill] sm:$0xff] %v8187_v30  ;;  %v885_v37 = vadd.f32 %v884_v45, %v822_v46  ;;  %v1566_v27 = vadd.f32 %v1565_v3, %v7668_v4  ;;  %v3306_v52 = vadd.f32 %v3305_v1, %v3243_v61  ;;  %v3173_v22 = vadd.f32 %v3172_v10, %v8159_v38  ;;  %v8194_v50 = vpop.f32.mrf.mxu0  ;;  %v8196_v18 = vpop.f32.mrf.mxu1  ;;  %v14294_v4 = vld [vmem:[#allocation63_spill] sm:$0xff] }
 0x1af   :  { %v1700_v19 = vadd.f32 %v1699_v14, %v1637_v57  ;;  %v2430_v6 = vmul.f32 %v8120_v43, %v8120_v43  ;;  %v2359_v34 = vadd.f32 %v8120_v43, %v2358_v60  ;;  %v2492_v54 = vadd.f32 %v2491_v26, %v2429_v0  ;;  %14202 = vst [vmem:[#allocation193_spill] sm:$0xff] %v8194_v50 }
 0x1b0   :  { %14203 = vst [vmem:[#allocation194_spill] sm:$0xff] %v8196_v18  ;;  %v823_v2 = vmul.f32 %v7680_v7, %v7680_v7  ;;  %v3245_v46 = vmul.f32 %v8122_v35, %v8122_v35  ;;  %v3174_v3 = vadd.f32 %v8122_v35, %v3173_v22  ;;  %v3307_v45 = vadd.f32 %v3306_v52, %v3244_v48  ;;  %v8208_v61 = vpop.f32.mrf.mxu0  ;;  %v8210_v1 = vpop.f32.mrf.mxu1 }
 0x1b1   :  { %v1638_v57 = vmul.f32 %v7682_v5, %v7682_v5  ;;  %v2431_v14 = vmul.f32 %v8145_v11, %v8145_v11  ;;  %v2493_v0 = vadd.f32 %v2492_v54, %v2430_v6  ;;  %v2360_v10 = vadd.f32 %v8145_v11, %v2359_v34  ;;  %14204 = vst [vmem:[#allocation195_spill] sm:$0xff] %v8208_v61 }
 0x1b2   :  { %14205 = vst [vmem:[#allocation196_spill] sm:$0xff] %v8210_v1  ;;  %v752_v26 = vadd.f32 %v751_v21, %v7680_v7  ;;  %v3246_v60 = vmul.f32 %v8147_v13, %v8147_v13  ;;  %v3308_v22 = vadd.f32 %v3307_v45, %v3245_v46  ;;  %v3175_v48 = vadd.f32 %v8147_v13, %v3174_v3  ;;  %v8221_v6 = vpop.f32.mrf.mxu0  ;;  %v8223_v38 = vpop.f32.mrf.mxu1 }
 0x1b3   :  { %v2361_v52 = vadd.f32 %v2360_v10, %v8185_v33  ;;  %v2432_v35 = vmul.f32 %v8185_v33, %v8185_v33  ;;  %v2494_v54 = vadd.f32 %v2493_v0, %v2431_v14  ;;  %v2433_v34 = vmul.f32 %v8208_v61, %v8208_v61  ;;  %14206 = vst [vmem:[#allocation197_spill] sm:$0xff] %v8221_v6 }
 0x1b4   :  { %14207 = vst [vmem:[#allocation198_spill] sm:$0xff] %v8223_v38  ;;  %v3176_v21 = vadd.f32 %v3175_v48, %v8187_v30  ;;  %v3247_v46 = vmul.f32 %v8187_v30, %v8187_v30  ;;  %v3309_v45 = vadd.f32 %v3308_v22, %v3246_v60  ;;  %v3248_v3 = vmul.f32 %v8210_v1, %v8210_v1  ;;  %v8234_v33 = vpop.f32.mrf.mxu0  ;;  %v8236_v11 = vpop.f32.mrf.mxu1 }
 0x1b5   :  { %v1640_v10 = vmul.f32 %v7675_v55, %v7675_v55  ;;  %v1567_v14 = vadd.f32 %v1566_v27, %v7682_v5  ;;  %v2495_v0 = vadd.f32 %v2494_v54, %v2432_v35  ;;  %v2362_v13 = vadd.f32 %v2361_v52, %v8208_v61  ;;  %14208 = vst [vmem:[#allocation199_spill] sm:$0xff] %v8234_v33  ;;  %v14293_v5 = vld [vmem:[#allocation59_spill] sm:$0xff] }
 0x1b6   :  { %14209 = vst [vmem:[#allocation200_spill] sm:$0xff] %v8236_v11  ;;  %v886_v48 = vadd.f32 %v885_v37, %v823_v2  ;;  %v1701_v43 = vadd.f32 %v1700_v19, %v1638_v57  ;;  %v3310_v42 = vadd.f32 %v3309_v45, %v3247_v46  ;;  %v3177_v60 = vadd.f32 %v3176_v21, %v8210_v1  ;;  %v8246_v52 = vpop.f32.mrf.mxu0  ;;  %v8248_v54 = vpop.f32.mrf.mxu1 }
 0x1b7   :  { %v8241_v22 = vmul.f32 %v7689_v8, %v7689_v8  ;;  %v2434_v30 = vmul.f32 %v8170_v36, %v8170_v36  ;;  %v2363_v27 = vadd.f32 %v8170_v36, %v2362_v13  ;;  %v2496_v35 = vadd.f32 %v2495_v0, %v2433_v34  ;;  %14210 = vst [vmem:[#allocation201_spill] sm:$0xff] %v8246_v52 }
 0x1b8   :  { %14211 = vst [vmem:[#allocation202_spill] sm:$0xff] %v8248_v54  ;;  %v753_v37 = vadd.f32 %v7659_v62, %v752_v26  ;;  %v3249_v19 = vmul.f32 %v8172_v56, %v8172_v56  ;;  %v3178_v2 = vadd.f32 %v8172_v56, %v3177_v60  ;;  %v3311_v57 = vadd.f32 %v3310_v42, %v3248_v3  ;;  %v8258_v34 = vpop.f32.mrf.mxu0  ;;  %v8260_v0 = vpop.f32.mrf.mxu1 }
 0x1b9   :  { %v1568_v21 = vadd.f32 %v7661_v47, %v1567_v14  ;;  %v2435_v46 = vmul.f32 %v8194_v50, %v8194_v50  ;;  %v2497_v45 = vadd.f32 %v2496_v35, %v2434_v30  ;;  %v2364_v13 = vadd.f32 %v8194_v50, %v2363_v27  ;;  %14212 = vst [vmem:[#allocation203_spill] sm:$0xff] %v8258_v34  ;;  %v14219_v50 = vld [vmem:[#allocation112_spill] sm:$0xff]  ;;  %v14292_v47 = vld [vmem:[#allocation65_spill] sm:$0xff] }
 0x1ba   :  { %14213 = vst [vmem:[#allocation204_spill] sm:$0xff] %v8260_v0  ;;  %v887_v26 = vadd.f32 %v886_v48, %v8087_v40  ;;  %v3250_v1 = vmul.f32 %v8196_v18, %v8196_v18  ;;  %v3312_v36 = vadd.f32 %v3311_v57, %v3249_v19  ;;  %v3179_v42 = vadd.f32 %v8196_v18, %v3178_v2  ;;  %v8271_v27 = vpop.f32.mrf.mxu0  ;;  %v8273_v35 = vpop.f32.mrf.mxu1 }
 0x1bb   :  { %v2365_v3 = vadd.f32 %v2364_v13, %v8234_v33  ;;  %v2436_v14 = vmul.f32 %v8234_v33, %v8234_v33  ;;  %v2498_v30 = vadd.f32 %v2497_v45, %v2435_v46  ;;  %v2437_v60 = vmul.f32 %v8258_v34, %v8258_v34  ;;  %14214 = vst [vmem:[#allocation205_spill] sm:$0xff] %v8271_v27  ;;  %v14216_v13 = vld [vmem:[#allocation111_spill] sm:$0xff] }
 0x1bc   :  { %14215 = vst [vmem:[#allocation206_spill] sm:$0xff] %v8273_v35  ;;  %v3180_v40 = vadd.f32 %v3179_v42, %v8236_v11  ;;  %v3251_v48 = vmul.f32 %v8236_v11, %v8236_v11  ;;  %v3313_v19 = vadd.f32 %v3312_v36, %v3250_v1  ;;  %v3252_v2 = vmul.f32 %v8260_v0, %v8260_v0  ;;  %v8284_v56 = vpop.f32.mrf.mxu0  ;;  %v8286_v33 = vpop.f32.mrf.mxu1 }
 0x1bd   :  { %v1702_v57 = vadd.f32 %v1701_v43, %v8098_v16  ;;  %v826_v46 = vmul.f32 %v14216_v13, %v14216_v13  ;;  %v2499_v45 = vadd.f32 %v2498_v30, %v2436_v14  ;;  %v2366_v18 = vadd.f32 %v2365_v3, %v8258_v34  ;;  %14217 = vst [vmem:[#allocation111_spill] sm:$0xff] %v8284_v56 }
 0x1be   :  { %14218 = vst [vmem:[#allocation207_spill] sm:$0xff] %v8286_v33  ;;  %v754_v42 = vadd.f32 %v7673_v25, %v753_v37  ;;  %v1641_v36 = vmul.f32 %v14219_v50, %v14219_v50  ;;  %v3314_v1 = vadd.f32 %v3313_v19, %v3251_v48  ;;  %v3181_v11 = vadd.f32 %v3180_v40, %v8260_v0  ;;  %v8296_v30 = vpop.f32.mrf.mxu0  ;;  %v8298_v34 = vpop.f32.mrf.mxu1 }
 0x1bf   :  { %v1569_v16 = vadd.f32 %v7675_v55, %v1568_v21  ;;  %v2438_v43 = vmul.f32 %v8221_v6, %v8221_v6  ;;  %v2367_v14 = vadd.f32 %v8221_v6, %v2366_v18  ;;  %v2500_v3 = vadd.f32 %v2499_v45, %v2437_v60  ;;  %14220 = vst [vmem:[#allocation208_spill] sm:$0xff] %v8296_v30 }
 0x1c0   :  { %14221 = vst [vmem:[#allocation209_spill] sm:$0xff] %v8298_v34  ;;  %v888_v37 = vadd.f32 %v887_v26, %v8182_v63  ;;  %v3253_v61 = vmul.f32 %v8223_v38, %v8223_v38  ;;  %v3182_v48 = vadd.f32 %v8223_v38, %v3181_v11  ;;  %v3315_v40 = vadd.f32 %v3314_v1, %v3252_v2  ;;  %v8307_v60 = vpop.f32.mrf.mxu0  ;;  %v8309_v45 = vpop.f32.mrf.mxu1 }
 0x1c1   :  { %v1703_v19 = vadd.f32 %v1702_v57, %v1640_v10  ;;  %v2439_v21 = vmul.f32 %v8246_v52, %v8246_v52  ;;  %v2501_v0 = vadd.f32 %v2500_v3, %v2438_v43  ;;  %v2368_v18 = vadd.f32 %v8246_v52, %v2367_v14  ;;  %14222 = vst [vmem:[#allocation210_spill] sm:$0xff] %v8307_v60  ;;  %v14228_v52 = vld [vmem:[#allocation115_spill] sm:$0xff] }
 0x1c2   :  { %14223 = vst [vmem:[#allocation211_spill] sm:$0xff] %v8309_v45  ;;  %v755_v6 = vadd.f32 %v754_v42, %v14216_v13  ;;  %v3254_v63 = vmul.f32 %v8248_v54, %v8248_v54  ;;  %v3316_v26 = vadd.f32 %v3315_v40, %v3253_v61  ;;  %v3183_v11 = vadd.f32 %v8248_v54, %v3182_v48  ;;  %v8320_v43 = vpop.f32.mrf.mxu0  ;;  %v8322_v14 = vpop.f32.mrf.mxu1 }
 0x1c3   :  { %v2369_v10 = vadd.f32 %v2368_v18, %v8284_v56  ;;  %v2440_v2 = vmul.f32 %v8284_v56, %v8284_v56  ;;  %v2502_v57 = vadd.f32 %v2501_v0, %v2439_v21  ;;  %v2441_v1 = vmul.f32 %v8307_v60, %v8307_v60  ;;  %14224 = vst [vmem:[#allocation212_spill] sm:$0xff] %v8320_v43 }
 0x1c4   :  { %14225 = vst [vmem:[#allocation213_spill] sm:$0xff] %v8322_v14  ;;  %v3184_v42 = vadd.f32 %v3183_v11, %v8286_v33  ;;  %v3255_v61 = vmul.f32 %v8286_v33, %v8286_v33  ;;  %v3317_v3 = vadd.f32 %v3316_v26, %v3254_v63  ;;  %v3256_v48 = vmul.f32 %v8309_v45, %v8309_v45  ;;  %v8331_v54 = vpop.f32.mrf.mxu0  ;;  %v8333_v38 = vpop.f32.mrf.mxu1  ;;  %v14229_v26 = vld [vmem:[#allocation116_spill] sm:$0xff] }
 0x1c5   :  { %v889_v40 = vadd.f32 %v888_v37, %v826_v46  ;;  %v1570_v18 = vadd.f32 %v1569_v16, %v14219_v50  ;;  %v2503_v0 = vadd.f32 %v2502_v57, %v2440_v2  ;;  %v2370_v21 = vadd.f32 %v2369_v10, %v8307_v60  ;;  %14226 = vst [vmem:[#allocation214_spill] sm:$0xff] %v8331_v54 }
 0x1c6   :  { %14227 = vst [vmem:[#allocation215_spill] sm:$0xff] %v8333_v38  ;;  %v1704_v56 = vadd.f32 %v1703_v19, %v1641_v36  ;;  %v827_v11 = vmul.f32 %v14228_v52, %v14228_v52  ;;  %v3318_v49 = vadd.f32 %v3317_v3, %v3255_v61  ;;  %v3185_v63 = vadd.f32 %v3184_v42, %v8309_v45  ;;  %v8343_v10 = vpop.f32.mrf.mxu0  ;;  %v8345_v2 = vpop.f32.mrf.mxu1 }
 0x1c7   :  { %v1642_v33 = vmul.f32 %v14229_v26, %v14229_v26  ;;  %v2442_v46 = vmul.f32 %v8271_v27, %v8271_v27  ;;  %v2371_v16 = vadd.f32 %v8271_v27, %v2370_v21  ;;  %v2504_v37 = vadd.f32 %v2503_v0, %v2441_v1  ;;  %14230 = vst [vmem:[#allocation115_spill] sm:$0xff] %v8343_v10 }
 0x1c8   :  { %14231 = vst [vmem:[#allocation216_spill] sm:$0xff] %v8345_v2  ;;  %v756_v36 = vadd.f32 %v755_v6, %v14228_v52  ;;  %v3257_v19 = vmul.f32 %v8273_v35, %v8273_v35  ;;  %v3186_v57 = vadd.f32 %v8273_v35, %v3185_v63  ;;  %v3319_v42 = vadd.f32 %v3318_v49, %v3256_v48  ;;  %v8355_v0 = vpop.f32.mrf.mxu0  ;;  %v8357_v21 = vpop.f32.mrf.mxu1 }
 0x1c9   :  { %v1571_v61 = vadd.f32 %v1570_v18, %v14229_v26  ;;  %v2443_v3 = vmul.f32 %v8296_v30, %v8296_v30  ;;  %v2505_v45 = vadd.f32 %v2504_v37, %v2442_v46  ;;  %v2372_v1 = vadd.f32 %v8296_v30, %v2371_v16  ;;  %14232 = vst [vmem:[#allocation217_spill] sm:$0xff] %v8355_v0  ;;  %v14239_v30 = vld [vmem:[#allocation113_spill] sm:$0xff] }
 0x1ca   :  { %14233 = vst [vmem:[#allocation218_spill] sm:$0xff] %v8357_v21  ;;  %v890_v27 = vadd.f32 %v889_v40, %v827_v11  ;;  %v3258_v6 = vmul.f32 %v8298_v34, %v8298_v34  ;;  %v3320_v60 = vadd.f32 %v3319_v42, %v3257_v19  ;;  %v3187_v63 = vadd.f32 %v8298_v34, %v3186_v57  ;;  %v8367_v16 = vpop.f32.mrf.mxu0  ;;  %v8369_v37 = vpop.f32.mrf.mxu1  ;;  %v14236_v42 = vld [vmem:[#allocation110_spill] sm:$0xff] }
 0x1cb   :  { %v2373_v49 = vadd.f32 %v2372_v1, %v8331_v54  ;;  %v2444_v48 = vmul.f32 %v8331_v54, %v8331_v54  ;;  %v2506_v18 = vadd.f32 %v2505_v45, %v2443_v3  ;;  %v2445_v46 = vmul.f32 %v8355_v0, %v8355_v0  ;;  %14234 = vst [vmem:[#allocation219_spill] sm:$0xff] %v8367_v16 }
 0x1cc   :  { %14235 = vst [vmem:[#allocation220_spill] sm:$0xff] %v8369_v37  ;;  %v3188_v40 = vadd.f32 %v3187_v63, %v8333_v38  ;;  %v3259_v11 = vmul.f32 %v8333_v38, %v8333_v38  ;;  %v3321_v19 = vadd.f32 %v3320_v60, %v3258_v6  ;;  %v3260_v57 = vmul.f32 %v8357_v21, %v8357_v21  ;;  %v8379_v35 = vpop.f32.mrf.mxu0  ;;  %v8381_v54 = vpop.f32.mrf.mxu1 }
 0x1cd   :  { %v1643_v1 = vmul.f32 %v14236_v42, %v14236_v42  ;;  %v1705_v45 = vadd.f32 %v1704_v56, %v1642_v33  ;;  %v2507_v3 = vadd.f32 %v2506_v18, %v2444_v48  ;;  %v2374_v34 = vadd.f32 %v2373_v49, %v8355_v0  ;;  %14237 = vst [vmem:[#allocation221_spill] sm:$0xff] %v8379_v35 }
 0x1ce   :  { %14238 = vst [vmem:[#allocation222_spill] sm:$0xff] %v8381_v54  ;;  %v829_v63 = vmul.f32 %v14239_v30, %v14239_v30  ;;  %v757_v38 = vadd.f32 %v7689_v8, %v756_v36  ;;  %v3322_v60 = vadd.f32 %v3321_v19, %v3259_v11  ;;  %v3189_v6 = vadd.f32 %v3188_v40, %v8357_v21  ;;  %v8391_v48 = vpop.f32.mrf.mxu0  ;;  %v8393_v18 = vpop.f32.mrf.mxu1 }
 0x1cf   :  { %v1572_v26 = vadd.f32 %v14236_v42, %v1571_v61  ;;  %v2446_v56 = vmul.f32 %v8320_v43, %v8320_v43  ;;  %v2375_v33 = vadd.f32 %v8320_v43, %v2374_v34  ;;  %v2508_v49 = vadd.f32 %v2507_v3, %v2445_v46  ;;  %14240 = vst [vmem:[#allocation113_spill] sm:$0xff] %v8391_v48 }
 0x1d0   :  { %14241 = vst [vmem:[#allocation223_spill] sm:$0xff] %v8393_v18  ;;  %v891_v0 = vadd.f32 %v890_v27, %v8241_v22  ;;  %v3261_v36 = vmul.f32 %v8322_v14, %v8322_v14  ;;  %v3190_v11 = vadd.f32 %v8322_v14, %v3189_v6  ;;  %v3323_v40 = vadd.f32 %v3322_v60, %v3260_v57  ;;  %v8402_v46 = vpop.f32.mrf.mxu0  ;;  %v8404_v3 = vpop.f32.mrf.mxu1 }
 0x1d1   :  { %v1706_v19 = vadd.f32 %v1705_v45, %v1643_v1  ;;  %v2447_v61 = vmul.f32 %v8343_v10, %v8343_v10  ;;  %v2509_v21 = vadd.f32 %v2508_v49, %v2446_v56  ;;  %v2376_v34 = vadd.f32 %v8343_v10, %v2375_v33  ;;  %14242 = vst [vmem:[#allocation224_spill] sm:$0xff] %v8402_v46 }
 0x1d2   :  { %14243 = vst [vmem:[#allocation225_spill] sm:$0xff] %v8404_v3  ;;  %v758_v43 = vadd.f32 %v14239_v30, %v757_v38  ;;  %v3262_v22 = vmul.f32 %v8345_v2, %v8345_v2  ;;  %v3324_v27 = vadd.f32 %v3323_v40, %v3261_v36  ;;  %v3191_v6 = vadd.f32 %v8345_v2, %v3190_v11  ;;  %v8415_v56 = vpop.f32.mrf.mxu0  ;;  %v8417_v33 = vpop.f32.mrf.mxu1  ;;  %v14246_v40 = vld [vmem:[#allocation114_spill] sm:$0xff] }
 0x1d3   :  { %v2377_v57 = vadd.f32 %v2376_v34, %v8379_v35  ;;  %v2448_v1 = vmul.f32 %v8379_v35, %v8379_v35  ;;  %v2510_v45 = vadd.f32 %v2509_v21, %v2447_v61  ;;  %v2449_v60 = vmul.f32 %v8402_v46, %v8402_v46  ;;  %14244 = vst [vmem:[#allocation226_spill] sm:$0xff] %v8415_v56 }
 0x1d4   :  { %14245 = vst [vmem:[#allocation227_spill] sm:$0xff] %v8417_v33  ;;  %v3192_v38 = vadd.f32 %v3191_v6, %v8381_v54  ;;  %v3263_v49 = vmul.f32 %v8381_v54, %v8381_v54  ;;  %v3325_v36 = vadd.f32 %v3324_v27, %v3262_v22  ;;  %v3264_v11 = vmul.f32 %v8404_v3, %v8404_v3  ;;  %v8428_v14 = vpop.f32.mrf.mxu0  ;;  %v8430_v35 = vpop.f32.mrf.mxu1 }
 0x1d5   :  { %v1644_v34 = vmul.f32 %v14246_v40, %v14246_v40  ;;  %v1573_v21 = vadd.f32 %v14246_v40, %v1572_v26  ;;  %v2511_v61 = vadd.f32 %v2510_v45, %v2448_v1  ;;  %v2378_v2 = vadd.f32 %v2377_v57, %v8402_v46  ;;  %14247 = vst [vmem:[#allocation228_spill] sm:$0xff] %v8428_v14 }
 0x1d6   :  { %14248 = vst [vmem:[#allocation229_spill] sm:$0xff] %v8430_v35  ;;  %v892_v6 = vadd.f32 %v891_v0, %v829_v63  ;;  %v3326_v10 = vadd.f32 %v3325_v36, %v3263_v49  ;;  %v3193_v54 = vadd.f32 %v3192_v38, %v8404_v3  ;;  %v2450_v27 = vmul.f32 %v8367_v16, %v8367_v16  ;;  %v8436_v55 = vpop.f32.mrf.mxu0  ;;  %v8438_v26 = vpop.f32.mrf.mxu1 }
 0x1d7   :  { %v1707_v22 = vadd.f32 %v1706_v19, %v1644_v34  ;;  %v2379_v42 = vadd.f32 %v8367_v16, %v2378_v2  ;;  %v2512_v50 = vadd.f32 %v2511_v61, %v2449_v60  ;;  %14249 = vst [vmem:[#allocation230_spill] sm:$0xff] %v8436_v55  ;;  %14250 = vst [vmem:[#allocation231_spill] sm:$0xff] %v8438_v26  ;;  %v759_v57 = vrot.slane %v758_v43, 4 }
 0x1d8   :  { %v3265_v1 = vmul.f32 %v8369_v37, %v8369_v37  ;;  %v3194_v0 = vadd.f32 %v8369_v37, %v3193_v54  ;;  %v3327_v63 = vadd.f32 %v3326_v10, %v3264_v11  ;;  %v1574_v45 = vrot.slane %v1573_v21, 4  ;;  %v8446_v2 = vpop.f32.mrf.mxu0  ;;  %v8448_v60 = vpop.f32.mrf.mxu1 }
 0x1d9   :  { %v2451_v19 = vmul.f32 %v8391_v48, %v8391_v48  ;;  %v2513_v38 = vadd.f32 %v2512_v50, %v2450_v27  ;;  %v2380_v49 = vadd.f32 %v8391_v48, %v2379_v42  ;;  %14251 = vst [vmem:[#allocation232_spill] sm:$0xff] %v8446_v2  ;;  %14252 = vst [vmem:[#allocation233_spill] sm:$0xff] %v8448_v60  ;;  %v893_v36 = vrot.slane %v892_v6, 4 }
 0x1da   :  { %v3266_v34 = vmul.f32 %v8393_v18, %v8393_v18  ;;  %v3328_v61 = vadd.f32 %v3327_v63, %v3265_v1  ;;  %v3195_v3 = vadd.f32 %v8393_v18, %v3194_v0  ;;  %v2452_v10 = vmul.f32 %v8428_v14, %v8428_v14  ;;  %v8458_v42 = vpop.f32.mrf.mxu0  ;;  %v8460_v27 = vpop.f32.mrf.mxu1 }
 0x1db   :  { %v2381_v54 = vadd.f32 %v2380_v49, %v8428_v14  ;;  %v2514_v11 = vadd.f32 %v2513_v38, %v2451_v19  ;;  %v2453_v50 = vmul.f32 %v8446_v2, %v8446_v2  ;;  %14253 = vst [vmem:[#allocation234_spill] sm:$0xff] %v8458_v42  ;;  %14254 = vst [vmem:[#allocation235_spill] sm:$0xff] %v8460_v27  ;;  %v1708_v49 = vrot.slane %v1707_v22, 4 }
 0x1dc   :  { %v3196_v37 = vadd.f32 %v3195_v3, %v8430_v35  ;;  %v3267_v1 = vmul.f32 %v8430_v35, %v8430_v35  ;;  %v3329_v63 = vadd.f32 %v3328_v61, %v3266_v34  ;;  %v3268_v0 = vmul.f32 %v8448_v60, %v8448_v60  ;;  %v8468_v38 = vpop.f32.mrf.mxu0  ;;  %v8470_v14 = vpop.f32.mrf.mxu1 }
 0x1dd   :  { %v2515_v18 = vadd.f32 %v2514_v11, %v2452_v10  ;;  %v2382_v19 = vadd.f32 %v2381_v54, %v8446_v2  ;;  %14255 = vst [vmem:[#allocation236_spill] sm:$0xff] %v8468_v38  ;;  %14256 = vst [vmem:[#allocation237_spill] sm:$0xff] %v8470_v14  ;;  %v760_v48 = vadd.f32 %v759_v57, %v758_v43  ;;  %v14291_v2 = vld [vmem:[#allocation61_spill] sm:$0xff] }
 0x1de   :  { %v3330_v16 = vadd.f32 %v3329_v63, %v3267_v1  ;;  %v3197_v46 = vadd.f32 %v3196_v37, %v8448_v60  ;;  %v1575_v3 = vadd.f32 %v1574_v45, %v1573_v21  ;;  %v2454_v35 = vmul.f32 %v8415_v56, %v8415_v56  ;;  %v8476_v40 = vpop.f32.mrf.mxu0  ;;  %v8478_v10 = vpop.f32.mrf.mxu1 }
 0x1df   :  { %v2383_v34 = vadd.f32 %v8415_v56, %v2382_v19  ;;  %v2516_v61 = vadd.f32 %v2515_v18, %v2453_v50  ;;  %14257 = vst [vmem:[#allocation238_spill] sm:$0xff] %v8476_v40  ;;  %14258 = vst [vmem:[#allocation239_spill] sm:$0xff] %v8478_v10  ;;  %v894_v54 = vadd.f32 %v893_v36, %v892_v6  ;;  %v761_v50 = vrot.slane %v760_v48, 2 }
 0x1e0   :  { %v3269_v11 = vmul.f32 %v8417_v33, %v8417_v33  ;;  %v3198_v43 = vadd.f32 %v8417_v33, %v3197_v46  ;;  %v3331_v57 = vadd.f32 %v3330_v16, %v3268_v0  ;;  %v1709_v1 = vadd.f32 %v1708_v49, %v1707_v22  ;;  %v8486_v63 = vpop.f32.mrf.mxu0  ;;  %v8488_v18 = vpop.f32.mrf.mxu1 }
 0x1e1   :  { %v2455_v37 = vmul.f32 %v8436_v55, %v8436_v55  ;;  %v2517_v21 = vadd.f32 %v2516_v61, %v2454_v35  ;;  %v2384_v45 = vadd.f32 %v8436_v55, %v2383_v34  ;;  %14259 = vst [vmem:[#allocation240_spill] sm:$0xff] %v8486_v63  ;;  %14260 = vst [vmem:[#allocation241_spill] sm:$0xff] %v8488_v18 }
 0x1e2   :  { %v3270_v6 = vmul.f32 %v8438_v26, %v8438_v26  ;;  %v3332_v36 = vadd.f32 %v3331_v57, %v3269_v11  ;;  %v3199_v19 = vadd.f32 %v8438_v26, %v3198_v43  ;;  %v2456_v46 = vmul.f32 %v8468_v38, %v8468_v38 }
 0x1e3   :  { %v2385_v16 = vadd.f32 %v2384_v45, %v8468_v38  ;;  %v2518_v22 = vadd.f32 %v2517_v21, %v2455_v37  ;;  %v2457_v35 = vmul.f32 %v8486_v63, %v8486_v63  ;;  %v3271_v49 = vmul.f32 %v8470_v14, %v8470_v14 }
 0x1e4   :  { %v3200_v0 = vadd.f32 %v3199_v19, %v8470_v14  ;;  %v3333_v34 = vadd.f32 %v3332_v36, %v3270_v6  ;;  %v3272_v61 = vmul.f32 %v8488_v18, %v8488_v18  ;;  %v1576_v11 = vrot.slane %v1575_v3, 2 }
 0x1e5   :  { %v2519_v43 = vadd.f32 %v2518_v22, %v2456_v46  ;;  %v2386_v57 = vadd.f32 %v2385_v16, %v8486_v63  ;;  %v895_v45 = vrot.slane %v894_v54, 2  ;;  %v1710_v21 = vrot.slane %v1709_v1, 2 }
 0x1e6   :  { %v3334_v26 = vadd.f32 %v3333_v34, %v3271_v49  ;;  %v3201_v37 = vadd.f32 %v3200_v0, %v8488_v18  ;;  %v2458_v33 = vmul.f32 %v8458_v42, %v8458_v42  ;;  %v762_v14 = vadd.f32 %v761_v50, %v760_v48 }
 0x1e7   :  { %v2387_v19 = vadd.f32 %v8458_v42, %v2386_v57  ;;  %v2520_v60 = vadd.f32 %v2519_v43, %v2457_v35  ;;  %v3273_v6 = vmul.f32 %v8460_v27, %v8460_v27  ;;  %v1577_v22 = vadd.f32 %v1576_v11, %v1575_v3 }
 0x1e8   :  { %v3202_v36 = vadd.f32 %v8460_v27, %v3201_v37  ;;  %v3335_v46 = vadd.f32 %v3334_v26, %v3272_v61  ;;  %v2459_v16 = vmul.f32 %v8476_v40, %v8476_v40  ;;  %v3274_v34 = vmul.f32 %v8478_v10, %v8478_v10 }
 0x1e9   :  { %v2388_v0 = vadd.f32 %v8476_v40, %v2387_v19  ;;  %v2521_v49 = vadd.f32 %v2520_v60, %v2458_v33  ;;  %v896_v48 = vadd.f32 %v895_v45, %v894_v54  ;;  %v1711_v50 = vadd.f32 %v1710_v21, %v1709_v1 }
 0x1ea   :  { %v3203_v57 = vadd.f32 %v8478_v10, %v3202_v36  ;;  %v3336_v35 = vadd.f32 %v3335_v46, %v3273_v6  ;;  %v763_v26 = vrot.slane %v762_v14, 1  ;;  %v1578_v3 = vrot.slane %v1577_v22, 1 }
 0x1eb   :  { %v2389_v43 = vrot.slane %v2388_v0, 4  ;;  %v2522_v18 = vadd.f32 %v2521_v49, %v2459_v16  ;;  %v897_v19 = vrot.slane %v896_v48, 1  ;;  %v1712_v33 = vrot.slane %v1711_v50, 1 }
 0x1ec   :  { %v3204_v42 = vrot.slane %v3203_v57, 4  ;;  %v3337_v37 = vadd.f32 %v3336_v35, %v3274_v34  ;;  %v764_v36 = vadd.f32 %v763_v26, %v762_v14  ;;  %v1579_v6 = vadd.f32 %v1578_v3, %v1577_v22 }
 0x1ed   :  { %v2390_v61 = vadd.f32 %v2389_v43, %v2388_v0  ;;  %v2523_v11 = vrot.slane %v2522_v18, 4  ;;  %v898_v46 = vadd.f32 %v897_v19, %v896_v48  ;;  %v1713_v16 = vadd.f32 %v1712_v33, %v1711_v50 }
 0x1ee   :  { %v3205_v27 = vadd.f32 %v3204_v42, %v3203_v57  ;;  %v3338_v63 = vrot.slane %v3337_v37, 4  ;;  %v1580_v42 = vadd.f32 %v1579_v6, %v764_v36 }
 0x1ef   :  { %v2391_v60 = vrot.slane %v2390_v61, 2  ;;  %v2524_v40 = vadd.f32 %v2523_v11, %v2522_v18  ;;  %v1714_v56 = vadd.f32 %v1713_v16, %v898_v46  ;;  %v14264_v46 = vld [vmem:[#allocation3_spill] sm:$0xff] }
 0x1f0   :  { %v3206_v38 = vrot.slane %v3205_v27, 2  ;;  %v3339_v55 = vadd.f32 %v3338_v63, %v3337_v37 }
 0x1f1   :  { %v2392_v54 = vadd.f32 %v2391_v60, %v2390_v61  ;;  %v2525_v1 = vrot.slane %v2524_v40, 2  ;;  %v3349_v61 = vld [vmem:[%s13649_s2] sm:$0x1] }
 0x1f2   :  { %v3207_v45 = vadd.f32 %v3206_v38, %v3205_v27  ;;  %v3340_v21 = vrot.slane %v3339_v55, 2 }
 0x1f3   :  { %v2393_v49 = vrot.slane %v2392_v54, 1  ;;  %v2526_v34 = vadd.f32 %v2525_v1, %v2524_v40  ;;  %v3422_v40 = vlaneseq }
 0x1f4   :  { %v3208_v0 = vrot.slane %v3207_v45, 1  ;;  %v3341_v35 = vadd.f32 %v3340_v21, %v3339_v55 }
 0x1f5   :  { %v2394_v57 = vadd.f32 %v2393_v49, %v2392_v54  ;;  %v2527_v43 = vrot.slane %v2526_v34, 1  ;;  %v3423_v19 = vshrl.u32 %v3422_v40, 7  ;;  %v14262_v54 = vld [vmem:[#allocation5_spill] sm:$0xff]  ;;  %v14265_v49 = vld [vmem:[#allocation7_spill] sm:$0xff] }
 0x1f6   :  { %v3342_v10 = vrot.slane %v3341_v35, 1  ;;  %v3209_v63 = vadd.f32 %v3208_v0, %v3207_v45  ;;  %v14263_v45 = vld [vmem:[#allocation9_spill] sm:$0xff] }
 0x1f7   :  { %v2395_v18 = vadd.f32 %v2394_v57, %v1580_v42  ;;  %v2528_v11 = vadd.f32 %v2527_v43, %v2526_v34  ;;  %v3424_v60 = vsub.s32 0, %v3423_v19  ;;  %v14268_v57 = vld [vmem:[#allocation17_spill] sm:$0xff] }
 0x1f8   :  { %v3343_v37 = vadd.f32 %v3342_v10, %v3341_v35  ;;  %v14267_v35 = vld [vmem:[#allocation13_spill] sm:$0xff] }
 0x1f9   :  { %v2529_v14 = vadd.f32 %v2528_v11, %v1714_v56  ;;  %v3210_v22 = vadd.f32 %v3209_v63, %v2395_v18  ;;  %v3353_v56 = vld [vmem:[%s13650_s3] sm:$0x1]  ;;  %v14269_v18 = vld [vmem:[#allocation11_spill] sm:$0xff]  ;;  %v14275_v40 = vld [vmem:[#allocation29_spill] sm:$0xff] }
 0x1fa   :  { %v14270_v63 = vld [vmem:[#allocation15_spill] sm:$0xff] }
 0x1fb   :  { %v3344_v26 = vadd.f32 %v3343_v37, %v2529_v14  ;;  %v3345_v27 = vmul.f32 0.00048828125, %v3210_v22  ;;  %v14271_v22 = vld [vmem:[#allocation21_spill] sm:$0xff] }
 0x1fd   :  { %v3346_v38 = vmul.f32 0.00048828125, %v3344_v26  ;;  %v3347_v48 = vmul.f32 %v3345_v27, %v3345_v27  ;;  %v14272_v26 = vld [vmem:[#allocation25_spill] sm:$0xff] }
 0x1ff   :  { %v3348_v50 = vsub.f32 %v3346_v38, %v3347_v48  ;;  %v14273_v38 = vld [vmem:[#allocation19_spill] sm:$0xff] }
 0x201   :  { %v3350_v3 = vadd.f32 1e-05, %v3348_v50  ;;  %v14274_v50 = vld [vmem:[#allocation23_spill] sm:$0xff] }
 0x203   :  { %6697 = vrsqrt.f32 %v3350_v3 }
 0x210   :  { %v6698_v55 = vpop.eup %6697 }
 0x211   :  { %v3352_v33 = vmul.f32 %v6698_v55, %v3349_v61  ;;  %v14276_v61 = vld [vmem:[#allocation33_spill] sm:$0xff] }
 0x213   :  { %v3354_v36 = vmul.f32 %v3352_v33, %v3345_v27  ;;  %v8523_v10 = vrot.slane %v3352_v33, %v3424_v60  ;;  %v14277_v33 = vld [vmem:[#allocation27_spill] sm:$0xff] }
 0x215   :  { %14261 = vst [vmem:[#allocation242_spill] sm:$0xff] %v8523_v10  ;;  %v3355_v6 = vsub.f32 %v3353_v56, %v3354_v36  ;;  %v8527_v1 = vmul.f32 %v8523_v10, %v14262_v54  ;;  %v8531_v21 = vmul.f32 %v8523_v10, %v14263_v45  ;;  %v8535_v16 = vmul.f32 %v14264_v46, %v8523_v10  ;;  %v14278_v36 = vld [vmem:[#allocation31_spill] sm:$0xff]  ;;  %v14280_v45 = vld [vmem:[#allocation41_spill] sm:$0xff] }
 0x216   :  { %v8539_v34 = vmul.f32 %v14265_v49, %v8523_v10  ;;  %v8545_v42 = vmul.f32 %v8523_v10, %v14267_v35  ;;  %v8549_v43 = vmul.f32 %v8523_v10, %v14268_v57  ;;  %v8553_v11 = vmul.f32 %v14269_v18, %v8523_v10  ;;  %v14281_v49 = vld [vmem:[#allocation35_spill] sm:$0xff] }
 0x217   :  { %v8541_v0 = vrot.slane %v3355_v6, %v3424_v60  ;;  %v8557_v14 = vmul.f32 %v14270_v63, %v8523_v10  ;;  %v8561_v37 = vmul.f32 %v8523_v10, %v14271_v22  ;;  %v8565_v27 = vmul.f32 %v8523_v10, %v14272_v26  ;;  %v14279_v6 = vld [vmem:[#allocation37_spill] sm:$0xff]  ;;  %v14282_v57 = vld [vmem:[#allocation39_spill] sm:$0xff] }
 0x218   :  { %v8569_v48 = vmul.f32 %v14273_v38, %v8523_v10  ;;  %v8573_v3 = vmul.f32 %v14274_v50, %v8523_v10  ;;  %v8577_v55 = vmul.f32 %v8523_v10, %v14275_v40  ;;  %v8581_v19 = vmul.f32 %v8523_v10, %v14276_v61  ;;  %v14283_v63 = vld [vmem:[#allocation45_spill] sm:$0xff]  ;;  %v14285_v50 = vld [vmem:[#allocation43_spill] sm:$0xff] }
 0x219   :  { %14266 = vst [vmem:[#allocation5_spill] sm:$0xff] %v8541_v0  ;;  %v8585_v60 = vmul.f32 %v14277_v33, %v8523_v10  ;;  %v8589_v56 = vmul.f32 %v14278_v36, %v8523_v10  ;;  %v8593_v54 = vmul.f32 %v8523_v10, %v14279_v6  ;;  %v8597_v46 = vmul.f32 %v8523_v10, %v14280_v45  ;;  %v14284_v26 = vld [vmem:[#allocation49_spill] sm:$0xff]  ;;  %v14286_v61 = vld [vmem:[#allocation47_spill] sm:$0xff] }
 0x21a   :  { %v8601_v35 = vmul.f32 %v14281_v49, %v8523_v10  ;;  %v8605_v18 = vmul.f32 %v14282_v57, %v8523_v10  ;;  %v8609_v22 = vmul.f32 %v8523_v10, %v14283_v63  ;;  %v8613_v38 = vmul.f32 %v8523_v10, %v14284_v26  ;;  %v14287_v36 = vld [vmem:[#allocation53_spill] sm:$0xff]  ;;  %v14289_v57 = vld [vmem:[#allocation51_spill] sm:$0xff] }
 0x21b   :  { %v8617_v40 = vmul.f32 %v14285_v50, %v8523_v10  ;;  %v8621_v33 = vmul.f32 %v14286_v61, %v8523_v10  ;;  %v8625_v6 = vmul.f32 %v8523_v10, %v14287_v36  ;;  %v14288_v45 = vld [vmem:[#allocation57_spill] sm:$0xff]  ;;  %v8633_v63 = vmul.f32 %v14289_v57, %v8523_v10  ;;  %v14290_v26 = vld [vmem:[#allocation55_spill] sm:$0xff] }
 0x21c   :  { %v8629_v49 = vmul.f32 %v8523_v10, %v14288_v45  ;;  %v8637_v50 = vmul.f32 %v14290_v26, %v8523_v10  ;;  %v8641_v61 = vmul.f32 %v8523_v10, %v14291_v2  ;;  %v8645_v36 = vmul.f32 %v8523_v10, %v14292_v47 }
 0x21d   :  { %v8649_v45 = vmul.f32 %v14293_v5, %v8523_v10  ;;  %v8653_v57 = vmul.f32 %v14294_v4, %v8523_v10  ;;  %v8657_v26 = vmul.f32 %v8523_v10, %v14295_v9  ;;  %v8661_v2 = vmul.f32 %v8523_v10, %v14296_v59 }
 0x21e   :  { %v8665_v47 = vmul.f32 %v14297_v15, %v8523_v10  ;;  %v8669_v5 = vmul.f32 %v14299_v51, %v8523_v10  ;;  %v8673_v4 = vmul.f32 %v8523_v10, %v14301_v24  ;;  %v8677_v9 = vmul.f32 %v8523_v10, %v14303_v44 }
 0x21f   :  { %v8681_v59 = vmul.f32 %v14305_v41, %v8523_v10  ;;  %v8685_v15 = vmul.f32 %v14307_v20, %v8523_v10 }
 0x220   :  { %14298 = vst [vmem:[#allocation9_spill] sm:$0xff] %v8665_v47  ;;  %14300 = vst [vmem:[#allocation3_spill] sm:$0xff] %v8669_v5  ;;  %v14309_v47 = vld [vmem:[#allocation85_spill] sm:$0xff] }
 0x221   :  { %14302 = vst [vmem:[#allocation7_spill] sm:$0xff] %v8673_v4  ;;  %14304 = vst [vmem:[#allocation13_spill] sm:$0xff] %v8677_v9  ;;  %v8689_v51 = vmul.f32 %v8523_v10, %v14309_v47  ;;  %v14310_v5 = vld [vmem:[#allocation89_spill] sm:$0xff]  ;;  %v14312_v4 = vld [vmem:[#allocation83_spill] sm:$0xff] }
 0x222   :  { %14306 = vst [vmem:[#allocation17_spill] sm:$0xff] %v8681_v59  ;;  %14308 = vst [vmem:[#allocation11_spill] sm:$0xff] %v8685_v15  ;;  %v8693_v24 = vmul.f32 %v8523_v10, %v14310_v5  ;;  %v8697_v44 = vmul.f32 %v14312_v4, %v8523_v10  ;;  %v14313_v9 = vld [vmem:[#allocation87_spill] sm:$0xff]  ;;  %v14314_v59 = vld [vmem:[#allocation92_spill] sm:$0xff]  ;;  %v8713_v5 = vmul.f32 %v7577_v23, %v8523_v10 }
 0x223   :  { %v8701_v41 = vmul.f32 %v14313_v9, %v8523_v10  ;;  %v8705_v20 = vmul.f32 %v8523_v10, %v14314_v59  ;;  %v14315_v15 = vld [vmem:[#allocation96_spill] sm:$0xff]  ;;  %v8721_v9 = vmul.f32 %v8523_v10, %v7610_v31  ;;  %v8725_v59 = vmul.f32 %v8523_v10, %v7624_v58 }
 0x224   :  { %14311 = vst [vmem:[#allocation15_spill] sm:$0xff] %v8693_v24  ;;  %v8709_v47 = vmul.f32 %v8523_v10, %v14315_v15  ;;  %v14316_v24 = vld [vmem:[#allocation94_spill] sm:$0xff]  ;;  %v8729_v15 = vmul.f32 %v7603_v17, %v8523_v10  ;;  %v8733_v23 = vmul.f32 %v7617_v12, %v8523_v10  ;;  %v8741_v31 = vmul.f32 %v8523_v10, %v7652_v29 }
 0x225   :  { %v8717_v4 = vmul.f32 %v14316_v24, %v8523_v10  ;;  %v8737_v24 = vmul.f32 %v8523_v10, %v7640_v28  ;;  %v8745_v58 = vmul.f32 %v7633_v53, %v8523_v10  ;;  %v8749_v17 = vmul.f32 %v7645_v32, %v8523_v10 }
 0x226   :  { %v8753_v12 = vmul.f32 %v8523_v10, %v7666_v39  ;;  %v8757_v28 = vmul.f32 %v8523_v10, %v7680_v7  ;;  %v8761_v29 = vmul.f32 %v7659_v62, %v8523_v10  ;;  %v8765_v53 = vmul.f32 %v7673_v25, %v8523_v10 }
 0x227   :  { %v8769_v32 = vmul.f32 %v8523_v10, %v14216_v13  ;;  %v8773_v39 = vmul.f32 %v8523_v10, %v14228_v52  ;;  %v8777_v7 = vmul.f32 %v7689_v8, %v8523_v10  ;;  %v8781_v62 = vmul.f32 %v14239_v30, %v8523_v10  ;;  %v14327_v10 = vld [vmem:[#allocation9_spill] sm:$0xff] }
 0x228   :  { %v8785_v25 = vadd.f32 %v8541_v0, %v8527_v1  ;;  %v8789_v13 = vadd.f32 %v8541_v0, %v8531_v21  ;;  %v8793_v52 = vadd.f32 %v8541_v0, %v8535_v16  ;;  %v8797_v8 = vadd.f32 %v8541_v0, %v8539_v34 }
 0x229   :  { %v8801_v30 = vadd.f32 %v8541_v0, %v8545_v42  ;;  %v8805_v1 = vadd.f32 %v8541_v0, %v8549_v43  ;;  %v8809_v21 = vadd.f32 %v8541_v0, %v8553_v11  ;;  %v8813_v16 = vadd.f32 %v8541_v0, %v8557_v14 }
 0x22a   :  { %v8817_v34 = vadd.f32 %v8541_v0, %v8561_v37  ;;  %v8821_v42 = vadd.f32 %v8541_v0, %v8565_v27  ;;  %v8825_v43 = vadd.f32 %v8541_v0, %v8569_v48  ;;  %v8829_v11 = vadd.f32 %v8541_v0, %v8573_v3 }
 0x22b   :  { %v8833_v14 = vadd.f32 %v8541_v0, %v8577_v55  ;;  %v8837_v37 = vadd.f32 %v8541_v0, %v8581_v19  ;;  %v8841_v27 = vadd.f32 %v8541_v0, %v8585_v60  ;;  %v8845_v48 = vadd.f32 %v8541_v0, %v8589_v56 }
 0x22c   :  { %14317 = vst [vmem:[#allocation21_spill] sm:$0xff] %v8817_v34  ;;  %14318 = vst [vmem:[#allocation25_spill] sm:$0xff] %v8821_v42  ;;  %v8849_v3 = vadd.f32 %v8541_v0, %v8593_v54  ;;  %v8853_v55 = vadd.f32 %v8541_v0, %v8597_v46  ;;  %v8857_v19 = vadd.f32 %v8541_v0, %v8601_v35  ;;  %vm3561_vm0 = vcmp.gt.f32.partialorder %v8785_v25, 0.0 }
 0x22d   :  { %14319 = vst [vmem:[#allocation19_spill] sm:$0xff] %v8825_v43  ;;  %14320 = vst [vmem:[#allocation23_spill] sm:$0xff] %v8841_v27  ;;  %v8861_v60 = vadd.f32 %v8541_v0, %v8605_v18  ;;  %v8865_v56 = vadd.f32 %v8541_v0, %v8609_v22  ;;  %v8869_v54 = vadd.f32 %v8541_v0, %v8613_v38  ;;  %vm3562_vm1 = vcmp.gt.f32.partialorder %v8789_v13, 0.0 }
 0x22e   :  { %v8873_v46 = vadd.f32 %v8541_v0, %v8617_v40  ;;  %v8877_v35 = vadd.f32 %v8541_v0, %v8621_v33  ;;  %v8881_v18 = vadd.f32 %v8541_v0, %v8625_v6  ;;  %v8885_v22 = vadd.f32 %v8541_v0, %v8629_v49 }
 0x22f   :  { %v8889_v38 = vadd.f32 %v8541_v0, %v8633_v63  ;;  %v8893_v40 = vadd.f32 %v8541_v0, %v8637_v50  ;;  %v8897_v33 = vadd.f32 %v8541_v0, %v8641_v61  ;;  %v8901_v6 = vadd.f32 %v8541_v0, %v8645_v36 }
 0x230   :  { %14321 = vst [vmem:[#allocation29_spill] sm:$0xff] %v8873_v46  ;;  %v8905_v49 = vadd.f32 %v8541_v0, %v8649_v45  ;;  %v8909_v63 = vadd.f32 %v8541_v0, %v8653_v57  ;;  %v8913_v50 = vadd.f32 %v8541_v0, %v8657_v26  ;;  %v8917_v61 = vadd.f32 %v8541_v0, %v8661_v2 }
 0x231   :  { %14322 = vst [vmem:[#allocation33_spill] sm:$0xff] %v8901_v6  ;;  %v8921_v36 = vadd.f32 %v8541_v0, %v14327_v10  ;;  %v14328_v6 = vld [vmem:[#allocation3_spill] sm:$0xff]  ;;  %vm3563_vm2 = vcmp.gt.f32.partialorder %v8793_v52, 0.0  ;;  %vm3564_vm3 = vcmp.gt.f32.partialorder %v8797_v8, 0.0  ;;  %vm3565_vm4 = vcmp.gt.f32.partialorder %v8801_v30, 0.0 }
 0x232   :  { %14323 = vst [vmem:[#allocation27_spill] sm:$0xff] %v8905_v49  ;;  %14324 = vst [vmem:[#allocation31_spill] sm:$0xff] %v8909_v63  ;;  %v8925_v45 = vadd.f32 %v8541_v0, %v14328_v6  ;;  %v14330_v49 = vld [vmem:[#allocation7_spill] sm:$0xff]  ;;  %v14331_v63 = vld [vmem:[#allocation13_spill] sm:$0xff]  ;;  %v8945_v6 = vadd.f32 %v8541_v0, %v8689_v51  ;;  %v8965_v51 = vadd.f32 %v8541_v0, %v8709_v47  ;;  %vm3566_vm5 = vcmp.gt.f32.partialorder %v8805_v1, 0.0 }
 0x233   :  { %14325 = vst [vmem:[#allocation37_spill] sm:$0xff] %v8913_v50  ;;  %14326 = vst [vmem:[#allocation41_spill] sm:$0xff] %v8917_v61  ;;  %v8929_v57 = vadd.f32 %v8541_v0, %v14330_v49  ;;  %v8933_v26 = vadd.f32 %v8541_v0, %v14331_v63  ;;  %v14332_v50 = vld [vmem:[#allocation17_spill] sm:$0xff]  ;;  %v14333_v61 = vld [vmem:[#allocation11_spill] sm:$0xff]  ;;  %v8953_v63 = vadd.f32 %v8541_v0, %v8697_v44  ;;  %vm3567_vm6 = vcmp.gt.f32.partialorder %v8809_v21, 0.0 }
 0x234   :  { %14329 = vst [vmem:[#allocation35_spill] sm:$0xff] %v8925_v45  ;;  %v8937_v2 = vadd.f32 %v8541_v0, %v14332_v50  ;;  %v8941_v10 = vadd.f32 %v8541_v0, %v14333_v61  ;;  %v14334_v45 = vld [vmem:[#allocation15_spill] sm:$0xff]  ;;  %v8957_v50 = vadd.f32 %v8541_v0, %v8701_v41  ;;  %v8961_v61 = vadd.f32 %v8541_v0, %v8705_v20 }
 0x235   :  { %v8949_v49 = vadd.f32 %v8541_v0, %v14334_v45  ;;  %14335 = vst [vmem:[#allocation39_spill] sm:$0xff] %v8953_v63  ;;  %14337 = vst [vmem:[#allocation49_spill] sm:$0xff] %v8965_v51  ;;  %v8969_v45 = vadd.f32 %v8541_v0, %v8713_v5  ;;  %v8973_v44 = vadd.f32 %v8541_v0, %v8717_v4  ;;  %v8987_v51 = vpop.permute.xlu0 %3631  ;;  %vm3568_vm7 = vcmp.gt.f32.partialorder %v8813_v16, 0.0 }
 0x236   :  { %14336 = vst [vmem:[#allocation45_spill] sm:$0xff] %v8957_v50  ;;  %v8977_v41 = vadd.f32 %v8541_v0, %v8721_v9  ;;  %v8981_v20 = vadd.f32 %v8541_v0, %v8725_v59  ;;  %v8985_v47 = vadd.f32 %v8541_v0, %v8729_v15  ;;  %14338 = vst [vmem:[#allocation43_spill] sm:$0xff] %v8987_v51  ;;  %vm3569_vm8 = vcmp.gt.f32.partialorder %v8817_v34, 0.0 }
 0x237   :  { %v8991_v5 = vadd.f32 %v8541_v0, %v8733_v23  ;;  %v8995_v4 = vadd.f32 %v8541_v0, %v8737_v24  ;;  %v8999_v9 = vadd.f32 %v8541_v0, %v8741_v31  ;;  %v9003_v59 = vadd.f32 %v8541_v0, %v8745_v58 }
 0x238   :  { %v9007_v15 = vadd.f32 %v8541_v0, %v8749_v17  ;;  %v9011_v23 = vadd.f32 %v8541_v0, %v8753_v12  ;;  %v9015_v24 = vadd.f32 %v8541_v0, %v8757_v28  ;;  %v9019_v31 = vadd.f32 %v8541_v0, %v8761_v29 }
 0x239   :  { %v9023_v58 = vadd.f32 %v8541_v0, %v8765_v53  ;;  %v9027_v17 = vadd.f32 %v8541_v0, %v8769_v32  ;;  %v9031_v12 = vadd.f32 %v8541_v0, %v8773_v39  ;;  %v9035_v28 = vadd.f32 %v8541_v0, %v8777_v7 }
 0x23a   :  { %v9039_v29 = vadd.f32 %v8541_v0, %v8781_v62  ;;  %v9043_v53 = vmul.f32 %v8987_v51, %v8785_v25  ;;  %v9047_v32 = vmul.f32 %v8987_v51, %v8789_v13  ;;  %v9051_v39 = vmul.f32 %v8987_v51, %v8793_v52 }
 0x23b   :  { %v9055_v7 = vmul.f32 %v8987_v51, %v8797_v8  ;;  %v9059_v62 = vmul.f32 %v8987_v51, %v8801_v30  ;;  %v9063_v0 = vmul.f32 %v8987_v51, %v8805_v1  ;;  %vm3570_vm9 = vcmp.gt.f32.partialorder %v8821_v42, 0.0 }
 0x23c   :  { %14339 = vst [vmem:[#allocation47_spill] sm:$0xff] %v9043_v53  ;;  %14340 = vst [vmem:[#allocation53_spill] sm:$0xff] %v9047_v32  ;;  %v9067_v53 = vmul.f32 %v8987_v51, %v8809_v21  ;;  %v9071_v32 = vmul.f32 %v8987_v51, %v8813_v16  ;;  %vm3571_vm10 = vcmp.gt.f32.partialorder %v8825_v43, 0.0  ;;  %vm3572_vm11 = vcmp.gt.f32.partialorder %v8829_v11, 0.0 }
 0x23d   :  { %14341 = vst [vmem:[#allocation57_spill] sm:$0xff] %v9051_v39  ;;  %14342 = vst [vmem:[#allocation51_spill] sm:$0xff] %v9055_v7  ;;  %v9075_v39 = vmul.f32 %v8987_v51, %v8817_v34  ;;  %v9079_v7 = vmul.f32 %v8987_v51, %v8821_v42  ;;  %vm3608_vm14 = vcmp.gt.f32.partialorder %v8973_v44, 0.0  ;;  %vm3609_vm15 = vcmp.gt.f32.partialorder %v8977_v41, 0.0 }
 0x23e   :  { %14343 = vst [vmem:[#allocation55_spill] sm:$0xff] %v9059_v62  ;;  %14344 = vst [vmem:[#allocation61_spill] sm:$0xff] %v9063_v0  ;;  %v9083_v62 = vmul.f32 %v8987_v51, %v8825_v43  ;;  %v9087_v0 = vmul.f32 %v8987_v51, %v8829_v11  ;;  %vm3610_vm13 = vcmp.gt.f32.partialorder %v8981_v20, 0.0  ;;  %vm3611_vm12 = vcmp.gt.f32.partialorder %v8985_v47, 0.0 }
 0x23f   :  { %14345 = vst [vmem:[#allocation65_spill] sm:$0xff] %v9067_v53  ;;  %14346 = vst [vmem:[#allocation59_spill] sm:$0xff] %v9071_v32  ;;  %v9091_v53 = vmul.f32 %v8987_v51, %v8833_v14  ;;  %v9095_v32 = vmul.f32 %v8987_v51, %v8837_v37 }
 0x240   :  { %14347 = vst [vmem:[#allocation63_spill] sm:$0xff] %v9075_v39  ;;  %14348 = vst [vmem:[#allocation69_spill] sm:$0xff] %v9079_v7  ;;  %v9099_v39 = vmul.f32 %v8987_v51, %v8841_v27  ;;  %v9103_v7 = vmul.f32 %v8987_v51, %v8845_v48 }
 0x241   :  { %14349 = vst [vmem:[#allocation73_spill] sm:$0xff] %v9083_v62  ;;  %14350 = vst [vmem:[#allocation67_spill] sm:$0xff] %v9087_v0  ;;  %v9107_v62 = vmul.f32 %v8987_v51, %v8849_v3  ;;  %v9111_v0 = vmul.f32 %v8987_v51, %v8853_v55 }
 0x242   :  { %14351 = vst [vmem:[#allocation71_spill] sm:$0xff] %v9091_v53  ;;  %14352 = vst [vmem:[#allocation77_spill] sm:$0xff] %v9095_v32  ;;  %v9115_v53 = vmul.f32 %v8987_v51, %v8857_v19 }
 0x243   :  { %14353 = vst [vmem:[#allocation81_spill] sm:$0xff] %v9099_v39  ;;  %14354 = vst [vmem:[#allocation75_spill] sm:$0xff] %v9103_v7  ;;  %v9122_v7 = vmul.f32 %v8987_v51, %v8861_v60 }
 0x244   :  { %14355 = vst [vmem:[#allocation79_spill] sm:$0xff] %v9107_v62  ;;  %14356 = vst [vmem:[#allocation85_spill] sm:$0xff] %v9111_v0  ;;  %v9126_v62 = vmul.f32 %v8987_v51, %v8865_v56  ;;  %v9130_v0 = vmul.f32 %v8987_v51, %v8869_v54 }
 0x245   :  { %14357 = vst [vmem:[#allocation89_spill] sm:$0xff] %v9115_v53  ;;  %14358 = vst [vmem:[#allocation83_spill] sm:$0xff] %v9122_v7  ;;  %v9134_v53 = vmul.f32 %v8987_v51, %v8873_v46  ;;  %v9142_v7 = vmul.f32 %v8987_v51, %v8877_v35 }
 0x246   :  { %14359 = vst [vmem:[#allocation87_spill] sm:$0xff] %v9126_v62  ;;  %14360 = vst [vmem:[#allocation92_spill] sm:$0xff] %v9130_v0  ;;  %v9146_v62 = vmul.f32 %v8987_v51, %v8881_v18  ;;  %v9150_v0 = vmul.f32 %v8987_v51, %v8885_v22 }
 0x247   :  { %14361 = vst [vmem:[#allocation96_spill] sm:$0xff] %v9134_v53  ;;  %14362 = vst [vmem:[#allocation94_spill] sm:$0xff] %v9142_v7  ;;  %v9154_v53 = vmul.f32 %v8987_v51, %v8889_v38  ;;  %v9162_v7 = vmul.f32 %v8987_v51, %v8893_v40 }
 0x248   :  { %14363 = vst [vmem:[#allocation9_spill] sm:$0xff] %v9146_v62  ;;  %14364 = vst [vmem:[#allocation3_spill] sm:$0xff] %v9150_v0  ;;  %v9166_v62 = vmul.f32 %v8987_v51, %v8897_v33  ;;  %v14368_v0 = vld [vmem:[#allocation33_spill] sm:$0xff] }
 0x249   :  { %14365 = vst [vmem:[#allocation7_spill] sm:$0xff] %v9154_v53  ;;  %14366 = vst [vmem:[#allocation13_spill] sm:$0xff] %v9162_v7  ;;  %v9170_v39 = vmul.f32 %v8987_v51, %v14368_v0  ;;  %v14370_v53 = vld [vmem:[#allocation27_spill] sm:$0xff] }
 0x24a   :  { %14367 = vst [vmem:[#allocation17_spill] sm:$0xff] %v9166_v62  ;;  %v9174_v32 = vmul.f32 %v8987_v51, %v14370_v53  ;;  %v14372_v7 = vld [vmem:[#allocation31_spill] sm:$0xff]  ;;  %v14374_v62 = vld [vmem:[#allocation37_spill] sm:$0xff] }
 0x24b   :  { %14369 = vst [vmem:[#allocation11_spill] sm:$0xff] %v9170_v39  ;;  %v9182_v43 = vmul.f32 %v8987_v51, %v14372_v7  ;;  %v9186_v42 = vmul.f32 %v8987_v51, %v14374_v62  ;;  %v14376_v39 = vld [vmem:[#allocation41_spill] sm:$0xff] }
 0x24c   :  { %14371 = vst [vmem:[#allocation15_spill] sm:$0xff] %v9174_v32  ;;  %v9190_v34 = vmul.f32 %v8987_v51, %v14376_v39  ;;  %v9194_v32 = vmul.f32 %v8987_v51, %v8921_v36 }
 0x24d   :  { %14373 = vst [vmem:[#allocation33_spill] sm:$0xff] %v9182_v43  ;;  %14375 = vst [vmem:[#allocation27_spill] sm:$0xff] %v9186_v42  ;;  %v14379_v43 = vld [vmem:[#allocation35_spill] sm:$0xff]  ;;  %v9206_v42 = vmul.f32 %v8987_v51, %v8929_v57 }
 0x24e   :  { %14377 = vst [vmem:[#allocation31_spill] sm:$0xff] %v9190_v34  ;;  %14378 = vst [vmem:[#allocation37_spill] sm:$0xff] %v9194_v32  ;;  %v9202_v27 = vmul.f32 %v8987_v51, %v14379_v43  ;;  %v9210_v34 = vmul.f32 %v8987_v51, %v8933_v26  ;;  %v9214_v32 = vmul.f32 %v8987_v51, %v8937_v2 }
 0x24f   :  { %14381 = vst [vmem:[#allocation35_spill] sm:$0xff] %v9206_v42  ;;  %v9226_v42 = vmul.f32 %v8987_v51, %v8945_v6 }
 0x250   :  { %14380 = vst [vmem:[#allocation41_spill] sm:$0xff] %v9202_v27  ;;  %14382 = vst [vmem:[#allocation243_spill] sm:$0xff] %v9210_v34  ;;  %v9222_v27 = vmul.f32 %v8987_v51, %v8941_v10  ;;  %v9230_v34 = vmul.f32 %v8987_v51, %v8949_v49 }
 0x251   :  { %14383 = vst [vmem:[#allocation244_spill] sm:$0xff] %v9214_v32  ;;  %14385 = vst [vmem:[#allocation246_spill] sm:$0xff] %v9226_v42  ;;  %v9234_v32 = vmul.f32 %v8987_v51, %v8953_v63  ;;  %v9246_v42 = vmul.f32 %v8987_v51, %v8961_v61  ;;  %v14411_v63 = vld [vmem:[#allocation53_spill] sm:$0xff] }
 0x252   :  { %14384 = vst [vmem:[#allocation245_spill] sm:$0xff] %v9222_v27  ;;  %14386 = vst [vmem:[#allocation247_spill] sm:$0xff] %v9230_v34  ;;  %v9242_v27 = vmul.f32 %v8987_v51, %v8957_v50  ;;  %v14390_v34 = vld [vmem:[#allocation49_spill] sm:$0xff] }
 0x253   :  { %14387 = vst [vmem:[#allocation248_spill] sm:$0xff] %v9234_v32  ;;  %14389 = vst [vmem:[#allocation250_spill] sm:$0xff] %v9246_v42  ;;  %v9250_v46 = vmul.f32 %v8987_v51, %v14390_v34  ;;  %v9254_v32 = vmul.f32 %v8987_v51, %v8969_v45  ;;  %v9266_v42 = vmul.f32 %v8987_v51, %v8977_v41  ;;  %v14412_v50 = vld [vmem:[#allocation57_spill] sm:$0xff] }
 0x254   :  { %14388 = vst [vmem:[#allocation249_spill] sm:$0xff] %v9242_v27  ;;  %v9262_v27 = vmul.f32 %v8987_v51, %v8973_v44  ;;  %v3700_v34 = vsel %vm3563_vm2, %v8793_v52, %v14412_v50  ;;  %v14416_v50 = vld [vmem:[#allocation65_spill] sm:$0xff]  ;;  %vm3614_vm2 = vcmp.gt.f32.partialorder %v8999_v9, 0.0 }
 0x255   :  { %14391 = vst [vmem:[#allocation251_spill] sm:$0xff] %v9250_v46  ;;  %14392 = vst [vmem:[#allocation252_spill] sm:$0xff] %v9254_v32  ;;  %v9270_v46 = vmul.f32 %v8987_v51, %v8981_v20  ;;  %v9274_v32 = vmul.f32 %v8987_v51, %v8985_v47 }
 0x256   :  { %14393 = vst [vmem:[#allocation253_spill] sm:$0xff] %v9262_v27  ;;  %14394 = vst [vmem:[#allocation254_spill] sm:$0xff] %v9266_v42  ;;  %v9282_v27 = vmul.f32 %v8987_v51, %v8991_v5  ;;  %v9286_v42 = vmul.f32 %v8987_v51, %v8995_v4 }
 0x257   :  { %14395 = vst [vmem:[#allocation255_spill] sm:$0xff] %v9270_v46  ;;  %14396 = vst [vmem:[#allocation256_spill] sm:$0xff] %v9274_v32  ;;  %v9290_v46 = vmul.f32 %v8987_v51, %v8999_v9  ;;  %v9294_v32 = vmul.f32 %v8987_v51, %v9003_v59 }
 0x258   :  { %14397 = vst [vmem:[#allocation257_spill] sm:$0xff] %v9282_v27  ;;  %14398 = vst [vmem:[#allocation258_spill] sm:$0xff] %v9286_v42  ;;  %v9302_v27 = vmul.f32 %v8987_v51, %v9007_v15  ;;  %v9306_v42 = vmul.f32 %v8987_v51, %v9011_v23 }
 0x259   :  { %14399 = vst [vmem:[#allocation259_spill] sm:$0xff] %v9290_v46  ;;  %14400 = vst [vmem:[#allocation260_spill] sm:$0xff] %v9294_v32  ;;  %v9310_v46 = vmul.f32 %v8987_v51, %v9015_v24  ;;  %v9314_v32 = vmul.f32 %v8987_v51, %v9019_v31 }
 0x25a   :  { %14401 = vst [vmem:[#allocation261_spill] sm:$0xff] %v9302_v27  ;;  %14402 = vst [vmem:[#allocation262_spill] sm:$0xff] %v9306_v42  ;;  %v9322_v27 = vmul.f32 %v8987_v51, %v9023_v58  ;;  %v9326_v42 = vmul.f32 %v8987_v51, %v9027_v17 }
 0x25b   :  { %14403 = vst [vmem:[#allocation263_spill] sm:$0xff] %v9310_v46  ;;  %14404 = vst [vmem:[#allocation264_spill] sm:$0xff] %v9314_v32  ;;  %v9330_v46 = vmul.f32 %v8987_v51, %v9031_v12  ;;  %v9334_v32 = vmul.f32 %v8987_v51, %v9035_v28 }
 0x25c   :  { %14405 = vst [vmem:[#allocation265_spill] sm:$0xff] %v9322_v27  ;;  %14406 = vst [vmem:[#allocation266_spill] sm:$0xff] %v9326_v42  ;;  %v9342_v27 = vmul.f32 %v8987_v51, %v9039_v29  ;;  %v14410_v42 = vld [vmem:[#allocation47_spill] sm:$0xff] }
 0x25d   :  { %14407 = vst [vmem:[#allocation267_spill] sm:$0xff] %v9330_v46  ;;  %14408 = vst [vmem:[#allocation268_spill] sm:$0xff] %v9334_v32  ;;  %v3698_v46 = vsel %vm3561_vm0, %v8785_v25, %v14410_v42  ;;  %v3699_v32 = vsel %vm3562_vm1, %v8789_v13, %v14411_v63  ;;  %v14413_v51 = vld [vmem:[#allocation51_spill] sm:$0xff]  ;;  %v14415_v63 = vld [vmem:[#allocation61_spill] sm:$0xff]  ;;  %vm3612_vm0 = vcmp.gt.f32.partialorder %v8991_v5, 0.0  ;;  %vm3613_vm1 = vcmp.gt.f32.partialorder %v8995_v4, 0.0 }
 0x25e   :  { %14409 = vst [vmem:[#allocation269_spill] sm:$0xff] %v9342_v27  ;;  %v3701_v25 = vsel %vm3564_vm3, %v8797_v8, %v14413_v51  ;;  %v14414_v42 = vld [vmem:[#allocation55_spill] sm:$0xff]  ;;  %v3703_v52 = vsel %vm3566_vm5, %v8805_v1, %v14415_v63  ;;  %v3704_v27 = vsel %vm3567_vm6, %v8809_v21, %v14416_v50  ;;  %3762 = vst [vmem:[%s13651_s5] sm:$0xff] %v3698_v46  ;;  %vm3615_vm3 = vcmp.gt.f32.partialorder %v9003_v59, 0.0  ;;  %v14419_v21 = vld [vmem:[#allocation21_spill] sm:$0xff] }
 0x25f   :  { %v3702_v13 = vsel %vm3565_vm4, %v8801_v30, %v14414_v42  ;;  %3763 = vst [vmem:[%s13651_s5 + $0x8] sm:$0xff] %v3699_v32  ;;  %3764 = vst [vmem:[%s13651_s5 + $0x10] sm:$0xff] %v3700_v34  ;;  %v14417_v8 = vld [vmem:[#allocation59_spill] sm:$0xff]  ;;  %v14420_v51 = vld [vmem:[#allocation69_spill] sm:$0xff]  ;;  %vm3616_vm4 = vcmp.gt.f32.partialorder %v9007_v15, 0.0  ;;  %vm3617_vm5 = vcmp.gt.f32.partialorder %v9011_v23, 0.0 }
 0x260   :  { %v3705_v30 = vsel %vm3568_vm7, %v8813_v16, %v14417_v8  ;;  %v14418_v1 = vld [vmem:[#allocation63_spill] sm:$0xff]  ;;  %v14421_v34 = vld [vmem:[#allocation25_spill] sm:$0xff]  ;;  %3765 = vst [vmem:[%s13651_s5 + $0x18] sm:$0xff] %v3701_v25  ;;  %3766 = vst [vmem:[%s13651_s5 + $0x20] sm:$0xff] %v3702_v13  ;;  %vm14433_vm7 = vcmp.gt.f32.partialorder %v8845_v48, 0.0  ;;  %vm14435_vm6 = vcmp.gt.f32.partialorder %v8849_v3, 0.0 }
 0x261   :  { %v3706_v46 = vsel %vm3569_vm8, %v14419_v21, %v14418_v1  ;;  %v3707_v32 = vsel %vm3570_vm9, %v14421_v34, %v14420_v51  ;;  %v14422_v42 = vld [vmem:[#allocation73_spill] sm:$0xff]  ;;  %v14423_v63 = vld [vmem:[#allocation19_spill] sm:$0xff]  ;;  %3767 = vst [vmem:[%s13651_s5 + $0x28] sm:$0xff] %v3703_v52  ;;  %3768 = vst [vmem:[%s13651_s5 + $0x30] sm:$0xff] %v3704_v27  ;;  %vm14426_vm8 = vcmp.gt.f32.partialorder %v8833_v14, 0.0  ;;  %vm14428_vm9 = vcmp.gt.f32.partialorder %v8837_v37, 0.0 }
 0x262   :  { %v3708_v50 = vsel %vm3571_vm10, %v14423_v63, %v14422_v42  ;;  %v14424_v16 = vld [vmem:[#allocation67_spill] sm:$0xff]  ;;  %v14427_v8 = vld [vmem:[#allocation77_spill] sm:$0xff]  ;;  %3769 = vst [vmem:[%s13651_s5 + $0x38] sm:$0xff] %v3705_v30  ;;  %3770 = vst [vmem:[%s13651_s5 + $0x40] sm:$0xff] %v3706_v46 }
 0x263   :  { %v3709_v25 = vsel %vm3572_vm11, %v8829_v11, %v14424_v16  ;;  %v14425_v13 = vld [vmem:[#allocation71_spill] sm:$0xff]  ;;  %v3711_v27 = vsel %vm14428_vm9, %v8837_v37, %v14427_v8  ;;  %v14429_v1 = vld [vmem:[#allocation81_spill] sm:$0xff]  ;;  %3771 = vst [vmem:[%s13651_s5 + $0x48] sm:$0xff] %v3707_v32  ;;  %3772 = vst [vmem:[%s13651_s5 + $0x50] sm:$0xff] %v3708_v50  ;;  %vm14437_vm11 = vcmp.gt.f32.partialorder %v8853_v55, 0.0  ;;  %vm14439_vm9 = vcmp.gt.f32.partialorder %v8857_v19, 0.0 }
 0x264   :  { %v3710_v52 = vsel %vm14426_vm8, %v8833_v14, %v14425_v13  ;;  %v14430_v21 = vld [vmem:[#allocation23_spill] sm:$0xff]  ;;  %vm3621_vm8 = vcmp.gt.f32.partialorder %v9027_v17, 0.0  ;;  %v14436_v46 = vld [vmem:[#allocation85_spill] sm:$0xff]  ;;  %3773 = vst [vmem:[%s13651_s5 + $0x58] sm:$0xff] %v3709_v25  ;;  %3775 = vst [vmem:[%s13651_s5 + $0x68] sm:$0xff] %v3711_v27 }
 0x265   :  { %vm14431_vm10 = vcmp.gt.f32.partialorder %v14430_v21, 0.0  ;;  %v14432_v11 = vld [vmem:[#allocation75_spill] sm:$0xff]  ;;  %v3715_v34 = vsel %vm14437_vm11, %v8853_v55, %v14436_v46  ;;  %v14438_v32 = vld [vmem:[#allocation89_spill] sm:$0xff]  ;;  %3774 = vst [vmem:[%s13651_s5 + $0x60] sm:$0xff] %v3710_v52  ;;  %vm14443_vm11 = vcmp.gt.f32.partialorder %v8865_v56, 0.0  ;;  %v14444_v63 = vld [vmem:[#allocation92_spill] sm:$0xff] }
 0x266   :  { %v3712_v51 = vsel %vm14431_vm10, %v14430_v21, %v14429_v1  ;;  %v3713_v14 = vsel %vm14433_vm7, %v8845_v48, %v14432_v11  ;;  %v14434_v37 = vld [vmem:[#allocation79_spill] sm:$0xff]  ;;  %v3716_v42 = vsel %vm14439_vm9, %v8857_v19, %v14438_v32  ;;  %vm14441_vm7 = vcmp.gt.f32.partialorder %v8861_v60, 0.0  ;;  %v14446_v16 = vld [vmem:[#allocation96_spill] sm:$0xff]  ;;  %v14447_v25 = vld [vmem:[#allocation29_spill] sm:$0xff]  ;;  %3779 = vst [vmem:[%s13651_s5 + $0x88] sm:$0xff] %v3715_v34 }
 0x267   :  { %v3714_v30 = vsel %vm14435_vm6, %v8849_v3, %v14434_v37  ;;  %3776 = vst [vmem:[%s13651_s5 + $0x70] sm:$0xff] %v3712_v51  ;;  %vm3624_vm6 = vcmp.gt.f32.partialorder %v9039_v29, 0.0  ;;  %v14440_v48 = vld [vmem:[#allocation83_spill] sm:$0xff]  ;;  %vm14445_vm9 = vcmp.gt.f32.partialorder %v8869_v54, 0.0  ;;  %vm14448_vm10 = vcmp.gt.f32.partialorder %v14447_v25, 0.0  ;;  %3777 = vst [vmem:[%s13651_s5 + $0x78] sm:$0xff] %v3713_v14 }
 0x268   :  { %v3717_v3 = vsel %vm14441_vm7, %v8861_v60, %v14440_v48  ;;  %v14442_v55 = vld [vmem:[#allocation87_spill] sm:$0xff]  ;;  %v3719_v50 = vsel %vm14445_vm9, %v8869_v54, %v14444_v63  ;;  %v3720_v13 = vsel %vm14448_vm10, %v14447_v25, %v14446_v16  ;;  %3778 = vst [vmem:[%s13651_s5 + $0x80] sm:$0xff] %v3714_v30  ;;  %3780 = vst [vmem:[%s13651_s5 + $0x90] sm:$0xff] %v3716_v42  ;;  %v14449_v60 = vld [vmem:[#allocation94_spill] sm:$0xff]  ;;  %vm14450_vm10 = vcmp.gt.f32.partialorder %v8877_v35, 0.0 }
 0x269   :  { %v3718_v19 = vsel %vm14443_vm11, %v8865_v56, %v14442_v55  ;;  %v3721_v56 = vsel %vm14450_vm10, %v8877_v35, %v14449_v60  ;;  %v14451_v54 = vld [vmem:[#allocation9_spill] sm:$0xff]  ;;  %vm14452_vm7 = vcmp.gt.f32.partialorder %v8881_v18, 0.0  ;;  %v14453_v8 = vld [vmem:[#allocation3_spill] sm:$0xff]  ;;  %vm14454_vm11 = vcmp.gt.f32.partialorder %v8885_v22, 0.0  ;;  %3781 = vst [vmem:[%s13651_s5 + $0x98] sm:$0xff] %v3717_v3  ;;  %3783 = vst [vmem:[%s13651_s5 + $0xa8] sm:$0xff] %v3719_v50 }
 0x26a   :  { %v3722_v52 = vsel %vm14452_vm7, %v8881_v18, %v14451_v54  ;;  %v3723_v27 = vsel %vm14454_vm11, %v8885_v22, %v14453_v8  ;;  %v14455_v1 = vld [vmem:[#allocation7_spill] sm:$0xff]  ;;  %vm14456_vm9 = vcmp.gt.f32.partialorder %v8889_v38, 0.0  ;;  %3782 = vst [vmem:[%s13651_s5 + $0xa0] sm:$0xff] %v3718_v19  ;;  %3784 = vst [vmem:[%s13651_s5 + $0xb0] sm:$0xff] %v3720_v13  ;;  %v14457_v35 = vld [vmem:[#allocation13_spill] sm:$0xff]  ;;  %vm14458_vm10 = vcmp.gt.f32.partialorder %v8893_v40, 0.0 }
 0x26b   :  { %v3724_v21 = vsel %vm14456_vm9, %v8889_v38, %v14455_v1  ;;  %v3725_v18 = vsel %vm14458_vm10, %v8893_v40, %v14457_v35  ;;  %v14459_v22 = vld [vmem:[#allocation17_spill] sm:$0xff]  ;;  %vm14460_vm7 = vcmp.gt.f32.partialorder %v8897_v33, 0.0  ;;  %v14461_v51 = vld [vmem:[#allocation11_spill] sm:$0xff]  ;;  %vm14462_vm11 = vcmp.gt.f32.partialorder %v14368_v0, 0.0  ;;  %3785 = vst [vmem:[%s13651_s5 + $0xb8] sm:$0xff] %v3721_v56  ;;  %3786 = vst [vmem:[%s13651_s5 + $0xc0] sm:$0xff] %v3722_v52 }
 0x26c   :  { %v3726_v38 = vsel %vm14460_vm7, %v8897_v33, %v14459_v22  ;;  %v3727_v11 = vsel %vm14462_vm11, %v14368_v0, %v14461_v51  ;;  %v14463_v14 = vld [vmem:[#allocation15_spill] sm:$0xff]  ;;  %vm14464_vm9 = vcmp.gt.f32.partialorder %v14370_v53, 0.0  ;;  %3787 = vst [vmem:[%s13651_s5 + $0xc8] sm:$0xff] %v3723_v27  ;;  %3788 = vst [vmem:[%s13651_s5 + $0xd0] sm:$0xff] %v3724_v21  ;;  %v14465_v0 = vld [vmem:[#allocation33_spill] sm:$0xff]  ;;  %vm14466_vm10 = vcmp.gt.f32.partialorder %v14372_v7, 0.0 }
 0x26d   :  { %v3728_v37 = vsel %vm14464_vm9, %v14370_v53, %v14463_v14  ;;  %v3729_v40 = vsel %vm14466_vm10, %v14372_v7, %v14465_v0  ;;  %v14467_v33 = vld [vmem:[#allocation27_spill] sm:$0xff]  ;;  %vm14468_vm7 = vcmp.gt.f32.partialorder %v14374_v62, 0.0  ;;  %vm14470_vm11 = vcmp.gt.f32.partialorder %v14376_v39, 0.0  ;;  %v14471_v34 = vld [vmem:[#allocation37_spill] sm:$0xff]  ;;  %3789 = vst [vmem:[%s13651_s5 + $0xd8] sm:$0xff] %v3725_v18  ;;  %3790 = vst [vmem:[%s13651_s5 + $0xe0] sm:$0xff] %v3726_v38 }
 0x26e   :  { %v3730_v53 = vsel %vm14468_vm7, %v14374_v62, %v14467_v33  ;;  %v14469_v30 = vld [vmem:[#allocation31_spill] sm:$0xff]  ;;  %vm14472_vm9 = vcmp.gt.f32.partialorder %v8921_v36, 0.0  ;;  %3791 = vst [vmem:[%s13651_s5 + $0xe8] sm:$0xff] %v3727_v11  ;;  %3792 = vst [vmem:[%s13651_s5 + $0xf0] sm:$0xff] %v3728_v37  ;;  %vm14474_vm10 = vcmp.gt.f32.partialorder %v14379_v43, 0.0  ;;  %vm14476_vm7 = vcmp.gt.f32.partialorder %v8929_v57, 0.0 }
 0x26f   :  { %v3731_v46 = vsel %vm14470_vm11, %v14376_v39, %v14469_v30  ;;  %v3732_v32 = vsel %vm14472_vm9, %v8921_v36, %v14471_v34  ;;  %v14473_v39 = vld [vmem:[#allocation41_spill] sm:$0xff]  ;;  %v14475_v7 = vld [vmem:[#allocation35_spill] sm:$0xff]  ;;  %vm14478_vm11 = vcmp.gt.f32.partialorder %v8933_v26, 0.0  ;;  %v14479_v3 = vld [vmem:[#allocation244_spill] sm:$0xff]  ;;  %vm14480_vm9 = vcmp.gt.f32.partialorder %v8937_v2, 0.0  ;;  %3793 = vst [vmem:[%s13651_s5 + $0xf8] sm:$0xff] %v3729_v40 }
 0x270   :  { %v3733_v36 = vsel %vm14474_vm10, %v14379_v43, %v14473_v39  ;;  %v3734_v62 = vsel %vm14476_vm7, %v8929_v57, %v14475_v7  ;;  %v14477_v42 = vld [vmem:[#allocation243_spill] sm:$0xff]  ;;  %v3736_v55 = vsel %vm14480_vm9, %v8937_v2, %v14479_v3  ;;  %3794 = vst [vmem:[%s13651_s5 + $0x100] sm:$0xff] %v3730_v53  ;;  %3795 = vst [vmem:[%s13651_s5 + $0x108] sm:$0xff] %v3731_v46  ;;  %v14481_v43 = vld [vmem:[#allocation245_spill] sm:$0xff]  ;;  %vm14482_vm10 = vcmp.gt.f32.partialorder %v8941_v10, 0.0 }
 0x271   :  { %v3735_v48 = vsel %vm14478_vm11, %v8933_v26, %v14477_v42  ;;  %3796 = vst [vmem:[%s13651_s5 + $0x110] sm:$0xff] %v3732_v32  ;;  %v3737_v57 = vsel %vm14482_vm10, %v8941_v10, %v14481_v43  ;;  %v14483_v26 = vld [vmem:[#allocation246_spill] sm:$0xff]  ;;  %vm14484_vm7 = vcmp.gt.f32.partialorder %v8945_v6, 0.0  ;;  %v14485_v19 = vld [vmem:[#allocation247_spill] sm:$0xff]  ;;  %vm14486_vm11 = vcmp.gt.f32.partialorder %v8949_v49, 0.0  ;;  %v14487_v50 = vld [vmem:[#allocation248_spill] sm:$0xff] }
 0x272   :  { %v3738_v2 = vsel %vm14484_vm7, %v8945_v6, %v14483_v26  ;;  %v3739_v63 = vsel %vm14486_vm11, %v8949_v49, %v14485_v19  ;;  %v14488_v16 = vld [vmem:[#allocation39_spill] sm:$0xff]  ;;  %3797 = vst [vmem:[%s13651_s5 + $0x118] sm:$0xff] %v3733_v36  ;;  %3798 = vst [vmem:[%s13651_s5 + $0x120] sm:$0xff] %v3734_v62  ;;  %v14490_v10 = vld [vmem:[#allocation249_spill] sm:$0xff]  ;;  %vm14494_vm7 = vcmp.gt.f32.partialorder %v8961_v61, 0.0 }
 0x273   :  { %vm14489_vm9 = vcmp.gt.f32.partialorder %v14488_v16, 0.0  ;;  %3799 = vst [vmem:[%s13651_s5 + $0x128] sm:$0xff] %v3735_v48  ;;  %3800 = vst [vmem:[%s13651_s5 + $0x130] sm:$0xff] %v3736_v55  ;;  %v14491_v6 = vld [vmem:[#allocation45_spill] sm:$0xff]  ;;  %v14493_v13 = vld [vmem:[#allocation250_spill] sm:$0xff] }
 0x274   :  { %v3740_v25 = vsel %vm14489_vm9, %v14488_v16, %v14487_v50  ;;  %vm14492_vm10 = vcmp.gt.f32.partialorder %v14491_v6, 0.0  ;;  %v3742_v60 = vsel %vm14494_vm7, %v8961_v61, %v14493_v13  ;;  %v14495_v56 = vld [vmem:[#allocation251_spill] sm:$0xff]  ;;  %v14496_v54 = vld [vmem:[#allocation49_spill] sm:$0xff]  ;;  %v14498_v8 = vld [vmem:[#allocation252_spill] sm:$0xff]  ;;  %vm14499_vm9 = vcmp.gt.f32.partialorder %v8969_v45, 0.0  ;;  %3801 = vst [vmem:[%s13651_s5 + $0x138] sm:$0xff] %v3737_v57 }
 0x275   :  { %v3741_v49 = vsel %vm14492_vm10, %v14491_v6, %v14490_v10  ;;  %vm14497_vm11 = vcmp.gt.f32.partialorder %v14496_v54, 0.0  ;;  %v3744_v27 = vsel %vm14499_vm9, %v8969_v45, %v14498_v8  ;;  %3802 = vst [vmem:[%s13651_s5 + $0x140] sm:$0xff] %v3738_v2  ;;  %3803 = vst [vmem:[%s13651_s5 + $0x148] sm:$0xff] %v3739_v63  ;;  %v14500_v61 = vld [vmem:[#allocation253_spill] sm:$0xff]  ;;  %v14501_v1 = vld [vmem:[#allocation254_spill] sm:$0xff] }
 0x276   :  { %v3743_v52 = vsel %vm14497_vm11, %v14496_v54, %v14495_v56  ;;  %3804 = vst [vmem:[%s13651_s5 + $0x150] sm:$0xff] %v3740_v25  ;;  %v3745_v45 = vsel %vm3608_vm14, %v8973_v44, %v14500_v61  ;;  %v3746_v21 = vsel %vm3609_vm15, %v8977_v41, %v14501_v1  ;;  %v14502_v35 = vld [vmem:[#allocation255_spill] sm:$0xff]  ;;  %v14503_v22 = vld [vmem:[#allocation256_spill] sm:$0xff]  ;;  %3805 = vst [vmem:[%s13651_s5 + $0x158] sm:$0xff] %v3741_v49  ;;  %vm14515_vm14 = vcmp.gt.f32.partialorder %v9023_v58, 0.0 }
 0x277   :  { %v3747_v18 = vsel %vm3610_vm13, %v8981_v20, %v14502_v35  ;;  %v3748_v38 = vsel %vm3611_vm12, %v8985_v47, %v14503_v22  ;;  %3806 = vst [vmem:[%s13651_s5 + $0x160] sm:$0xff] %v3742_v60  ;;  %3807 = vst [vmem:[%s13651_s5 + $0x168] sm:$0xff] %v3743_v52  ;;  %v14504_v44 = vld [vmem:[#allocation257_spill] sm:$0xff]  ;;  %v14505_v20 = vld [vmem:[#allocation258_spill] sm:$0xff]  ;;  %vm14511_vm12 = vcmp.gt.f32.partialorder %v9015_v24, 0.0  ;;  %vm14513_vm13 = vcmp.gt.f32.partialorder %v9019_v31, 0.0 }
 0x278   :  { %3808 = vst [vmem:[%s13651_s5 + $0x170] sm:$0xff] %v3744_v27  ;;  %v3749_v41 = vsel %vm3612_vm0, %v8991_v5, %v14504_v44  ;;  %v3750_v47 = vsel %vm3613_vm1, %v8995_v4, %v14505_v20  ;;  %v14506_v51 = vld [vmem:[#allocation259_spill] sm:$0xff]  ;;  %v14507_v14 = vld [vmem:[#allocation260_spill] sm:$0xff]  ;;  %3809 = vst [vmem:[%s13651_s5 + $0x178] sm:$0xff] %v3745_v45  ;;  %vm14518_vm15 = vcmp.gt.f32.partialorder %v9031_v12, 0.0  ;;  %vm14520_vm0 = vcmp.gt.f32.partialorder %v9035_v28, 0.0 }
 0x279   :  { %v3751_v11 = vsel %vm3614_vm2, %v8999_v9, %v14506_v51  ;;  %v3752_v37 = vsel %vm3615_vm3, %v9003_v59, %v14507_v14  ;;  %3810 = vst [vmem:[%s13651_s5 + $0x180] sm:$0xff] %v3746_v21  ;;  %3811 = vst [vmem:[%s13651_s5 + $0x188] sm:$0xff] %v3747_v18  ;;  %v14508_v5 = vld [vmem:[#allocation261_spill] sm:$0xff]  ;;  %v14509_v9 = vld [vmem:[#allocation262_spill] sm:$0xff] }
 0x27a   :  { %3812 = vst [vmem:[%s13651_s5 + $0x190] sm:$0xff] %v3748_v38  ;;  %v3753_v4 = vsel %vm3616_vm4, %v9007_v15, %v14508_v5  ;;  %v3754_v59 = vsel %vm3617_vm5, %v9011_v23, %v14509_v9  ;;  %v14510_v0 = vld [vmem:[#allocation263_spill] sm:$0xff]  ;;  %v14512_v33 = vld [vmem:[#allocation264_spill] sm:$0xff]  ;;  %3813 = vst [vmem:[%s13651_s5 + $0x198] sm:$0xff] %v3749_v41 }
 0x27b   :  { %v3755_v40 = vsel %vm14511_vm12, %v9015_v24, %v14510_v0  ;;  %v3756_v53 = vsel %vm14513_vm13, %v9019_v31, %v14512_v33  ;;  %3814 = vst [vmem:[%s13651_s5 + $0x1a0] sm:$0xff] %v3750_v47  ;;  %3815 = vst [vmem:[%s13651_s5 + $0x1a8] sm:$0xff] %v3751_v11  ;;  %v14514_v15 = vld [vmem:[#allocation265_spill] sm:$0xff]  ;;  %v14516_v24 = vld [vmem:[#allocation266_spill] sm:$0xff] }
 0x27c   :  { %3816 = vst [vmem:[%s13651_s5 + $0x1b0] sm:$0xff] %v3752_v37  ;;  %v3757_v23 = vsel %vm14515_vm14, %v9023_v58, %v14514_v15  ;;  %v3758_v31 = vsel %vm3621_vm8, %v9027_v17, %v14516_v24  ;;  %v14517_v30 = vld [vmem:[#allocation267_spill] sm:$0xff]  ;;  %v14519_v34 = vld [vmem:[#allocation268_spill] sm:$0xff]  ;;  %3817 = vst [vmem:[%s13651_s5 + $0x1b8] sm:$0xff] %v3753_v4 }
 0x27d   :  { %v3759_v46 = vsel %vm14518_vm15, %v9031_v12, %v14517_v30  ;;  %v3760_v32 = vsel %vm14520_vm0, %v9035_v28, %v14519_v34  ;;  %3818 = vst [vmem:[%s13651_s5 + $0x1c0] sm:$0xff] %v3754_v59  ;;  %3819 = vst [vmem:[%s13651_s5 + $0x1c8] sm:$0xff] %v3755_v40  ;;  %v14521_v58 = vld [vmem:[#allocation269_spill] sm:$0xff]  ;;  %v14522_v12 = vld [vmem:[#allocation6_spill] sm:$0xff] }
 0x27e   :  { %3820 = vst [vmem:[%s13651_s5 + $0x1d0] sm:$0xff] %v3756_v53  ;;  %v3761_v17 = vsel %vm3624_vm6, %v9039_v29, %v14521_v58  ;;  %3821 = vst [vmem:[%s13651_s5 + $0x1d8] sm:$0xff] %v3757_v23  ;;  %v14523_v28 = vld [vmem:[#allocation242_spill] sm:$0xff]  ;;  %v14525_v7 = vld [vmem:[#allocation4_spill] sm:$0xff] }
 0x27f   :  { %3822 = vst [vmem:[%s13651_s5 + $0x1e0] sm:$0xff] %v3758_v31  ;;  %3823 = vst [vmem:[%s13651_s5 + $0x1e8] sm:$0xff] %v3759_v46  ;;  %v9811_v29 = vmul.f32 %v14523_v28, %v14522_v12  ;;  %v14524_v39 = vld [vmem:[#allocation10_spill] sm:$0xff]  ;;  %v9819_v62 = vmul.f32 %v14525_v7, %v14523_v28  ;;  %v14526_v42 = vld [vmem:[#allocation8_spill] sm:$0xff] }
 0x280   :  { %3824 = vst [vmem:[%s13651_s5 + $0x1f0] sm:$0xff] %v3760_v32  ;;  %3825 = vst [vmem:[%s13651_s5 + $0x1f8] sm:$0xff] %v3761_v17  ;;  %v9815_v36 = vmul.f32 %v14523_v28, %v14524_v39  ;;  %v9823_v48 = vmul.f32 %v14526_v42, %v14523_v28  ;;  %v14527_v3 = vld [vmem:[#allocation14_spill] sm:$0xff]  ;;  %v14529_v26 = vld [vmem:[#allocation12_spill] sm:$0xff] }
 0x281   :  { %v9827_v55 = vmul.f32 %v14523_v28, %v14527_v3  ;;  %v14528_v43 = vld [vmem:[#allocation18_spill] sm:$0xff]  ;;  %v9835_v2 = vmul.f32 %v14529_v26, %v14523_v28  ;;  %v14530_v19 = vld [vmem:[#allocation16_spill] sm:$0xff] }
 0x282   :  { %v9831_v57 = vmul.f32 %v14523_v28, %v14528_v43  ;;  %v9839_v63 = vmul.f32 %v14530_v19, %v14523_v28  ;;  %v14531_v50 = vld [vmem:[#allocation22_spill] sm:$0xff]  ;;  %v14533_v6 = vld [vmem:[#allocation20_spill] sm:$0xff] }
 0x283   :  { %v9843_v16 = vmul.f32 %v14523_v28, %v14531_v50  ;;  %v14532_v25 = vld [vmem:[#allocation26_spill] sm:$0xff]  ;;  %v9851_v49 = vmul.f32 %v14533_v6, %v14523_v28  ;;  %v14534_v13 = vld [vmem:[#allocation24_spill] sm:$0xff] }
 0x284   :  { %v9847_v10 = vmul.f32 %v14523_v28, %v14532_v25  ;;  %v9855_v60 = vmul.f32 %v14534_v13, %v14523_v28  ;;  %v14535_v56 = vld [vmem:[#allocation30_spill] sm:$0xff]  ;;  %v14537_v27 = vld [vmem:[#allocation28_spill] sm:$0xff] }
 0x285   :  { %v9859_v54 = vmul.f32 %v14523_v28, %v14535_v56  ;;  %v14536_v52 = vld [vmem:[#allocation34_spill] sm:$0xff]  ;;  %v9867_v61 = vmul.f32 %v14537_v27, %v14523_v28  ;;  %v14538_v45 = vld [vmem:[#allocation32_spill] sm:$0xff] }
 0x286   :  { %v9863_v8 = vmul.f32 %v14523_v28, %v14536_v52  ;;  %v9871_v1 = vmul.f32 %v14538_v45, %v14523_v28  ;;  %v14539_v21 = vld [vmem:[#allocation38_spill] sm:$0xff]  ;;  %v14541_v38 = vld [vmem:[#allocation36_spill] sm:$0xff] }
 0x287   :  { %v9875_v35 = vmul.f32 %v14523_v28, %v14539_v21  ;;  %v14540_v18 = vld [vmem:[#allocation42_spill] sm:$0xff]  ;;  %v9883_v44 = vmul.f32 %v14541_v38, %v14523_v28  ;;  %v14542_v41 = vld [vmem:[#allocation40_spill] sm:$0xff] }
 0x288   :  { %v9879_v22 = vmul.f32 %v14523_v28, %v14540_v18  ;;  %v9887_v20 = vmul.f32 %v14542_v41, %v14523_v28  ;;  %v14543_v47 = vld [vmem:[#allocation46_spill] sm:$0xff]  ;;  %v14545_v37 = vld [vmem:[#allocation44_spill] sm:$0xff] }
 0x289   :  { %v9891_v51 = vmul.f32 %v14523_v28, %v14543_v47  ;;  %v14544_v11 = vld [vmem:[#allocation50_spill] sm:$0xff]  ;;  %v9899_v5 = vmul.f32 %v14545_v37, %v14523_v28  ;;  %v14546_v4 = vld [vmem:[#allocation48_spill] sm:$0xff] }
 0x28a   :  { %v9895_v14 = vmul.f32 %v14523_v28, %v14544_v11  ;;  %v9903_v9 = vmul.f32 %v14546_v4, %v14523_v28  ;;  %v14547_v59 = vld [vmem:[#allocation54_spill] sm:$0xff]  ;;  %v14549_v53 = vld [vmem:[#allocation52_spill] sm:$0xff] }
 0x28b   :  { %v9907_v0 = vmul.f32 %v14523_v28, %v14547_v59  ;;  %v14548_v40 = vld [vmem:[#allocation58_spill] sm:$0xff]  ;;  %v9915_v15 = vmul.f32 %v14549_v53, %v14523_v28  ;;  %v14550_v23 = vld [vmem:[#allocation56_spill] sm:$0xff] }
 0x28c   :  { %v9911_v33 = vmul.f32 %v14523_v28, %v14548_v40  ;;  %v9919_v24 = vmul.f32 %v14550_v23, %v14523_v28  ;;  %v14551_v31 = vld [vmem:[#allocation62_spill] sm:$0xff]  ;;  %v14553_v32 = vld [vmem:[#allocation60_spill] sm:$0xff]  ;;  %v14567_v40 = vld [vmem:[#allocation93_spill] sm:$0xff] }
 0x28d   :  { %v9923_v30 = vmul.f32 %v14523_v28, %v14551_v31  ;;  %v14552_v46 = vld [vmem:[#allocation66_spill] sm:$0xff]  ;;  %v9931_v58 = vmul.f32 %v14553_v32, %v14523_v28  ;;  %v14554_v17 = vld [vmem:[#allocation64_spill] sm:$0xff]  ;;  %v9987_v53 = vmul.f32 %v14523_v28, %v14567_v40  ;;  %v14568_v23 = vld [vmem:[#allocation97_spill] sm:$0xff] }
 0x28e   :  { %v9927_v34 = vmul.f32 %v14523_v28, %v14552_v46  ;;  %v9935_v12 = vmul.f32 %v14554_v17, %v14523_v28  ;;  %v14555_v39 = vld [vmem:[#allocation70_spill] sm:$0xff]  ;;  %v14557_v43 = vld [vmem:[#allocation68_spill] sm:$0xff]  ;;  %v9991_v31 = vmul.f32 %v14523_v28, %v14568_v23  ;;  %v14569_v46 = vld [vmem:[#allocation91_spill] sm:$0xff] }
 0x28f   :  { %v9939_v7 = vmul.f32 %v14523_v28, %v14555_v39  ;;  %v14556_v42 = vld [vmem:[#allocation74_spill] sm:$0xff]  ;;  %v9947_v26 = vmul.f32 %v14557_v43, %v14523_v28  ;;  %v14558_v19 = vld [vmem:[#allocation72_spill] sm:$0xff]  ;;  %v9995_v32 = vmul.f32 %v14569_v46, %v14523_v28  ;;  %v14570_v17 = vld [vmem:[#allocation95_spill] sm:$0xff] }
 0x290   :  { %v9943_v3 = vmul.f32 %v14523_v28, %v14556_v42  ;;  %v9951_v50 = vmul.f32 %v14558_v19, %v14523_v28  ;;  %v14559_v25 = vld [vmem:[#allocation78_spill] sm:$0xff]  ;;  %v14561_v52 = vld [vmem:[#allocation76_spill] sm:$0xff]  ;;  %v9999_v39 = vmul.f32 %v14570_v17, %v14523_v28  ;;  %v14571_v42 = vld [vmem:[#allocation99_spill] sm:$0xff] }
 0x291   :  { %v9955_v6 = vmul.f32 %v14523_v28, %v14559_v25  ;;  %v14560_v13 = vld [vmem:[#allocation82_spill] sm:$0xff]  ;;  %v9963_v27 = vmul.f32 %v14561_v52, %v14523_v28  ;;  %v14562_v45 = vld [vmem:[#allocation80_spill] sm:$0xff]  ;;  %v10003_v43 = vmul.f32 %v14523_v28, %v14571_v42  ;;  %v14572_v19 = vld [vmem:[#allocation101_spill] sm:$0xff] }
 0x292   :  { %v9959_v56 = vmul.f32 %v14523_v28, %v14560_v13  ;;  %v9967_v21 = vmul.f32 %v14562_v45, %v14523_v28  ;;  %v14563_v18 = vld [vmem:[#allocation86_spill] sm:$0xff]  ;;  %v14565_v11 = vld [vmem:[#allocation84_spill] sm:$0xff]  ;;  %v10007_v25 = vmul.f32 %v14523_v28, %v14572_v19  ;;  %v14583_v19 = vld [vmem:[#allocation107_spill] sm:$0xff] }
 0x293   :  { %v9971_v38 = vmul.f32 %v14523_v28, %v14563_v18  ;;  %v14564_v41 = vld [vmem:[#allocation90_spill] sm:$0xff]  ;;  %v9979_v37 = vmul.f32 %v14565_v11, %v14523_v28  ;;  %v14566_v4 = vld [vmem:[#allocation88_spill] sm:$0xff] }
 0x294   :  { %v9975_v47 = vmul.f32 %v14523_v28, %v14564_v41  ;;  %v9983_v59 = vmul.f32 %v14566_v4, %v14523_v28  ;;  %v14573_v13 = vld [vmem:[#allocation98_spill] sm:$0xff]  ;;  %v14574_v45 = vld [vmem:[#allocation100_spill] sm:$0xff]  ;;  %v14575_v41 = vld [vmem:[#allocation103_spill] sm:$0xff] }
 0x295   :  { %v10011_v52 = vmul.f32 %v14573_v13, %v14523_v28  ;;  %v10015_v18 = vmul.f32 %v14574_v45, %v14523_v28  ;;  %v10019_v11 = vmul.f32 %v14523_v28, %v14575_v41  ;;  %v14577_v4 = vld [vmem:[#allocation105_spill] sm:$0xff]  ;;  %v14579_v23 = vld [vmem:[#allocation102_spill] sm:$0xff]  ;;  %v14581_v17 = vld [vmem:[#allocation104_spill] sm:$0xff]  ;;  %v10035_v13 = vmul.f32 %v14523_v28, %v14583_v19 }
 0x296   :  { %v10023_v40 = vmul.f32 %v14523_v28, %v14577_v4  ;;  %v10027_v46 = vmul.f32 %v14579_v23, %v14523_v28  ;;  %v10031_v42 = vmul.f32 %v14581_v17, %v14523_v28  ;;  %v14585_v45 = vld [vmem:[#allocation109_spill] sm:$0xff] }
 0x297   :  { %14576 = vst [vmem:[#allocation47_spill] sm:$0xff] %v10019_v11  ;;  %14584 = vst [vmem:[#allocation55_spill] sm:$0xff] %v10035_v13  ;;  %v10039_v41 = vmul.f32 %v14523_v28, %v14585_v45  ;;  %v14587_v11 = vld [vmem:[#allocation106_spill] sm:$0xff] }
 0x298   :  { %14578 = vst [vmem:[#allocation53_spill] sm:$0xff] %v10023_v40  ;;  %14580 = vst [vmem:[#allocation57_spill] sm:$0xff] %v10027_v46  ;;  %v10043_v4 = vmul.f32 %v14587_v11, %v14523_v28  ;;  %v14589_v40 = vld [vmem:[#allocation108_spill] sm:$0xff]  ;;  %v14592_v13 = vld [vmem:[#allocation110_spill] sm:$0xff] }
 0x299   :  { %14582 = vst [vmem:[#allocation51_spill] sm:$0xff] %v10031_v42  ;;  %14586 = vst [vmem:[#allocation61_spill] sm:$0xff] %v10039_v41  ;;  %v10047_v23 = vmul.f32 %v14589_v40, %v14523_v28  ;;  %v14590_v46 = vld [vmem:[#allocation112_spill] sm:$0xff]  ;;  %v10059_v45 = vmul.f32 %v14592_v13, %v14523_v28  ;;  %v14593_v41 = vld [vmem:[#allocation114_spill] sm:$0xff] }
 0x29a   :  { %14588 = vst [vmem:[#allocation65_spill] sm:$0xff] %v10043_v4  ;;  %v10051_v17 = vmul.f32 %v14523_v28, %v14590_v46  ;;  %v14591_v42 = vld [vmem:[#allocation116_spill] sm:$0xff]  ;;  %v10063_v11 = vmul.f32 %v14593_v41, %v14523_v28  ;;  %v14594_v4 = vld [vmem:[#allocation5_spill] sm:$0xff] }
 0x29b   :  { %v10055_v19 = vmul.f32 %v14523_v28, %v14591_v42  ;;  %v10067_v40 = vadd.f32 %v9811_v29, %v14594_v4  ;;  %v10071_v46 = vadd.f32 %v9815_v36, %v14594_v4  ;;  %v10075_v42 = vadd.f32 %v9819_v62, %v14594_v4 }
 0x29c   :  { %v10079_v13 = vadd.f32 %v9823_v48, %v14594_v4  ;;  %v10083_v41 = vadd.f32 %v9827_v55, %v14594_v4  ;;  %v10087_v29 = vadd.f32 %v9831_v57, %v14594_v4  ;;  %v10091_v36 = vadd.f32 %v9835_v2, %v14594_v4 }
 0x29d   :  { %v10095_v62 = vadd.f32 %v9839_v63, %v14594_v4  ;;  %v10099_v48 = vadd.f32 %v9843_v16, %v14594_v4  ;;  %v10103_v55 = vadd.f32 %v9847_v10, %v14594_v4  ;;  %v10107_v57 = vadd.f32 %v9851_v49, %v14594_v4 }
 0x29e   :  { %v10111_v2 = vadd.f32 %v9855_v60, %v14594_v4  ;;  %v10115_v63 = vadd.f32 %v9859_v54, %v14594_v4  ;;  %v10119_v16 = vadd.f32 %v9863_v8, %v14594_v4  ;;  %v10123_v10 = vadd.f32 %v9867_v61, %v14594_v4  ;;  %v14610_v28 = vld [vmem:[#allocation47_spill] sm:$0xff] }
 0x29f   :  { %v10127_v49 = vadd.f32 %v9871_v1, %v14594_v4  ;;  %v10131_v60 = vadd.f32 %v9875_v35, %v14594_v4  ;;  %v10135_v54 = vadd.f32 %v9879_v22, %v14594_v4  ;;  %v10139_v8 = vadd.f32 %v9883_v44, %v14594_v4 }
 0x2a0   :  { %v10143_v61 = vadd.f32 %v9887_v20, %v14594_v4  ;;  %v10147_v1 = vadd.f32 %v9891_v51, %v14594_v4  ;;  %v10151_v35 = vadd.f32 %v9895_v14, %v14594_v4  ;;  %v10155_v22 = vadd.f32 %v9899_v5, %v14594_v4 }
 0x2a1   :  { %v10159_v44 = vadd.f32 %v9903_v9, %v14594_v4  ;;  %v10163_v20 = vadd.f32 %v9907_v0, %v14594_v4  ;;  %v10167_v51 = vadd.f32 %v9911_v33, %v14594_v4  ;;  %v10171_v14 = vadd.f32 %v9915_v15, %v14594_v4 }
 0x2a2   :  { %v10175_v5 = vadd.f32 %v9919_v24, %v14594_v4  ;;  %v10179_v9 = vadd.f32 %v9923_v30, %v14594_v4  ;;  %v10183_v0 = vadd.f32 %v9927_v34, %v14594_v4  ;;  %v10187_v33 = vadd.f32 %v9931_v58, %v14594_v4 }
 0x2a3   :  { %14595 = vst [vmem:[#allocation59_spill] sm:$0xff] %v10163_v20  ;;  %14596 = vst [vmem:[#allocation63_spill] sm:$0xff] %v10167_v51  ;;  %v10191_v15 = vadd.f32 %v9935_v12, %v14594_v4  ;;  %v10195_v24 = vadd.f32 %v9939_v7, %v14594_v4  ;;  %v10199_v30 = vadd.f32 %v9943_v3, %v14594_v4  ;;  %vm4018_vm1 = vcmp.gt.f32.partialorder %v10067_v40, 0.0 }
 0x2a4   :  { %14597 = vst [vmem:[#allocation21_spill] sm:$0xff] %v10171_v14  ;;  %14598 = vst [vmem:[#allocation69_spill] sm:$0xff] %v10175_v5  ;;  %v10203_v34 = vadd.f32 %v9947_v26, %v14594_v4  ;;  %v10207_v58 = vadd.f32 %v9951_v50, %v14594_v4  ;;  %v10211_v12 = vadd.f32 %v9955_v6, %v14594_v4  ;;  %vm4019_vm2 = vcmp.gt.f32.partialorder %v10071_v46, 0.0 }
 0x2a5   :  { %14599 = vst [vmem:[#allocation25_spill] sm:$0xff] %v10183_v0  ;;  %14600 = vst [vmem:[#allocation73_spill] sm:$0xff] %v10187_v33  ;;  %v10215_v7 = vadd.f32 %v9959_v56, %v14594_v4  ;;  %v10219_v3 = vadd.f32 %v9963_v27, %v14594_v4  ;;  %v10223_v26 = vadd.f32 %v9967_v21, %v14594_v4  ;;  %vm4020_vm3 = vcmp.gt.f32.partialorder %v10075_v42, 0.0 }
 0x2a6   :  { %14601 = vst [vmem:[#allocation19_spill] sm:$0xff] %v10207_v58  ;;  %v10227_v50 = vadd.f32 %v9971_v38, %v14594_v4  ;;  %v10231_v6 = vadd.f32 %v9975_v47, %v14594_v4  ;;  %v10235_v56 = vadd.f32 %v9979_v37, %v14594_v4  ;;  %v10239_v27 = vadd.f32 %v9983_v59, %v14594_v4 }
 0x2a7   :  { %v10243_v21 = vadd.f32 %v9987_v53, %v14594_v4  ;;  %v10247_v38 = vadd.f32 %v9991_v31, %v14594_v4  ;;  %v10251_v47 = vadd.f32 %v9995_v32, %v14594_v4  ;;  %v10255_v37 = vadd.f32 %v9999_v39, %v14594_v4 }
 0x2a8   :  { %14602 = vst [vmem:[#allocation67_spill] sm:$0xff] %v10235_v56  ;;  %14603 = vst [vmem:[#allocation71_spill] sm:$0xff] %v10239_v27  ;;  %v10259_v59 = vadd.f32 %v10003_v43, %v14594_v4  ;;  %v10263_v53 = vadd.f32 %v10007_v25, %v14594_v4  ;;  %v10267_v31 = vadd.f32 %v10011_v52, %v14594_v4  ;;  %vm4021_vm4 = vcmp.gt.f32.partialorder %v10079_v13, 0.0 }
 0x2a9   :  { %14604 = vst [vmem:[#allocation77_spill] sm:$0xff] %v10247_v38  ;;  %14605 = vst [vmem:[#allocation81_spill] sm:$0xff] %v10255_v37  ;;  %v10271_v32 = vadd.f32 %v10015_v18, %v14594_v4  ;;  %v10275_v39 = vadd.f32 %v14610_v28, %v14594_v4  ;;  %v14612_v37 = vld [vmem:[#allocation53_spill] sm:$0xff]  ;;  %vm4022_vm5 = vcmp.gt.f32.partialorder %v10083_v41, 0.0  ;;  %vm4023_vm8 = vcmp.gt.f32.partialorder %v10087_v29, 0.0 }
 0x2aa   :  { %14606 = vst [vmem:[#allocation23_spill] sm:$0xff] %v10259_v59  ;;  %14607 = vst [vmem:[#allocation75_spill] sm:$0xff] %v10263_v53  ;;  %v10279_v43 = vadd.f32 %v14612_v37, %v14594_v4  ;;  %v14613_v59 = vld [vmem:[#allocation57_spill] sm:$0xff]  ;;  %v14614_v53 = vld [vmem:[#allocation51_spill] sm:$0xff]  ;;  %vm4024_vm6 = vcmp.gt.f32.partialorder %v10091_v36, 0.0  ;;  %vm4025_vm10 = vcmp.gt.f32.partialorder %v10095_v62, 0.0 }
 0x2ab   :  { %14608 = vst [vmem:[#allocation79_spill] sm:$0xff] %v10267_v31  ;;  %14609 = vst [vmem:[#allocation85_spill] sm:$0xff] %v10271_v32  ;;  %v10283_v25 = vadd.f32 %v14613_v59, %v14594_v4  ;;  %v10287_v52 = vadd.f32 %v14614_v53, %v14594_v4  ;;  %v14615_v31 = vld [vmem:[#allocation55_spill] sm:$0xff]  ;;  %v14616_v32 = vld [vmem:[#allocation61_spill] sm:$0xff]  ;;  %v10303_v59 = vadd.f32 %v10047_v23, %v14594_v4  ;;  %vm4026_vm7 = vcmp.gt.f32.partialorder %v10099_v48, 0.0 }
 0x2ac   :  { %14611 = vst [vmem:[#allocation89_spill] sm:$0xff] %v10275_v39  ;;  %v10291_v18 = vadd.f32 %v14615_v31, %v14594_v4  ;;  %v10295_v28 = vadd.f32 %v14616_v32, %v14594_v4  ;;  %v14617_v39 = vld [vmem:[#allocation65_spill] sm:$0xff]  ;;  %v10307_v53 = vadd.f32 %v10051_v17, %v14594_v4  ;;  %v10311_v31 = vadd.f32 %v10055_v19, %v14594_v4 }
 0x2ad   :  { %v10299_v37 = vadd.f32 %v14617_v39, %v14594_v4  ;;  %v10315_v32 = vadd.f32 %v10059_v45, %v14594_v4  ;;  %v10319_v39 = vadd.f32 %v10063_v11, %v14594_v4  ;;  %vm4027_vm11 = vcmp.gt.f32.partialorder %v10103_v55, 0.0 }
 0x2ae   :  { %vm4028_vm9 = vcmp.gt.f32.partialorder %v10107_v57, 0.0  ;;  %vm4029_vm12 = vcmp.gt.f32.partialorder %v10111_v2, 0.0 }
 0x2af   :  { %14618 = vst [vmem:[#allocation83_spill] sm:$0xff] %v10299_v37  ;;  %v14619_v37 = vld [vmem:[#allocation43_spill] sm:$0xff] }
 0x2b0   :  { %v10323_v23 = vmul.f32 %v10067_v40, %v14619_v37  ;;  %v10327_v17 = vmul.f32 %v10071_v46, %v14619_v37  ;;  %v10331_v19 = vmul.f32 %v10075_v42, %v14619_v37  ;;  %v10335_v45 = vmul.f32 %v10079_v13, %v14619_v37 }
 0x2b1   :  { %v10339_v11 = vmul.f32 %v10083_v41, %v14619_v37  ;;  %v10343_v4 = vmul.f32 %v10087_v29, %v14619_v37 }
 0x2b2   :  { %14620 = vst [vmem:[#allocation87_spill] sm:$0xff] %v10323_v23  ;;  %14621 = vst [vmem:[#allocation92_spill] sm:$0xff] %v10327_v17  ;;  %v10347_v23 = vmul.f32 %v10091_v36, %v14619_v37  ;;  %v10351_v17 = vmul.f32 %v10095_v62, %v14619_v37 }
 0x2b3   :  { %14622 = vst [vmem:[#allocation96_spill] sm:$0xff] %v10331_v19  ;;  %14623 = vst [vmem:[#allocation29_spill] sm:$0xff] %v10335_v45  ;;  %v10355_v19 = vmul.f32 %v10099_v48, %v14619_v37  ;;  %v10359_v45 = vmul.f32 %v10103_v55, %v14619_v37 }
 0x2b4   :  { %14624 = vst [vmem:[#allocation94_spill] sm:$0xff] %v10339_v11  ;;  %14625 = vst [vmem:[#allocation9_spill] sm:$0xff] %v10343_v4  ;;  %v10363_v11 = vmul.f32 %v10107_v57, %v14619_v37  ;;  %v10367_v4 = vmul.f32 %v10111_v2, %v14619_v37 }
 0x2b5   :  { %14626 = vst [vmem:[#allocation3_spill] sm:$0xff] %v10347_v23  ;;  %14627 = vst [vmem:[#allocation7_spill] sm:$0xff] %v10351_v17  ;;  %v10371_v23 = vmul.f32 %v10115_v63, %v14619_v37  ;;  %v10375_v17 = vmul.f32 %v10119_v16, %v14619_v37 }
 0x2b6   :  { %14628 = vst [vmem:[#allocation13_spill] sm:$0xff] %v10355_v19  ;;  %14629 = vst [vmem:[#allocation17_spill] sm:$0xff] %v10359_v45  ;;  %v10379_v19 = vmul.f32 %v10123_v10, %v14619_v37  ;;  %v10383_v45 = vmul.f32 %v10127_v49, %v14619_v37 }
 0x2b7   :  { %14630 = vst [vmem:[#allocation11_spill] sm:$0xff] %v10363_v11  ;;  %14631 = vst [vmem:[#allocation15_spill] sm:$0xff] %v10367_v4  ;;  %v10387_v11 = vmul.f32 %v10131_v60, %v14619_v37  ;;  %v10391_v4 = vmul.f32 %v10135_v54, %v14619_v37 }
 0x2b8   :  { %14632 = vst [vmem:[#allocation33_spill] sm:$0xff] %v10371_v23  ;;  %14633 = vst [vmem:[#allocation27_spill] sm:$0xff] %v10383_v45  ;;  %v10395_v23 = vmul.f32 %v10139_v8, %v14619_v37  ;;  %v10402_v45 = vmul.f32 %v10143_v61, %v14619_v37 }
 0x2b9   :  { %14634 = vst [vmem:[#allocation31_spill] sm:$0xff] %v10387_v11  ;;  %14635 = vst [vmem:[#allocation37_spill] sm:$0xff] %v10391_v4  ;;  %v10406_v11 = vmul.f32 %v10147_v1, %v14619_v37  ;;  %v10410_v4 = vmul.f32 %v10151_v35, %v14619_v37 }
 0x2ba   :  { %14636 = vst [vmem:[#allocation41_spill] sm:$0xff] %v10395_v23  ;;  %14637 = vst [vmem:[#allocation35_spill] sm:$0xff] %v10402_v45  ;;  %v10414_v23 = vmul.f32 %v10155_v22, %v14619_v37  ;;  %v10422_v45 = vmul.f32 %v10159_v44, %v14619_v37 }
 0x2bb   :  { %14638 = vst [vmem:[#allocation243_spill] sm:$0xff] %v10406_v11  ;;  %14639 = vst [vmem:[#allocation244_spill] sm:$0xff] %v10410_v4  ;;  %v10426_v11 = vmul.f32 %v10163_v20, %v14619_v37  ;;  %v10430_v4 = vmul.f32 %v10167_v51, %v14619_v37 }
 0x2bc   :  { %14640 = vst [vmem:[#allocation245_spill] sm:$0xff] %v10414_v23  ;;  %14641 = vst [vmem:[#allocation246_spill] sm:$0xff] %v10422_v45  ;;  %v10434_v23 = vmul.f32 %v10171_v14, %v14619_v37  ;;  %v10442_v45 = vmul.f32 %v10175_v5, %v14619_v37 }
 0x2bd   :  { %14642 = vst [vmem:[#allocation247_spill] sm:$0xff] %v10426_v11  ;;  %14643 = vst [vmem:[#allocation248_spill] sm:$0xff] %v10430_v4  ;;  %v10446_v11 = vmul.f32 %v10179_v9, %v14619_v37  ;;  %v10450_v4 = vmul.f32 %v10183_v0, %v14619_v37 }
 0x2be   :  { %14644 = vst [vmem:[#allocation39_spill] sm:$0xff] %v10434_v23  ;;  %14645 = vst [vmem:[#allocation249_spill] sm:$0xff] %v10442_v45  ;;  %v10454_v23 = vmul.f32 %v10187_v33, %v14619_v37  ;;  %v10462_v45 = vmul.f32 %v10191_v15, %v14619_v37 }
 0x2bf   :  { %14646 = vst [vmem:[#allocation45_spill] sm:$0xff] %v10446_v11  ;;  %14647 = vst [vmem:[#allocation250_spill] sm:$0xff] %v10450_v4  ;;  %v10466_v11 = vmul.f32 %v10195_v24, %v14619_v37  ;;  %v10470_v4 = vmul.f32 %v10199_v30, %v14619_v37 }
 0x2c0   :  { %14648 = vst [vmem:[#allocation251_spill] sm:$0xff] %v10454_v23  ;;  %14649 = vst [vmem:[#allocation49_spill] sm:$0xff] %v10462_v45  ;;  %v10474_v23 = vmul.f32 %v10203_v34, %v14619_v37  ;;  %v10482_v45 = vmul.f32 %v10207_v58, %v14619_v37 }
 0x2c1   :  { %14650 = vst [vmem:[#allocation252_spill] sm:$0xff] %v10466_v11  ;;  %14651 = vst [vmem:[#allocation253_spill] sm:$0xff] %v10470_v4  ;;  %v10486_v11 = vmul.f32 %v10211_v12, %v14619_v37  ;;  %v10490_v4 = vmul.f32 %v10215_v7, %v14619_v37 }
 0x2c2   :  { %14652 = vst [vmem:[#allocation254_spill] sm:$0xff] %v10474_v23  ;;  %14653 = vst [vmem:[#allocation255_spill] sm:$0xff] %v10482_v45  ;;  %v10494_v23 = vmul.f32 %v10219_v3, %v14619_v37  ;;  %v10502_v45 = vmul.f32 %v10223_v26, %v14619_v37 }
 0x2c3   :  { %14654 = vst [vmem:[#allocation256_spill] sm:$0xff] %v10486_v11  ;;  %14655 = vst [vmem:[#allocation257_spill] sm:$0xff] %v10490_v4  ;;  %v10506_v11 = vmul.f32 %v10227_v50, %v14619_v37  ;;  %v10510_v4 = vmul.f32 %v10231_v6, %v14619_v37 }
 0x2c4   :  { %14656 = vst [vmem:[#allocation258_spill] sm:$0xff] %v10494_v23  ;;  %14657 = vst [vmem:[#allocation259_spill] sm:$0xff] %v10502_v45  ;;  %v10514_v23 = vmul.f32 %v10235_v56, %v14619_v37  ;;  %v10522_v45 = vmul.f32 %v10239_v27, %v14619_v37  ;;  %v14690_v56 = vld [vmem:[#allocation92_spill] sm:$0xff] }
 0x2c5   :  { %14658 = vst [vmem:[#allocation260_spill] sm:$0xff] %v10506_v11  ;;  %14659 = vst [vmem:[#allocation261_spill] sm:$0xff] %v10510_v4  ;;  %v10526_v11 = vmul.f32 %v10243_v21, %v14619_v37  ;;  %v10530_v4 = vmul.f32 %v10247_v38, %v14619_v37  ;;  %v14691_v27 = vld [vmem:[#allocation96_spill] sm:$0xff] }
 0x2c6   :  { %14660 = vst [vmem:[#allocation262_spill] sm:$0xff] %v10514_v23  ;;  %14661 = vst [vmem:[#allocation263_spill] sm:$0xff] %v10522_v45  ;;  %v10534_v23 = vmul.f32 %v10251_v47, %v14619_v37  ;;  %v14665_v45 = vld [vmem:[#allocation81_spill] sm:$0xff]  ;;  %v4148_v38 = vsel %vm4020_vm3, %v10075_v42, %v14691_v27  ;;  %v14695_v27 = vld [vmem:[#allocation3_spill] sm:$0xff]  ;;  %vm4071_vm3 = vcmp.gt.f32.partialorder %v10279_v43, 0.0 }
 0x2c7   :  { %14662 = vst [vmem:[#allocation264_spill] sm:$0xff] %v10526_v11  ;;  %14663 = vst [vmem:[#allocation265_spill] sm:$0xff] %v10530_v4  ;;  %v10542_v14 = vmul.f32 %v14665_v45, %v14619_v37  ;;  %v14667_v11 = vld [vmem:[#allocation23_spill] sm:$0xff]  ;;  %vm4065_vm15 = vcmp.gt.f32.partialorder %v14665_v45, 0.0 }
 0x2c8   :  { %14664 = vst [vmem:[#allocation266_spill] sm:$0xff] %v10534_v23  ;;  %v10546_v51 = vmul.f32 %v14667_v11, %v14619_v37  ;;  %v14669_v4 = vld [vmem:[#allocation75_spill] sm:$0xff]  ;;  %vm4066_vm0 = vcmp.gt.f32.partialorder %v14667_v11, 0.0  ;;  %5761 = vst [vmem:[%s13651_s5 + $0x210] sm:$0xff] %v4148_v38 }
 0x2c9   :  { %14666 = vst [vmem:[#allocation267_spill] sm:$0xff] %v10542_v14  ;;  %v10550_v20 = vmul.f32 %v14669_v4, %v14619_v37  ;;  %v14671_v23 = vld [vmem:[#allocation79_spill] sm:$0xff]  ;;  %v14673_v14 = vld [vmem:[#allocation85_spill] sm:$0xff]  ;;  %vm4067_vm14 = vcmp.gt.f32.partialorder %v14669_v4, 0.0 }
 0x2ca   :  { %14668 = vst [vmem:[#allocation268_spill] sm:$0xff] %v10546_v51  ;;  %v10554_v5 = vmul.f32 %v14671_v23, %v14619_v37  ;;  %v10562_v33 = vmul.f32 %v14673_v14, %v14619_v37  ;;  %v14675_v51 = vld [vmem:[#allocation89_spill] sm:$0xff]  ;;  %vm4068_vm13 = vcmp.gt.f32.partialorder %v14671_v23, 0.0  ;;  %v14699_v38 = vld [vmem:[#allocation11_spill] sm:$0xff] }
 0x2cb   :  { %14670 = vst [vmem:[#allocation269_spill] sm:$0xff] %v10550_v20  ;;  %v10566_v0 = vmul.f32 %v14675_v51, %v14619_v37  ;;  %v10570_v20 = vmul.f32 %v10279_v43, %v14619_v37 }
 0x2cc   :  { %14672 = vst [vmem:[#allocation6_spill] sm:$0xff] %v10554_v5  ;;  %14674 = vst [vmem:[#allocation10_spill] sm:$0xff] %v10562_v33  ;;  %v10574_v5 = vmul.f32 %v10283_v25, %v14619_v37  ;;  %v10582_v33 = vmul.f32 %v10287_v52, %v14619_v37 }
 0x2cd   :  { %14676 = vst [vmem:[#allocation4_spill] sm:$0xff] %v10566_v0  ;;  %14677 = vst [vmem:[#allocation8_spill] sm:$0xff] %v10570_v20  ;;  %v10586_v0 = vmul.f32 %v10291_v18, %v14619_v37  ;;  %v10590_v20 = vmul.f32 %v10295_v28, %v14619_v37 }
 0x2ce   :  { %14678 = vst [vmem:[#allocation14_spill] sm:$0xff] %v10574_v5  ;;  %14679 = vst [vmem:[#allocation18_spill] sm:$0xff] %v10582_v33  ;;  %v14682_v5 = vld [vmem:[#allocation83_spill] sm:$0xff]  ;;  %v10602_v33 = vmul.f32 %v10303_v59, %v14619_v37 }
 0x2cf   :  { %14680 = vst [vmem:[#allocation12_spill] sm:$0xff] %v10586_v0  ;;  %14681 = vst [vmem:[#allocation16_spill] sm:$0xff] %v10590_v20  ;;  %v10594_v58 = vmul.f32 %v14682_v5, %v14619_v37  ;;  %v10606_v0 = vmul.f32 %v10307_v53, %v14619_v37  ;;  %v10610_v20 = vmul.f32 %v10311_v31, %v14619_v37 }
 0x2d0   :  { %14684 = vst [vmem:[#allocation26_spill] sm:$0xff] %v10602_v33  ;;  %v10622_v33 = vmul.f32 %v10319_v39, %v14619_v37 }
 0x2d1   :  { %14683 = vst [vmem:[#allocation22_spill] sm:$0xff] %v10594_v58  ;;  %14685 = vst [vmem:[#allocation20_spill] sm:$0xff] %v10606_v0  ;;  %v10614_v58 = vmul.f32 %v10315_v32, %v14619_v37  ;;  %v14689_v0 = vld [vmem:[#allocation87_spill] sm:$0xff]  ;;  %v14692_v37 = vld [vmem:[#allocation29_spill] sm:$0xff] }
 0x2d2   :  { %14686 = vst [vmem:[#allocation24_spill] sm:$0xff] %v10610_v20  ;;  %14688 = vst [vmem:[#allocation34_spill] sm:$0xff] %v10622_v33  ;;  %v4146_v20 = vsel %vm4018_vm1, %v10067_v40, %v14689_v0  ;;  %v4149_v40 = vsel %vm4021_vm4, %v10079_v13, %v14692_v37  ;;  %v14693_v0 = vld [vmem:[#allocation94_spill] sm:$0xff]  ;;  %v4152_v33 = vsel %vm4024_vm6, %v10091_v36, %v14695_v27  ;;  %vm4069_vm1 = vcmp.gt.f32.partialorder %v14673_v14, 0.0  ;;  %v14696_v13 = vld [vmem:[#allocation7_spill] sm:$0xff] }
 0x2d3   :  { %14687 = vst [vmem:[#allocation30_spill] sm:$0xff] %v10614_v58  ;;  %v4147_v58 = vsel %vm4019_vm2, %v10071_v46, %v14690_v56  ;;  %v4150_v46 = vsel %vm4022_vm5, %v10083_v41, %v14693_v0  ;;  %v14694_v56 = vld [vmem:[#allocation9_spill] sm:$0xff]  ;;  %5759 = vst [vmem:[%s13651_s5 + $0x200] sm:$0xff] %v4146_v20  ;;  %vm4070_vm2 = vcmp.gt.f32.partialorder %v14675_v51, 0.0  ;;  %vm4072_vm4 = vcmp.gt.f32.partialorder %v10283_v25, 0.0 }
 0x2d4   :  { %v4151_v42 = vsel %vm4023_vm8, %v10087_v29, %v14694_v56  ;;  %5760 = vst [vmem:[%s13651_s5 + $0x208] sm:$0xff] %v4147_v58  ;;  %v4153_v41 = vsel %vm4025_vm10, %v10095_v62, %v14696_v13  ;;  %v14697_v29 = vld [vmem:[#allocation13_spill] sm:$0xff]  ;;  %v4156_v37 = vsel %vm4028_vm9, %v10107_v57, %v14699_v38  ;;  %5762 = vst [vmem:[%s13651_s5 + $0x218] sm:$0xff] %v4149_v40  ;;  %vm4073_vm5 = vcmp.gt.f32.partialorder %v10287_v52, 0.0  ;;  %v14700_v62 = vld [vmem:[#allocation15_spill] sm:$0xff] }
 0x2d5   :  { %v4154_v36 = vsel %vm4026_vm7, %v10099_v48, %v14697_v29  ;;  %v14698_v20 = vld [vmem:[#allocation17_spill] sm:$0xff]  ;;  %5763 = vst [vmem:[%s13651_s5 + $0x220] sm:$0xff] %v4150_v46  ;;  %5764 = vst [vmem:[%s13651_s5 + $0x228] sm:$0xff] %v4151_v42  ;;  %vm4074_vm8 = vcmp.gt.f32.partialorder %v10291_v18, 0.0  ;;  %v4157_v48 = vsel %vm4029_vm12, %v10111_v2, %v14700_v62  ;;  %vm14702_vm7 = vcmp.gt.f32.partialorder %v10115_v63, 0.0  ;;  %v14705_v2 = vld [vmem:[#allocation27_spill] sm:$0xff] }
 0x2d6   :  { %v4155_v58 = vsel %vm4027_vm11, %v10103_v55, %v14698_v20  ;;  %5765 = vst [vmem:[%s13651_s5 + $0x230] sm:$0xff] %v4152_v33  ;;  %v14701_v55 = vld [vmem:[#allocation33_spill] sm:$0xff]  ;;  %vm14703_vm11 = vcmp.gt.f32.partialorder %v10119_v16, 0.0  ;;  %vm14704_vm9 = vcmp.gt.f32.partialorder %v10123_v10, 0.0  ;;  %5766 = vst [vmem:[%s13651_s5 + $0x238] sm:$0xff] %v4153_v41  ;;  %vm14706_vm10 = vcmp.gt.f32.partialorder %v10127_v49, 0.0 }
 0x2d7   :  { %v4158_v57 = vsel %vm14702_vm7, %v10115_v63, %v14701_v55  ;;  %v4159_v33 = vsel %vm14703_vm11, %v10119_v16, %v10375_v17  ;;  %v4160_v40 = vsel %vm14704_vm9, %v10123_v10, %v10379_v19  ;;  %5767 = vst [vmem:[%s13651_s5 + $0x240] sm:$0xff] %v4154_v36  ;;  %5768 = vst [vmem:[%s13651_s5 + $0x248] sm:$0xff] %v4155_v58  ;;  %vm4078_vm7 = vcmp.gt.f32.partialorder %v10307_v53, 0.0  ;;  %v14707_v16 = vld [vmem:[#allocation31_spill] sm:$0xff]  ;;  %v14709_v17 = vld [vmem:[#allocation37_spill] sm:$0xff] }
 0x2d8   :  { %5769 = vst [vmem:[%s13651_s5 + $0x250] sm:$0xff] %v4156_v37  ;;  %v4161_v63 = vsel %vm14706_vm10, %v10127_v49, %v14705_v2  ;;  %vm14708_vm6 = vcmp.gt.f32.partialorder %v10131_v60, 0.0  ;;  %vm14710_vm12 = vcmp.gt.f32.partialorder %v10135_v54, 0.0  ;;  %v14711_v0 = vld [vmem:[#allocation41_spill] sm:$0xff]  ;;  %vm14712_vm11 = vcmp.gt.f32.partialorder %v10139_v8, 0.0  ;;  %5770 = vst [vmem:[%s13651_s5 + $0x258] sm:$0xff] %v4157_v48 }
 0x2d9   :  { %v4162_v10 = vsel %vm14708_vm6, %v10131_v60, %v14707_v16  ;;  %v4163_v19 = vsel %vm14710_vm12, %v10135_v54, %v14709_v17  ;;  %v4164_v46 = vsel %vm14712_vm11, %v10139_v8, %v14711_v0  ;;  %5771 = vst [vmem:[%s13651_s5 + $0x260] sm:$0xff] %v4158_v57  ;;  %5772 = vst [vmem:[%s13651_s5 + $0x268] sm:$0xff] %v4159_v33  ;;  %vm4081_vm6 = vcmp.gt.f32.partialorder %v10319_v39, 0.0  ;;  %v14713_v49 = vld [vmem:[#allocation35_spill] sm:$0xff]  ;;  %v14717_v56 = vld [vmem:[#allocation244_spill] sm:$0xff] }
 0x2da   :  { %5773 = vst [vmem:[%s13651_s5 + $0x270] sm:$0xff] %v4160_v40  ;;  %vm14714_vm10 = vcmp.gt.f32.partialorder %v10143_v61, 0.0  ;;  %v14715_v54 = vld [vmem:[#allocation243_spill] sm:$0xff]  ;;  %vm14716_vm12 = vcmp.gt.f32.partialorder %v10147_v1, 0.0  ;;  %vm14718_vm11 = vcmp.gt.f32.partialorder %v10151_v35, 0.0  ;;  %v14719_v27 = vld [vmem:[#allocation245_spill] sm:$0xff] }
 0x2db   :  { %v4165_v60 = vsel %vm14714_vm10, %v10143_v61, %v14713_v49  ;;  %v4166_v8 = vsel %vm14716_vm12, %v10147_v1, %v14715_v54  ;;  %v4167_v42 = vsel %vm14718_vm11, %v10151_v35, %v14717_v56  ;;  %vm14720_vm9 = vcmp.gt.f32.partialorder %v10155_v22, 0.0  ;;  %5774 = vst [vmem:[%s13651_s5 + $0x278] sm:$0xff] %v4161_v63  ;;  %5775 = vst [vmem:[%s13651_s5 + $0x280] sm:$0xff] %v4162_v10  ;;  %v14721_v61 = vld [vmem:[#allocation246_spill] sm:$0xff]  ;;  %v14723_v35 = vld [vmem:[#allocation247_spill] sm:$0xff] }
 0x2dc   :  { %v4168_v13 = vsel %vm14720_vm9, %v10155_v22, %v14719_v27  ;;  %5776 = vst [vmem:[%s13651_s5 + $0x288] sm:$0xff] %v4163_v19  ;;  %5777 = vst [vmem:[%s13651_s5 + $0x290] sm:$0xff] %v4164_v46  ;;  %vm14722_vm9 = vcmp.gt.f32.partialorder %v10159_v44, 0.0  ;;  %v14724_v22 = vld [vmem:[#allocation59_spill] sm:$0xff]  ;;  %v14726_v29 = vld [vmem:[#allocation248_spill] sm:$0xff] }
 0x2dd   :  { %v4169_v1 = vsel %vm14722_vm9, %v10159_v44, %v14721_v61  ;;  %vm14725_vm10 = vcmp.gt.f32.partialorder %v14724_v22, 0.0  ;;  %v14727_v36 = vld [vmem:[#allocation63_spill] sm:$0xff]  ;;  %v14730_v38 = vld [vmem:[#allocation21_spill] sm:$0xff]  ;;  %5778 = vst [vmem:[%s13651_s5 + $0x298] sm:$0xff] %v4165_v60  ;;  %5779 = vst [vmem:[%s13651_s5 + $0x2a0] sm:$0xff] %v4166_v8 }
 0x2de   :  { %v4170_v41 = vsel %vm14725_vm10, %v14724_v22, %v14723_v35  ;;  %vm14728_vm12 = vcmp.gt.f32.partialorder %v14727_v36, 0.0  ;;  %v14729_v58 = vld [vmem:[#allocation39_spill] sm:$0xff]  ;;  %vm14731_vm11 = vcmp.gt.f32.partialorder %v14730_v38, 0.0  ;;  %5780 = vst [vmem:[%s13651_s5 + $0x2a8] sm:$0xff] %v4167_v42  ;;  %5781 = vst [vmem:[%s13651_s5 + $0x2b0] sm:$0xff] %v4168_v13  ;;  %v14732_v44 = vld [vmem:[#allocation249_spill] sm:$0xff] }
 0x2df   :  { %v4171_v20 = vsel %vm14728_vm12, %v14727_v36, %v14726_v29  ;;  %v4172_v37 = vsel %vm14731_vm11, %v14730_v38, %v14729_v58  ;;  %v14733_v62 = vld [vmem:[#allocation69_spill] sm:$0xff]  ;;  %vm14736_vm10 = vcmp.gt.f32.partialorder %v10179_v9, 0.0  ;;  %v14737_v33 = vld [vmem:[#allocation250_spill] sm:$0xff]  ;;  %v14740_v63 = vld [vmem:[#allocation251_spill] sm:$0xff]  ;;  %5782 = vst [vmem:[%s13651_s5 + $0x2b8] sm:$0xff] %v4169_v1 }
 0x2e0   :  { %vm14734_vm9 = vcmp.gt.f32.partialorder %v14733_v62, 0.0  ;;  %v14735_v55 = vld [vmem:[#allocation45_spill] sm:$0xff]  ;;  %5783 = vst [vmem:[%s13651_s5 + $0x2c0] sm:$0xff] %v4170_v41  ;;  %5784 = vst [vmem:[%s13651_s5 + $0x2c8] sm:$0xff] %v4171_v20  ;;  %v14745_v19 = vld [vmem:[#allocation252_spill] sm:$0xff] }
 0x2e1   :  { %v4173_v48 = vsel %vm14734_vm9, %v14733_v62, %v14732_v44  ;;  %v4174_v57 = vsel %vm14736_vm10, %v10179_v9, %v14735_v55  ;;  %v14738_v40 = vld [vmem:[#allocation25_spill] sm:$0xff]  ;;  %5785 = vst [vmem:[%s13651_s5 + $0x2d0] sm:$0xff] %v4172_v37  ;;  %vm14744_vm9 = vcmp.gt.f32.partialorder %v10191_v15, 0.0  ;;  %vm14746_vm10 = vcmp.gt.f32.partialorder %v10195_v24, 0.0  ;;  %v14749_v60 = vld [vmem:[#allocation254_spill] sm:$0xff]  ;;  %v14767_v41 = vld [vmem:[#allocation67_spill] sm:$0xff] }
 0x2e2   :  { %vm14739_vm12 = vcmp.gt.f32.partialorder %v14738_v40, 0.0  ;;  %v14741_v16 = vld [vmem:[#allocation73_spill] sm:$0xff]  ;;  %v4178_v0 = vsel %vm14746_vm10, %v10195_v24, %v14745_v19  ;;  %5786 = vst [vmem:[%s13651_s5 + $0x2d8] sm:$0xff] %v4173_v48  ;;  %5787 = vst [vmem:[%s13651_s5 + $0x2e0] sm:$0xff] %v4174_v57  ;;  %v14752_v24 = vld [vmem:[#allocation19_spill] sm:$0xff]  ;;  %vm14755_vm10 = vcmp.gt.f32.partialorder %v10211_v12, 0.0 }
 0x2e3   :  { %v4175_v2 = vsel %vm14739_vm12, %v14738_v40, %v14737_v33  ;;  %vm14742_vm11 = vcmp.gt.f32.partialorder %v14741_v16, 0.0  ;;  %v14743_v9 = vld [vmem:[#allocation49_spill] sm:$0xff]  ;;  %vm14748_vm12 = vcmp.gt.f32.partialorder %v10199_v30, 0.0  ;;  %v14758_v27 = vld [vmem:[#allocation258_spill] sm:$0xff]  ;;  %5791 = vst [vmem:[%s13651_s5 + $0x300] sm:$0xff] %v4178_v0  ;;  %v14772_v36 = vld [vmem:[#allocation264_spill] sm:$0xff] }
 0x2e4   :  { %v4176_v10 = vsel %vm14742_vm11, %v14741_v16, %v14740_v63  ;;  %v4177_v17 = vsel %vm14744_vm9, %v10191_v15, %v14743_v9  ;;  %v14747_v46 = vld [vmem:[#allocation253_spill] sm:$0xff]  ;;  %vm14750_vm11 = vcmp.gt.f32.partialorder %v10203_v34, 0.0  ;;  %5788 = vst [vmem:[%s13651_s5 + $0x2e8] sm:$0xff] %v4175_v2  ;;  %v14751_v15 = vld [vmem:[#allocation255_spill] sm:$0xff]  ;;  %vm14753_vm9 = vcmp.gt.f32.partialorder %v14752_v24, 0.0  ;;  %v14766_v22 = vld [vmem:[#allocation262_spill] sm:$0xff] }
 0x2e5   :  { %v4179_v49 = vsel %vm14748_vm12, %v10199_v30, %v14747_v46  ;;  %v4180_v54 = vsel %vm14750_vm11, %v10203_v34, %v14749_v60  ;;  %5789 = vst [vmem:[%s13651_s5 + $0x2f0] sm:$0xff] %v4176_v10  ;;  %v4181_v30 = vsel %vm14753_vm9, %v14752_v24, %v14751_v15  ;;  %v14754_v34 = vld [vmem:[#allocation256_spill] sm:$0xff]  ;;  %v14756_v56 = vld [vmem:[#allocation257_spill] sm:$0xff]  ;;  %vm14757_vm12 = vcmp.gt.f32.partialorder %v10215_v7, 0.0  ;;  %5790 = vst [vmem:[%s13651_s5 + $0x2f8] sm:$0xff] %v4177_v17 }
 0x2e6   :  { %v4182_v8 = vsel %vm14755_vm10, %v10211_v12, %v14754_v34  ;;  %v4183_v42 = vsel %vm14757_vm12, %v10215_v7, %v14756_v56  ;;  %vm14759_vm11 = vcmp.gt.f32.partialorder %v10219_v3, 0.0  ;;  %5792 = vst [vmem:[%s13651_s5 + $0x308] sm:$0xff] %v4179_v49  ;;  %5793 = vst [vmem:[%s13651_s5 + $0x310] sm:$0xff] %v4180_v54  ;;  %v14760_v12 = vld [vmem:[#allocation259_spill] sm:$0xff]  ;;  %vm14761_vm9 = vcmp.gt.f32.partialorder %v10223_v26, 0.0  ;;  %v14764_v1 = vld [vmem:[#allocation261_spill] sm:$0xff] }
 0x2e7   :  { %v4184_v13 = vsel %vm14759_vm11, %v10219_v3, %v14758_v27  ;;  %v4185_v7 = vsel %vm14761_vm9, %v10223_v26, %v14760_v12  ;;  %v14762_v3 = vld [vmem:[#allocation260_spill] sm:$0xff]  ;;  %vm14763_vm10 = vcmp.gt.f32.partialorder %v10227_v50, 0.0  ;;  %vm14765_vm12 = vcmp.gt.f32.partialorder %v10231_v6, 0.0  ;;  %5794 = vst [vmem:[%s13651_s5 + $0x318] sm:$0xff] %v4181_v30  ;;  %5795 = vst [vmem:[%s13651_s5 + $0x320] sm:$0xff] %v4182_v8  ;;  %v14769_v26 = vld [vmem:[#allocation263_spill] sm:$0xff] }
 0x2e8   :  { %v4186_v61 = vsel %vm14763_vm10, %v10227_v50, %v14762_v3  ;;  %v4187_v35 = vsel %vm14765_vm12, %v10231_v6, %v14764_v1  ;;  %vm14768_vm11 = vcmp.gt.f32.partialorder %v14767_v41, 0.0  ;;  %5796 = vst [vmem:[%s13651_s5 + $0x328] sm:$0xff] %v4183_v42  ;;  %5797 = vst [vmem:[%s13651_s5 + $0x330] sm:$0xff] %v4184_v13  ;;  %v14770_v50 = vld [vmem:[#allocation71_spill] sm:$0xff]  ;;  %vm14773_vm10 = vcmp.gt.f32.partialorder %v10243_v21, 0.0  ;;  %v14774_v58 = vld [vmem:[#allocation265_spill] sm:$0xff] }
 0x2e9   :  { %v4188_v29 = vsel %vm14768_vm11, %v14767_v41, %v14766_v22  ;;  %vm14771_vm9 = vcmp.gt.f32.partialorder %v14770_v50, 0.0  ;;  %v4190_v20 = vsel %vm14773_vm10, %v10243_v21, %v14772_v36  ;;  %v14775_v38 = vld [vmem:[#allocation77_spill] sm:$0xff]  ;;  %v14777_v44 = vld [vmem:[#allocation266_spill] sm:$0xff]  ;;  %vm14778_vm11 = vcmp.gt.f32.partialorder %v10251_v47, 0.0  ;;  %5798 = vst [vmem:[%s13651_s5 + $0x338] sm:$0xff] %v4185_v7  ;;  %5799 = vst [vmem:[%s13651_s5 + $0x340] sm:$0xff] %v4186_v61 }
 0x2ea   :  { %v4189_v6 = vsel %vm14771_vm9, %v14770_v50, %v14769_v26  ;;  %vm14776_vm12 = vcmp.gt.f32.partialorder %v14775_v38, 0.0  ;;  %v4192_v62 = vsel %vm14778_vm11, %v10251_v47, %v14777_v44  ;;  %5800 = vst [vmem:[%s13651_s5 + $0x348] sm:$0xff] %v4187_v35  ;;  %5801 = vst [vmem:[%s13651_s5 + $0x350] sm:$0xff] %v4188_v29  ;;  %v14779_v21 = vld [vmem:[#allocation267_spill] sm:$0xff]  ;;  %v14780_v48 = vld [vmem:[#allocation268_spill] sm:$0xff] }
 0x2eb   :  { %v4191_v37 = vsel %vm14776_vm12, %v14775_v38, %v14774_v58  ;;  %v4193_v47 = vsel %vm4065_vm15, %v14665_v45, %v14779_v21  ;;  %v4194_v55 = vsel %vm4066_vm0, %v14667_v11, %v14780_v48  ;;  %v14781_v57 = vld [vmem:[#allocation269_spill] sm:$0xff]  ;;  %v14782_v40 = vld [vmem:[#allocation6_spill] sm:$0xff]  ;;  %5802 = vst [vmem:[%s13651_s5 + $0x358] sm:$0xff] %v4189_v6  ;;  %5803 = vst [vmem:[%s13651_s5 + $0x360] sm:$0xff] %v4190_v20  ;;  %vm14794_vm15 = vcmp.gt.f32.partialorder %v10303_v59, 0.0 }
 0x2ec   :  { %v4195_v33 = vsel %vm4067_vm14, %v14669_v4, %v14781_v57  ;;  %v4196_v2 = vsel %vm4068_vm13, %v14671_v23, %v14782_v40  ;;  %5804 = vst [vmem:[%s13651_s5 + $0x368] sm:$0xff] %v4191_v37  ;;  %5805 = vst [vmem:[%s13651_s5 + $0x370] sm:$0xff] %v4192_v62  ;;  %v14783_v4 = vld [vmem:[#allocation10_spill] sm:$0xff]  ;;  %v14784_v45 = vld [vmem:[#allocation4_spill] sm:$0xff]  ;;  %vm14790_vm13 = vcmp.gt.f32.partialorder %v10295_v28, 0.0  ;;  %vm14792_vm14 = vcmp.gt.f32.partialorder %v14682_v5, 0.0 }
 0x2ed   :  { %v4197_v23 = vsel %vm4069_vm1, %v14673_v14, %v14783_v4  ;;  %v4198_v11 = vsel %vm4070_vm2, %v14675_v51, %v14784_v45  ;;  %v14785_v63 = vld [vmem:[#allocation8_spill] sm:$0xff]  ;;  %v14786_v10 = vld [vmem:[#allocation14_spill] sm:$0xff]  ;;  %5806 = vst [vmem:[%s13651_s5 + $0x378] sm:$0xff] %v4193_v47  ;;  %5807 = vst [vmem:[%s13651_s5 + $0x380] sm:$0xff] %v4194_v55  ;;  %vm14797_vm0 = vcmp.gt.f32.partialorder %v10311_v31, 0.0  ;;  %vm14799_vm1 = vcmp.gt.f32.partialorder %v10315_v32, 0.0 }
 0x2ee   :  { %v4199_v16 = vsel %vm4071_vm3, %v10279_v43, %v14785_v63  ;;  %v4200_v9 = vsel %vm4072_vm4, %v10283_v25, %v14786_v10  ;;  %5808 = vst [vmem:[%s13651_s5 + $0x388] sm:$0xff] %v4195_v33  ;;  %5809 = vst [vmem:[%s13651_s5 + $0x390] sm:$0xff] %v4196_v2  ;;  %v14787_v51 = vld [vmem:[#allocation18_spill] sm:$0xff]  ;;  %v14788_v43 = vld [vmem:[#allocation12_spill] sm:$0xff] }
 0x2ef   :  { %v4201_v14 = vsel %vm4073_vm5, %v10287_v52, %v14787_v51  ;;  %v4202_v25 = vsel %vm4074_vm8, %v10291_v18, %v14788_v43  ;;  %v14789_v17 = vld [vmem:[#allocation16_spill] sm:$0xff]  ;;  %v14791_v0 = vld [vmem:[#allocation22_spill] sm:$0xff]  ;;  %5810 = vst [vmem:[%s13651_s5 + $0x398] sm:$0xff] %v4197_v23  ;;  %5811 = vst [vmem:[%s13651_s5 + $0x3a0] sm:$0xff] %v4198_v11 }
 0x2f0   :  { %v4203_v19 = vsel %vm14790_vm13, %v10295_v28, %v14789_v17  ;;  %v4204_v46 = vsel %vm14792_vm14, %v14682_v5, %v14791_v0  ;;  %5812 = vst [vmem:[%s13651_s5 + $0x3a8] sm:$0xff] %v4199_v16  ;;  %5813 = vst [vmem:[%s13651_s5 + $0x3b0] sm:$0xff] %v4200_v9  ;;  %v14793_v52 = vld [vmem:[#allocation26_spill] sm:$0xff]  ;;  %v14795_v18 = vld [vmem:[#allocation20_spill] sm:$0xff] }
 0x2f1   :  { %v4205_v5 = vsel %vm14794_vm15, %v10303_v59, %v14793_v52  ;;  %v4206_v28 = vsel %vm4078_vm7, %v10307_v53, %v14795_v18  ;;  %v14796_v49 = vld [vmem:[#allocation24_spill] sm:$0xff]  ;;  %v14798_v54 = vld [vmem:[#allocation30_spill] sm:$0xff]  ;;  %5814 = vst [vmem:[%s13651_s5 + $0x3b8] sm:$0xff] %v4201_v14  ;;  %5815 = vst [vmem:[%s13651_s5 + $0x3c0] sm:$0xff] %v4202_v25 }
 0x2f2   :  { %v4207_v60 = vsel %vm14797_vm0, %v10311_v31, %v14796_v49  ;;  %v4208_v15 = vsel %vm14799_vm1, %v10315_v32, %v14798_v54  ;;  %5816 = vst [vmem:[%s13651_s5 + $0x3c8] sm:$0xff] %v4203_v19  ;;  %5817 = vst [vmem:[%s13651_s5 + $0x3d0] sm:$0xff] %v4204_v46  ;;  %v14800_v59 = vld [vmem:[#allocation34_spill] sm:$0xff]  ;;  %v14801_v31 = vld [vmem:[#allocation119_spill] sm:$0xff] }
 0x2f3   :  { %v4209_v53 = vsel %vm4081_vm6, %v10319_v39, %v14800_v59  ;;  %5818 = vst [vmem:[%s13651_s5 + $0x3d8] sm:$0xff] %v4205_v5  ;;  %5819 = vst [vmem:[%s13651_s5 + $0x3e0] sm:$0xff] %v4206_v28  ;;  %v14802_v32 = vld [vmem:[#allocation242_spill] sm:$0xff]  ;;  %v14803_v24 = vld [vmem:[#allocation123_spill] sm:$0xff] }
 0x2f4   :  { %5820 = vst [vmem:[%s13651_s5 + $0x3e8] sm:$0xff] %v4207_v60  ;;  %5821 = vst [vmem:[%s13651_s5 + $0x3f0] sm:$0xff] %v4208_v15  ;;  %v11091_v39 = vmul.f32 %v14802_v32, %v14801_v31  ;;  %v11095_v30 = vmul.f32 %v14802_v32, %v14803_v24  ;;  %v14804_v34 = vld [vmem:[#allocation117_spill] sm:$0xff]  ;;  %v14806_v27 = vld [vmem:[#allocation127_spill] sm:$0xff] }
 0x2f5   :  { %5822 = vst [vmem:[%s13651_s5 + $0x3f8] sm:$0xff] %v4209_v53  ;;  %v11099_v8 = vmul.f32 %v14804_v34, %v14802_v32  ;;  %v14805_v56 = vld [vmem:[#allocation121_spill] sm:$0xff]  ;;  %v11107_v13 = vmul.f32 %v14802_v32, %v14806_v27  ;;  %v14807_v12 = vld [vmem:[#allocation131_spill] sm:$0xff] }
 0x2f6   :  { %v11103_v42 = vmul.f32 %v14805_v56, %v14802_v32  ;;  %v11111_v7 = vmul.f32 %v14802_v32, %v14807_v12  ;;  %v14808_v3 = vld [vmem:[#allocation125_spill] sm:$0xff]  ;;  %v14810_v22 = vld [vmem:[#allocation135_spill] sm:$0xff] }
 0x2f7   :  { %v11115_v61 = vmul.f32 %v14808_v3, %v14802_v32  ;;  %v14809_v1 = vld [vmem:[#allocation129_spill] sm:$0xff]  ;;  %v11123_v41 = vmul.f32 %v14802_v32, %v14810_v22  ;;  %v14811_v29 = vld [vmem:[#allocation139_spill] sm:$0xff] }
 0x2f8   :  { %v11119_v35 = vmul.f32 %v14809_v1, %v14802_v32  ;;  %v11127_v26 = vmul.f32 %v14802_v32, %v14811_v29  ;;  %v14812_v50 = vld [vmem:[#allocation133_spill] sm:$0xff]  ;;  %v14814_v58 = vld [vmem:[#allocation143_spill] sm:$0xff] }
 0x2f9   :  { %v11131_v6 = vmul.f32 %v14812_v50, %v14802_v32  ;;  %v14813_v36 = vld [vmem:[#allocation137_spill] sm:$0xff]  ;;  %v11139_v38 = vmul.f32 %v14802_v32, %v14814_v58  ;;  %v14815_v37 = vld [vmem:[#allocation147_spill] sm:$0xff] }
 0x2fa   :  { %v11135_v20 = vmul.f32 %v14813_v36, %v14802_v32  ;;  %v11143_v44 = vmul.f32 %v14802_v32, %v14815_v37  ;;  %v14816_v62 = vld [vmem:[#allocation141_spill] sm:$0xff]  ;;  %v14818_v55 = vld [vmem:[#allocation151_spill] sm:$0xff] }
 0x2fb   :  { %v11147_v21 = vmul.f32 %v14816_v62, %v14802_v32  ;;  %v14817_v47 = vld [vmem:[#allocation145_spill] sm:$0xff]  ;;  %v11155_v57 = vmul.f32 %v14802_v32, %v14818_v55  ;;  %v14819_v33 = vld [vmem:[#allocation155_spill] sm:$0xff] }
 0x2fc   :  { %v11151_v48 = vmul.f32 %v14817_v47, %v14802_v32  ;;  %v11159_v40 = vmul.f32 %v14802_v32, %v14819_v33  ;;  %v14820_v2 = vld [vmem:[#allocation149_spill] sm:$0xff]  ;;  %v14822_v11 = vld [vmem:[#allocation159_spill] sm:$0xff] }
 0x2fd   :  { %v11163_v4 = vmul.f32 %v14820_v2, %v14802_v32  ;;  %v14821_v23 = vld [vmem:[#allocation153_spill] sm:$0xff]  ;;  %v11171_v63 = vmul.f32 %v14802_v32, %v14822_v11  ;;  %v14823_v16 = vld [vmem:[#allocation163_spill] sm:$0xff] }
 0x2fe   :  { %v11167_v45 = vmul.f32 %v14821_v23, %v14802_v32  ;;  %v11175_v10 = vmul.f32 %v14802_v32, %v14823_v16  ;;  %v14824_v9 = vld [vmem:[#allocation157_spill] sm:$0xff]  ;;  %v14826_v25 = vld [vmem:[#allocation167_spill] sm:$0xff] }
 0x2ff   :  { %v11179_v51 = vmul.f32 %v14824_v9, %v14802_v32  ;;  %v14825_v14 = vld [vmem:[#allocation161_spill] sm:$0xff]  ;;  %v11187_v17 = vmul.f32 %v14802_v32, %v14826_v25  ;;  %v14827_v19 = vld [vmem:[#allocation171_spill] sm:$0xff] }
 0x300   :  { %v11183_v43 = vmul.f32 %v14825_v14, %v14802_v32  ;;  %v11191_v0 = vmul.f32 %v14802_v32, %v14827_v19  ;;  %v14828_v46 = vld [vmem:[#allocation165_spill] sm:$0xff]  ;;  %v14830_v28 = vld [vmem:[#allocation175_spill] sm:$0xff] }
 0x301   :  { %v11195_v52 = vmul.f32 %v14828_v46, %v14802_v32  ;;  %v14829_v5 = vld [vmem:[#allocation169_spill] sm:$0xff]  ;;  %v11203_v49 = vmul.f32 %v14802_v32, %v14830_v28  ;;  %v14831_v60 = vld [vmem:[#allocation179_spill] sm:$0xff] }
 0x302   :  { %v11199_v18 = vmul.f32 %v14829_v5, %v14802_v32  ;;  %v11207_v54 = vmul.f32 %v14802_v32, %v14831_v60  ;;  %v14832_v15 = vld [vmem:[#allocation173_spill] sm:$0xff]  ;;  %v14834_v24 = vld [vmem:[#allocation183_spill] sm:$0xff]  ;;  %v14847_v5 = vld [vmem:[#allocation210_spill] sm:$0xff] }
 0x303   :  { %v11211_v59 = vmul.f32 %v14832_v15, %v14802_v32  ;;  %v14833_v53 = vld [vmem:[#allocation177_spill] sm:$0xff]  ;;  %v11219_v34 = vmul.f32 %v14802_v32, %v14834_v24  ;;  %v14835_v56 = vld [vmem:[#allocation187_spill] sm:$0xff]  ;;  %v11271_v28 = vmul.f32 %v14802_v32, %v14847_v5 }
 0x304   :  { %v11215_v31 = vmul.f32 %v14833_v53, %v14802_v32  ;;  %v11223_v27 = vmul.f32 %v14802_v32, %v14835_v56  ;;  %v14836_v12 = vld [vmem:[#allocation181_spill] sm:$0xff]  ;;  %v14838_v29 = vld [vmem:[#allocation191_spill] sm:$0xff]  ;;  %v14849_v53 = vld [vmem:[#allocation208_spill] sm:$0xff] }
 0x305   :  { %v11227_v3 = vmul.f32 %v14836_v12, %v14802_v32  ;;  %v14837_v1 = vld [vmem:[#allocation185_spill] sm:$0xff]  ;;  %v11235_v50 = vmul.f32 %v14802_v32, %v14838_v29  ;;  %v14839_v36 = vld [vmem:[#allocation195_spill] sm:$0xff]  ;;  %v11279_v24 = vmul.f32 %v14849_v53, %v14802_v32  ;;  %v14850_v56 = vld [vmem:[#allocation214_spill] sm:$0xff] }
 0x306   :  { %v11231_v22 = vmul.f32 %v14837_v1, %v14802_v32  ;;  %v11239_v58 = vmul.f32 %v14802_v32, %v14839_v36  ;;  %v14840_v37 = vld [vmem:[#allocation189_spill] sm:$0xff]  ;;  %v14842_v33 = vld [vmem:[#allocation199_spill] sm:$0xff]  ;;  %v11283_v12 = vmul.f32 %v14802_v32, %v14850_v56  ;;  %v14852_v36 = vld [vmem:[#allocation212_spill] sm:$0xff] }
 0x307   :  { %v11243_v62 = vmul.f32 %v14840_v37, %v14802_v32  ;;  %v14841_v47 = vld [vmem:[#allocation193_spill] sm:$0xff]  ;;  %v11251_v2 = vmul.f32 %v14802_v32, %v14842_v33  ;;  %v14843_v23 = vld [vmem:[#allocation203_spill] sm:$0xff]  ;;  %v11291_v37 = vmul.f32 %v14852_v36, %v14802_v32 }
 0x308   :  { %v11247_v55 = vmul.f32 %v14841_v47, %v14802_v32  ;;  %v11255_v11 = vmul.f32 %v14802_v32, %v14843_v23  ;;  %v14844_v16 = vld [vmem:[#allocation197_spill] sm:$0xff]  ;;  %v14846_v19 = vld [vmem:[#allocation111_spill] sm:$0xff] }
 0x309   :  { %v11259_v9 = vmul.f32 %v14844_v16, %v14802_v32  ;;  %v14845_v14 = vld [vmem:[#allocation201_spill] sm:$0xff]  ;;  %v11267_v46 = vmul.f32 %v14802_v32, %v14846_v19  ;;  %v14853_v47 = vld [vmem:[#allocation115_spill] sm:$0xff] }
 0x30a   :  { %v11263_v25 = vmul.f32 %v14845_v14, %v14802_v32  ;;  %v14848_v60 = vld [vmem:[#allocation205_spill] sm:$0xff]  ;;  %v11295_v33 = vmul.f32 %v14853_v47, %v14802_v32  ;;  %v14856_v14 = vld [vmem:[#allocation224_spill] sm:$0xff]  ;;  %v14858_v5 = vld [vmem:[#allocation219_spill] sm:$0xff] }
 0x30b   :  { %v11275_v15 = vmul.f32 %v14848_v60, %v14802_v32  ;;  %v14851_v1 = vld [vmem:[#allocation217_spill] sm:$0xff]  ;;  %v11303_v19 = vmul.f32 %v14802_v32, %v14856_v14  ;;  %v11307_v60 = vmul.f32 %v14858_v5, %v14802_v32  ;;  %v14864_v47 = vld [vmem:[#allocation232_spill] sm:$0xff] }
 0x30c   :  { %v11287_v29 = vmul.f32 %v14802_v32, %v14851_v1  ;;  %v14854_v23 = vld [vmem:[#allocation221_spill] sm:$0xff]  ;;  %v14862_v1 = vld [vmem:[#allocation228_spill] sm:$0xff] }
 0x30d   :  { %v11299_v16 = vmul.f32 %v14802_v32, %v14854_v23  ;;  %14857 = vst [vmem:[#allocation32_spill] sm:$0xff] %v11303_v19  ;;  %14859 = vst [vmem:[#allocation38_spill] sm:$0xff] %v11307_v60  ;;  %v14860_v53 = vld [vmem:[#allocation113_spill] sm:$0xff]  ;;  %v11315_v36 = vmul.f32 %v14802_v32, %v14862_v1  ;;  %v11319_v23 = vmul.f32 %v14802_v32, %v14864_v47  ;;  %v14868_v19 = vld [vmem:[#allocation230_spill] sm:$0xff] }
 0x30e   :  { %v11311_v56 = vmul.f32 %v14860_v53, %v14802_v32  ;;  %v11327_v5 = vmul.f32 %v14868_v19, %v14802_v32  ;;  %v14869_v60 = vld [vmem:[#allocation236_spill] sm:$0xff] }
 0x30f   :  { %14855 = vst [vmem:[#allocation28_spill] sm:$0xff] %v11299_v16  ;;  %14863 = vst [vmem:[#allocation36_spill] sm:$0xff] %v11315_v36  ;;  %v14866_v16 = vld [vmem:[#allocation226_spill] sm:$0xff]  ;;  %v11331_v53 = vmul.f32 %v14802_v32, %v14869_v60 }
 0x310   :  { %14861 = vst [vmem:[#allocation42_spill] sm:$0xff] %v11311_v56  ;;  %14865 = vst [vmem:[#allocation40_spill] sm:$0xff] %v11319_v23  ;;  %v11323_v14 = vmul.f32 %v14866_v16, %v14802_v32  ;;  %v14870_v56 = vld [vmem:[#allocation240_spill] sm:$0xff]  ;;  %v14871_v36 = vld [vmem:[#allocation234_spill] sm:$0xff] }
 0x311   :  { %v11335_v1 = vmul.f32 %v14802_v32, %v14870_v56  ;;  %v11339_v47 = vmul.f32 %v14871_v36, %v14802_v32  ;;  %v14872_v23 = vld [vmem:[#allocation238_spill] sm:$0xff] }
 0x312   :  { %14867 = vst [vmem:[#allocation46_spill] sm:$0xff] %v11323_v14  ;;  %v11343_v16 = vmul.f32 %v14872_v23, %v14802_v32  ;;  %v14873_v14 = vld [vmem:[#allocation5_spill] sm:$0xff] }
 0x313   :  { %v11347_v19 = vadd.f32 %v11091_v39, %v14873_v14  ;;  %v11351_v60 = vadd.f32 %v11095_v30, %v14873_v14  ;;  %v11355_v56 = vadd.f32 %v11099_v8, %v14873_v14  ;;  %v11359_v36 = vadd.f32 %v11103_v42, %v14873_v14 }
 0x314   :  { %v11363_v23 = vadd.f32 %v11107_v13, %v14873_v14  ;;  %v11367_v39 = vadd.f32 %v11111_v7, %v14873_v14  ;;  %v11371_v30 = vadd.f32 %v11115_v61, %v14873_v14  ;;  %v11375_v8 = vadd.f32 %v11119_v35, %v14873_v14 }
 0x315   :  { %v11379_v42 = vadd.f32 %v11123_v41, %v14873_v14  ;;  %v11383_v13 = vadd.f32 %v11127_v26, %v14873_v14  ;;  %v11387_v7 = vadd.f32 %v11131_v6, %v14873_v14  ;;  %v11391_v61 = vadd.f32 %v11135_v20, %v14873_v14 }
 0x316   :  { %v11395_v35 = vadd.f32 %v11139_v38, %v14873_v14  ;;  %v11399_v41 = vadd.f32 %v11143_v44, %v14873_v14  ;;  %v11403_v26 = vadd.f32 %v11147_v21, %v14873_v14  ;;  %v11407_v6 = vadd.f32 %v11151_v48, %v14873_v14  ;;  %v14889_v32 = vld [vmem:[#allocation28_spill] sm:$0xff] }
 0x317   :  { %v11411_v20 = vadd.f32 %v11155_v57, %v14873_v14  ;;  %v11415_v38 = vadd.f32 %v11159_v40, %v14873_v14  ;;  %v11419_v44 = vadd.f32 %v11163_v4, %v14873_v14  ;;  %v11423_v21 = vadd.f32 %v11167_v45, %v14873_v14 }
 0x318   :  { %v11427_v48 = vadd.f32 %v11171_v63, %v14873_v14  ;;  %v11431_v57 = vadd.f32 %v11175_v10, %v14873_v14  ;;  %v11435_v40 = vadd.f32 %v11179_v51, %v14873_v14  ;;  %v11439_v4 = vadd.f32 %v11183_v43, %v14873_v14 }
 0x319   :  { %v11443_v45 = vadd.f32 %v11187_v17, %v14873_v14  ;;  %v11447_v63 = vadd.f32 %v11191_v0, %v14873_v14  ;;  %v11451_v10 = vadd.f32 %v11195_v52, %v14873_v14  ;;  %v11455_v51 = vadd.f32 %v11199_v18, %v14873_v14 }
 0x31a   :  { %v11459_v43 = vadd.f32 %v11203_v49, %v14873_v14  ;;  %v11463_v17 = vadd.f32 %v11207_v54, %v14873_v14  ;;  %v11467_v0 = vadd.f32 %v11211_v59, %v14873_v14  ;;  %v11471_v52 = vadd.f32 %v11215_v31, %v14873_v14 }
 0x31b   :  { %14874 = vst [vmem:[#allocation50_spill] sm:$0xff] %v11443_v45  ;;  %14875 = vst [vmem:[#allocation44_spill] sm:$0xff] %v11447_v63  ;;  %v11475_v18 = vadd.f32 %v11219_v34, %v14873_v14  ;;  %v11479_v49 = vadd.f32 %v11223_v27, %v14873_v14  ;;  %v11483_v54 = vadd.f32 %v11227_v3, %v14873_v14  ;;  %vm4466_vm2 = vcmp.gt.f32.partialorder %v11347_v19, 0.0 }
 0x31c   :  { %14876 = vst [vmem:[#allocation48_spill] sm:$0xff] %v11451_v10  ;;  %14877 = vst [vmem:[#allocation54_spill] sm:$0xff] %v11455_v51  ;;  %v11487_v59 = vadd.f32 %v11231_v22, %v14873_v14  ;;  %v11491_v31 = vadd.f32 %v11235_v50, %v14873_v14  ;;  %v11495_v34 = vadd.f32 %v11239_v58, %v14873_v14  ;;  %vm4467_vm3 = vcmp.gt.f32.partialorder %v11351_v60, 0.0 }
 0x31d   :  { %14878 = vst [vmem:[#allocation58_spill] sm:$0xff] %v11463_v17  ;;  %14879 = vst [vmem:[#allocation52_spill] sm:$0xff] %v11467_v0  ;;  %v11499_v27 = vadd.f32 %v11243_v62, %v14873_v14  ;;  %v11503_v3 = vadd.f32 %v11247_v55, %v14873_v14  ;;  %v11507_v22 = vadd.f32 %v11251_v2, %v14873_v14  ;;  %vm4468_vm4 = vcmp.gt.f32.partialorder %v11355_v56, 0.0 }
 0x31e   :  { %14880 = vst [vmem:[#allocation56_spill] sm:$0xff] %v11487_v59  ;;  %v11511_v50 = vadd.f32 %v11255_v11, %v14873_v14  ;;  %v11515_v58 = vadd.f32 %v11259_v9, %v14873_v14  ;;  %v11519_v62 = vadd.f32 %v11263_v25, %v14873_v14  ;;  %v11523_v55 = vadd.f32 %v11267_v46, %v14873_v14 }
 0x31f   :  { %v11527_v2 = vadd.f32 %v11271_v28, %v14873_v14  ;;  %v11531_v11 = vadd.f32 %v11275_v15, %v14873_v14  ;;  %v11535_v9 = vadd.f32 %v11279_v24, %v14873_v14  ;;  %v11539_v25 = vadd.f32 %v11283_v12, %v14873_v14 }
 0x320   :  { %14881 = vst [vmem:[#allocation62_spill] sm:$0xff] %v11515_v58  ;;  %14882 = vst [vmem:[#allocation66_spill] sm:$0xff] %v11519_v62  ;;  %v11543_v46 = vadd.f32 %v11287_v29, %v14873_v14  ;;  %v11547_v28 = vadd.f32 %v11291_v37, %v14873_v14  ;;  %v11551_v15 = vadd.f32 %v11295_v33, %v14873_v14  ;;  %vm4469_vm5 = vcmp.gt.f32.partialorder %v11359_v36, 0.0 }
 0x321   :  { %14883 = vst [vmem:[#allocation60_spill] sm:$0xff] %v11527_v2  ;;  %14884 = vst [vmem:[#allocation64_spill] sm:$0xff] %v11535_v9  ;;  %v11555_v24 = vadd.f32 %v14889_v32, %v14873_v14  ;;  %v14891_v9 = vld [vmem:[#allocation32_spill] sm:$0xff]  ;;  %vm4470_vm8 = vcmp.gt.f32.partialorder %v11363_v23, 0.0  ;;  %vm4471_vm7 = vcmp.gt.f32.partialorder %v11367_v39, 0.0  ;;  %vm4472_vm6 = vcmp.gt.f32.partialorder %v11371_v30, 0.0 }
 0x322   :  { %14885 = vst [vmem:[#allocation70_spill] sm:$0xff] %v11539_v25  ;;  %14886 = vst [vmem:[#allocation74_spill] sm:$0xff] %v11543_v46  ;;  %v11559_v12 = vadd.f32 %v14891_v9, %v14873_v14  ;;  %v14892_v25 = vld [vmem:[#allocation38_spill] sm:$0xff]  ;;  %vm4473_vm9 = vcmp.gt.f32.partialorder %v11375_v8, 0.0  ;;  %vm4474_vm10 = vcmp.gt.f32.partialorder %v11379_v42, 0.0  ;;  %vm4475_vm12 = vcmp.gt.f32.partialorder %v11383_v13, 0.0 }
 0x323   :  { %14887 = vst [vmem:[#allocation68_spill] sm:$0xff] %v11547_v28  ;;  %14888 = vst [vmem:[#allocation72_spill] sm:$0xff] %v11551_v15  ;;  %v11563_v29 = vadd.f32 %v14892_v25, %v14873_v14  ;;  %v14893_v46 = vld [vmem:[#allocation42_spill] sm:$0xff]  ;;  %v14894_v28 = vld [vmem:[#allocation36_spill] sm:$0xff]  ;;  %v11583_v25 = vadd.f32 %v11327_v5, %v14873_v14  ;;  %vm4476_vm11 = vcmp.gt.f32.partialorder %v11387_v7, 0.0  ;;  %vm4477_vm13 = vcmp.gt.f32.partialorder %v11391_v61, 0.0 }
 0x324   :  { %14890 = vst [vmem:[#allocation78_spill] sm:$0xff] %v11555_v24  ;;  %v11567_v37 = vadd.f32 %v14893_v46, %v14873_v14  ;;  %v11571_v33 = vadd.f32 %v14894_v28, %v14873_v14  ;;  %v14895_v15 = vld [vmem:[#allocation40_spill] sm:$0xff]  ;;  %v14896_v24 = vld [vmem:[#allocation46_spill] sm:$0xff]  ;;  %v11587_v46 = vadd.f32 %v11331_v53, %v14873_v14  ;;  %v11591_v28 = vadd.f32 %v11335_v1, %v14873_v14 }
 0x325   :  { %v11575_v32 = vadd.f32 %v14895_v15, %v14873_v14  ;;  %v11579_v9 = vadd.f32 %v14896_v24, %v14873_v14  ;;  %v11595_v15 = vadd.f32 %v11339_v47, %v14873_v14  ;;  %v11599_v24 = vadd.f32 %v11343_v16, %v14873_v14 }
 0x327   :  { %14897 = vst [vmem:[#allocation82_spill] sm:$0xff] %v11579_v9  ;;  %v14898_v9 = vld [vmem:[#allocation43_spill] sm:$0xff] }
 0x328   :  { %v11603_v5 = vmul.f32 %v11347_v19, %v14898_v9  ;;  %v11607_v53 = vmul.f32 %v11351_v60, %v14898_v9  ;;  %v11611_v1 = vmul.f32 %v11355_v56, %v14898_v9  ;;  %v11615_v47 = vmul.f32 %v11359_v36, %v14898_v9 }
 0x329   :  { %v11619_v16 = vmul.f32 %v11363_v23, %v14898_v9  ;;  %v11623_v14 = vmul.f32 %v11367_v39, %v14898_v9 }
 0x32a   :  { %14899 = vst [vmem:[#allocation76_spill] sm:$0xff] %v11603_v5  ;;  %14900 = vst [vmem:[#allocation80_spill] sm:$0xff] %v11607_v53  ;;  %v11627_v5 = vmul.f32 %v11371_v30, %v14898_v9  ;;  %v11631_v53 = vmul.f32 %v11375_v8, %v14898_v9 }
 0x32b   :  { %14901 = vst [vmem:[#allocation86_spill] sm:$0xff] %v11611_v1  ;;  %14902 = vst [vmem:[#allocation90_spill] sm:$0xff] %v11615_v47  ;;  %v11635_v1 = vmul.f32 %v11379_v42, %v14898_v9  ;;  %v11639_v47 = vmul.f32 %v11383_v13, %v14898_v9 }
 0x32c   :  { %14903 = vst [vmem:[#allocation84_spill] sm:$0xff] %v11619_v16  ;;  %14904 = vst [vmem:[#allocation88_spill] sm:$0xff] %v11623_v14  ;;  %v11643_v16 = vmul.f32 %v11387_v7, %v14898_v9  ;;  %v11647_v14 = vmul.f32 %v11391_v61, %v14898_v9 }
 0x32d   :  { %14905 = vst [vmem:[#allocation93_spill] sm:$0xff] %v11627_v5  ;;  %14906 = vst [vmem:[#allocation97_spill] sm:$0xff] %v11631_v53  ;;  %v11651_v5 = vmul.f32 %v11395_v35, %v14898_v9  ;;  %v11655_v53 = vmul.f32 %v11399_v41, %v14898_v9 }
 0x32e   :  { %14907 = vst [vmem:[#allocation91_spill] sm:$0xff] %v11635_v1  ;;  %14908 = vst [vmem:[#allocation95_spill] sm:$0xff] %v11639_v47  ;;  %v11659_v1 = vmul.f32 %v11403_v26, %v14898_v9  ;;  %v11663_v47 = vmul.f32 %v11407_v6, %v14898_v9 }
 0x32f   :  { %14909 = vst [vmem:[#allocation99_spill] sm:$0xff] %v11643_v16  ;;  %14910 = vst [vmem:[#allocation101_spill] sm:$0xff] %v11647_v14  ;;  %v11667_v16 = vmul.f32 %v11411_v20, %v14898_v9  ;;  %v11671_v14 = vmul.f32 %v11415_v38, %v14898_v9 }
 0x330   :  { %14911 = vst [vmem:[#allocation98_spill] sm:$0xff] %v11651_v5  ;;  %14912 = vst [vmem:[#allocation100_spill] sm:$0xff] %v11663_v47  ;;  %v11675_v5 = vmul.f32 %v11419_v44, %v14898_v9  ;;  %v11682_v47 = vmul.f32 %v11423_v21, %v14898_v9 }
 0x331   :  { %14913 = vst [vmem:[#allocation103_spill] sm:$0xff] %v11667_v16  ;;  %14914 = vst [vmem:[#allocation105_spill] sm:$0xff] %v11671_v14  ;;  %v11686_v16 = vmul.f32 %v11427_v48, %v14898_v9  ;;  %v11690_v14 = vmul.f32 %v11431_v57, %v14898_v9 }
 0x332   :  { %14915 = vst [vmem:[#allocation102_spill] sm:$0xff] %v11675_v5  ;;  %14916 = vst [vmem:[#allocation104_spill] sm:$0xff] %v11682_v47  ;;  %v11694_v5 = vmul.f32 %v11435_v40, %v14898_v9  ;;  %v11702_v47 = vmul.f32 %v11439_v4, %v14898_v9 }
 0x333   :  { %14917 = vst [vmem:[#allocation107_spill] sm:$0xff] %v11686_v16  ;;  %14918 = vst [vmem:[#allocation109_spill] sm:$0xff] %v11690_v14  ;;  %v11706_v16 = vmul.f32 %v11443_v45, %v14898_v9  ;;  %v11710_v14 = vmul.f32 %v11447_v63, %v14898_v9 }
 0x334   :  { %14919 = vst [vmem:[#allocation106_spill] sm:$0xff] %v11694_v5  ;;  %14920 = vst [vmem:[#allocation108_spill] sm:$0xff] %v11702_v47  ;;  %v11714_v5 = vmul.f32 %v11451_v10, %v14898_v9  ;;  %v11722_v47 = vmul.f32 %v11455_v51, %v14898_v9 }
 0x335   :  { %14921 = vst [vmem:[#allocation112_spill] sm:$0xff] %v11706_v16  ;;  %14922 = vst [vmem:[#allocation116_spill] sm:$0xff] %v11710_v14  ;;  %v11726_v16 = vmul.f32 %v11459_v43, %v14898_v9  ;;  %v11730_v14 = vmul.f32 %v11463_v17, %v14898_v9 }
 0x336   :  { %14923 = vst [vmem:[#allocation110_spill] sm:$0xff] %v11714_v5  ;;  %14924 = vst [vmem:[#allocation114_spill] sm:$0xff] %v11722_v47  ;;  %v11734_v5 = vmul.f32 %v11467_v0, %v14898_v9  ;;  %v11742_v47 = vmul.f32 %v11471_v52, %v14898_v9 }
 0x337   :  { %14925 = vst [vmem:[#allocation47_spill] sm:$0xff] %v11726_v16  ;;  %14926 = vst [vmem:[#allocation53_spill] sm:$0xff] %v11730_v14  ;;  %v11746_v16 = vmul.f32 %v11475_v18, %v14898_v9  ;;  %v11750_v14 = vmul.f32 %v11479_v49, %v14898_v9 }
 0x338   :  { %14927 = vst [vmem:[#allocation57_spill] sm:$0xff] %v11734_v5  ;;  %14928 = vst [vmem:[#allocation51_spill] sm:$0xff] %v11742_v47  ;;  %v11754_v5 = vmul.f32 %v11483_v54, %v14898_v9  ;;  %v11762_v47 = vmul.f32 %v11487_v59, %v14898_v9 }
 0x339   :  { %14929 = vst [vmem:[#allocation55_spill] sm:$0xff] %v11746_v16  ;;  %14930 = vst [vmem:[#allocation61_spill] sm:$0xff] %v11750_v14  ;;  %v11766_v16 = vmul.f32 %v11491_v31, %v14898_v9  ;;  %v11770_v14 = vmul.f32 %v11495_v34, %v14898_v9 }
 0x33a   :  { %14931 = vst [vmem:[#allocation65_spill] sm:$0xff] %v11754_v5  ;;  %14932 = vst [vmem:[#allocation81_spill] sm:$0xff] %v11762_v47  ;;  %v11774_v5 = vmul.f32 %v11499_v27, %v14898_v9  ;;  %v11782_v47 = vmul.f32 %v11503_v3, %v14898_v9 }
 0x33b   :  { %14933 = vst [vmem:[#allocation23_spill] sm:$0xff] %v11766_v16  ;;  %14934 = vst [vmem:[#allocation75_spill] sm:$0xff] %v11770_v14  ;;  %v11786_v16 = vmul.f32 %v11507_v22, %v14898_v9  ;;  %v11790_v14 = vmul.f32 %v11511_v50, %v14898_v9 }
 0x33c   :  { %14935 = vst [vmem:[#allocation79_spill] sm:$0xff] %v11774_v5  ;;  %14936 = vst [vmem:[#allocation85_spill] sm:$0xff] %v11782_v47  ;;  %v11794_v5 = vmul.f32 %v11515_v58, %v14898_v9  ;;  %v11802_v47 = vmul.f32 %v11519_v62, %v14898_v9  ;;  %v14969_v58 = vld [vmem:[#allocation80_spill] sm:$0xff]  ;;  %v14970_v62 = vld [vmem:[#allocation86_spill] sm:$0xff] }
 0x33d   :  { %14937 = vst [vmem:[#allocation89_spill] sm:$0xff] %v11786_v16  ;;  %14938 = vst [vmem:[#allocation83_spill] sm:$0xff] %v11790_v14  ;;  %v11806_v16 = vmul.f32 %v11523_v55, %v14898_v9  ;;  %v11810_v14 = vmul.f32 %v11527_v2, %v14898_v9  ;;  %v4596_v2 = vsel %vm4468_vm4, %v11355_v56, %v14970_v62  ;;  %v14974_v62 = vld [vmem:[#allocation93_spill] sm:$0xff]  ;;  %vm4519_vm4 = vcmp.gt.f32.partialorder %v11559_v12, 0.0 }
 0x33e   :  { %14939 = vst [vmem:[#allocation87_spill] sm:$0xff] %v11794_v5  ;;  %14940 = vst [vmem:[#allocation92_spill] sm:$0xff] %v11802_v47  ;;  %v11814_v5 = vmul.f32 %v11531_v11, %v14898_v9  ;;  %v14944_v47 = vld [vmem:[#allocation64_spill] sm:$0xff] }
 0x33f   :  { %14941 = vst [vmem:[#allocation96_spill] sm:$0xff] %v11806_v16  ;;  %14942 = vst [vmem:[#allocation29_spill] sm:$0xff] %v11810_v14  ;;  %v11822_v10 = vmul.f32 %v14944_v47, %v14898_v9  ;;  %v14946_v16 = vld [vmem:[#allocation70_spill] sm:$0xff]  ;;  %vm4513_vm0 = vcmp.gt.f32.partialorder %v14944_v47, 0.0 }
 0x340   :  { %14943 = vst [vmem:[#allocation94_spill] sm:$0xff] %v11814_v5  ;;  %v11826_v63 = vmul.f32 %v14946_v16, %v14898_v9  ;;  %v14948_v14 = vld [vmem:[#allocation74_spill] sm:$0xff]  ;;  %v14950_v5 = vld [vmem:[#allocation68_spill] sm:$0xff]  ;;  %vm4514_vm1 = vcmp.gt.f32.partialorder %v14946_v16, 0.0  ;;  %5889 = vst [vmem:[%s13651_s5 + $0x410] sm:$0xff] %v4596_v2 }
 0x341   :  { %14945 = vst [vmem:[#allocation9_spill] sm:$0xff] %v11822_v10  ;;  %v11830_v45 = vmul.f32 %v14948_v14, %v14898_v9  ;;  %v11834_v51 = vmul.f32 %v14950_v5, %v14898_v9  ;;  %v14952_v10 = vld [vmem:[#allocation72_spill] sm:$0xff]  ;;  %vm4515_vm15 = vcmp.gt.f32.partialorder %v14948_v14, 0.0  ;;  %vm4516_vm14 = vcmp.gt.f32.partialorder %v14950_v5, 0.0  ;;  %v14978_v2 = vld [vmem:[#allocation99_spill] sm:$0xff] }
 0x342   :  { %14947 = vst [vmem:[#allocation3_spill] sm:$0xff] %v11826_v63  ;;  %v11842_v0 = vmul.f32 %v14952_v10, %v14898_v9  ;;  %v14954_v63 = vld [vmem:[#allocation78_spill] sm:$0xff] }
 0x343   :  { %14949 = vst [vmem:[#allocation7_spill] sm:$0xff] %v11830_v45  ;;  %14951 = vst [vmem:[#allocation13_spill] sm:$0xff] %v11834_v51  ;;  %v11846_v17 = vmul.f32 %v14954_v63, %v14898_v9  ;;  %v11850_v45 = vmul.f32 %v11559_v12, %v14898_v9  ;;  %v11854_v51 = vmul.f32 %v11563_v29, %v14898_v9 }
 0x344   :  { %14953 = vst [vmem:[#allocation17_spill] sm:$0xff] %v11842_v0  ;;  %v11862_v0 = vmul.f32 %v11567_v37, %v14898_v9 }
 0x345   :  { %14955 = vst [vmem:[#allocation11_spill] sm:$0xff] %v11846_v17  ;;  %14956 = vst [vmem:[#allocation15_spill] sm:$0xff] %v11850_v45  ;;  %v11866_v17 = vmul.f32 %v11571_v33, %v14898_v9  ;;  %v11870_v45 = vmul.f32 %v11575_v32, %v14898_v9 }
 0x346   :  { %14957 = vst [vmem:[#allocation33_spill] sm:$0xff] %v11854_v51  ;;  %14958 = vst [vmem:[#allocation27_spill] sm:$0xff] %v11862_v0  ;;  %v14961_v51 = vld [vmem:[#allocation82_spill] sm:$0xff]  ;;  %v11882_v0 = vmul.f32 %v11583_v25, %v14898_v9 }
 0x347   :  { %14959 = vst [vmem:[#allocation31_spill] sm:$0xff] %v11866_v17  ;;  %14960 = vst [vmem:[#allocation37_spill] sm:$0xff] %v11870_v45  ;;  %v11874_v59 = vmul.f32 %v14961_v51, %v14898_v9  ;;  %v11886_v17 = vmul.f32 %v11587_v46, %v14898_v9  ;;  %v11890_v45 = vmul.f32 %v11591_v28, %v14898_v9 }
 0x348   :  { %14963 = vst [vmem:[#allocation35_spill] sm:$0xff] %v11882_v0  ;;  %v11902_v0 = vmul.f32 %v11599_v24, %v14898_v9 }
 0x349   :  { %14962 = vst [vmem:[#allocation41_spill] sm:$0xff] %v11874_v59  ;;  %14964 = vst [vmem:[#allocation243_spill] sm:$0xff] %v11886_v17  ;;  %v11894_v59 = vmul.f32 %v11595_v15, %v14898_v9  ;;  %v14968_v17 = vld [vmem:[#allocation76_spill] sm:$0xff]  ;;  %v14971_v9 = vld [vmem:[#allocation90_spill] sm:$0xff] }
 0x34a   :  { %14965 = vst [vmem:[#allocation244_spill] sm:$0xff] %v11890_v45  ;;  %14967 = vst [vmem:[#allocation246_spill] sm:$0xff] %v11902_v0  ;;  %v4594_v45 = vsel %vm4466_vm2, %v11347_v19, %v14968_v17  ;;  %v4597_v19 = vsel %vm4469_vm5, %v11359_v36, %v14971_v9  ;;  %v14972_v17 = vld [vmem:[#allocation84_spill] sm:$0xff]  ;;  %v4600_v0 = vsel %vm4472_vm6, %v11371_v30, %v14974_v62  ;;  %vm4517_vm2 = vcmp.gt.f32.partialorder %v14952_v10, 0.0  ;;  %v14975_v36 = vld [vmem:[#allocation97_spill] sm:$0xff] }
 0x34b   :  { %14966 = vst [vmem:[#allocation245_spill] sm:$0xff] %v11894_v59  ;;  %v4595_v59 = vsel %vm4467_vm3, %v11351_v60, %v14969_v58  ;;  %v4598_v60 = vsel %vm4470_vm8, %v11363_v23, %v14972_v17  ;;  %v14973_v58 = vld [vmem:[#allocation88_spill] sm:$0xff]  ;;  %5887 = vst [vmem:[%s13651_s5 + $0x400] sm:$0xff] %v4594_v45  ;;  %vm4518_vm3 = vcmp.gt.f32.partialorder %v14954_v63, 0.0  ;;  %vm4520_vm5 = vcmp.gt.f32.partialorder %v11563_v29, 0.0  ;;  %v14977_v45 = vld [vmem:[#allocation95_spill] sm:$0xff] }
 0x34c   :  { %v4599_v56 = vsel %vm4471_vm7, %v11367_v39, %v14973_v58  ;;  %5888 = vst [vmem:[%s13651_s5 + $0x408] sm:$0xff] %v4595_v59  ;;  %v4601_v23 = vsel %vm4473_vm9, %v11375_v8, %v14975_v36  ;;  %v14976_v39 = vld [vmem:[#allocation91_spill] sm:$0xff]  ;;  %v4603_v59 = vsel %vm4475_vm12, %v11383_v13, %v14977_v45  ;;  %v4604_v9 = vsel %vm4476_vm11, %v11387_v7, %v14978_v2  ;;  %v14979_v8 = vld [vmem:[#allocation101_spill] sm:$0xff]  ;;  %v14980_v13 = vld [vmem:[#allocation98_spill] sm:$0xff] }
 0x34d   :  { %v4602_v30 = vsel %vm4474_vm10, %v11379_v42, %v14976_v39  ;;  %5890 = vst [vmem:[%s13651_s5 + $0x418] sm:$0xff] %v4597_v19  ;;  %5891 = vst [vmem:[%s13651_s5 + $0x420] sm:$0xff] %v4598_v60  ;;  %vm4521_vm8 = vcmp.gt.f32.partialorder %v11567_v37, 0.0  ;;  %vm4522_vm7 = vcmp.gt.f32.partialorder %v11571_v33, 0.0  ;;  %v4605_v42 = vsel %vm4477_vm13, %v11391_v61, %v14979_v8  ;;  %v14984_v61 = vld [vmem:[#allocation100_spill] sm:$0xff]  ;;  %v14990_v17 = vld [vmem:[#allocation102_spill] sm:$0xff] }
 0x34e   :  { %5892 = vst [vmem:[%s13651_s5 + $0x428] sm:$0xff] %v4599_v56  ;;  %5893 = vst [vmem:[%s13651_s5 + $0x430] sm:$0xff] %v4600_v0  ;;  %vm14981_vm10 = vcmp.gt.f32.partialorder %v11395_v35, 0.0  ;;  %vm14982_vm12 = vcmp.gt.f32.partialorder %v11399_v41, 0.0  ;;  %vm14983_vm11 = vcmp.gt.f32.partialorder %v11403_v26, 0.0  ;;  %vm14985_vm9 = vcmp.gt.f32.partialorder %v11407_v6, 0.0 }
 0x34f   :  { %v4606_v7 = vsel %vm14981_vm10, %v11395_v35, %v14980_v13  ;;  %v4607_v0 = vsel %vm14982_vm12, %v11399_v41, %v11655_v53  ;;  %v4608_v19 = vsel %vm14983_vm11, %v11403_v26, %v11659_v1  ;;  %5894 = vst [vmem:[%s13651_s5 + $0x438] sm:$0xff] %v4601_v23  ;;  %5895 = vst [vmem:[%s13651_s5 + $0x440] sm:$0xff] %v4602_v30  ;;  %vm4526_vm10 = vcmp.gt.f32.partialorder %v11587_v46, 0.0  ;;  %v14986_v41 = vld [vmem:[#allocation103_spill] sm:$0xff]  ;;  %v14988_v53 = vld [vmem:[#allocation105_spill] sm:$0xff] }
 0x350   :  { %5896 = vst [vmem:[%s13651_s5 + $0x448] sm:$0xff] %v4603_v59  ;;  %5897 = vst [vmem:[%s13651_s5 + $0x450] sm:$0xff] %v4604_v9  ;;  %v4609_v35 = vsel %vm14985_vm9, %v11407_v6, %v14984_v61  ;;  %vm14987_vm6 = vcmp.gt.f32.partialorder %v11411_v20, 0.0  ;;  %vm14989_vm13 = vcmp.gt.f32.partialorder %v11415_v38, 0.0  ;;  %vm14991_vm12 = vcmp.gt.f32.partialorder %v11419_v44, 0.0  ;;  %v14992_v6 = vld [vmem:[#allocation104_spill] sm:$0xff] }
 0x351   :  { %v4610_v26 = vsel %vm14987_vm6, %v11411_v20, %v14986_v41  ;;  %v4611_v1 = vsel %vm14989_vm13, %v11415_v38, %v14988_v53  ;;  %v4612_v60 = vsel %vm14991_vm12, %v11419_v44, %v14990_v17  ;;  %5898 = vst [vmem:[%s13651_s5 + $0x458] sm:$0xff] %v4605_v42  ;;  %5899 = vst [vmem:[%s13651_s5 + $0x460] sm:$0xff] %v4606_v7  ;;  %vm4529_vm6 = vcmp.gt.f32.partialorder %v11599_v24, 0.0  ;;  %v14994_v38 = vld [vmem:[#allocation107_spill] sm:$0xff]  ;;  %v14996_v58 = vld [vmem:[#allocation109_spill] sm:$0xff] }
 0x352   :  { %5900 = vst [vmem:[%s13651_s5 + $0x468] sm:$0xff] %v4607_v0  ;;  %5901 = vst [vmem:[%s13651_s5 + $0x470] sm:$0xff] %v4608_v19  ;;  %vm14993_vm9 = vcmp.gt.f32.partialorder %v11423_v21, 0.0  ;;  %vm14995_vm13 = vcmp.gt.f32.partialorder %v11427_v48, 0.0  ;;  %vm14997_vm12 = vcmp.gt.f32.partialorder %v11431_v57, 0.0  ;;  %v14998_v62 = vld [vmem:[#allocation106_spill] sm:$0xff] }
 0x353   :  { %v4613_v20 = vsel %vm14993_vm9, %v11423_v21, %v14992_v6  ;;  %v4614_v44 = vsel %vm14995_vm13, %v11427_v48, %v14994_v38  ;;  %v4615_v56 = vsel %vm14997_vm12, %v11431_v57, %v14996_v58  ;;  %vm14999_vm11 = vcmp.gt.f32.partialorder %v11435_v40, 0.0  ;;  %5902 = vst [vmem:[%s13651_s5 + $0x478] sm:$0xff] %v4609_v35  ;;  %5903 = vst [vmem:[%s13651_s5 + $0x480] sm:$0xff] %v4610_v26  ;;  %v15000_v21 = vld [vmem:[#allocation108_spill] sm:$0xff]  ;;  %v15008_v59 = vld [vmem:[#allocation110_spill] sm:$0xff] }
 0x354   :  { %v4616_v36 = vsel %vm14999_vm11, %v11435_v40, %v14998_v62  ;;  %5904 = vst [vmem:[%s13651_s5 + $0x488] sm:$0xff] %v4611_v1  ;;  %5905 = vst [vmem:[%s13651_s5 + $0x490] sm:$0xff] %v4612_v60  ;;  %vm15001_vm11 = vcmp.gt.f32.partialorder %v11439_v4, 0.0  ;;  %v15002_v57 = vld [vmem:[#allocation112_spill] sm:$0xff]  ;;  %v15003_v40 = vld [vmem:[#allocation50_spill] sm:$0xff] }
 0x355   :  { %v4617_v48 = vsel %vm15001_vm11, %v11439_v4, %v15000_v21  ;;  %vm15004_vm9 = vcmp.gt.f32.partialorder %v15003_v40, 0.0  ;;  %v15005_v39 = vld [vmem:[#allocation116_spill] sm:$0xff]  ;;  %5906 = vst [vmem:[%s13651_s5 + $0x498] sm:$0xff] %v4613_v20  ;;  %5907 = vst [vmem:[%s13651_s5 + $0x4a0] sm:$0xff] %v4614_v44  ;;  %v15011_v4 = vld [vmem:[#allocation114_spill] sm:$0xff] }
 0x356   :  { %v4618_v23 = vsel %vm15004_vm9, %v15003_v40, %v15002_v57  ;;  %v15006_v30 = vld [vmem:[#allocation44_spill] sm:$0xff]  ;;  %5908 = vst [vmem:[%s13651_s5 + $0x4a8] sm:$0xff] %v4615_v56  ;;  %5909 = vst [vmem:[%s13651_s5 + $0x4b0] sm:$0xff] %v4616_v36  ;;  %v15012_v8 = vld [vmem:[#allocation54_spill] sm:$0xff]  ;;  %vm15015_vm9 = vcmp.gt.f32.partialorder %v11459_v43, 0.0 }
 0x357   :  { %vm15007_vm13 = vcmp.gt.f32.partialorder %v15006_v30, 0.0  ;;  %v15009_v2 = vld [vmem:[#allocation48_spill] sm:$0xff]  ;;  %vm15013_vm11 = vcmp.gt.f32.partialorder %v15012_v8, 0.0  ;;  %v15014_v13 = vld [vmem:[#allocation47_spill] sm:$0xff]  ;;  %v15016_v0 = vld [vmem:[#allocation53_spill] sm:$0xff]  ;;  %5910 = vst [vmem:[%s13651_s5 + $0x4b8] sm:$0xff] %v4617_v48 }
 0x358   :  { %v4619_v45 = vsel %vm15007_vm13, %v15006_v30, %v15005_v39  ;;  %vm15010_vm12 = vcmp.gt.f32.partialorder %v15009_v2, 0.0  ;;  %v4621_v42 = vsel %vm15013_vm11, %v15012_v8, %v15011_v4  ;;  %v4622_v7 = vsel %vm15015_vm9, %v11459_v43, %v15014_v13  ;;  %v15017_v19 = vld [vmem:[#allocation58_spill] sm:$0xff]  ;;  %v15019_v35 = vld [vmem:[#allocation57_spill] sm:$0xff]  ;;  %v15020_v41 = vld [vmem:[#allocation52_spill] sm:$0xff]  ;;  %5911 = vst [vmem:[%s13651_s5 + $0x4c0] sm:$0xff] %v4618_v23 }
 0x359   :  { %v4620_v9 = vsel %vm15010_vm12, %v15009_v2, %v15008_v59  ;;  %vm15018_vm13 = vcmp.gt.f32.partialorder %v15017_v19, 0.0  ;;  %vm15021_vm12 = vcmp.gt.f32.partialorder %v15020_v41, 0.0  ;;  %5912 = vst [vmem:[%s13651_s5 + $0x4c8] sm:$0xff] %v4619_v45  ;;  %v15022_v43 = vld [vmem:[#allocation51_spill] sm:$0xff]  ;;  %vm15023_vm11 = vcmp.gt.f32.partialorder %v11471_v52, 0.0  ;;  %v15026_v60 = vld [vmem:[#allocation61_spill] sm:$0xff] }
 0x35a   :  { %v4623_v61 = vsel %vm15018_vm13, %v15017_v19, %v15016_v0  ;;  %v4624_v26 = vsel %vm15021_vm12, %v15020_v41, %v15019_v35  ;;  %5913 = vst [vmem:[%s13651_s5 + $0x4d0] sm:$0xff] %v4620_v9  ;;  %v4625_v53 = vsel %vm15023_vm11, %v11471_v52, %v15022_v43  ;;  %v15024_v1 = vld [vmem:[#allocation55_spill] sm:$0xff]  ;;  %vm15025_vm9 = vcmp.gt.f32.partialorder %v11475_v18, 0.0  ;;  %v15028_v20 = vld [vmem:[#allocation65_spill] sm:$0xff]  ;;  %5914 = vst [vmem:[%s13651_s5 + $0x4d8] sm:$0xff] %v4621_v42 }
 0x35b   :  { %v4626_v17 = vsel %vm15025_vm9, %v11475_v18, %v15024_v1  ;;  %vm15027_vm13 = vcmp.gt.f32.partialorder %v11479_v49, 0.0  ;;  %vm15029_vm12 = vcmp.gt.f32.partialorder %v11483_v54, 0.0  ;;  %5915 = vst [vmem:[%s13651_s5 + $0x4e0] sm:$0xff] %v4622_v7  ;;  %5916 = vst [vmem:[%s13651_s5 + $0x4e8] sm:$0xff] %v4623_v61  ;;  %v15030_v52 = vld [vmem:[#allocation81_spill] sm:$0xff]  ;;  %v15031_v18 = vld [vmem:[#allocation56_spill] sm:$0xff] }
 0x35c   :  { %v4627_v6 = vsel %vm15027_vm13, %v11479_v49, %v15026_v60  ;;  %v4628_v38 = vsel %vm15029_vm12, %v11483_v54, %v15028_v20  ;;  %5917 = vst [vmem:[%s13651_s5 + $0x4f0] sm:$0xff] %v4624_v26  ;;  %vm15032_vm11 = vcmp.gt.f32.partialorder %v15031_v18, 0.0  ;;  %v15033_v54 = vld [vmem:[#allocation23_spill] sm:$0xff]  ;;  %vm15034_vm9 = vcmp.gt.f32.partialorder %v11491_v31, 0.0  ;;  %5918 = vst [vmem:[%s13651_s5 + $0x4f8] sm:$0xff] %v4625_v53  ;;  %v15046_v23 = vld [vmem:[#allocation62_spill] sm:$0xff] }
 0x35d   :  { %v4629_v49 = vsel %vm15032_vm11, %v15031_v18, %v15030_v52  ;;  %v4630_v44 = vsel %vm15034_vm9, %v11491_v31, %v15033_v54  ;;  %v15035_v58 = vld [vmem:[#allocation75_spill] sm:$0xff]  ;;  %vm15036_vm13 = vcmp.gt.f32.partialorder %v11495_v34, 0.0  ;;  %vm15038_vm12 = vcmp.gt.f32.partialorder %v11499_v27, 0.0  ;;  %5919 = vst [vmem:[%s13651_s5 + $0x500] sm:$0xff] %v4626_v17  ;;  %5920 = vst [vmem:[%s13651_s5 + $0x508] sm:$0xff] %v4627_v6  ;;  %v15039_v31 = vld [vmem:[#allocation85_spill] sm:$0xff] }
 0x35e   :  { %v4631_v56 = vsel %vm15036_vm13, %v11495_v34, %v15035_v58  ;;  %v15037_v62 = vld [vmem:[#allocation79_spill] sm:$0xff]  ;;  %5921 = vst [vmem:[%s13651_s5 + $0x510] sm:$0xff] %v4628_v38  ;;  %vm15040_vm11 = vcmp.gt.f32.partialorder %v11503_v3, 0.0  ;;  %vm15042_vm9 = vcmp.gt.f32.partialorder %v11507_v22, 0.0  ;;  %vm15044_vm13 = vcmp.gt.f32.partialorder %v11511_v50, 0.0  ;;  %5922 = vst [vmem:[%s13651_s5 + $0x518] sm:$0xff] %v4629_v49 }
 0x35f   :  { %v4632_v36 = vsel %vm15038_vm12, %v11499_v27, %v15037_v62  ;;  %v4633_v34 = vsel %vm15040_vm11, %v11503_v3, %v15039_v31  ;;  %v15041_v27 = vld [vmem:[#allocation89_spill] sm:$0xff]  ;;  %v15043_v48 = vld [vmem:[#allocation83_spill] sm:$0xff]  ;;  %vm15047_vm12 = vcmp.gt.f32.partialorder %v15046_v23, 0.0  ;;  %5923 = vst [vmem:[%s13651_s5 + $0x520] sm:$0xff] %v4630_v44  ;;  %5924 = vst [vmem:[%s13651_s5 + $0x528] sm:$0xff] %v4631_v56 }
 0x360   :  { %v4634_v21 = vsel %vm15042_vm9, %v11507_v22, %v15041_v27  ;;  %v4635_v57 = vsel %vm15044_vm13, %v11511_v50, %v15043_v48  ;;  %v15045_v40 = vld [vmem:[#allocation87_spill] sm:$0xff]  ;;  %5925 = vst [vmem:[%s13651_s5 + $0x530] sm:$0xff] %v4632_v36  ;;  %v15048_v3 = vld [vmem:[#allocation92_spill] sm:$0xff]  ;;  %v15049_v22 = vld [vmem:[#allocation66_spill] sm:$0xff]  ;;  %vm15052_vm9 = vcmp.gt.f32.partialorder %v11523_v55, 0.0 }
 0x361   :  { %v4636_v39 = vsel %vm15047_vm12, %v15046_v23, %v15045_v40  ;;  %vm15050_vm11 = vcmp.gt.f32.partialorder %v15049_v22, 0.0  ;;  %v15051_v30 = vld [vmem:[#allocation96_spill] sm:$0xff]  ;;  %v15053_v59 = vld [vmem:[#allocation29_spill] sm:$0xff]  ;;  %v15056_v4 = vld [vmem:[#allocation94_spill] sm:$0xff]  ;;  %vm15057_vm12 = vcmp.gt.f32.partialorder %v11531_v11, 0.0  ;;  %5926 = vst [vmem:[%s13651_s5 + $0x538] sm:$0xff] %v4633_v34 }
 0x362   :  { %v4637_v50 = vsel %vm15050_vm11, %v15049_v22, %v15048_v3  ;;  %v4638_v45 = vsel %vm15052_vm9, %v11523_v55, %v15051_v30  ;;  %v15054_v2 = vld [vmem:[#allocation60_spill] sm:$0xff]  ;;  %v4640_v8 = vsel %vm15057_vm12, %v11531_v11, %v15056_v4  ;;  %5927 = vst [vmem:[%s13651_s5 + $0x540] sm:$0xff] %v4634_v21  ;;  %5928 = vst [vmem:[%s13651_s5 + $0x548] sm:$0xff] %v4635_v57  ;;  %v15058_v55 = vld [vmem:[#allocation9_spill] sm:$0xff] }
 0x363   :  { %vm15055_vm13 = vcmp.gt.f32.partialorder %v15054_v2, 0.0  ;;  %5929 = vst [vmem:[%s13651_s5 + $0x550] sm:$0xff] %v4636_v39  ;;  %v4641_v11 = vsel %vm4513_vm0, %v14944_v47, %v15058_v55  ;;  %v15059_v42 = vld [vmem:[#allocation3_spill] sm:$0xff]  ;;  %v15061_v19 = vld [vmem:[#allocation13_spill] sm:$0xff]  ;;  %5930 = vst [vmem:[%s13651_s5 + $0x558] sm:$0xff] %v4637_v50  ;;  %vm15073_vm0 = vcmp.gt.f32.partialorder %v11583_v25, 0.0 }
 0x364   :  { %v4639_v9 = vsel %vm15055_vm13, %v15054_v2, %v15053_v59  ;;  %v4642_v13 = vsel %vm4514_vm1, %v14946_v16, %v15059_v42  ;;  %v15060_v7 = vld [vmem:[#allocation7_spill] sm:$0xff]  ;;  %v4644_v61 = vsel %vm4516_vm14, %v14950_v5, %v15061_v19  ;;  %5931 = vst [vmem:[%s13651_s5 + $0x560] sm:$0xff] %v4638_v45  ;;  %5933 = vst [vmem:[%s13651_s5 + $0x570] sm:$0xff] %v4640_v8  ;;  %v15065_v26 = vld [vmem:[#allocation33_spill] sm:$0xff]  ;;  %vm15069_vm14 = vcmp.gt.f32.partialorder %v11575_v32, 0.0 }
 0x365   :  { %v4643_v0 = vsel %vm4515_vm15, %v14948_v14, %v15060_v7  ;;  %5932 = vst [vmem:[%s13651_s5 + $0x568] sm:$0xff] %v4639_v9  ;;  %v15062_v14 = vld [vmem:[#allocation17_spill] sm:$0xff]  ;;  %v15063_v47 = vld [vmem:[#allocation11_spill] sm:$0xff]  ;;  %v4648_v43 = vsel %vm4520_vm5, %v11563_v29, %v15065_v26  ;;  %5934 = vst [vmem:[%s13651_s5 + $0x578] sm:$0xff] %v4641_v11  ;;  %vm15071_vm15 = vcmp.gt.f32.partialorder %v14961_v51, 0.0  ;;  %vm15076_vm1 = vcmp.gt.f32.partialorder %v11591_v28, 0.0 }
 0x366   :  { %v4645_v5 = vsel %vm4517_vm2, %v14952_v10, %v15062_v14  ;;  %v4646_v16 = vsel %vm4518_vm3, %v14954_v63, %v15063_v47  ;;  %v15064_v35 = vld [vmem:[#allocation15_spill] sm:$0xff]  ;;  %5935 = vst [vmem:[%s13651_s5 + $0x580] sm:$0xff] %v4642_v13  ;;  %5936 = vst [vmem:[%s13651_s5 + $0x588] sm:$0xff] %v4643_v0  ;;  %v15068_v53 = vld [vmem:[#allocation37_spill] sm:$0xff]  ;;  %vm15078_vm2 = vcmp.gt.f32.partialorder %v11595_v15, 0.0 }
 0x367   :  { %v4647_v41 = vsel %vm4519_vm4, %v11559_v12, %v15064_v35  ;;  %5937 = vst [vmem:[%s13651_s5 + $0x590] sm:$0xff] %v4644_v61  ;;  %v15066_v63 = vld [vmem:[#allocation27_spill] sm:$0xff]  ;;  %v4651_v1 = vsel %vm15069_vm14, %v11575_v32, %v15068_v53  ;;  %v15070_v17 = vld [vmem:[#allocation41_spill] sm:$0xff]  ;;  %5938 = vst [vmem:[%s13651_s5 + $0x598] sm:$0xff] %v4645_v5 }
 0x368   :  { %v4649_v10 = vsel %vm4521_vm8, %v11567_v37, %v15066_v63  ;;  %v15067_v12 = vld [vmem:[#allocation31_spill] sm:$0xff]  ;;  %v4652_v60 = vsel %vm15071_vm15, %v14961_v51, %v15070_v17  ;;  %5939 = vst [vmem:[%s13651_s5 + $0x5a0] sm:$0xff] %v4646_v16  ;;  %5940 = vst [vmem:[%s13651_s5 + $0x5a8] sm:$0xff] %v4647_v41  ;;  %v15075_v6 = vld [vmem:[#allocation244_spill] sm:$0xff] }
 0x369   :  { %v4650_v29 = vsel %vm4522_vm7, %v11571_v33, %v15067_v12  ;;  %5941 = vst [vmem:[%s13651_s5 + $0x5b0] sm:$0xff] %v4648_v43  ;;  %v15072_v37 = vld [vmem:[#allocation35_spill] sm:$0xff]  ;;  %v4655_v20 = vsel %vm15076_vm1, %v11591_v28, %v15075_v6  ;;  %v15077_v38 = vld [vmem:[#allocation245_spill] sm:$0xff]  ;;  %5942 = vst [vmem:[%s13651_s5 + $0x5b8] sm:$0xff] %v4649_v10 }
 0x36a   :  { %v4653_v51 = vsel %vm15073_vm0, %v11583_v25, %v15072_v37  ;;  %v15074_v33 = vld [vmem:[#allocation243_spill] sm:$0xff]  ;;  %v4656_v52 = vsel %vm15078_vm2, %v11595_v15, %v15077_v38  ;;  %5943 = vst [vmem:[%s13651_s5 + $0x5c0] sm:$0xff] %v4650_v29  ;;  %5944 = vst [vmem:[%s13651_s5 + $0x5c8] sm:$0xff] %v4651_v1  ;;  %v15079_v25 = vld [vmem:[#allocation246_spill] sm:$0xff] }
 0x36b   :  { %v4654_v32 = vsel %vm4526_vm10, %v11587_v46, %v15074_v33  ;;  %5945 = vst [vmem:[%s13651_s5 + $0x5d0] sm:$0xff] %v4652_v60  ;;  %v4657_v46 = vsel %vm4529_vm6, %v11599_v24, %v15079_v25  ;;  %5946 = vst [vmem:[%s13651_s5 + $0x5d8] sm:$0xff] %v4653_v51  ;;  %v15080_v28 = vld [vmem:[#allocation241_spill] sm:$0xff]  ;;  %v15081_v15 = vld [vmem:[#allocation242_spill] sm:$0xff] }
 0x36c   :  { %5947 = vst [vmem:[%s13651_s5 + $0x5e0] sm:$0xff] %v4654_v32  ;;  %5948 = vst [vmem:[%s13651_s5 + $0x5e8] sm:$0xff] %v4655_v20  ;;  %v4847_v24 = vmul.f32 %v15081_v15, %v15080_v28  ;;  %v15082_v18 = vld [vmem:[#allocation5_spill] sm:$0xff]  ;;  %v15084_v54 = vld [vmem:[#allocation120_spill] sm:$0xff] }
 0x36d   :  { %5949 = vst [vmem:[%s13651_s5 + $0x5f0] sm:$0xff] %v4656_v52  ;;  %5950 = vst [vmem:[%s13651_s5 + $0x5f8] sm:$0xff] %v4657_v46  ;;  %v12376_v44 = vmul.f32 %v15081_v15, %v15084_v54  ;;  %v15085_v58 = vld [vmem:[#allocation124_spill] sm:$0xff]  ;;  %v15086_v62 = vld [vmem:[#allocation118_spill] sm:$0xff] }
 0x36e   :  { %v12372_v49 = vadd.f32 %v4847_v24, %v15082_v18  ;;  %v12380_v56 = vmul.f32 %v15081_v15, %v15085_v58  ;;  %v12384_v36 = vmul.f32 %v15086_v62, %v15081_v15  ;;  %v15087_v31 = vld [vmem:[#allocation122_spill] sm:$0xff]  ;;  %v15088_v27 = vld [vmem:[#allocation128_spill] sm:$0xff] }
 0x36f   :  { %v12388_v34 = vmul.f32 %v15087_v31, %v15081_v15  ;;  %v12392_v21 = vmul.f32 %v15081_v15, %v15088_v27  ;;  %v15089_v48 = vld [vmem:[#allocation132_spill] sm:$0xff]  ;;  %v15090_v40 = vld [vmem:[#allocation126_spill] sm:$0xff] }
 0x370   :  { %15083 = vst [vmem:[#allocation247_spill] sm:$0xff] %v12372_v49  ;;  %v12396_v57 = vmul.f32 %v15081_v15, %v15089_v48  ;;  %v12400_v23 = vmul.f32 %v15090_v40, %v15081_v15  ;;  %v15091_v39 = vld [vmem:[#allocation130_spill] sm:$0xff]  ;;  %v15092_v22 = vld [vmem:[#allocation136_spill] sm:$0xff]  ;;  %v15145_v49 = vld [vmem:[#allocation229_spill] sm:$0xff] }
 0x371   :  { %v12404_v3 = vmul.f32 %v15091_v39, %v15081_v15  ;;  %v12408_v50 = vmul.f32 %v15081_v15, %v15092_v22  ;;  %v15093_v30 = vld [vmem:[#allocation140_spill] sm:$0xff]  ;;  %v15094_v59 = vld [vmem:[#allocation134_spill] sm:$0xff] }
 0x372   :  { %v12412_v45 = vmul.f32 %v15081_v15, %v15093_v30  ;;  %v12416_v2 = vmul.f32 %v15094_v59, %v15081_v15  ;;  %v15095_v9 = vld [vmem:[#allocation138_spill] sm:$0xff]  ;;  %v15096_v8 = vld [vmem:[#allocation144_spill] sm:$0xff] }
 0x373   :  { %v12420_v4 = vmul.f32 %v15095_v9, %v15081_v15  ;;  %v12424_v55 = vmul.f32 %v15081_v15, %v15096_v8  ;;  %v15097_v11 = vld [vmem:[#allocation148_spill] sm:$0xff]  ;;  %v15098_v13 = vld [vmem:[#allocation142_spill] sm:$0xff] }
 0x374   :  { %v12428_v42 = vmul.f32 %v15081_v15, %v15097_v11  ;;  %v12432_v7 = vmul.f32 %v15098_v13, %v15081_v15  ;;  %v15099_v0 = vld [vmem:[#allocation146_spill] sm:$0xff]  ;;  %v15100_v61 = vld [vmem:[#allocation152_spill] sm:$0xff] }
 0x375   :  { %v12436_v19 = vmul.f32 %v15099_v0, %v15081_v15  ;;  %v12440_v14 = vmul.f32 %v15081_v15, %v15100_v61  ;;  %v15101_v5 = vld [vmem:[#allocation156_spill] sm:$0xff]  ;;  %v15102_v16 = vld [vmem:[#allocation150_spill] sm:$0xff] }
 0x376   :  { %v12444_v47 = vmul.f32 %v15081_v15, %v15101_v5  ;;  %v12448_v35 = vmul.f32 %v15102_v16, %v15081_v15  ;;  %v15103_v41 = vld [vmem:[#allocation154_spill] sm:$0xff]  ;;  %v15104_v43 = vld [vmem:[#allocation160_spill] sm:$0xff] }
 0x377   :  { %v12452_v26 = vmul.f32 %v15103_v41, %v15081_v15  ;;  %v12456_v63 = vmul.f32 %v15081_v15, %v15104_v43  ;;  %v15105_v10 = vld [vmem:[#allocation164_spill] sm:$0xff]  ;;  %v15106_v29 = vld [vmem:[#allocation158_spill] sm:$0xff] }
 0x378   :  { %v12460_v12 = vmul.f32 %v15081_v15, %v15105_v10  ;;  %v12464_v53 = vmul.f32 %v15106_v29, %v15081_v15  ;;  %v15107_v1 = vld [vmem:[#allocation162_spill] sm:$0xff]  ;;  %v15108_v60 = vld [vmem:[#allocation168_spill] sm:$0xff] }
 0x379   :  { %v12468_v17 = vmul.f32 %v15107_v1, %v15081_v15  ;;  %v12472_v37 = vmul.f32 %v15081_v15, %v15108_v60  ;;  %v15109_v51 = vld [vmem:[#allocation172_spill] sm:$0xff]  ;;  %v15110_v32 = vld [vmem:[#allocation166_spill] sm:$0xff] }
 0x37a   :  { %v12476_v33 = vmul.f32 %v15081_v15, %v15109_v51  ;;  %v12480_v6 = vmul.f32 %v15110_v32, %v15081_v15  ;;  %v15111_v20 = vld [vmem:[#allocation170_spill] sm:$0xff]  ;;  %v15112_v52 = vld [vmem:[#allocation176_spill] sm:$0xff] }
 0x37b   :  { %v12484_v38 = vmul.f32 %v15111_v20, %v15081_v15  ;;  %v12488_v25 = vmul.f32 %v15081_v15, %v15112_v52  ;;  %v15113_v46 = vld [vmem:[#allocation180_spill] sm:$0xff]  ;;  %v15114_v24 = vld [vmem:[#allocation174_spill] sm:$0xff]  ;;  %v15128_v20 = vld [vmem:[#allocation207_spill] sm:$0xff] }
 0x37c   :  { %v12492_v28 = vmul.f32 %v15081_v15, %v15113_v46  ;;  %v12496_v54 = vmul.f32 %v15114_v24, %v15081_v15  ;;  %v15115_v58 = vld [vmem:[#allocation178_spill] sm:$0xff]  ;;  %v15116_v31 = vld [vmem:[#allocation184_spill] sm:$0xff]  ;;  %v12552_v52 = vmul.f32 %v15081_v15, %v15128_v20  ;;  %v15129_v46 = vld [vmem:[#allocation211_spill] sm:$0xff] }
 0x37d   :  { %v12500_v62 = vmul.f32 %v15115_v58, %v15081_v15  ;;  %v12504_v27 = vmul.f32 %v15081_v15, %v15116_v31  ;;  %v15117_v48 = vld [vmem:[#allocation188_spill] sm:$0xff]  ;;  %v15118_v39 = vld [vmem:[#allocation182_spill] sm:$0xff]  ;;  %v12556_v24 = vmul.f32 %v15081_v15, %v15129_v46  ;;  %v15139_v46 = vld [vmem:[#allocation225_spill] sm:$0xff] }
 0x37e   :  { %v12508_v40 = vmul.f32 %v15081_v15, %v15117_v48  ;;  %v12512_v22 = vmul.f32 %v15118_v39, %v15081_v15  ;;  %v15119_v30 = vld [vmem:[#allocation186_spill] sm:$0xff]  ;;  %v15120_v9 = vld [vmem:[#allocation192_spill] sm:$0xff]  ;;  %v15131_v48 = vld [vmem:[#allocation209_spill] sm:$0xff] }
 0x37f   :  { %v12516_v59 = vmul.f32 %v15119_v30, %v15081_v15  ;;  %v12520_v8 = vmul.f32 %v15081_v15, %v15120_v9  ;;  %v15121_v11 = vld [vmem:[#allocation196_spill] sm:$0xff]  ;;  %v15122_v0 = vld [vmem:[#allocation190_spill] sm:$0xff]  ;;  %v12564_v39 = vmul.f32 %v15131_v48, %v15081_v15  ;;  %v15132_v30 = vld [vmem:[#allocation215_spill] sm:$0xff] }
 0x380   :  { %v12524_v13 = vmul.f32 %v15081_v15, %v15121_v11  ;;  %v12528_v61 = vmul.f32 %v15122_v0, %v15081_v15  ;;  %v15123_v5 = vld [vmem:[#allocation194_spill] sm:$0xff]  ;;  %v15124_v41 = vld [vmem:[#allocation200_spill] sm:$0xff]  ;;  %v12568_v9 = vmul.f32 %v15081_v15, %v15132_v30 }
 0x381   :  { %v12532_v16 = vmul.f32 %v15123_v5, %v15081_v15  ;;  %v12536_v43 = vmul.f32 %v15081_v15, %v15124_v41  ;;  %v15125_v10 = vld [vmem:[#allocation204_spill] sm:$0xff]  ;;  %v15126_v1 = vld [vmem:[#allocation198_spill] sm:$0xff]  ;;  %v15134_v5 = vld [vmem:[#allocation213_spill] sm:$0xff] }
 0x382   :  { %v12540_v29 = vmul.f32 %v15081_v15, %v15125_v10  ;;  %v12544_v60 = vmul.f32 %v15126_v1, %v15081_v15  ;;  %v15127_v51 = vld [vmem:[#allocation202_spill] sm:$0xff]  ;;  %v12576_v41 = vmul.f32 %v15134_v5, %v15081_v15  ;;  %v15135_v10 = vld [vmem:[#allocation216_spill] sm:$0xff] }
 0x383   :  { %v12548_v32 = vmul.f32 %v15127_v51, %v15081_v15  ;;  %v15130_v58 = vld [vmem:[#allocation206_spill] sm:$0xff]  ;;  %v12580_v1 = vmul.f32 %v15135_v10, %v15081_v15  ;;  %v15141_v48 = vld [vmem:[#allocation220_spill] sm:$0xff]  ;;  %v12600_v10 = vmul.f32 %v15081_v15, %v15145_v49 }
 0x384   :  { %v12560_v31 = vmul.f32 %v15130_v58, %v15081_v15  ;;  %v15133_v11 = vld [vmem:[#allocation218_spill] sm:$0xff]  ;;  %v12588_v58 = vmul.f32 %v15081_v15, %v15139_v46  ;;  %v12592_v30 = vmul.f32 %v15141_v48, %v15081_v15 }
 0x385   :  { %v12572_v0 = vmul.f32 %v15081_v15, %v15133_v11  ;;  %15136 = vst [vmem:[#allocation59_spill] sm:$0xff] %v12580_v1  ;;  %v15137_v51 = vld [vmem:[#allocation222_spill] sm:$0xff]  ;;  %v15143_v11 = vld [vmem:[#allocation223_spill] sm:$0xff]  ;;  %15146 = vst [vmem:[#allocation249_spill] sm:$0xff] %v12600_v10 }
 0x386   :  { %v12584_v20 = vmul.f32 %v15081_v15, %v15137_v51  ;;  %15140 = vst [vmem:[#allocation63_spill] sm:$0xff] %v12588_v58  ;;  %15142 = vst [vmem:[#allocation39_spill] sm:$0xff] %v12592_v30  ;;  %v12596_v5 = vmul.f32 %v15143_v11, %v15081_v15  ;;  %v15147_v1 = vld [vmem:[#allocation233_spill] sm:$0xff]  ;;  %v15149_v58 = vld [vmem:[#allocation231_spill] sm:$0xff] }
 0x387   :  { %v12604_v51 = vmul.f32 %v15081_v15, %v15147_v1  ;;  %v12612_v48 = vmul.f32 %v15149_v58, %v15081_v15  ;;  %v15150_v30 = vld [vmem:[#allocation237_spill] sm:$0xff]  ;;  %v15152_v10 = vld [vmem:[#allocation239_spill] sm:$0xff]  ;;  %v12632_v58 = vadd.f32 %v12380_v56, %v15082_v18  ;;  %v12652_v56 = vadd.f32 %v12400_v23, %v15082_v18 }
 0x388   :  { %15138 = vst [vmem:[#allocation248_spill] sm:$0xff] %v12584_v20  ;;  %15144 = vst [vmem:[#allocation21_spill] sm:$0xff] %v12596_v5  ;;  %v15148_v20 = vld [vmem:[#allocation227_spill] sm:$0xff]  ;;  %v12616_v11 = vmul.f32 %v15081_v15, %v15150_v30  ;;  %v12624_v1 = vmul.f32 %v15152_v10, %v15081_v15  ;;  %v12636_v30 = vadd.f32 %v12384_v36, %v15082_v18 }
 0x389   :  { %v12608_v46 = vmul.f32 %v15148_v20, %v15081_v15  ;;  %v15151_v5 = vld [vmem:[#allocation235_spill] sm:$0xff]  ;;  %v12628_v20 = vadd.f32 %v12376_v44, %v15082_v18  ;;  %v12648_v44 = vadd.f32 %v12396_v57, %v15082_v18  ;;  %v12656_v36 = vadd.f32 %v12404_v3, %v15082_v18 }
 0x38a   :  { %v12620_v49 = vmul.f32 %v15151_v5, %v15081_v15  ;;  %v12640_v5 = vadd.f32 %v12388_v34, %v15082_v18  ;;  %v12644_v15 = vadd.f32 %v12392_v21, %v15082_v18  ;;  %v12660_v34 = vadd.f32 %v12408_v50, %v15082_v18 }
 0x38b   :  { %v12664_v21 = vadd.f32 %v12412_v45, %v15082_v18  ;;  %v12668_v57 = vadd.f32 %v12416_v2, %v15082_v18  ;;  %v12672_v23 = vadd.f32 %v12420_v4, %v15082_v18  ;;  %v12676_v3 = vadd.f32 %v12424_v55, %v15082_v18 }
 0x38c   :  { %v12680_v50 = vadd.f32 %v12428_v42, %v15082_v18  ;;  %v12684_v45 = vadd.f32 %v12432_v7, %v15082_v18  ;;  %v12688_v2 = vadd.f32 %v12436_v19, %v15082_v18  ;;  %v12692_v4 = vadd.f32 %v12440_v14, %v15082_v18  ;;  %v15167_v10 = vld [vmem:[#allocation59_spill] sm:$0xff] }
 0x38d   :  { %v12696_v55 = vadd.f32 %v12444_v47, %v15082_v18  ;;  %v12700_v42 = vadd.f32 %v12448_v35, %v15082_v18  ;;  %v12704_v7 = vadd.f32 %v12452_v26, %v15082_v18  ;;  %v12708_v19 = vadd.f32 %v12456_v63, %v15082_v18 }
 0x38e   :  { %v12712_v14 = vadd.f32 %v12460_v12, %v15082_v18  ;;  %v12716_v47 = vadd.f32 %v12464_v53, %v15082_v18  ;;  %v12720_v35 = vadd.f32 %v12468_v17, %v15082_v18  ;;  %v12724_v26 = vadd.f32 %v12472_v37, %v15082_v18 }
 0x38f   :  { %v12728_v63 = vadd.f32 %v12476_v33, %v15082_v18  ;;  %v12732_v12 = vadd.f32 %v12480_v6, %v15082_v18  ;;  %v12736_v53 = vadd.f32 %v12484_v38, %v15082_v18  ;;  %v12740_v17 = vadd.f32 %v12488_v25, %v15082_v18 }
 0x390   :  { %15153 = vst [vmem:[#allocation69_spill] sm:$0xff] %v12720_v35  ;;  %15154 = vst [vmem:[#allocation45_spill] sm:$0xff] %v12724_v26  ;;  %v12744_v37 = vadd.f32 %v12492_v28, %v15082_v18  ;;  %v12748_v33 = vadd.f32 %v12496_v54, %v15082_v18  ;;  %v12752_v6 = vadd.f32 %v12500_v62, %v15082_v18  ;;  %vm4914_vm3 = vcmp.gt.f32.partialorder %v12628_v20, 0.0 }
 0x391   :  { %15155 = vst [vmem:[#allocation250_spill] sm:$0xff] %v12728_v63  ;;  %15156 = vst [vmem:[#allocation25_spill] sm:$0xff] %v12732_v12  ;;  %v12756_v38 = vadd.f32 %v12504_v27, %v15082_v18  ;;  %v12760_v25 = vadd.f32 %v12508_v40, %v15082_v18  ;;  %v12764_v28 = vadd.f32 %v12512_v22, %v15082_v18  ;;  %vm4915_vm4 = vcmp.gt.f32.partialorder %v12632_v58, 0.0 }
 0x392   :  { %15157 = vst [vmem:[#allocation251_spill] sm:$0xff] %v12744_v37  ;;  %v12768_v54 = vadd.f32 %v12516_v59, %v15082_v18  ;;  %v12772_v62 = vadd.f32 %v12520_v8, %v15082_v18  ;;  %v12776_v27 = vadd.f32 %v12524_v13, %v15082_v18  ;;  %v12780_v40 = vadd.f32 %v12528_v61, %v15082_v18 }
 0x393   :  { %15158 = vst [vmem:[#allocation73_spill] sm:$0xff] %v12764_v28  ;;  %v12784_v22 = vadd.f32 %v12532_v16, %v15082_v18  ;;  %v12788_v59 = vadd.f32 %v12536_v43, %v15082_v18  ;;  %v12792_v8 = vadd.f32 %v12540_v29, %v15082_v18  ;;  %v12796_v13 = vadd.f32 %v12544_v60, %v15082_v18 }
 0x394   :  { %15159 = vst [vmem:[#allocation49_spill] sm:$0xff] %v12780_v40  ;;  %v12800_v61 = vadd.f32 %v12548_v32, %v15082_v18  ;;  %v12804_v16 = vadd.f32 %v12552_v52, %v15082_v18  ;;  %v12808_v43 = vadd.f32 %v12556_v24, %v15082_v18  ;;  %v12812_v29 = vadd.f32 %v12560_v31, %v15082_v18 }
 0x395   :  { %15160 = vst [vmem:[#allocation252_spill] sm:$0xff] %v12796_v13  ;;  %v12816_v60 = vadd.f32 %v12564_v39, %v15082_v18  ;;  %v12820_v32 = vadd.f32 %v12568_v9, %v15082_v18  ;;  %v12824_v52 = vadd.f32 %v12572_v0, %v15082_v18  ;;  %v12828_v24 = vadd.f32 %v12576_v41, %v15082_v18 }
 0x396   :  { %15161 = vst [vmem:[#allocation253_spill] sm:$0xff] %v12804_v16  ;;  %15162 = vst [vmem:[#allocation254_spill] sm:$0xff] %v12812_v29  ;;  %v12832_v31 = vadd.f32 %v15167_v10, %v15082_v18  ;;  %v15168_v29 = vld [vmem:[#allocation248_spill] sm:$0xff]  ;;  %vm4916_vm5 = vcmp.gt.f32.partialorder %v12636_v30, 0.0  ;;  %vm4917_vm8 = vcmp.gt.f32.partialorder %v12640_v5, 0.0  ;;  %vm4918_vm7 = vcmp.gt.f32.partialorder %v12644_v15, 0.0 }
 0x397   :  { %15163 = vst [vmem:[#allocation255_spill] sm:$0xff] %v12816_v60  ;;  %15164 = vst [vmem:[#allocation19_spill] sm:$0xff] %v12820_v32  ;;  %v12836_v39 = vadd.f32 %v15168_v29, %v15082_v18  ;;  %v15169_v60 = vld [vmem:[#allocation63_spill] sm:$0xff]  ;;  %v12856_v29 = vadd.f32 %v12604_v51, %v15082_v18  ;;  %v12876_v51 = vadd.f32 %v12624_v1, %v15082_v18  ;;  %vm4919_vm10 = vcmp.gt.f32.partialorder %v12648_v44, 0.0 }
 0x398   :  { %15165 = vst [vmem:[#allocation256_spill] sm:$0xff] %v12824_v52  ;;  %15166 = vst [vmem:[#allocation257_spill] sm:$0xff] %v12828_v24  ;;  %v12840_v9 = vadd.f32 %v15169_v60, %v15082_v18  ;;  %v15170_v32 = vld [vmem:[#allocation39_spill] sm:$0xff]  ;;  %v15171_v52 = vld [vmem:[#allocation21_spill] sm:$0xff]  ;;  %v12860_v60 = vadd.f32 %v12608_v46, %v15082_v18  ;;  %vm4920_vm6 = vcmp.gt.f32.partialorder %v12652_v56, 0.0  ;;  %vm4921_vm11 = vcmp.gt.f32.partialorder %v12656_v36, 0.0 }
 0x399   :  { %v12844_v0 = vadd.f32 %v15170_v32, %v15082_v18  ;;  %v12848_v41 = vadd.f32 %v15171_v52, %v15082_v18  ;;  %v15172_v24 = vld [vmem:[#allocation249_spill] sm:$0xff]  ;;  %15173 = vst [vmem:[#allocation258_spill] sm:$0xff] %v12856_v29  ;;  %v12864_v32 = vadd.f32 %v12612_v48, %v15082_v18  ;;  %v12868_v52 = vadd.f32 %v12616_v11, %v15082_v18  ;;  %v15174_v29 = vld [vmem:[#allocation43_spill] sm:$0xff] }
 0x39a   :  { %v12852_v10 = vadd.f32 %v15172_v24, %v15082_v18  ;;  %v12872_v24 = vadd.f32 %v12620_v49, %v15082_v18  ;;  %v12880_v46 = vmul.f32 %v12628_v20, %v15174_v29  ;;  %v12884_v48 = vmul.f32 %v12632_v58, %v15174_v29 }
 0x39b   :  { %v12888_v11 = vmul.f32 %v12636_v30, %v15174_v29  ;;  %v12892_v49 = vmul.f32 %v12640_v5, %v15174_v29  ;;  %v12896_v18 = vmul.f32 %v12644_v15, %v15174_v29  ;;  %v12900_v1 = vmul.f32 %v12648_v44, %v15174_v29 }
 0x39c   :  { %15175 = vst [vmem:[#allocation259_spill] sm:$0xff] %v12880_v46  ;;  %15176 = vst [vmem:[#allocation260_spill] sm:$0xff] %v12884_v48  ;;  %v12904_v46 = vmul.f32 %v12652_v56, %v15174_v29  ;;  %v12908_v48 = vmul.f32 %v12656_v36, %v15174_v29  ;;  %vm4922_vm9 = vcmp.gt.f32.partialorder %v12660_v34, 0.0  ;;  %vm4923_vm13 = vcmp.gt.f32.partialorder %v12664_v21, 0.0 }
 0x39d   :  { %15177 = vst [vmem:[#allocation261_spill] sm:$0xff] %v12888_v11  ;;  %15178 = vst [vmem:[#allocation262_spill] sm:$0xff] %v12892_v49  ;;  %v12912_v11 = vmul.f32 %v12660_v34, %v15174_v29  ;;  %v12916_v49 = vmul.f32 %v12664_v21, %v15174_v29  ;;  %vm4924_vm12 = vcmp.gt.f32.partialorder %v12668_v57, 0.0  ;;  %vm4925_vm14 = vcmp.gt.f32.partialorder %v12672_v23, 0.0 }
 0x39e   :  { %15179 = vst [vmem:[#allocation67_spill] sm:$0xff] %v12896_v18  ;;  %15180 = vst [vmem:[#allocation263_spill] sm:$0xff] %v12900_v1  ;;  %v12920_v18 = vmul.f32 %v12668_v57, %v15174_v29  ;;  %v12924_v1 = vmul.f32 %v12672_v23, %v15174_v29 }
 0x39f   :  { %15181 = vst [vmem:[#allocation71_spill] sm:$0xff] %v12904_v46  ;;  %15182 = vst [vmem:[#allocation264_spill] sm:$0xff] %v12908_v48  ;;  %v12928_v46 = vmul.f32 %v12676_v3, %v15174_v29  ;;  %v12932_v48 = vmul.f32 %v12680_v50, %v15174_v29 }
 0x3a0   :  { %15183 = vst [vmem:[#allocation265_spill] sm:$0xff] %v12912_v11  ;;  %15184 = vst [vmem:[#allocation77_spill] sm:$0xff] %v12916_v49  ;;  %v12936_v11 = vmul.f32 %v12684_v45, %v15174_v29  ;;  %v12940_v49 = vmul.f32 %v12688_v2, %v15174_v29 }
 0x3a1   :  { %15185 = vst [vmem:[#allocation266_spill] sm:$0xff] %v12920_v18  ;;  %15186 = vst [vmem:[#allocation267_spill] sm:$0xff] %v12924_v1  ;;  %v12944_v18 = vmul.f32 %v12692_v4, %v15174_v29  ;;  %v12948_v1 = vmul.f32 %v12696_v55, %v15174_v29 }
 0x3a2   :  { %15187 = vst [vmem:[#allocation268_spill] sm:$0xff] %v12932_v48  ;;  %15188 = vst [vmem:[#allocation269_spill] sm:$0xff] %v12936_v11  ;;  %v12954_v48 = vmul.f32 %v12700_v42, %v15174_v29  ;;  %v12958_v11 = vmul.f32 %v12704_v7, %v15174_v29 }
 0x3a3   :  { %15189 = vst [vmem:[#allocation6_spill] sm:$0xff] %v12940_v49  ;;  %15190 = vst [vmem:[#allocation10_spill] sm:$0xff] %v12944_v18  ;;  %v12962_v49 = vmul.f32 %v12708_v19, %v15174_v29  ;;  %v12966_v18 = vmul.f32 %v12712_v14, %v15174_v29 }
 0x3a4   :  { %15191 = vst [vmem:[#allocation4_spill] sm:$0xff] %v12954_v48  ;;  %15192 = vst [vmem:[#allocation8_spill] sm:$0xff] %v12958_v11  ;;  %v12974_v48 = vmul.f32 %v12716_v47, %v15174_v29  ;;  %v12978_v11 = vmul.f32 %v12720_v35, %v15174_v29 }
 0x3a5   :  { %15193 = vst [vmem:[#allocation14_spill] sm:$0xff] %v12962_v49  ;;  %15194 = vst [vmem:[#allocation18_spill] sm:$0xff] %v12966_v18  ;;  %v12982_v49 = vmul.f32 %v12724_v26, %v15174_v29  ;;  %v12986_v18 = vmul.f32 %v12728_v63, %v15174_v29 }
 0x3a6   :  { %15195 = vst [vmem:[#allocation12_spill] sm:$0xff] %v12974_v48  ;;  %15196 = vst [vmem:[#allocation16_spill] sm:$0xff] %v12978_v11  ;;  %v12994_v48 = vmul.f32 %v12732_v12, %v15174_v29  ;;  %v12998_v11 = vmul.f32 %v12736_v53, %v15174_v29 }
 0x3a7   :  { %15197 = vst [vmem:[#allocation22_spill] sm:$0xff] %v12982_v49  ;;  %15198 = vst [vmem:[#allocation26_spill] sm:$0xff] %v12986_v18  ;;  %v13002_v49 = vmul.f32 %v12740_v17, %v15174_v29  ;;  %v13006_v18 = vmul.f32 %v12744_v37, %v15174_v29 }
 0x3a8   :  { %15199 = vst [vmem:[#allocation20_spill] sm:$0xff] %v12994_v48  ;;  %15200 = vst [vmem:[#allocation24_spill] sm:$0xff] %v12998_v11  ;;  %v13014_v48 = vmul.f32 %v12748_v33, %v15174_v29  ;;  %v13018_v11 = vmul.f32 %v12752_v6, %v15174_v29 }
 0x3a9   :  { %15201 = vst [vmem:[#allocation30_spill] sm:$0xff] %v13002_v49  ;;  %15202 = vst [vmem:[#allocation34_spill] sm:$0xff] %v13006_v18  ;;  %v13022_v49 = vmul.f32 %v12756_v38, %v15174_v29  ;;  %v13026_v18 = vmul.f32 %v12760_v25, %v15174_v29 }
 0x3aa   :  { %15203 = vst [vmem:[#allocation119_spill] sm:$0xff] %v13014_v48  ;;  %15204 = vst [vmem:[#allocation123_spill] sm:$0xff] %v13018_v11  ;;  %v13034_v48 = vmul.f32 %v12764_v28, %v15174_v29  ;;  %v13038_v11 = vmul.f32 %v12768_v54, %v15174_v29 }
 0x3ab   :  { %15205 = vst [vmem:[#allocation117_spill] sm:$0xff] %v13022_v49  ;;  %15206 = vst [vmem:[#allocation121_spill] sm:$0xff] %v13026_v18  ;;  %v13042_v49 = vmul.f32 %v12772_v62, %v15174_v29  ;;  %v13046_v18 = vmul.f32 %v12776_v27, %v15174_v29 }
 0x3ac   :  { %15207 = vst [vmem:[#allocation127_spill] sm:$0xff] %v13034_v48  ;;  %15208 = vst [vmem:[#allocation131_spill] sm:$0xff] %v13038_v11  ;;  %v13054_v48 = vmul.f32 %v12780_v40, %v15174_v29  ;;  %v13058_v11 = vmul.f32 %v12784_v22, %v15174_v29 }
 0x3ad   :  { %15209 = vst [vmem:[#allocation125_spill] sm:$0xff] %v13042_v49  ;;  %15210 = vst [vmem:[#allocation129_spill] sm:$0xff] %v13046_v18  ;;  %v13062_v49 = vmul.f32 %v12788_v59, %v15174_v29  ;;  %v13066_v18 = vmul.f32 %v12792_v8, %v15174_v29 }
 0x3ae   :  { %15211 = vst [vmem:[#allocation135_spill] sm:$0xff] %v13054_v48  ;;  %15212 = vst [vmem:[#allocation139_spill] sm:$0xff] %v13058_v11  ;;  %v13074_v48 = vmul.f32 %v12796_v13, %v15174_v29  ;;  %v13078_v11 = vmul.f32 %v12800_v61, %v15174_v29  ;;  %v15245_v13 = vld [vmem:[#allocation260_spill] sm:$0xff] }
 0x3af   :  { %15213 = vst [vmem:[#allocation133_spill] sm:$0xff] %v13062_v49  ;;  %15214 = vst [vmem:[#allocation137_spill] sm:$0xff] %v13066_v18  ;;  %v13082_v49 = vmul.f32 %v12804_v16, %v15174_v29  ;;  %v13086_v18 = vmul.f32 %v12808_v43, %v15174_v29  ;;  %v5043_v16 = vsel %vm4915_vm4, %v12632_v58, %v15245_v13  ;;  %v15249_v13 = vld [vmem:[#allocation263_spill] sm:$0xff]  ;;  %vm4965_vm4 = vcmp.gt.f32.partialorder %v12832_v31, 0.0 }
 0x3b0   :  { %15215 = vst [vmem:[#allocation143_spill] sm:$0xff] %v13074_v48  ;;  %15216 = vst [vmem:[#allocation147_spill] sm:$0xff] %v13078_v11  ;;  %v15219_v48 = vld [vmem:[#allocation254_spill] sm:$0xff]  ;;  %v15221_v11 = vld [vmem:[#allocation255_spill] sm:$0xff] }
 0x3b1   :  { %15217 = vst [vmem:[#allocation141_spill] sm:$0xff] %v13082_v49  ;;  %15218 = vst [vmem:[#allocation145_spill] sm:$0xff] %v13086_v18  ;;  %v13094_v63 = vmul.f32 %v15219_v48, %v15174_v29  ;;  %v13098_v26 = vmul.f32 %v15221_v11, %v15174_v29  ;;  %v15223_v49 = vld [vmem:[#allocation19_spill] sm:$0xff]  ;;  %v15225_v18 = vld [vmem:[#allocation256_spill] sm:$0xff]  ;;  %vm4960_vm2 = vcmp.gt.f32.partialorder %v15219_v48, 0.0  ;;  %vm4961_vm1 = vcmp.gt.f32.partialorder %v15221_v11, 0.0 }
 0x3b2   :  { %v13102_v35 = vmul.f32 %v15223_v49, %v15174_v29  ;;  %v13106_v12 = vmul.f32 %v15225_v18, %v15174_v29  ;;  %vm4962_vm0 = vcmp.gt.f32.partialorder %v15223_v49, 0.0  ;;  %vm4963_vm15 = vcmp.gt.f32.partialorder %v15225_v18, 0.0  ;;  %6016 = vst [vmem:[%s13651_s5 + $0x608] sm:$0xff] %v5043_v16  ;;  %v15253_v16 = vld [vmem:[#allocation77_spill] sm:$0xff] }
 0x3b3   :  { %15220 = vst [vmem:[#allocation151_spill] sm:$0xff] %v13094_v63  ;;  %15222 = vst [vmem:[#allocation155_spill] sm:$0xff] %v13098_v26  ;;  %v15227_v63 = vld [vmem:[#allocation257_spill] sm:$0xff]  ;;  %v13118_v26 = vmul.f32 %v12832_v31, %v15174_v29  ;;  %v5047_v18 = vsel %vm4919_vm10, %v12648_v44, %v15249_v13  ;;  %vm4969_vm10 = vcmp.gt.f32.partialorder %v12848_v41, 0.0 }
 0x3b4   :  { %15224 = vst [vmem:[#allocation149_spill] sm:$0xff] %v13102_v35  ;;  %15226 = vst [vmem:[#allocation153_spill] sm:$0xff] %v13106_v12  ;;  %v13114_v37 = vmul.f32 %v15227_v63, %v15174_v29  ;;  %v13122_v35 = vmul.f32 %v12836_v39, %v15174_v29  ;;  %v13126_v12 = vmul.f32 %v12840_v9, %v15174_v29 }
 0x3b5   :  { %15229 = vst [vmem:[#allocation163_spill] sm:$0xff] %v13118_v26  ;;  %v13138_v26 = vmul.f32 %v12848_v41, %v15174_v29  ;;  %6020 = vst [vmem:[%s13651_s5 + $0x628] sm:$0xff] %v5047_v18  ;;  %v15257_v18 = vld [vmem:[#allocation268_spill] sm:$0xff] }
 0x3b6   :  { %15228 = vst [vmem:[#allocation159_spill] sm:$0xff] %v13114_v37  ;;  %15230 = vst [vmem:[#allocation157_spill] sm:$0xff] %v13122_v35  ;;  %v13134_v37 = vmul.f32 %v12844_v0, %v15174_v29  ;;  %v13142_v35 = vmul.f32 %v12852_v10, %v15174_v29 }
 0x3b7   :  { %15231 = vst [vmem:[#allocation161_spill] sm:$0xff] %v13126_v12  ;;  %15233 = vst [vmem:[#allocation171_spill] sm:$0xff] %v13138_v26  ;;  %v15235_v12 = vld [vmem:[#allocation258_spill] sm:$0xff]  ;;  %v13158_v26 = vmul.f32 %v12864_v32, %v15174_v29 }
 0x3b8   :  { %15232 = vst [vmem:[#allocation167_spill] sm:$0xff] %v13134_v37  ;;  %15234 = vst [vmem:[#allocation165_spill] sm:$0xff] %v13142_v35  ;;  %v13146_v28 = vmul.f32 %v15235_v12, %v15174_v29  ;;  %v13154_v37 = vmul.f32 %v12860_v60, %v15174_v29  ;;  %v13162_v35 = vmul.f32 %v12868_v52, %v15174_v29 }
 0x3b9   :  { %15238 = vst [vmem:[#allocation179_spill] sm:$0xff] %v13158_v26  ;;  %v13178_v26 = vmul.f32 %v12876_v51, %v15174_v29 }
 0x3ba   :  { %15236 = vst [vmem:[#allocation169_spill] sm:$0xff] %v13146_v28  ;;  %15237 = vst [vmem:[#allocation175_spill] sm:$0xff] %v13154_v37  ;;  %v15240_v28 = vld [vmem:[#allocation247_spill] sm:$0xff]  ;;  %v13174_v37 = vmul.f32 %v12872_v24, %v15174_v29 }
 0x3bb   :  { %15239 = vst [vmem:[#allocation173_spill] sm:$0xff] %v13162_v35  ;;  %v13166_v40 = vmul.f32 %v15240_v28, %v15174_v29  ;;  %15243 = vst [vmem:[#allocation187_spill] sm:$0xff] %v13178_v26  ;;  %v15244_v35 = vld [vmem:[#allocation259_spill] sm:$0xff]  ;;  %v15246_v29 = vld [vmem:[#allocation261_spill] sm:$0xff] }
 0x3bc   :  { %15242 = vst [vmem:[#allocation183_spill] sm:$0xff] %v13174_v37  ;;  %v5044_v26 = vsel %vm4916_vm5, %v12636_v30, %v15246_v29  ;;  %v15247_v37 = vld [vmem:[#allocation262_spill] sm:$0xff]  ;;  %vm4966_vm5 = vcmp.gt.f32.partialorder %v12836_v39, 0.0  ;;  %v15250_v30 = vld [vmem:[#allocation71_spill] sm:$0xff]  ;;  %v5051_v29 = vsel %vm4923_vm13, %v12664_v21, %v15253_v16  ;;  %vm15258_vm13 = vcmp.gt.f32.partialorder %v12680_v50, 0.0 }
 0x3bd   :  { %15241 = vst [vmem:[#allocation177_spill] sm:$0xff] %v13166_v40  ;;  %v5042_v40 = vsel %vm4914_vm3, %v12628_v20, %v15244_v35  ;;  %v5045_v20 = vsel %vm4917_vm8, %v12640_v5, %v15247_v37  ;;  %v15248_v35 = vld [vmem:[#allocation67_spill] sm:$0xff]  ;;  %vm4964_vm3 = vcmp.gt.f32.partialorder %v15227_v63, 0.0  ;;  %vm4967_vm8 = vcmp.gt.f32.partialorder %v12840_v9, 0.0  ;;  %v15252_v37 = vld [vmem:[#allocation265_spill] sm:$0xff]  ;;  %6017 = vst [vmem:[%s13651_s5 + $0x610] sm:$0xff] %v5044_v26 }
 0x3be   :  { %v5046_v58 = vsel %vm4918_vm7, %v12644_v15, %v15248_v35  ;;  %6015 = vst [vmem:[%s13651_s5 + $0x600] sm:$0xff] %v5042_v40  ;;  %v5048_v5 = vsel %vm4920_vm6, %v12652_v56, %v15250_v30  ;;  %v15251_v15 = vld [vmem:[#allocation264_spill] sm:$0xff]  ;;  %v5050_v40 = vsel %vm4922_vm9, %v12660_v34, %v15252_v37  ;;  %6018 = vst [vmem:[%s13651_s5 + $0x618] sm:$0xff] %v5045_v20  ;;  %vm4968_vm7 = vcmp.gt.f32.partialorder %v12844_v0, 0.0  ;;  %v15254_v56 = vld [vmem:[#allocation266_spill] sm:$0xff] }
 0x3bf   :  { %v5049_v44 = vsel %vm4921_vm11, %v12656_v36, %v15251_v15  ;;  %6019 = vst [vmem:[%s13651_s5 + $0x620] sm:$0xff] %v5046_v58  ;;  %v5052_v36 = vsel %vm4924_vm12, %v12668_v57, %v15254_v56  ;;  %v15255_v34 = vld [vmem:[#allocation267_spill] sm:$0xff]  ;;  %vm15256_vm9 = vcmp.gt.f32.partialorder %v12676_v3, 0.0  ;;  %v5055_v20 = vsel %vm15258_vm13, %v12680_v50, %v15257_v18  ;;  %6021 = vst [vmem:[%s13651_s5 + $0x630] sm:$0xff] %v5048_v5  ;;  %v15259_v57 = vld [vmem:[#allocation269_spill] sm:$0xff] }
 0x3c0   :  { %v5053_v21 = vsel %vm4925_vm14, %v12672_v23, %v15255_v34  ;;  %v5054_v26 = vsel %vm15256_vm9, %v12676_v3, %v12928_v46  ;;  %6022 = vst [vmem:[%s13651_s5 + $0x638] sm:$0xff] %v5049_v44  ;;  %6023 = vst [vmem:[%s13651_s5 + $0x640] sm:$0xff] %v5050_v40  ;;  %vm4972_vm14 = vcmp.gt.f32.partialorder %v12860_v60, 0.0  ;;  %vm15260_vm11 = vcmp.gt.f32.partialorder %v12684_v45, 0.0  ;;  %v15261_v3 = vld [vmem:[#allocation6_spill] sm:$0xff]  ;;  %v15280_v37 = vld [vmem:[#allocation45_spill] sm:$0xff] }
 0x3c1   :  { %6024 = vst [vmem:[%s13651_s5 + $0x648] sm:$0xff] %v5051_v29  ;;  %v5056_v23 = vsel %vm15260_vm11, %v12684_v45, %v15259_v57  ;;  %vm15262_vm6 = vcmp.gt.f32.partialorder %v12688_v2, 0.0  ;;  %v15263_v46 = vld [vmem:[#allocation10_spill] sm:$0xff]  ;;  %vm15264_vm12 = vcmp.gt.f32.partialorder %v12692_v4, 0.0  ;;  %vm15265_vm9 = vcmp.gt.f32.partialorder %v12696_v55, 0.0  ;;  %6025 = vst [vmem:[%s13651_s5 + $0x650] sm:$0xff] %v5052_v36 }
 0x3c2   :  { %v5057_v50 = vsel %vm15262_vm6, %v12688_v2, %v15261_v3  ;;  %v5058_v35 = vsel %vm15264_vm12, %v12692_v4, %v15263_v46  ;;  %v5059_v58 = vsel %vm15265_vm9, %v12696_v55, %v12948_v1  ;;  %6026 = vst [vmem:[%s13651_s5 + $0x658] sm:$0xff] %v5053_v21  ;;  %6027 = vst [vmem:[%s13651_s5 + $0x660] sm:$0xff] %v5054_v26  ;;  %vm4977_vm11 = vcmp.gt.f32.partialorder %v12876_v51, 0.0  ;;  %v15266_v45 = vld [vmem:[#allocation4_spill] sm:$0xff]  ;;  %v15270_v1 = vld [vmem:[#allocation14_spill] sm:$0xff] }
 0x3c3   :  { %6028 = vst [vmem:[%s13651_s5 + $0x668] sm:$0xff] %v5055_v20  ;;  %vm15267_vm12 = vcmp.gt.f32.partialorder %v12700_v42, 0.0  ;;  %v15268_v4 = vld [vmem:[#allocation8_spill] sm:$0xff]  ;;  %vm15269_vm9 = vcmp.gt.f32.partialorder %v12704_v7, 0.0  ;;  %vm15271_vm13 = vcmp.gt.f32.partialorder %v12708_v19, 0.0  ;;  %v15272_v30 = vld [vmem:[#allocation18_spill] sm:$0xff] }
 0x3c4   :  { %v5060_v2 = vsel %vm15267_vm12, %v12700_v42, %v15266_v45  ;;  %v5061_v55 = vsel %vm15269_vm9, %v12704_v7, %v15268_v4  ;;  %v5062_v13 = vsel %vm15271_vm13, %v12708_v19, %v15270_v1  ;;  %vm15273_vm6 = vcmp.gt.f32.partialorder %v12712_v14, 0.0  ;;  %6029 = vst [vmem:[%s13651_s5 + $0x670] sm:$0xff] %v5056_v23  ;;  %6030 = vst [vmem:[%s13651_s5 + $0x678] sm:$0xff] %v5057_v50  ;;  %v15274_v42 = vld [vmem:[#allocation12_spill] sm:$0xff]  ;;  %v15279_v44 = vld [vmem:[#allocation22_spill] sm:$0xff] }
 0x3c5   :  { %v5063_v5 = vsel %vm15273_vm6, %v12712_v14, %v15272_v30  ;;  %6031 = vst [vmem:[%s13651_s5 + $0x680] sm:$0xff] %v5058_v35  ;;  %6032 = vst [vmem:[%s13651_s5 + $0x688] sm:$0xff] %v5059_v58  ;;  %vm15275_vm13 = vcmp.gt.f32.partialorder %v12716_v47, 0.0  ;;  %v15276_v19 = vld [vmem:[#allocation16_spill] sm:$0xff]  ;;  %v15277_v14 = vld [vmem:[#allocation69_spill] sm:$0xff]  ;;  %vm15281_vm12 = vcmp.gt.f32.partialorder %v15280_v37, 0.0 }
 0x3c6   :  { %v5064_v7 = vsel %vm15275_vm13, %v12716_v47, %v15274_v42  ;;  %vm15278_vm6 = vcmp.gt.f32.partialorder %v15277_v14, 0.0  ;;  %v5066_v40 = vsel %vm15281_vm12, %v15280_v37, %v15279_v44  ;;  %v15282_v16 = vld [vmem:[#allocation26_spill] sm:$0xff]  ;;  %6033 = vst [vmem:[%s13651_s5 + $0x690] sm:$0xff] %v5060_v2  ;;  %6034 = vst [vmem:[%s13651_s5 + $0x698] sm:$0xff] %v5061_v55  ;;  %v15285_v47 = vld [vmem:[#allocation20_spill] sm:$0xff]  ;;  %vm15291_vm12 = vcmp.gt.f32.partialorder %v12740_v17, 0.0 }
 0x3c7   :  { %v5065_v15 = vsel %vm15278_vm6, %v15277_v14, %v15276_v19  ;;  %v15283_v29 = vld [vmem:[#allocation250_spill] sm:$0xff]  ;;  %6035 = vst [vmem:[%s13651_s5 + $0x6a0] sm:$0xff] %v5062_v13  ;;  %6036 = vst [vmem:[%s13651_s5 + $0x6a8] sm:$0xff] %v5063_v5  ;;  %v15286_v36 = vld [vmem:[#allocation25_spill] sm:$0xff]  ;;  %vm15289_vm6 = vcmp.gt.f32.partialorder %v12736_v53, 0.0 }
 0x3c8   :  { %vm15284_vm9 = vcmp.gt.f32.partialorder %v15283_v29, 0.0  ;;  %vm15287_vm13 = vcmp.gt.f32.partialorder %v15286_v36, 0.0  ;;  %v15288_v21 = vld [vmem:[#allocation24_spill] sm:$0xff]  ;;  %v15290_v18 = vld [vmem:[#allocation30_spill] sm:$0xff]  ;;  %v15293_v23 = vld [vmem:[#allocation251_spill] sm:$0xff]  ;;  %6037 = vst [vmem:[%s13651_s5 + $0x6b0] sm:$0xff] %v5064_v7 }
 0x3c9   :  { %v5067_v56 = vsel %vm15284_vm9, %v15283_v29, %v15282_v16  ;;  %v5068_v34 = vsel %vm15287_vm13, %v15286_v36, %v15285_v47  ;;  %v5069_v26 = vsel %vm15289_vm6, %v12736_v53, %v15288_v21  ;;  %v5070_v20 = vsel %vm15291_vm12, %v12740_v17, %v15290_v18  ;;  %v15292_v57 = vld [vmem:[#allocation34_spill] sm:$0xff]  ;;  %6038 = vst [vmem:[%s13651_s5 + $0x6b8] sm:$0xff] %v5065_v15  ;;  %v15295_v53 = vld [vmem:[#allocation119_spill] sm:$0xff]  ;;  %v15299_v35 = vld [vmem:[#allocation117_spill] sm:$0xff] }
 0x3ca   :  { %vm15294_vm9 = vcmp.gt.f32.partialorder %v15293_v23, 0.0  ;;  %6039 = vst [vmem:[%s13651_s5 + $0x6c0] sm:$0xff] %v5066_v40  ;;  %6040 = vst [vmem:[%s13651_s5 + $0x6c8] sm:$0xff] %v5067_v56  ;;  %vm15296_vm13 = vcmp.gt.f32.partialorder %v12748_v33, 0.0  ;;  %v15297_v50 = vld [vmem:[#allocation123_spill] sm:$0xff]  ;;  %vm15298_vm6 = vcmp.gt.f32.partialorder %v12752_v6, 0.0 }
 0x3cb   :  { %v5071_v3 = vsel %vm15294_vm9, %v15293_v23, %v15292_v57  ;;  %v5072_v17 = vsel %vm15296_vm13, %v12748_v33, %v15295_v53  ;;  %v5073_v46 = vsel %vm15298_vm6, %v12752_v6, %v15297_v50  ;;  %vm15300_vm12 = vcmp.gt.f32.partialorder %v12756_v38, 0.0  ;;  %v15301_v45 = vld [vmem:[#allocation121_spill] sm:$0xff]  ;;  %6041 = vst [vmem:[%s13651_s5 + $0x6d0] sm:$0xff] %v5068_v34  ;;  %6042 = vst [vmem:[%s13651_s5 + $0x6d8] sm:$0xff] %v5069_v26  ;;  %v15303_v33 = vld [vmem:[#allocation127_spill] sm:$0xff] }
 0x3cc   :  { %v5074_v58 = vsel %vm15300_vm12, %v12756_v38, %v15299_v35  ;;  %vm15302_vm9 = vcmp.gt.f32.partialorder %v12760_v25, 0.0  ;;  %6043 = vst [vmem:[%s13651_s5 + $0x6e0] sm:$0xff] %v5070_v20  ;;  %6044 = vst [vmem:[%s13651_s5 + $0x6e8] sm:$0xff] %v5071_v3  ;;  %v15304_v6 = vld [vmem:[#allocation73_spill] sm:$0xff]  ;;  %vm15307_vm6 = vcmp.gt.f32.partialorder %v12768_v54, 0.0  ;;  %vm15309_vm12 = vcmp.gt.f32.partialorder %v12772_v62, 0.0 }
 0x3cd   :  { %v5075_v2 = vsel %vm15302_vm9, %v12760_v25, %v15301_v45  ;;  %vm15305_vm13 = vcmp.gt.f32.partialorder %v15304_v6, 0.0  ;;  %v15306_v25 = vld [vmem:[#allocation131_spill] sm:$0xff]  ;;  %v15308_v55 = vld [vmem:[#allocation125_spill] sm:$0xff]  ;;  %vm15311_vm9 = vcmp.gt.f32.partialorder %v12776_v27, 0.0  ;;  %6045 = vst [vmem:[%s13651_s5 + $0x6f0] sm:$0xff] %v5072_v17  ;;  %6046 = vst [vmem:[%s13651_s5 + $0x6f8] sm:$0xff] %v5073_v46 }
 0x3ce   :  { %v5076_v38 = vsel %vm15305_vm13, %v15304_v6, %v15303_v33  ;;  %v5077_v4 = vsel %vm15307_vm6, %v12768_v54, %v15306_v25  ;;  %v5078_v1 = vsel %vm15309_vm12, %v12772_v62, %v15308_v55  ;;  %v15310_v13 = vld [vmem:[#allocation129_spill] sm:$0xff]  ;;  %6047 = vst [vmem:[%s13651_s5 + $0x700] sm:$0xff] %v5074_v58  ;;  %6048 = vst [vmem:[%s13651_s5 + $0x708] sm:$0xff] %v5075_v2  ;;  %v15312_v54 = vld [vmem:[#allocation135_spill] sm:$0xff]  ;;  %vm15316_vm6 = vcmp.gt.f32.partialorder %v12784_v22, 0.0 }
 0x3cf   :  { %v5079_v30 = vsel %vm15311_vm9, %v12776_v27, %v15310_v13  ;;  %v15313_v62 = vld [vmem:[#allocation49_spill] sm:$0xff]  ;;  %v15315_v5 = vld [vmem:[#allocation139_spill] sm:$0xff]  ;;  %vm15318_vm12 = vcmp.gt.f32.partialorder %v12788_v59, 0.0  ;;  %vm15320_vm9 = vcmp.gt.f32.partialorder %v12792_v8, 0.0  ;;  %6049 = vst [vmem:[%s13651_s5 + $0x710] sm:$0xff] %v5076_v38  ;;  %6050 = vst [vmem:[%s13651_s5 + $0x718] sm:$0xff] %v5077_v4 }
 0x3d0   :  { %vm15314_vm13 = vcmp.gt.f32.partialorder %v15313_v62, 0.0  ;;  %v5081_v42 = vsel %vm15316_vm6, %v12784_v22, %v15315_v5  ;;  %v15317_v7 = vld [vmem:[#allocation133_spill] sm:$0xff]  ;;  %6051 = vst [vmem:[%s13651_s5 + $0x720] sm:$0xff] %v5078_v1  ;;  %6052 = vst [vmem:[%s13651_s5 + $0x728] sm:$0xff] %v5079_v30  ;;  %v15321_v22 = vld [vmem:[#allocation143_spill] sm:$0xff]  ;;  %vm15325_vm6 = vcmp.gt.f32.partialorder %v12800_v61, 0.0 }
 0x3d1   :  { %v5080_v27 = vsel %vm15314_vm13, %v15313_v62, %v15312_v54  ;;  %v5082_v19 = vsel %vm15318_vm12, %v12788_v59, %v15317_v7  ;;  %v15319_v14 = vld [vmem:[#allocation137_spill] sm:$0xff]  ;;  %v15322_v59 = vld [vmem:[#allocation252_spill] sm:$0xff]  ;;  %v15324_v44 = vld [vmem:[#allocation147_spill] sm:$0xff]  ;;  %6054 = vst [vmem:[%s13651_s5 + $0x738] sm:$0xff] %v5081_v42 }
 0x3d2   :  { %v5083_v15 = vsel %vm15320_vm9, %v12792_v8, %v15319_v14  ;;  %vm15323_vm13 = vcmp.gt.f32.partialorder %v15322_v59, 0.0  ;;  %v5085_v37 = vsel %vm15325_vm6, %v12800_v61, %v15324_v44  ;;  %v15326_v40 = vld [vmem:[#allocation141_spill] sm:$0xff]  ;;  %vm15330_vm9 = vcmp.gt.f32.partialorder %v12808_v43, 0.0  ;;  %6053 = vst [vmem:[%s13651_s5 + $0x730] sm:$0xff] %v5080_v27  ;;  %6055 = vst [vmem:[%s13651_s5 + $0x740] sm:$0xff] %v5082_v19  ;;  %v15331_v61 = vld [vmem:[#allocation151_spill] sm:$0xff] }
 0x3d3   :  { %v5084_v8 = vsel %vm15323_vm13, %v15322_v59, %v15321_v22  ;;  %v15327_v16 = vld [vmem:[#allocation253_spill] sm:$0xff]  ;;  %6056 = vst [vmem:[%s13651_s5 + $0x748] sm:$0xff] %v5083_v15  ;;  %v15332_v36 = vld [vmem:[#allocation155_spill] sm:$0xff]  ;;  %v15335_v20 = vld [vmem:[#allocation256_spill] sm:$0xff] }
 0x3d4   :  { %vm15328_vm12 = vcmp.gt.f32.partialorder %v15327_v16, 0.0  ;;  %v15329_v56 = vld [vmem:[#allocation145_spill] sm:$0xff]  ;;  %v5089_v34 = vsel %vm4961_vm1, %v15221_v11, %v15332_v36  ;;  %6057 = vst [vmem:[%s13651_s5 + $0x750] sm:$0xff] %v5084_v8  ;;  %6058 = vst [vmem:[%s13651_s5 + $0x758] sm:$0xff] %v5085_v37  ;;  %vm15348_vm1 = vcmp.gt.f32.partialorder %v12864_v32, 0.0 }
 0x3d5   :  { %v5086_v29 = vsel %vm15328_vm12, %v15327_v16, %v15326_v40  ;;  %v5087_v47 = vsel %vm15330_vm9, %v12808_v43, %v15329_v56  ;;  %v5088_v43 = vsel %vm4960_vm2, %v15219_v48, %v15331_v61  ;;  %v15333_v21 = vld [vmem:[#allocation149_spill] sm:$0xff]  ;;  %v15336_v48 = vld [vmem:[#allocation159_spill] sm:$0xff]  ;;  %6062 = vst [vmem:[%s13651_s5 + $0x778] sm:$0xff] %v5089_v34  ;;  %vm15350_vm2 = vcmp.gt.f32.partialorder %v12868_v52, 0.0 }
 0x3d6   :  { %v5090_v26 = vsel %vm4962_vm0, %v15223_v49, %v15333_v21  ;;  %v15334_v18 = vld [vmem:[#allocation153_spill] sm:$0xff]  ;;  %6059 = vst [vmem:[%s13651_s5 + $0x760] sm:$0xff] %v5086_v29  ;;  %6060 = vst [vmem:[%s13651_s5 + $0x768] sm:$0xff] %v5087_v47  ;;  %v5092_v11 = vsel %vm4964_vm3, %v15227_v63, %v15336_v48  ;;  %v15337_v49 = vld [vmem:[#allocation163_spill] sm:$0xff]  ;;  %vm15345_vm0 = vcmp.gt.f32.partialorder %v15235_v12, 0.0  ;;  %vm15352_vm3 = vcmp.gt.f32.partialorder %v15240_v28, 0.0 }
 0x3d7   :  { %v5091_v57 = vsel %vm4963_vm15, %v15335_v20, %v15334_v18  ;;  %v5093_v23 = vsel %vm4965_vm4, %v12832_v31, %v15337_v49  ;;  %v15338_v3 = vld [vmem:[#allocation157_spill] sm:$0xff]  ;;  %6061 = vst [vmem:[%s13651_s5 + $0x770] sm:$0xff] %v5088_v43  ;;  %6063 = vst [vmem:[%s13651_s5 + $0x780] sm:$0xff] %v5090_v26  ;;  %v15340_v63 = vld [vmem:[#allocation167_spill] sm:$0xff]  ;;  %vm15343_vm15 = vcmp.gt.f32.partialorder %v12852_v10, 0.0  ;;  %vm15354_vm4 = vcmp.gt.f32.partialorder %v12872_v24, 0.0 }
 0x3d8   :  { %v5094_v53 = vsel %vm4966_vm5, %v12836_v39, %v15338_v3  ;;  %v15339_v17 = vld [vmem:[#allocation161_spill] sm:$0xff]  ;;  %6064 = vst [vmem:[%s13651_s5 + $0x788] sm:$0xff] %v5091_v57  ;;  %v5096_v31 = vsel %vm4968_vm7, %v12844_v0, %v15340_v63  ;;  %v15341_v39 = vld [vmem:[#allocation171_spill] sm:$0xff]  ;;  %6065 = vst [vmem:[%s13651_s5 + $0x790] sm:$0xff] %v5092_v11 }
 0x3d9   :  { %v5095_v50 = vsel %vm4967_vm8, %v12840_v9, %v15339_v17  ;;  %v5097_v9 = vsel %vm4969_vm10, %v12848_v41, %v15341_v39  ;;  %v15342_v46 = vld [vmem:[#allocation165_spill] sm:$0xff]  ;;  %6066 = vst [vmem:[%s13651_s5 + $0x798] sm:$0xff] %v5093_v23  ;;  %6067 = vst [vmem:[%s13651_s5 + $0x7a0] sm:$0xff] %v5094_v53  ;;  %v15346_v0 = vld [vmem:[#allocation175_spill] sm:$0xff] }
 0x3da   :  { %v5098_v35 = vsel %vm15343_vm15, %v12852_v10, %v15342_v46  ;;  %v15344_v58 = vld [vmem:[#allocation169_spill] sm:$0xff]  ;;  %6068 = vst [vmem:[%s13651_s5 + $0x7a8] sm:$0xff] %v5095_v50  ;;  %v15347_v41 = vld [vmem:[#allocation179_spill] sm:$0xff]  ;;  %6069 = vst [vmem:[%s13651_s5 + $0x7b0] sm:$0xff] %v5096_v31 }
 0x3db   :  { %v5099_v45 = vsel %vm15345_vm0, %v15235_v12, %v15344_v58  ;;  %v5100_v12 = vsel %vm4972_vm14, %v12860_v60, %v15346_v0  ;;  %v5101_v10 = vsel %vm15348_vm1, %v12864_v32, %v15347_v41  ;;  %v15349_v2 = vld [vmem:[#allocation173_spill] sm:$0xff]  ;;  %6070 = vst [vmem:[%s13651_s5 + $0x7b8] sm:$0xff] %v5097_v9  ;;  %6071 = vst [vmem:[%s13651_s5 + $0x7c0] sm:$0xff] %v5098_v35  ;;  %v15353_v60 = vld [vmem:[#allocation183_spill] sm:$0xff] }
 0x3dc   :  { %v5102_v33 = vsel %vm15350_vm2, %v12868_v52, %v15349_v2  ;;  %v15351_v6 = vld [vmem:[#allocation177_spill] sm:$0xff]  ;;  %6072 = vst [vmem:[%s13651_s5 + $0x7c8] sm:$0xff] %v5099_v45  ;;  %v15355_v32 = vld [vmem:[#allocation187_spill] sm:$0xff]  ;;  %6073 = vst [vmem:[%s13651_s5 + $0x7d0] sm:$0xff] %v5100_v12 }
 0x3dd   :  { %v5103_v38 = vsel %vm15352_vm3, %v15240_v28, %v15351_v6  ;;  %v5104_v28 = vsel %vm15354_vm4, %v12872_v24, %v15353_v60  ;;  %v5105_v52 = vsel %vm4977_vm11, %v12876_v51, %v15355_v32  ;;  %6074 = vst [vmem:[%s13651_s5 + $0x7d8] sm:$0xff] %v5101_v10  ;;  %6075 = vst [vmem:[%s13651_s5 + $0x7e0] sm:$0xff] %v5102_v33 }
 0x3de   :  { %6076 = vst [vmem:[%s13651_s5 + $0x7e8] sm:$0xff] %v5103_v38  ;;  %6077 = vst [vmem:[%s13651_s5 + $0x7f0] sm:$0xff] %v5104_v28 }
 0x3df   :  { %6078 = vst [vmem:[%s13651_s5 + $0x7f8] sm:$0xff] %v5105_v52 }

</bundles_post_ra>
